<compile_context>
chip_gen: v5e
topology: v5e:2x2
jax: 0.10.0
libtpu: 0.0.40
codegen_flags: <defaults>
</compile_context>

<pallas_src>
import functools

import jax
import jax.numpy as jnp
from jax.experimental import pallas as pl
from jax.experimental.pallas import tpu as pltpu

BN_EPS = 1e-5
VMEM_LIMIT = 32 * 1024 * 1024          # safe on v5e/v6e/v7x
ACT_DTYPE = jnp.bfloat16               # activation storage / MXU input dtype


def _cparams(*sem):
    return pltpu.CompilerParams(dimension_semantics=tuple(sem),
                                vmem_limit_bytes=VMEM_LIMIT)


def _pick_tile(m, cap=256):
    for t in (cap, 128, 64, 32, 16, 8):
        if t <= m and m % t == 0:
            return t
    return m


# -----------------------------------------------------------------------------
# Kernel 1: 3x3 conv (+bias) with fused BN-statistics accumulation.
# Grid = (N, H); each step consumes 3 padded input rows (kh taps) and emits one
# output row plus running per-channel sum / sum-of-squares (resident outputs).
# -----------------------------------------------------------------------------
def _conv3x3_kernel(x0_ref, x1_ref, x2_ref, w_ref, b_ref,
                    y_ref, sum_ref, ssq_ref):
    wp = x0_ref.shape[2]                  # padded width
    wo = wp - 2                           # output width
    cout = w_ref.shape[3]
    rows = (x0_ref[0, 0], x1_ref[0, 0], x2_ref[0, 0])      # (wp, cin) bf16
    acc = jnp.zeros((wo, cout), jnp.float32)
    for kh in range(3):
        row = rows[kh]
        for kw in range(3):
            acc = acc + jnp.dot(row[kw:kw + wo, :], w_ref[kh, kw],
                                preferred_element_type=jnp.float32)
    acc = acc + b_ref[...]
    y_ref[0, 0] = acc.astype(y_ref.dtype)

    @pl.when((pl.program_id(0) == 0) & (pl.program_id(1) == 0))
    def _init():
        sum_ref[...] = jnp.zeros_like(sum_ref)
        ssq_ref[...] = jnp.zeros_like(ssq_ref)

    sum_ref[...] += jnp.sum(acc, axis=0, keepdims=True)
    ssq_ref[...] += jnp.sum(acc * acc, axis=0, keepdims=True)


# -----------------------------------------------------------------------------
# Kernel 2a: BN normalize + activation (tiled over flattened rows).
# Kernel 2b: BN normalize + ReLU + fused 2x2 max-pool epilogue (Down blocks).
# -----------------------------------------------------------------------------
def _bn_act_kernel(y_ref, mean_ref, rstd_ref, gamma_ref, beta_ref, o_ref, *, act):
    y = y_ref[...].astype(jnp.float32)
    y = (y - mean_ref[...]) * rstd_ref[...] * gamma_ref[...] + beta_ref[...]
    if act == "relu":
        y = jnp.maximum(y, 0.0)
    o_ref[...] = y.astype(o_ref.dtype)


def _bn_act_pool_kernel(y_ref, mean_ref, rstd_ref, gamma_ref, beta_ref,
                        g_ref, p_ref):
    y = y_ref[0].astype(jnp.float32)                       # (2, w/2, 2, c)
    y = (y - mean_ref[...]) * rstd_ref[...] * gamma_ref[...] + beta_ref[...]
    y = jnp.maximum(y, 0.0)
    g_ref[0] = y.astype(g_ref.dtype)
    rm = jnp.maximum(y[0], y[1])                           # (w/2, 2, c)
    p_ref[0, 0] = jnp.max(rm, axis=1).astype(p_ref.dtype)  # (w/2, c)


# -----------------------------------------------------------------------------
# Kernel 3: 2x2 / stride-2 transposed conv, pixel-shuffled output layout.
# Output array shape (N, H, 2, W, 2*Cout) -> free reshape to (N, 2H, 2W, Cout).
# -----------------------------------------------------------------------------
def _convT_kernel(x_ref, w0_ref, w1_ref, b_ref, o_ref):
    x = x_ref[0, 0]                                        # (w, cin) bf16
    y0 = jnp.dot(x, w0_ref[...], preferred_element_type=jnp.float32) + b_ref[...]
    y1 = jnp.dot(x, w1_ref[...], preferred_element_type=jnp.float32) + b_ref[...]
    o_ref[0, 0, 0] = y0.astype(o_ref.dtype)
    o_ref[0, 0, 1] = y1.astype(o_ref.dtype)


# -----------------------------------------------------------------------------
# Kernel 4: tiled matmul + bias (+activation) -- used for the final 1x1 conv.
# -----------------------------------------------------------------------------
def _matmul_bias_kernel(x_ref, w_ref, b_ref, o_ref, *, act):
    y = jnp.dot(x_ref[...], w_ref[...],
                preferred_element_type=jnp.float32) + b_ref[...]
    if act == "relu":
        y = jnp.maximum(y, 0.0)
    o_ref[...] = y.astype(o_ref.dtype)


# -----------------------------------------------------------------------------
# Kernel 5: attention gate, two tiled passes.
#   pass A: s = [x, path] @ [wg; wp] + (bg+bp), plus BN-stat accumulation
#   pass B: a = sigmoid(W_att(relu(BN(s)))) ; out = a * path
# -----------------------------------------------------------------------------
def _att_pre_kernel(x_ref, p_ref, w_ref, b_ref, s_ref, sum_ref, ssq_ref):
    xp = jnp.concatenate([x_ref[...], p_ref[...]], axis=-1)
    s = jnp.dot(xp, w_ref[...], preferred_element_type=jnp.float32) + b_ref[...]
    s_ref[...] = s.astype(s_ref.dtype)

    @pl.when(pl.program_id(0) == 0)
    def _init():
        sum_ref[...] = jnp.zeros_like(sum_ref)
        ssq_ref[...] = jnp.zeros_like(ssq_ref)

    sum_ref[...] += jnp.sum(s, axis=0, keepdims=True)
    ssq_ref[...] += jnp.sum(s * s, axis=0, keepdims=True)


def _att_post_kernel(s_ref, p_ref, mean_ref, rstd_ref, gamma_ref, beta_ref,
                     wa_ref, ba_ref, o_ref):
    s = s_ref[...].astype(jnp.float32)
    s = (s - mean_ref[...]) * rstd_ref[...] * gamma_ref[...] + beta_ref[...]
    s = jnp.maximum(s, 0.0)
    # 1x1 conv to one channel == lane reduction; the 1-wide map stays in-kernel.
    a = jax.nn.sigmoid(jnp.sum(s * wa_ref[...], axis=-1, keepdims=True)
                       + ba_ref[...])
    o_ref[...] = (a * p_ref[...].astype(jnp.float32)).astype(o_ref.dtype)


# -----------------------------------------------------------------------------
# Wrappers.
# -----------------------------------------------------------------------------
def _bn_stats(ssum, ssq, count):
    mean = ssum / count
    var = jnp.maximum(ssq / count - mean * mean, 0.0)
    return mean, jax.lax.rsqrt(var + BN_EPS)


def _bn_relu(y, mean, rstd, gamma, beta):
    n, h, w, c = y.shape
    m = n * h * w
    tm = _pick_tile(m)
    out = pl.pallas_call(
        functools.partial(_bn_act_kernel, act="relu"),
        grid=(m // tm,),
        in_specs=[pl.BlockSpec((tm, c), lambda i: (i, 0))]
                 + [pl.BlockSpec((1, c), lambda i: (0, 0))] * 4,
        out_specs=pl.BlockSpec((tm, c), lambda i: (i, 0)),
        out_shape=jax.ShapeDtypeStruct((m, c), ACT_DTYPE),
        compiler_params=_cparams("parallel"),
    )(y.reshape(m, c), mean, rstd, gamma, beta)
    return out.reshape(n, h, w, c)


def _bn_relu_pool(y, mean, rstd, gamma, beta):
    n, h, w, c = y.shape
    assert h % 2 == 0 and w % 2 == 0  # TODO(synk): odd spatial dims unsupported
    w2 = w // 2
    y5 = y.reshape(n, h, w2, 2, c)                         # free reshape
    g5, p = pl.pallas_call(
        _bn_act_pool_kernel,
        grid=(n, h // 2),
        in_specs=[pl.BlockSpec((1, 2, w2, 2, c), lambda ni, hi: (ni, hi, 0, 0, 0))]
                 + [pl.BlockSpec((1, c), lambda ni, hi: (0, 0))] * 4,
        out_specs=(pl.BlockSpec((1, 2, w2, 2, c), lambda ni, hi: (ni, hi, 0, 0, 0)),
                   pl.BlockSpec((1, 1, w2, c), lambda ni, hi: (ni, hi, 0, 0))),
        out_shape=(jax.ShapeDtypeStruct((n, h, w2, 2, c), ACT_DTYPE),
                   jax.ShapeDtypeStruct((n, h // 2, w2, c), ACT_DTYPE)),
        compiler_params=_cparams("parallel", "parallel"),
    )(y5, mean, rstd, gamma, beta)
    return g5.reshape(n, h, w, c), p


def conv3x3_bn_relu(x, w, b, gamma, beta, *, pool=False):
    # x: [N,H,W,Cin]; w: [Cout,Cin,3,3] (PyTorch layout); padding=1.
    n, h, ww, cin = x.shape
    cout = w.shape[0]
    xp = jnp.pad(x.astype(ACT_DTYPE), ((0, 0), (1, 1), (1, 1), (0, 0)))
    wk = jnp.transpose(w, (2, 3, 1, 0)).astype(jnp.bfloat16)   # (3,3,cin,cout)
    b2 = b.reshape(1, cout).astype(jnp.float32)

    def row_spec(off):
        return pl.BlockSpec((1, 1, ww + 2, cin),
                            lambda ni, hi, o=off: (ni, hi + o, 0, 0))

    y, ssum, ssq = pl.pallas_call(
        _conv3x3_kernel,
        grid=(n, h),
        in_specs=[row_spec(0), row_spec(1), row_spec(2),
                  pl.BlockSpec((3, 3, cin, cout), lambda ni, hi: (0, 0, 0, 0)),
                  pl.BlockSpec((1, cout), lambda ni, hi: (0, 0))],
        out_specs=(pl.BlockSpec((1, 1, ww, cout), lambda ni, hi: (ni, hi, 0, 0)),
                   pl.BlockSpec((1, cout), lambda ni, hi: (0, 0)),
                   pl.BlockSpec((1, cout), lambda ni, hi: (0, 0))),
        out_shape=(jax.ShapeDtypeStruct((n, h, ww, cout), ACT_DTYPE),
                   jax.ShapeDtypeStruct((1, cout), jnp.float32),
                   jax.ShapeDtypeStruct((1, cout), jnp.float32)),
        compiler_params=_cparams("arbitrary", "arbitrary"),
    )(xp, xp, xp, wk, b2)

    mean, rstd = _bn_stats(ssum, ssq, float(n * h * ww))
    gamma2 = gamma.reshape(1, cout).astype(jnp.float32)
    beta2 = beta.reshape(1, cout).astype(jnp.float32)
    if pool:
        return _bn_relu_pool(y, mean, rstd, gamma2, beta2)
    return _bn_relu(y, mean, rstd, gamma2, beta2)


def conv1x1(x, w, b, *, act="none", out_dtype=jnp.float32):
    # TODO(synk): final num_class output is lane-narrow (masked stores); it is
    #             the network output so it cannot stay in-kernel.
    n, h, ww, cin = x.shape
    cout = w.shape[0]
    m = n * h * ww
    tm = _pick_tile(m)
    y = pl.pallas_call(
        functools.partial(_matmul_bias_kernel, act=act),
        grid=(m // tm,),
        in_specs=[pl.BlockSpec((tm, cin), lambda i: (i, 0)),
                  pl.BlockSpec((cin, cout), lambda i: (0, 0)),
                  pl.BlockSpec((1, cout), lambda i: (0, 0))],
        out_specs=pl.BlockSpec((tm, cout), lambda i: (i, 0)),
        out_shape=jax.ShapeDtypeStruct((m, cout), out_dtype),
        compiler_params=_cparams("parallel"),
    )(x.reshape(m, cin).astype(ACT_DTYPE),
      w.reshape(cout, cin).T.astype(jnp.bfloat16),
      b.reshape(1, cout).astype(jnp.float32))
    return y.reshape(n, h, ww, cout)


def conv_transpose2x2(x, w, b):
    # w: [Cin, Cout, 2, 2], stride 2 (PyTorch ConvTranspose2d layout).
    n, h, ww, cin = x.shape
    cout = w.shape[1]
    # per-kh weight, output columns ordered (kw, cout)
    w0 = jnp.transpose(w[:, :, 0, :], (0, 2, 1)).reshape(cin, 2 * cout).astype(jnp.bfloat16)
    w1 = jnp.transpose(w[:, :, 1, :], (0, 2, 1)).reshape(cin, 2 * cout).astype(jnp.bfloat16)
    b2 = jnp.tile(b, 2).reshape(1, 2 * cout).astype(jnp.float32)
    out = pl.pallas_call(
        _convT_kernel,
        grid=(n, h),
        in_specs=[pl.BlockSpec((1, 1, ww, cin), lambda ni, hi: (ni, hi, 0, 0)),
                  pl.BlockSpec((cin, 2 * cout), lambda ni, hi: (0, 0)),
                  pl.BlockSpec((cin, 2 * cout), lambda ni, hi: (0, 0)),
                  pl.BlockSpec((1, 2 * cout), lambda ni, hi: (0, 0))],
        out_specs=pl.BlockSpec((1, 1, 2, ww, 2 * cout),
                               lambda ni, hi: (ni, hi, 0, 0, 0)),
        out_shape=jax.ShapeDtypeStruct((n, h, 2, ww, 2 * cout), ACT_DTYPE),
        compiler_params=_cparams("parallel", "parallel"),
    )(x.astype(ACT_DTYPE), w0, w1, b2)
    return out.reshape(n, 2 * h, 2 * ww, cout)       # free reshape (pixel shuffle)


def attention_gate(x, path, p):
    n, h, w, cg = x.shape
    cp = path.shape[-1]
    ci = p["wg"].shape[0]
    m = n * h * w
    tm = _pick_tile(m)
    x2 = x.reshape(m, cg).astype(ACT_DTYPE)
    p2 = path.reshape(m, cp).astype(ACT_DTYPE)
    wgp = jnp.concatenate([p["wg"].reshape(ci, cg).T,
                           p["wp"].reshape(ci, cp).T], axis=0).astype(jnp.bfloat16)
    bgp = (p["bg"] + p["bp"]).reshape(1, ci).astype(jnp.float32)

    s, ssum, ssq = pl.pallas_call(
        _att_pre_kernel,
        grid=(m // tm,),
        in_specs=[pl.BlockSpec((tm, cg), lambda i: (i, 0)),
                  pl.BlockSpec((tm, cp), lambda i: (i, 0)),
                  pl.BlockSpec((cg + cp, ci), lambda i: (0, 0)),
                  pl.BlockSpec((1, ci), lambda i: (0, 0))],
        out_specs=(pl.BlockSpec((tm, ci), lambda i: (i, 0)),
                   pl.BlockSpec((1, ci), lambda i: (0, 0)),
                   pl.BlockSpec((1, ci), lambda i: (0, 0))),
        out_shape=(jax.ShapeDtypeStruct((m, ci), ACT_DTYPE),
                   jax.ShapeDtypeStruct((1, ci), jnp.float32),
                   jax.ShapeDtypeStruct((1, ci), jnp.float32)),
        compiler_params=_cparams("arbitrary"),
    )(x2, p2, wgp, bgp)

    mean, rstd = _bn_stats(ssum, ssq, float(m))
    out = pl.pallas_call(
        _att_post_kernel,
        grid=(m // tm,),
        in_specs=[pl.BlockSpec((tm, ci), lambda i: (i, 0)),
                  pl.BlockSpec((tm, cp), lambda i: (i, 0)),
                  pl.BlockSpec((1, ci), lambda i: (0, 0)),
                  pl.BlockSpec((1, ci), lambda i: (0, 0)),
                  pl.BlockSpec((1, ci), lambda i: (0, 0)),
                  pl.BlockSpec((1, ci), lambda i: (0, 0)),
                  pl.BlockSpec((1, ci), lambda i: (0, 0)),
                  pl.BlockSpec((1, 1), lambda i: (0, 0))],
        out_specs=pl.BlockSpec((tm, cp), lambda i: (i, 0)),
        out_shape=jax.ShapeDtypeStruct((m, cp), ACT_DTYPE),
        compiler_params=_cparams("parallel"),
    )(s, p2, mean, rstd,
      p["gamma"].reshape(1, ci).astype(jnp.float32),
      p["beta"].reshape(1, ci).astype(jnp.float32),
      p["wa"].reshape(1, ci).astype(jnp.float32),
      p["ba"].reshape(1, 1).astype(jnp.float32))
    return out.reshape(n, h, w, cp)


def double_conv(x, p, *, pool=False):
    x = conv3x3_bn_relu(x, p["w1"], p["b1"], p["g1"], p["be1"])
    return conv3x3_bn_relu(x, p["w2"], p["b2"], p["g2"], p["be2"], pool=pool)


# -----------------------------------------------------------------------------
# Parameter initialization (deterministic, PyTorch-like uniform fan-in init).
# -----------------------------------------------------------------------------
def _conv_init(key, cout, cin, k):
    kw, kb = jax.random.split(key)
    scale = 1.0 / float(cin * k * k) ** 0.5
    w = jax.random.uniform(kw, (cout, cin, k, k), jnp.float32, -scale, scale)
    b = jax.random.uniform(kb, (cout,), jnp.float32, -scale, scale)
    return w, b


def _convT_init(key, cin, cout, k=2):
    kw, kb = jax.random.split(key)
    scale = 1.0 / float(cin * k * k) ** 0.5
    w = jax.random.uniform(kw, (cin, cout, k, k), jnp.float32, -scale, scale)
    b = jax.random.uniform(kb, (cout,), jnp.float32, -scale, scale)
    return w, b


def init_params(key, in_c, num_class, depth, first_channel):
    filters = [first_channel * 2 ** i for i in range(depth)]
    keys = iter(jax.random.split(key, 128))

    def dconv(cin, cout):
        w1, b1 = _conv_init(next(keys), cout, cin, 3)
        w2, b2 = _conv_init(next(keys), cout, cout, 3)
        return dict(w1=w1, b1=b1, g1=jnp.ones((cout,)), be1=jnp.zeros((cout,)),
                    w2=w2, b2=b2, g2=jnp.ones((cout,)), be2=jnp.zeros((cout,)))

    params = {}
    downs, c = [], in_c
    for i in range(depth - 1):
        downs.append(dconv(c, filters[i]))
        c = filters[i]
    params["downs"] = downs

    params["mid"] = dconv(filters[-2], filters[-1])
    wt, bt = _convT_init(next(keys), filters[-1], filters[-1] // 2)
    params["mid_up"] = dict(w=wt, b=bt)

    ags, ups = {}, {}
    for lvl in range(2, depth):
        cs = filters[lvl - 1]
        wg, bg = _conv_init(next(keys), cs, cs, 1)
        wp, bp = _conv_init(next(keys), cs, cs, 1)
        wa, ba = _conv_init(next(keys), 1, cs, 1)
        ags[lvl] = dict(wg=wg, bg=bg, wp=wp, bp=bp,
                        gamma=jnp.ones((cs,)), beta=jnp.zeros((cs,)),
                        wa=wa, ba=ba)
        up_conv = dconv(filters[lvl], filters[lvl - 1])
        wtu, btu = _convT_init(next(keys), filters[lvl - 1], filters[lvl - 1] // 2)
        ups[lvl] = dict(conv=up_conv, up_w=wtu, up_b=btu)
    params["ags"] = ags
    params["ups"] = ups

    wf1, bf1 = _conv_init(next(keys), filters[0], filters[1], 3)
    wf2, bf2 = _conv_init(next(keys), filters[0], filters[0], 3)
    wf3, bf3 = _conv_init(next(keys), num_class, filters[0], 1)
    params["final"] = dict(
        w1=wf1, b1=bf1, g1=jnp.ones((filters[0],)), be1=jnp.zeros((filters[0],)),
        w2=wf2, b2=bf2, g2=jnp.ones((filters[0],)), be2=jnp.zeros((filters[0],)),
        w3=wf3, b3=bf3)
    return params


# -----------------------------------------------------------------------------
# Full forward pass (mirrors attention_unet.forward).
# -----------------------------------------------------------------------------
def attention_unet_forward(x_nchw, params, depth):
    x = jnp.transpose(x_nchw, (0, 2, 3, 1)).astype(ACT_DTYPE)   # NCHW -> NHWC

    x_path = []
    for i in range(depth - 1):                       # down1 .. down_{depth-1}
        g, x = double_conv(x, params["downs"][i], pool=True)    # pool fused
        x_path.append(g)

    x = double_conv(x, params["mid"])                # mid_bridge
    x = conv_transpose2x2(x, params["mid_up"]["w"], params["mid_up"]["b"])

    for lvl in range(depth - 1, 1, -1):              # ag / up loop
        x_path[lvl - 1] = attention_gate(x, x_path[lvl - 1], params["ags"][lvl])
        up = params["ups"][lvl]
        # TODO(synk): concat is left to XLA; fusing it into the next conv
        #             kernel would save one HBM round-trip per decoder level.
        xc = jnp.concatenate([x, x_path[lvl - 1]], axis=-1)
        xc = double_conv(xc, up["conv"])
        x = conv_transpose2x2(xc, up["up_w"], up["up_b"])

    x = jnp.concatenate([x, x_path[0]], axis=-1)     # torch.cat dim=1 (channels)

    f = params["final"]
    x = conv3x3_bn_relu(x, f["w1"], f["b1"], f["g1"], f["be1"])
    x = conv3x3_bn_relu(x, f["w2"], f["b2"], f["g2"], f["be2"])
    x = conv1x1(x, f["w3"], f["b3"])
    return jnp.transpose(x, (0, 3, 1, 2)).astype(jnp.float32)   # NHWC -> NCHW


if __name__ == "__main__":
    key = jax.random.PRNGKey(0)
    kx, kp = jax.random.split(key)

    N, C, H, W = 2, 3, 16, 16
    NUM_CLASS, DEPTH, FIRST_CH = 2, 3, 16

    x = jax.random.normal(kx, (N, C, H, W), jnp.float32)
    params = init_params(kp, in_c=C, num_class=NUM_CLASS,
                         depth=DEPTH, first_channel=FIRST_CH)

    fwd = jax.jit(functools.partial(attention_unet_forward, depth=DEPTH))
    out = jax.block_until_ready(fwd(x, params))
    assert out.shape == (N, NUM_CLASS, H, W), out.shape
    assert bool(jnp.all(jnp.isfinite(out)))
    print("KERNEL_OK")
</pallas_src>

<mosaic_0001>
module attributes {stable_mosaic.version = 11 : i64} {
  func.func @_conv3x3_kernel(%arg0: i32, %arg1: i32, %arg2: memref<1x1x18x3xbf16, #tpu.memory_space<vmem>>, %arg3: memref<1x1x18x3xbf16, #tpu.memory_space<vmem>>, %arg4: memref<1x1x18x3xbf16, #tpu.memory_space<vmem>>, %arg5: memref<3x3x3x16xbf16, #tpu.memory_space<vmem>>, %arg6: memref<1x16xf32, #tpu.memory_space<vmem>>, %arg7: memref<1x1x16x16xbf16, #tpu.memory_space<vmem>>, %arg8: memref<1x16xf32, #tpu.memory_space<vmem>>, %arg9: memref<1x16xf32, #tpu.memory_space<vmem>>) attributes {dimension_semantics = [#tpu.dimension_semantics<arbitrary>, #tpu.dimension_semantics<arbitrary>], iteration_bounds = array<i64: 2, 16>, scalar_prefetch = 0 : i64, scratch_operands = 0 : i64, tpu.core_type = #tpu.core_type<tc>, window_params = [{transform_indices = @transform_0, window_bounds = array<i64: 1, 1, 18, 3>}, {transform_indices = @transform_1, window_bounds = array<i64: 1, 1, 18, 3>}, {transform_indices = @transform_2, window_bounds = array<i64: 1, 1, 18, 3>}, {pipeline_mode = #tpu.pipeline_mode<synchronous>, transform_indices = @transform_3, window_bounds = array<i64: 3, 3, 3, 16>}, {pipeline_mode = #tpu.pipeline_mode<synchronous>, transform_indices = @transform_4, window_bounds = array<i64: 1, 16>}, {transform_indices = @transform_5, window_bounds = array<i64: 1, 1, 16, 16>}, {pipeline_mode = #tpu.pipeline_mode<synchronous>, transform_indices = @transform_6, window_bounds = array<i64: 1, 16>}, {pipeline_mode = #tpu.pipeline_mode<synchronous>, transform_indices = @transform_7, window_bounds = array<i64: 1, 16>}]} {
    %c0 = arith.constant 0 : index
    %c0_0 = arith.constant 0 : index
    %c0_1 = arith.constant 0 : index
    %c0_2 = arith.constant 0 : index
    %0 = vector.load %arg2[%c0, %c0_0, %c0_1, %c0_2] : memref<1x1x18x3xbf16, #tpu.memory_space<vmem>>, vector<1x1x18x3xbf16>
    %1 = vector.shape_cast %0 : vector<1x1x18x3xbf16> to vector<18x3xbf16>
    %c0_3 = arith.constant 0 : index
    %c0_4 = arith.constant 0 : index
    %c0_5 = arith.constant 0 : index
    %c0_6 = arith.constant 0 : index
    %2 = vector.load %arg3[%c0_3, %c0_4, %c0_5, %c0_6] : memref<1x1x18x3xbf16, #tpu.memory_space<vmem>>, vector<1x1x18x3xbf16>
    %3 = vector.shape_cast %2 : vector<1x1x18x3xbf16> to vector<18x3xbf16>
    %c0_7 = arith.constant 0 : index
    %c0_8 = arith.constant 0 : index
    %c0_9 = arith.constant 0 : index
    %c0_10 = arith.constant 0 : index
    %4 = vector.load %arg4[%c0_7, %c0_8, %c0_9, %c0_10] : memref<1x1x18x3xbf16, #tpu.memory_space<vmem>>, vector<1x1x18x3xbf16>
    %5 = vector.shape_cast %4 : vector<1x1x18x3xbf16> to vector<18x3xbf16>
    %cst = arith.constant 0.000000e+00 : f32
    %6 = vector.broadcast %cst : f32 to vector<16x16xf32>
    %7 = vector.extract_strided_slice %1 {offsets = [0, 0], sizes = [16, 3], strides = [1, 1]} : vector<18x3xbf16> to vector<16x3xbf16>
    %c0_11 = arith.constant 0 : index
    %c0_12 = arith.constant 0 : index
    %c0_13 = arith.constant 0 : index
    %c0_14 = arith.constant 0 : index
    %8 = vector.load %arg5[%c0_11, %c0_12, %c0_13, %c0_14] : memref<3x3x3x16xbf16, #tpu.memory_space<vmem>>, vector<1x1x3x16xbf16>
    %9 = vector.shape_cast %8 : vector<1x1x3x16xbf16> to vector<3x16xbf16>
    %cst_15 = arith.constant dense<0.000000e+00> : vector<16x16xf32>
    %10 = tpu.matmul %7, %9, %cst_15 {dimension_numbers = #tpu.dot_dimension_numbers<[1], [0], [0], [1], [0, 0, 1, 1], [], []>} : vector<16x3xbf16>, vector<3x16xbf16>, vector<16x16xf32> -> vector<16x16xf32>
    %11 = arith.addf %6, %10 : vector<16x16xf32>
    %12 = vector.extract_strided_slice %1 {offsets = [1, 0], sizes = [16, 3], strides = [1, 1]} : vector<18x3xbf16> to vector<16x3xbf16>
    %c0_16 = arith.constant 0 : index
    %c1 = arith.constant 1 : index
    %c0_17 = arith.constant 0 : index
    %c0_18 = arith.constant 0 : index
    %13 = vector.load %arg5[%c0_16, %c1, %c0_17, %c0_18] : memref<3x3x3x16xbf16, #tpu.memory_space<vmem>>, vector<1x1x3x16xbf16>
    %14 = vector.shape_cast %13 : vector<1x1x3x16xbf16> to vector<3x16xbf16>
    %cst_19 = arith.constant dense<0.000000e+00> : vector<16x16xf32>
    %15 = tpu.matmul %12, %14, %cst_19 {dimension_numbers = #tpu.dot_dimension_numbers<[1], [0], [0], [1], [0, 0, 1, 1], [], []>} : vector<16x3xbf16>, vector<3x16xbf16>, vector<16x16xf32> -> vector<16x16xf32>
    %16 = arith.addf %11, %15 : vector<16x16xf32>
    %17 = vector.extract_strided_slice %1 {offsets = [2, 0], sizes = [16, 3], strides = [1, 1]} : vector<18x3xbf16> to vector<16x3xbf16>
    %c0_20 = arith.constant 0 : index
    %c2 = arith.constant 2 : index
    %c0_21 = arith.constant 0 : index
    %c0_22 = arith.constant 0 : index
    %18 = vector.load %arg5[%c0_20, %c2, %c0_21, %c0_22] : memref<3x3x3x16xbf16, #tpu.memory_space<vmem>>, vector<1x1x3x16xbf16>
    %19 = vector.shape_cast %18 : vector<1x1x3x16xbf16> to vector<3x16xbf16>
    %cst_23 = arith.constant dense<0.000000e+00> : vector<16x16xf32>
    %20 = tpu.matmul %17, %19, %cst_23 {dimension_numbers = #tpu.dot_dimension_numbers<[1], [0], [0], [1], [0, 0, 1, 1], [], []>} : vector<16x3xbf16>, vector<3x16xbf16>, vector<16x16xf32> -> vector<16x16xf32>
    %21 = arith.addf %16, %20 : vector<16x16xf32>
    %22 = vector.extract_strided_slice %3 {offsets = [0, 0], sizes = [16, 3], strides = [1, 1]} : vector<18x3xbf16> to vector<16x3xbf16>
    %c1_24 = arith.constant 1 : index
    %c0_25 = arith.constant 0 : index
    %c0_26 = arith.constant 0 : index
    %c0_27 = arith.constant 0 : index
    %23 = vector.load %arg5[%c1_24, %c0_25, %c0_26, %c0_27] : memref<3x3x3x16xbf16, #tpu.memory_space<vmem>>, vector<1x1x3x16xbf16>
    %24 = vector.shape_cast %23 : vector<1x1x3x16xbf16> to vector<3x16xbf16>
    %cst_28 = arith.constant dense<0.000000e+00> : vector<16x16xf32>
    %25 = tpu.matmul %22, %24, %cst_28 {dimension_numbers = #tpu.dot_dimension_numbers<[1], [0], [0], [1], [0, 0, 1, 1], [], []>} : vector<16x3xbf16>, vector<3x16xbf16>, vector<16x16xf32> -> vector<16x16xf32>
    %26 = arith.addf %21, %25 : vector<16x16xf32>
    %27 = vector.extract_strided_slice %3 {offsets = [1, 0], sizes = [16, 3], strides = [1, 1]} : vector<18x3xbf16> to vector<16x3xbf16>
    %c1_29 = arith.constant 1 : index
    %c1_30 = arith.constant 1 : index
    %c0_31 = arith.constant 0 : index
    %c0_32 = arith.constant 0 : index
    %28 = vector.load %arg5[%c1_29, %c1_30, %c0_31, %c0_32] : memref<3x3x3x16xbf16, #tpu.memory_space<vmem>>, vector<1x1x3x16xbf16>
    %29 = vector.shape_cast %28 : vector<1x1x3x16xbf16> to vector<3x16xbf16>
    %cst_33 = arith.constant dense<0.000000e+00> : vector<16x16xf32>
    %30 = tpu.matmul %27, %29, %cst_33 {dimension_numbers = #tpu.dot_dimension_numbers<[1], [0], [0], [1], [0, 0, 1, 1], [], []>} : vector<16x3xbf16>, vector<3x16xbf16>, vector<16x16xf32> -> vector<16x16xf32>
    %31 = arith.addf %26, %30 : vector<16x16xf32>
    %32 = vector.extract_strided_slice %3 {offsets = [2, 0], sizes = [16, 3], strides = [1, 1]} : vector<18x3xbf16> to vector<16x3xbf16>
    %c1_34 = arith.constant 1 : index
    %c2_35 = arith.constant 2 : index
    %c0_36 = arith.constant 0 : index
    %c0_37 = arith.constant 0 : index
    %33 = vector.load %arg5[%c1_34, %c2_35, %c0_36, %c0_37] : memref<3x3x3x16xbf16, #tpu.memory_space<vmem>>, vector<1x1x3x16xbf16>
    %34 = vector.shape_cast %33 : vector<1x1x3x16xbf16> to vector<3x16xbf16>
    %cst_38 = arith.constant dense<0.000000e+00> : vector<16x16xf32>
    %35 = tpu.matmul %32, %34, %cst_38 {dimension_numbers = #tpu.dot_dimension_numbers<[1], [0], [0], [1], [0, 0, 1, 1], [], []>} : vector<16x3xbf16>, vector<3x16xbf16>, vector<16x16xf32> -> vector<16x16xf32>
    %36 = arith.addf %31, %35 : vector<16x16xf32>
    %37 = vector.extract_strided_slice %5 {offsets = [0, 0], sizes = [16, 3], strides = [1, 1]} : vector<18x3xbf16> to vector<16x3xbf16>
    %c2_39 = arith.constant 2 : index
    %c0_40 = arith.constant 0 : index
    %c0_41 = arith.constant 0 : index
    %c0_42 = arith.constant 0 : index
    %38 = vector.load %arg5[%c2_39, %c0_40, %c0_41, %c0_42] : memref<3x3x3x16xbf16, #tpu.memory_space<vmem>>, vector<1x1x3x16xbf16>
    %39 = vector.shape_cast %38 : vector<1x1x3x16xbf16> to vector<3x16xbf16>
    %cst_43 = arith.constant dense<0.000000e+00> : vector<16x16xf32>
    %40 = tpu.matmul %37, %39, %cst_43 {dimension_numbers = #tpu.dot_dimension_numbers<[1], [0], [0], [1], [0, 0, 1, 1], [], []>} : vector<16x3xbf16>, vector<3x16xbf16>, vector<16x16xf32> -> vector<16x16xf32>
    %41 = arith.addf %36, %40 : vector<16x16xf32>
    %42 = vector.extract_strided_slice %5 {offsets = [1, 0], sizes = [16, 3], strides = [1, 1]} : vector<18x3xbf16> to vector<16x3xbf16>
    %c2_44 = arith.constant 2 : index
    %c1_45 = arith.constant 1 : index
    %c0_46 = arith.constant 0 : index
    %c0_47 = arith.constant 0 : index
    %43 = vector.load %arg5[%c2_44, %c1_45, %c0_46, %c0_47] : memref<3x3x3x16xbf16, #tpu.memory_space<vmem>>, vector<1x1x3x16xbf16>
    %44 = vector.shape_cast %43 : vector<1x1x3x16xbf16> to vector<3x16xbf16>
    %cst_48 = arith.constant dense<0.000000e+00> : vector<16x16xf32>
    %45 = tpu.matmul %42, %44, %cst_48 {dimension_numbers = #tpu.dot_dimension_numbers<[1], [0], [0], [1], [0, 0, 1, 1], [], []>} : vector<16x3xbf16>, vector<3x16xbf16>, vector<16x16xf32> -> vector<16x16xf32>
    %46 = arith.addf %41, %45 : vector<16x16xf32>
    %47 = vector.extract_strided_slice %5 {offsets = [2, 0], sizes = [16, 3], strides = [1, 1]} : vector<18x3xbf16> to vector<16x3xbf16>
    %c2_49 = arith.constant 2 : index
    %c2_50 = arith.constant 2 : index
    %c0_51 = arith.constant 0 : index
    %c0_52 = arith.constant 0 : index
    %48 = vector.load %arg5[%c2_49, %c2_50, %c0_51, %c0_52] : memref<3x3x3x16xbf16, #tpu.memory_space<vmem>>, vector<1x1x3x16xbf16>
    %49 = vector.shape_cast %48 : vector<1x1x3x16xbf16> to vector<3x16xbf16>
    %cst_53 = arith.constant dense<0.000000e+00> : vector<16x16xf32>
    %50 = tpu.matmul %47, %49, %cst_53 {dimension_numbers = #tpu.dot_dimension_numbers<[1], [0], [0], [1], [0, 0, 1, 1], [], []>} : vector<16x3xbf16>, vector<3x16xbf16>, vector<16x16xf32> -> vector<16x16xf32>
    %51 = arith.addf %46, %50 : vector<16x16xf32>
    %c0_54 = arith.constant 0 : index
    %c0_55 = arith.constant 0 : index
    %52 = vector.load %arg6[%c0_54, %c0_55] : memref<1x16xf32, #tpu.memory_space<vmem>>, vector<1x16xf32>
    %53 = vector.broadcast %52 : vector<1x16xf32> to vector<16x16xf32>
    %54 = arith.addf %51, %53 : vector<16x16xf32>
    %55 = arith.truncf %54 : vector<16x16xf32> to vector<16x16xbf16>
    %c0_56 = arith.constant 0 : index
    %c0_57 = arith.constant 0 : index
    %c0_58 = arith.constant 0 : index
    %c0_59 = arith.constant 0 : index
    %56 = vector.load %arg7[%c0_56, %c0_57, %c0_58, %c0_59] : memref<1x1x16x16xbf16, #tpu.memory_space<vmem>>, vector<1x1x16x16xbf16>
    %57 = vector.shape_cast %56 : vector<1x1x16x16xbf16> to vector<16x16xbf16>
    %58 = vector.shape_cast %55 : vector<16x16xbf16> to vector<1x1x16x16xbf16>
    tpu.vector_store %arg7[%c0_56, %c0_57, %c0_58, %c0_59], %58 {strides = array<i32>} : memref<1x1x16x16xbf16, #tpu.memory_space<vmem>>, vector<1x1x16x16xbf16>,
    %c0_i32 = arith.constant 0 : i32
    %59 = arith.cmpi eq, %arg0, %c0_i32 : i32
    %c0_i32_60 = arith.constant 0 : i32
    %60 = arith.cmpi eq, %arg1, %c0_i32_60 : i32
    %61 = arith.andi %59, %60 : i1
    %62 = arith.extui %61 : i1 to i32
    %c0_i32_61 = arith.constant 0 : i32
    %63 = arith.cmpi ne, %62, %c0_i32_61 : i32
    scf.if %63 {
      %cst_72 = arith.constant 0.000000e+00 : f32
      %75 = vector.broadcast %cst_72 : f32 to vector<1x16xf32>
      %c0_73 = arith.constant 0 : index
      %c0_74 = arith.constant 0 : index
      %76 = vector.load %arg8[%c0_73, %c0_74] : memref<1x16xf32, #tpu.memory_space<vmem>>, vector<1x16xf32>
      tpu.vector_store %arg8[%c0_73, %c0_74], %75 {strides = array<i32>} : memref<1x16xf32, #tpu.memory_space<vmem>>, vector<1x16xf32>,
      %cst_75 = arith.constant 0.000000e+00 : f32
      %77 = vector.broadcast %cst_75 : f32 to vector<1x16xf32>
      %c0_76 = arith.constant 0 : index
      %c0_77 = arith.constant 0 : index
      %78 = vector.load %arg9[%c0_76, %c0_77] : memref<1x16xf32, #tpu.memory_space<vmem>>, vector<1x16xf32>
      tpu.vector_store %arg9[%c0_76, %c0_77], %77 {strides = array<i32>} : memref<1x16xf32, #tpu.memory_space<vmem>>, vector<1x16xf32>,
    } else {
    }
    %c0_62 = arith.constant 0 : index
    %c0_63 = arith.constant 0 : index
    %64 = vector.load %arg8[%c0_62, %c0_63] : memref<1x16xf32, #tpu.memory_space<vmem>>, vector<1x16xf32>
    %cst_64 = arith.constant dense<0.000000e+00> : vector<16xf32>
    %65 = vector.multi_reduction <add>, %54, %cst_64 [0] : vector<16x16xf32> to vector<16xf32>
    %66 = vector.shape_cast %65 : vector<16xf32> to vector<1x16xf32>
    %67 = arith.addf %64, %66 : vector<1x16xf32>
    %c0_65 = arith.constant 0 : index
    %c0_66 = arith.constant 0 : index
    %68 = vector.load %arg8[%c0_65, %c0_66] : memref<1x16xf32, #tpu.memory_space<vmem>>, vector<1x16xf32>
    tpu.vector_store %arg8[%c0_65, %c0_66], %67 {strides = array<i32>} : memref<1x16xf32, #tpu.memory_space<vmem>>, vector<1x16xf32>,
    %c0_67 = arith.constant 0 : index
    %c0_68 = arith.constant 0 : index
    %69 = vector.load %arg9[%c0_67, %c0_68] : memref<1x16xf32, #tpu.memory_space<vmem>>, vector<1x16xf32>
    %70 = arith.mulf %54, %54 : vector<16x16xf32>
    %cst_69 = arith.constant dense<0.000000e+00> : vector<16xf32>
    %71 = vector.multi_reduction <add>, %70, %cst_69 [0] : vector<16x16xf32> to vector<16xf32>
    %72 = vector.shape_cast %71 : vector<16xf32> to vector<1x16xf32>
    %73 = arith.addf %69, %72 : vector<1x16xf32>
    %c0_70 = arith.constant 0 : index
    %c0_71 = arith.constant 0 : index
    %74 = vector.load %arg9[%c0_70, %c0_71] : memref<1x16xf32, #tpu.memory_space<vmem>>, vector<1x16xf32>
    tpu.vector_store %arg9[%c0_70, %c0_71], %73 {strides = array<i32>} : memref<1x16xf32, #tpu.memory_space<vmem>>, vector<1x16xf32>,
    return
  }
  func.func @transform_0(%arg0: i32, %arg1: i32) -> (i32, i32, i32, i32) {
    %c0_i32 = arith.constant 0 : i32
    %0 = arith.addi %arg1, %c0_i32 : i32
    %c0_i32_0 = arith.constant 0 : i32
    %c0_i32_1 = arith.constant 0 : i32
    %c0_i32_2 = arith.constant 0 : i32
    return %arg0, %0, %c0_i32_0, %c0_i32_1 : i32, i32, i32, i32
  }
  func.func @transform_1(%arg0: i32, %arg1: i32) -> (i32, i32, i32, i32) {
    %c1_i32 = arith.constant 1 : i32
    %0 = arith.addi %arg1, %c1_i32 : i32
    %c0_i32 = arith.constant 0 : i32
    %c0_i32_0 = arith.constant 0 : i32
    %c0_i32_1 = arith.constant 0 : i32
    return %arg0, %0, %c0_i32, %c0_i32_0 : i32, i32, i32, i32
  }
  func.func @transform_2(%arg0: i32, %arg1: i32) -> (i32, i32, i32, i32) {
    %c2_i32 = arith.constant 2 : i32
    %0 = arith.addi %arg1, %c2_i32 : i32
    %c0_i32 = arith.constant 0 : i32
    %c0_i32_0 = arith.constant 0 : i32
    %c0_i32_1 = arith.constant 0 : i32
    return %arg0, %0, %c0_i32, %c0_i32_0 : i32, i32, i32, i32
  }
  func.func @transform_3(%arg0: i32, %arg1: i32) -> (i32, i32, i32, i32) {
    %c0_i32 = arith.constant 0 : i32
    %c0_i32_0 = arith.constant 0 : i32
    %c0_i32_1 = arith.constant 0 : i32
    %c0_i32_2 = arith.constant 0 : i32
    %c0_i32_3 = arith.constant 0 : i32
    return %c0_i32, %c0_i32_0, %c0_i32_1, %c0_i32_2 : i32, i32, i32, i32
  }
  func.func @transform_4(%arg0: i32, %arg1: i32) -> (i32, i32) {
    %c0_i32 = arith.constant 0 : i32
    %c0_i32_0 = arith.constant 0 : i32
    %c0_i32_1 = arith.constant 0 : i32
    return %c0_i32, %c0_i32_0 : i32, i32
  }
  func.func @transform_5(%arg0: i32, %arg1: i32) -> (i32, i32, i32, i32) {
    %c0_i32 = arith.constant 0 : i32
    %c0_i32_0 = arith.constant 0 : i32
    %c0_i32_1 = arith.constant 0 : i32
    return %arg0, %arg1, %c0_i32, %c0_i32_0 : i32, i32, i32, i32
  }
  func.func @transform_6(%arg0: i32, %arg1: i32) -> (i32, i32) {
    %c0_i32 = arith.constant 0 : i32
    %c0_i32_0 = arith.constant 0 : i32
    %c0_i32_1 = arith.constant 0 : i32
    return %c0_i32, %c0_i32_0 : i32, i32
  }
  func.func @transform_7(%arg0: i32, %arg1: i32) -> (i32, i32) {
    %c0_i32 = arith.constant 0 : i32
    %c0_i32_0 = arith.constant 0 : i32
    %c0_i32_1 = arith.constant 0 : i32
    return %c0_i32, %c0_i32_0 : i32, i32
  }
}

module attributes {stable_mosaic.version = 11 : i64} {
  func.func @_bn_act_kernel(%arg0: i32, %arg1: memref<256x16xbf16, #tpu.memory_space<vmem>>, %arg2: memref<1x16xf32, #tpu.memory_space<vmem>>, %arg3: memref<1x16xf32, #tpu.memory_space<vmem>>, %arg4: memref<1x16xf32, #tpu.memory_space<vmem>>, %arg5: memref<1x16xf32, #tpu.memory_space<vmem>>, %arg6: memref<256x16xbf16, #tpu.memory_space<vmem>>) attributes {dimension_semantics = [#tpu.dimension_semantics<parallel>], iteration_bounds = array<i64: 2>, scalar_prefetch = 0 : i64, scratch_operands = 0 : i64, tpu.core_type = #tpu.core_type<tc>, window_params = [{transform_indices = @transform_0, window_bounds = array<i64: 256, 16>}, {pipeline_mode = #tpu.pipeline_mode<synchronous>, transform_indices = @transform_1, window_bounds = array<i64: 1, 16>}, {pipeline_mode = #tpu.pipeline_mode<synchronous>, transform_indices = @transform_2, window_bounds = array<i64: 1, 16>}, {pipeline_mode = #tpu.pipeline_mode<synchronous>, transform_indices = @transform_3, window_bounds = array<i64: 1, 16>}, {pipeline_mode = #tpu.pipeline_mode<synchronous>, transform_indices = @transform_4, window_bounds = array<i64: 1, 16>}, {transform_indices = @transform_5, window_bounds = array<i64: 256, 16>}]} {
    %c0 = arith.constant 0 : index
    %c0_0 = arith.constant 0 : index
    %0 = vector.load %arg1[%c0, %c0_0] : memref<256x16xbf16, #tpu.memory_space<vmem>>, vector<256x16xbf16>
    %1 = arith.extf %0 : vector<256x16xbf16> to vector<256x16xf32>
    %c0_1 = arith.constant 0 : index
    %c0_2 = arith.constant 0 : index
    %2 = vector.load %arg2[%c0_1, %c0_2] : memref<1x16xf32, #tpu.memory_space<vmem>>, vector<1x16xf32>
    %3 = vector.broadcast %2 : vector<1x16xf32> to vector<256x16xf32>
    %4 = arith.subf %1, %3 : vector<256x16xf32>
    %c0_3 = arith.constant 0 : index
    %c0_4 = arith.constant 0 : index
    %5 = vector.load %arg3[%c0_3, %c0_4] : memref<1x16xf32, #tpu.memory_space<vmem>>, vector<1x16xf32>
    %6 = vector.broadcast %5 : vector<1x16xf32> to vector<256x16xf32>
    %7 = arith.mulf %4, %6 : vector<256x16xf32>
    %c0_5 = arith.constant 0 : index
    %c0_6 = arith.constant 0 : index
    %8 = vector.load %arg4[%c0_5, %c0_6] : memref<1x16xf32, #tpu.memory_space<vmem>>, vector<1x16xf32>
    %9 = vector.broadcast %8 : vector<1x16xf32> to vector<256x16xf32>
    %10 = arith.mulf %7, %9 : vector<256x16xf32>
    %c0_7 = arith.constant 0 : index
    %c0_8 = arith.constant 0 : index
    %11 = vector.load %arg5[%c0_7, %c0_8] : memref<1x16xf32, #tpu.memory_space<vmem>>, vector<1x16xf32>
    %12 = vector.broadcast %11 : vector<1x16xf32> to vector<256x16xf32>
    %13 = arith.addf %10, %12 : vector<256x16xf32>
    %cst = arith.constant 0.000000e+00 : f32
    %14 = vector.broadcast %cst : f32 to vector<256x16xf32>
    %15 = arith.maximumf %13, %14 : vector<256x16xf32>
    %16 = arith.truncf %15 : vector<256x16xf32> to vector<256x16xbf16>
    %c0_9 = arith.constant 0 : index
    %c0_10 = arith.constant 0 : index
    %17 = vector.load %arg6[%c0_9, %c0_10] : memref<256x16xbf16, #tpu.memory_space<vmem>>, vector<256x16xbf16>
    tpu.vector_store %arg6[%c0_9, %c0_10], %16 {strides = array<i32>} : memref<256x16xbf16, #tpu.memory_space<vmem>>, vector<256x16xbf16>,
    return
  }
  func.func @transform_0(%arg0: i32) -> (i32, i32) {
    %c0_i32 = arith.constant 0 : i32
    %c0_i32_0 = arith.constant 0 : i32
    return %arg0, %c0_i32 : i32, i32
  }
  func.func @transform_1(%arg0: i32) -> (i32, i32) {
    %c0_i32 = arith.constant 0 : i32
    %c0_i32_0 = arith.constant 0 : i32
    %c0_i32_1 = arith.constant 0 : i32
    return %c0_i32, %c0_i32_0 : i32, i32
  }
  func.func @transform_2(%arg0: i32) -> (i32, i32) {
    %c0_i32 = arith.constant 0 : i32
    %c0_i32_0 = arith.constant 0 : i32
    %c0_i32_1 = arith.constant 0 : i32
    return %c0_i32, %c0_i32_0 : i32, i32
  }
  func.func @transform_3(%arg0: i32) -> (i32, i32) {
    %c0_i32 = arith.constant 0 : i32
    %c0_i32_0 = arith.constant 0 : i32
    %c0_i32_1 = arith.constant 0 : i32
    return %c0_i32, %c0_i32_0 : i32, i32
  }
  func.func @transform_4(%arg0: i32) -> (i32, i32) {
    %c0_i32 = arith.constant 0 : i32
    %c0_i32_0 = arith.constant 0 : i32
    %c0_i32_1 = arith.constant 0 : i32
    return %c0_i32, %c0_i32_0 : i32, i32
  }
  func.func @transform_5(%arg0: i32) -> (i32, i32) {
    %c0_i32 = arith.constant 0 : i32
    %c0_i32_0 = arith.constant 0 : i32
    return %arg0, %c0_i32 : i32, i32
  }
}

module attributes {stable_mosaic.version = 11 : i64} {
  func.func @_conv3x3_kernel(%arg0: i32, %arg1: i32, %arg2: memref<1x1x18x16xbf16, #tpu.memory_space<vmem>>, %arg3: memref<1x1x18x16xbf16, #tpu.memory_space<vmem>>, %arg4: memref<1x1x18x16xbf16, #tpu.memory_space<vmem>>, %arg5: memref<3x3x16x16xbf16, #tpu.memory_space<vmem>>, %arg6: memref<1x16xf32, #tpu.memory_space<vmem>>, %arg7: memref<1x1x16x16xbf16, #tpu.memory_space<vmem>>, %arg8: memref<1x16xf32, #tpu.memory_space<vmem>>, %arg9: memref<1x16xf32, #tpu.memory_space<vmem>>) attributes {dimension_semantics = [#tpu.dimension_semantics<arbitrary>, #tpu.dimension_semantics<arbitrary>], iteration_bounds = array<i64: 2, 16>, scalar_prefetch = 0 : i64, scratch_operands = 0 : i64, tpu.core_type = #tpu.core_type<tc>, window_params = [{transform_indices = @transform_0, window_bounds = array<i64: 1, 1, 18, 16>}, {transform_indices = @transform_1, window_bounds = array<i64: 1, 1, 18, 16>}, {transform_indices = @transform_2, window_bounds = array<i64: 1, 1, 18, 16>}, {pipeline_mode = #tpu.pipeline_mode<synchronous>, transform_indices = @transform_3, window_bounds = array<i64: 3, 3, 16, 16>}, {pipeline_mode = #tpu.pipeline_mode<synchronous>, transform_indices = @transform_4, window_bounds = array<i64: 1, 16>}, {transform_indices = @transform_5, window_bounds = array<i64: 1, 1, 16, 16>}, {pipeline_mode = #tpu.pipeline_mode<synchronous>, transform_indices = @transform_6, window_bounds = array<i64: 1, 16>}, {pipeline_mode = #tpu.pipeline_mode<synchronous>, transform_indices = @transform_7, window_bounds = array<i64: 1, 16>}]} {
    %c0 = arith.constant 0 : index
    %c0_0 = arith.constant 0 : index
    %c0_1 = arith.constant 0 : index
    %c0_2 = arith.constant 0 : index
    %0 = vector.load %arg2[%c0, %c0_0, %c0_1, %c0_2] : memref<1x1x18x16xbf16, #tpu.memory_space<vmem>>, vector<1x1x18x16xbf16>
    %1 = vector.shape_cast %0 : vector<1x1x18x16xbf16> to vector<18x16xbf16>
    %c0_3 = arith.constant 0 : index
    %c0_4 = arith.constant 0 : index
    %c0_5 = arith.constant 0 : index
    %c0_6 = arith.constant 0 : index
    %2 = vector.load %arg3[%c0_3, %c0_4, %c0_5, %c0_6] : memref<1x1x18x16xbf16, #tpu.memory_space<vmem>>, vector<1x1x18x16xbf16>
    %3 = vector.shape_cast %2 : vector<1x1x18x16xbf16> to vector<18x16xbf16>
    %c0_7 = arith.constant 0 : index
    %c0_8 = arith.constant 0 : index
    %c0_9 = arith.constant 0 : index
    %c0_10 = arith.constant 0 : index
    %4 = vector.load %arg4[%c0_7, %c0_8, %c0_9, %c0_10] : memref<1x1x18x16xbf16, #tpu.memory_space<vmem>>, vector<1x1x18x16xbf16>
    %5 = vector.shape_cast %4 : vector<1x1x18x16xbf16> to vector<18x16xbf16>
    %cst = arith.constant 0.000000e+00 : f32
    %6 = vector.broadcast %cst : f32 to vector<16x16xf32>
    %7 = vector.extract_strided_slice %1 {offsets = [0, 0], sizes = [16, 16], strides = [1, 1]} : vector<18x16xbf16> to vector<16x16xbf16>
    %c0_11 = arith.constant 0 : index
    %c0_12 = arith.constant 0 : index
    %c0_13 = arith.constant 0 : index
    %c0_14 = arith.constant 0 : index
    %8 = vector.load %arg5[%c0_11, %c0_12, %c0_13, %c0_14] : memref<3x3x16x16xbf16, #tpu.memory_space<vmem>>, vector<1x1x16x16xbf16>
    %9 = vector.shape_cast %8 : vector<1x1x16x16xbf16> to vector<16x16xbf16>
    %cst_15 = arith.constant dense<0.000000e+00> : vector<16x16xf32>
    %10 = tpu.matmul %7, %9, %cst_15 {dimension_numbers = #tpu.dot_dimension_numbers<[1], [0], [0], [1], [0, 0, 1, 1], [], []>} : vector<16x16xbf16>, vector<16x16xbf16>, vector<16x16xf32> -> vector<16x16xf32>
    %11 = arith.addf %6, %10 : vector<16x16xf32>
    %12 = vector.extract_strided_slice %1 {offsets = [1, 0], sizes = [16, 16], strides = [1, 1]} : vector<18x16xbf16> to vector<16x16xbf16>
    %c0_16 = arith.constant 0 : index
    %c1 = arith.constant 1 : index
    %c0_17 = arith.constant 0 : index
    %c0_18 = arith.constant 0 : index
    %13 = vector.load %arg5[%c0_16, %c1, %c0_17, %c0_18] : memref<3x3x16x16xbf16, #tpu.memory_space<vmem>>, vector<1x1x16x16xbf16>
    %14 = vector.shape_cast %13 : vector<1x1x16x16xbf16> to vector<16x16xbf16>
    %cst_19 = arith.constant dense<0.000000e+00> : vector<16x16xf32>
    %15 = tpu.matmul %12, %14, %cst_19 {dimension_numbers = #tpu.dot_dimension_numbers<[1], [0], [0], [1], [0, 0, 1, 1], [], []>} : vector<16x16xbf16>, vector<16x16xbf16>, vector<16x16xf32> -> vector<16x16xf32>
    %16 = arith.addf %11, %15 : vector<16x16xf32>
    %17 = vector.extract_strided_slice %1 {offsets = [2, 0], sizes = [16, 16], strides = [1, 1]} : vector<18x16xbf16> to vector<16x16xbf16>
    %c0_20 = arith.constant 0 : index
    %c2 = arith.constant 2 : index
    %c0_21 = arith.constant 0 : index
    %c0_22 = arith.constant 0 : index
    %18 = vector.load %arg5[%c0_20, %c2, %c0_21, %c0_22] : memref<3x3x16x16xbf16, #tpu.memory_space<vmem>>, vector<1x1x16x16xbf16>
    %19 = vector.shape_cast %18 : vector<1x1x16x16xbf16> to vector<16x16xbf16>
    %cst_23 = arith.constant dense<0.000000e+00> : vector<16x16xf32>
    %20 = tpu.matmul %17, %19, %cst_23 {dimension_numbers = #tpu.dot_dimension_numbers<[1], [0], [0], [1], [0, 0, 1, 1], [], []>} : vector<16x16xbf16>, vector<16x16xbf16>, vector<16x16xf32> -> vector<16x16xf32>
    %21 = arith.addf %16, %20 : vector<16x16xf32>
    %22 = vector.extract_strided_slice %3 {offsets = [0, 0], sizes = [16, 16], strides = [1, 1]} : vector<18x16xbf16> to vector<16x16xbf16>
    %c1_24 = arith.constant 1 : index
    %c0_25 = arith.constant 0 : index
    %c0_26 = arith.constant 0 : index
    %c0_27 = arith.constant 0 : index
    %23 = vector.load %arg5[%c1_24, %c0_25, %c0_26, %c0_27] : memref<3x3x16x16xbf16, #tpu.memory_space<vmem>>, vector<1x1x16x16xbf16>
    %24 = vector.shape_cast %23 : vector<1x1x16x16xbf16> to vector<16x16xbf16>
    %cst_28 = arith.constant dense<0.000000e+00> : vector<16x16xf32>
    %25 = tpu.matmul %22, %24, %cst_28 {dimension_numbers = #tpu.dot_dimension_numbers<[1], [0], [0], [1], [0, 0, 1, 1], [], []>} : vector<16x16xbf16>, vector<16x16xbf16>, vector<16x16xf32> -> vector<16x16xf32>
    %26 = arith.addf %21, %25 : vector<16x16xf32>
    %27 = vector.extract_strided_slice %3 {offsets = [1, 0], sizes = [16, 16], strides = [1, 1]} : vector<18x16xbf16> to vector<16x16xbf16>
    %c1_29 = arith.constant 1 : index
    %c1_30 = arith.constant 1 : index
    %c0_31 = arith.constant 0 : index
    %c0_32 = arith.constant 0 : index
    %28 = vector.load %arg5[%c1_29, %c1_30, %c0_31, %c0_32] : memref<3x3x16x16xbf16, #tpu.memory_space<vmem>>, vector<1x1x16x16xbf16>
    %29 = vector.shape_cast %28 : vector<1x1x16x16xbf16> to vector<16x16xbf16>
    %cst_33 = arith.constant dense<0.000000e+00> : vector<16x16xf32>
    %30 = tpu.matmul %27, %29, %cst_33 {dimension_numbers = #tpu.dot_dimension_numbers<[1], [0], [0], [1], [0, 0, 1, 1], [], []>} : vector<16x16xbf16>, vector<16x16xbf16>, vector<16x16xf32> -> vector<16x16xf32>
    %31 = arith.addf %26, %30 : vector<16x16xf32>
    %32 = vector.extract_strided_slice %3 {offsets = [2, 0], sizes = [16, 16], strides = [1, 1]} : vector<18x16xbf16> to vector<16x16xbf16>
    %c1_34 = arith.constant 1 : index
    %c2_35 = arith.constant 2 : index
    %c0_36 = arith.constant 0 : index
    %c0_37 = arith.constant 0 : index
    %33 = vector.load %arg5[%c1_34, %c2_35, %c0_36, %c0_37] : memref<3x3x16x16xbf16, #tpu.memory_space<vmem>>, vector<1x1x16x16xbf16>
    %34 = vector.shape_cast %33 : vector<1x1x16x16xbf16> to vector<16x16xbf16>
    %cst_38 = arith.constant dense<0.000000e+00> : vector<16x16xf32>
    %35 = tpu.matmul %32, %34, %cst_38 {dimension_numbers = #tpu.dot_dimension_numbers<[1], [0], [0], [1], [0, 0, 1, 1], [], []>} : vector<16x16xbf16>, vector<16x16xbf16>, vector<16x16xf32> -> vector<16x16xf32>
    %36 = arith.addf %31, %35 : vector<16x16xf32>
    %37 = vector.extract_strided_slice %5 {offsets = [0, 0], sizes = [16, 16], strides = [1, 1]} : vector<18x16xbf16> to vector<16x16xbf16>
    %c2_39 = arith.constant 2 : index
    %c0_40 = arith.constant 0 : index
    %c0_41 = arith.constant 0 : index
    %c0_42 = arith.constant 0 : index
    %38 = vector.load %arg5[%c2_39, %c0_40, %c0_41, %c0_42] : memref<3x3x16x16xbf16, #tpu.memory_space<vmem>>, vector<1x1x16x16xbf16>
    %39 = vector.shape_cast %38 : vector<1x1x16x16xbf16> to vector<16x16xbf16>
    %cst_43 = arith.constant dense<0.000000e+00> : vector<16x16xf32>
    %40 = tpu.matmul %37, %39, %cst_43 {dimension_numbers = #tpu.dot_dimension_numbers<[1], [0], [0], [1], [0, 0, 1, 1], [], []>} : vector<16x16xbf16>, vector<16x16xbf16>, vector<16x16xf32> -> vector<16x16xf32>
    %41 = arith.addf %36, %40 : vector<16x16xf32>
    %42 = vector.extract_strided_slice %5 {offsets = [1, 0], sizes = [16, 16], strides = [1, 1]} : vector<18x16xbf16> to vector<16x16xbf16>
    %c2_44 = arith.constant 2 : index
    %c1_45 = arith.constant 1 : index
    %c0_46 = arith.constant 0 : index
    %c0_47 = arith.constant 0 : index
    %43 = vector.load %arg5[%c2_44, %c1_45, %c0_46, %c0_47] : memref<3x3x16x16xbf16, #tpu.memory_space<vmem>>, vector<1x1x16x16xbf16>
    %44 = vector.shape_cast %43 : vector<1x1x16x16xbf16> to vector<16x16xbf16>
    %cst_48 = arith.constant dense<0.000000e+00> : vector<16x16xf32>
    %45 = tpu.matmul %42, %44, %cst_48 {dimension_numbers = #tpu.dot_dimension_numbers<[1], [0], [0], [1], [0, 0, 1, 1], [], []>} : vector<16x16xbf16>, vector<16x16xbf16>, vector<16x16xf32> -> vector<16x16xf32>
    %46 = arith.addf %41, %45 : vector<16x16xf32>
    %47 = vector.extract_strided_slice %5 {offsets = [2, 0], sizes = [16, 16], strides = [1, 1]} : vector<18x16xbf16> to vector<16x16xbf16>
    %c2_49 = arith.constant 2 : index
    %c2_50 = arith.constant 2 : index
    %c0_51 = arith.constant 0 : index
    %c0_52 = arith.constant 0 : index
    %48 = vector.load %arg5[%c2_49, %c2_50, %c0_51, %c0_52] : memref<3x3x16x16xbf16, #tpu.memory_space<vmem>>, vector<1x1x16x16xbf16>
    %49 = vector.shape_cast %48 : vector<1x1x16x16xbf16> to vector<16x16xbf16>
    %cst_53 = arith.constant dense<0.000000e+00> : vector<16x16xf32>
    %50 = tpu.matmul %47, %49, %cst_53 {dimension_numbers = #tpu.dot_dimension_numbers<[1], [0], [0], [1], [0, 0, 1, 1], [], []>} : vector<16x16xbf16>, vector<16x16xbf16>, vector<16x16xf32> -> vector<16x16xf32>
    %51 = arith.addf %46, %50 : vector<16x16xf32>
    %c0_54 = arith.constant 0 : index
    %c0_55 = arith.constant 0 : index
    %52 = vector.load %arg6[%c0_54, %c0_55] : memref<1x16xf32, #tpu.memory_space<vmem>>, vector<1x16xf32>
    %53 = vector.broadcast %52 : vector<1x16xf32> to vector<16x16xf32>
    %54 = arith.addf %51, %53 : vector<16x16xf32>
    %55 = arith.truncf %54 : vector<16x16xf32> to vector<16x16xbf16>
    %c0_56 = arith.constant 0 : index
    %c0_57 = arith.constant 0 : index
    %c0_58 = arith.constant 0 : index
    %c0_59 = arith.constant 0 : index
    %56 = vector.load %arg7[%c0_56, %c0_57, %c0_58, %c0_59] : memref<1x1x16x16xbf16, #tpu.memory_space<vmem>>, vector<1x1x16x16xbf16>
    %57 = vector.shape_cast %56 : vector<1x1x16x16xbf16> to vector<16x16xbf16>
    %58 = vector.shape_cast %55 : vector<16x16xbf16> to vector<1x1x16x16xbf16>
    tpu.vector_store %arg7[%c0_56, %c0_57, %c0_58, %c0_59], %58 {strides = array<i32>} : memref<1x1x16x16xbf16, #tpu.memory_space<vmem>>, vector<1x1x16x16xbf16>,
    %c0_i32 = arith.constant 0 : i32
    %59 = arith.cmpi eq, %arg0, %c0_i32 : i32
    %c0_i32_60 = arith.constant 0 : i32
    %60 = arith.cmpi eq, %arg1, %c0_i32_60 : i32
    %61 = arith.andi %59, %60 : i1
    %62 = arith.extui %61 : i1 to i32
    %c0_i32_61 = arith.constant 0 : i32
    %63 = arith.cmpi ne, %62, %c0_i32_61 : i32
    scf.if %63 {
      %cst_72 = arith.constant 0.000000e+00 : f32
      %75 = vector.broadcast %cst_72 : f32 to vector<1x16xf32>
      %c0_73 = arith.constant 0 : index
      %c0_74 = arith.constant 0 : index
      %76 = vector.load %arg8[%c0_73, %c0_74] : memref<1x16xf32, #tpu.memory_space<vmem>>, vector<1x16xf32>
      tpu.vector_store %arg8[%c0_73, %c0_74], %75 {strides = array<i32>} : memref<1x16xf32, #tpu.memory_space<vmem>>, vector<1x16xf32>,
      %cst_75 = arith.constant 0.000000e+00 : f32
      %77 = vector.broadcast %cst_75 : f32 to vector<1x16xf32>
      %c0_76 = arith.constant 0 : index
      %c0_77 = arith.constant 0 : index
      %78 = vector.load %arg9[%c0_76, %c0_77] : memref<1x16xf32, #tpu.memory_space<vmem>>, vector<1x16xf32>
      tpu.vector_store %arg9[%c0_76, %c0_77], %77 {strides = array<i32>} : memref<1x16xf32, #tpu.memory_space<vmem>>, vector<1x16xf32>,
    } else {
    }
    %c0_62 = arith.constant 0 : index
    %c0_63 = arith.constant 0 : index
    %64 = vector.load %arg8[%c0_62, %c0_63] : memref<1x16xf32, #tpu.memory_space<vmem>>, vector<1x16xf32>
    %cst_64 = arith.constant dense<0.000000e+00> : vector<16xf32>
    %65 = vector.multi_reduction <add>, %54, %cst_64 [0] : vector<16x16xf32> to vector<16xf32>
    %66 = vector.shape_cast %65 : vector<16xf32> to vector<1x16xf32>
    %67 = arith.addf %64, %66 : vector<1x16xf32>
    %c0_65 = arith.constant 0 : index
    %c0_66 = arith.constant 0 : index
    %68 = vector.load %arg8[%c0_65, %c0_66] : memref<1x16xf32, #tpu.memory_space<vmem>>, vector<1x16xf32>
    tpu.vector_store %arg8[%c0_65, %c0_66], %67 {strides = array<i32>} : memref<1x16xf32, #tpu.memory_space<vmem>>, vector<1x16xf32>,
    %c0_67 = arith.constant 0 : index
    %c0_68 = arith.constant 0 : index
    %69 = vector.load %arg9[%c0_67, %c0_68] : memref<1x16xf32, #tpu.memory_space<vmem>>, vector<1x16xf32>
    %70 = arith.mulf %54, %54 : vector<16x16xf32>
    %cst_69 = arith.constant dense<0.000000e+00> : vector<16xf32>
    %71 = vector.multi_reduction <add>, %70, %cst_69 [0] : vector<16x16xf32> to vector<16xf32>
    %72 = vector.shape_cast %71 : vector<16xf32> to vector<1x16xf32>
    %73 = arith.addf %69, %72 : vector<1x16xf32>
    %c0_70 = arith.constant 0 : index
    %c0_71 = arith.constant 0 : index
    %74 = vector.load %arg9[%c0_70, %c0_71] : memref<1x16xf32, #tpu.memory_space<vmem>>, vector<1x16xf32>
    tpu.vector_store %arg9[%c0_70, %c0_71], %73 {strides = array<i32>} : memref<1x16xf32, #tpu.memory_space<vmem>>, vector<1x16xf32>,
    return
  }
  func.func @transform_0(%arg0: i32, %arg1: i32) -> (i32, i32, i32, i32) {
    %c0_i32 = arith.constant 0 : i32
    %0 = arith.addi %arg1, %c0_i32 : i32
    %c0_i32_0 = arith.constant 0 : i32
    %c0_i32_1 = arith.constant 0 : i32
    %c0_i32_2 = arith.constant 0 : i32
    return %arg0, %0, %c0_i32_0, %c0_i32_1 : i32, i32, i32, i32
  }
  func.func @transform_1(%arg0: i32, %arg1: i32) -> (i32, i32, i32, i32) {
    %c1_i32 = arith.constant 1 : i32
    %0 = arith.addi %arg1, %c1_i32 : i32
    %c0_i32 = arith.constant 0 : i32
    %c0_i32_0 = arith.constant 0 : i32
    %c0_i32_1 = arith.constant 0 : i32
    return %arg0, %0, %c0_i32, %c0_i32_0 : i32, i32, i32, i32
  }
  func.func @transform_2(%arg0: i32, %arg1: i32) -> (i32, i32, i32, i32) {
    %c2_i32 = arith.constant 2 : i32
    %0 = arith.addi %arg1, %c2_i32 : i32
    %c0_i32 = arith.constant 0 : i32
    %c0_i32_0 = arith.constant 0 : i32
    %c0_i32_1 = arith.constant 0 : i32
    return %arg0, %0, %c0_i32, %c0_i32_0 : i32, i32, i32, i32
  }
  func.func @transform_3(%arg0: i32, %arg1: i32) -> (i32, i32, i32, i32) {
    %c0_i32 = arith.constant 0 : i32
    %c0_i32_0 = arith.constant 0 : i32
    %c0_i32_1 = arith.constant 0 : i32
    %c0_i32_2 = arith.constant 0 : i32
    %c0_i32_3 = arith.constant 0 : i32
    return %c0_i32, %c0_i32_0, %c0_i32_1, %c0_i32_2 : i32, i32, i32, i32
  }
  func.func @transform_4(%arg0: i32, %arg1: i32) -> (i32, i32) {
    %c0_i32 = arith.constant 0 : i32
    %c0_i32_0 = arith.constant 0 : i32
    %c0_i32_1 = arith.constant 0 : i32
    return %c0_i32, %c0_i32_0 : i32, i32
  }
  func.func @transform_5(%arg0: i32, %arg1: i32) -> (i32, i32, i32, i32) {
    %c0_i32 = arith.constant 0 : i32
    %c0_i32_0 = arith.constant 0 : i32
    %c0_i32_1 = arith.constant 0 : i32
    return %arg0, %arg1, %c0_i32, %c0_i32_0 : i32, i32, i32, i32
  }
  func.func @transform_6(%arg0: i32, %arg1: i32) -> (i32, i32) {
    %c0_i32 = arith.constant 0 : i32
    %c0_i32_0 = arith.constant 0 : i32
    %c0_i32_1 = arith.constant 0 : i32
    return %c0_i32, %c0_i32_0 : i32, i32
  }
  func.func @transform_7(%arg0: i32, %arg1: i32) -> (i32, i32) {
    %c0_i32 = arith.constant 0 : i32
    %c0_i32_0 = arith.constant 0 : i32
    %c0_i32_1 = arith.constant 0 : i32
    return %c0_i32, %c0_i32_0 : i32, i32
  }
}

module attributes {stable_mosaic.version = 11 : i64} {
  func.func @_bn_act_pool_kernel(%arg0: i32, %arg1: i32, %arg2: memref<1x2x8x2x16xbf16, #tpu.memory_space<vmem>>, %arg3: memref<1x16xf32, #tpu.memory_space<vmem>>, %arg4: memref<1x16xf32, #tpu.memory_space<vmem>>, %arg5: memref<1x16xf32, #tpu.memory_space<vmem>>, %arg6: memref<1x16xf32, #tpu.memory_space<vmem>>, %arg7: memref<1x2x8x2x16xbf16, #tpu.memory_space<vmem>>, %arg8: memref<1x1x8x16xbf16, #tpu.memory_space<vmem>>) attributes {dimension_semantics = [#tpu.dimension_semantics<parallel>, #tpu.dimension_semantics<parallel>], iteration_bounds = array<i64: 2, 8>, scalar_prefetch = 0 : i64, scratch_operands = 0 : i64, tpu.core_type = #tpu.core_type<tc>, window_params = [{transform_indices = @transform_0, window_bounds = array<i64: 1, 2, 8, 2, 16>}, {pipeline_mode = #tpu.pipeline_mode<synchronous>, transform_indices = @transform_1, window_bounds = array<i64: 1, 16>}, {pipeline_mode = #tpu.pipeline_mode<synchronous>, transform_indices = @transform_2, window_bounds = array<i64: 1, 16>}, {pipeline_mode = #tpu.pipeline_mode<synchronous>, transform_indices = @transform_3, window_bounds = array<i64: 1, 16>}, {pipeline_mode = #tpu.pipeline_mode<synchronous>, transform_indices = @transform_4, window_bounds = array<i64: 1, 16>}, {transform_indices = @transform_5, window_bounds = array<i64: 1, 2, 8, 2, 16>}, {transform_indices = @transform_6, window_bounds = array<i64: 1, 1, 8, 16>}]} {
    %c0 = arith.constant 0 : index
    %c0_0 = arith.constant 0 : index
    %c0_1 = arith.constant 0 : index
    %c0_2 = arith.constant 0 : index
    %c0_3 = arith.constant 0 : index
    %0 = vector.load %arg2[%c0, %c0_0, %c0_1, %c0_2, %c0_3] : memref<1x2x8x2x16xbf16, #tpu.memory_space<vmem>>, vector<1x2x8x2x16xbf16>
    %1 = vector.shape_cast %0 : vector<1x2x8x2x16xbf16> to vector<2x8x2x16xbf16>
    %2 = arith.extf %1 : vector<2x8x2x16xbf16> to vector<2x8x2x16xf32>
    %c0_4 = arith.constant 0 : index
    %c0_5 = arith.constant 0 : index
    %3 = vector.load %arg3[%c0_4, %c0_5] : memref<1x16xf32, #tpu.memory_space<vmem>>, vector<1x16xf32>
    %4 = vector.shape_cast %3 : vector<1x16xf32> to vector<1x1x1x16xf32>
    %5 = vector.broadcast %4 : vector<1x1x1x16xf32> to vector<2x8x2x16xf32>
    %6 = arith.subf %2, %5 : vector<2x8x2x16xf32>
    %c0_6 = arith.constant 0 : index
    %c0_7 = arith.constant 0 : index
    %7 = vector.load %arg4[%c0_6, %c0_7] : memref<1x16xf32, #tpu.memory_space<vmem>>, vector<1x16xf32>
    %8 = vector.shape_cast %7 : vector<1x16xf32> to vector<1x1x1x16xf32>
    %9 = vector.broadcast %8 : vector<1x1x1x16xf32> to vector<2x8x2x16xf32>
    %10 = arith.mulf %6, %9 : vector<2x8x2x16xf32>
    %c0_8 = arith.constant 0 : index
    %c0_9 = arith.constant 0 : index
    %11 = vector.load %arg5[%c0_8, %c0_9] : memref<1x16xf32, #tpu.memory_space<vmem>>, vector<1x16xf32>
    %12 = vector.shape_cast %11 : vector<1x16xf32> to vector<1x1x1x16xf32>
    %13 = vector.broadcast %12 : vector<1x1x1x16xf32> to vector<2x8x2x16xf32>
    %14 = arith.mulf %10, %13 : vector<2x8x2x16xf32>
    %c0_10 = arith.constant 0 : index
    %c0_11 = arith.constant 0 : index
    %15 = vector.load %arg6[%c0_10, %c0_11] : memref<1x16xf32, #tpu.memory_space<vmem>>, vector<1x16xf32>
    %16 = vector.shape_cast %15 : vector<1x16xf32> to vector<1x1x1x16xf32>
    %17 = vector.broadcast %16 : vector<1x1x1x16xf32> to vector<2x8x2x16xf32>
    %18 = arith.addf %14, %17 : vector<2x8x2x16xf32>
    %cst = arith.constant 0.000000e+00 : f32
    %19 = vector.broadcast %cst : f32 to vector<2x8x2x16xf32>
    %20 = arith.maximumf %18, %19 : vector<2x8x2x16xf32>
    %21 = arith.truncf %20 : vector<2x8x2x16xf32> to vector<2x8x2x16xbf16>
    %c0_12 = arith.constant 0 : index
    %c0_13 = arith.constant 0 : index
    %c0_14 = arith.constant 0 : index
    %c0_15 = arith.constant 0 : index
    %c0_16 = arith.constant 0 : index
    %22 = vector.load %arg7[%c0_12, %c0_13, %c0_14, %c0_15, %c0_16] : memref<1x2x8x2x16xbf16, #tpu.memory_space<vmem>>, vector<1x2x8x2x16xbf16>
    %23 = vector.shape_cast %22 : vector<1x2x8x2x16xbf16> to vector<2x8x2x16xbf16>
    %24 = vector.shape_cast %21 : vector<2x8x2x16xbf16> to vector<1x2x8x2x16xbf16>
    tpu.vector_store %arg7[%c0_12, %c0_13, %c0_14, %c0_15, %c0_16], %24 {strides = array<i32>} : memref<1x2x8x2x16xbf16, #tpu.memory_space<vmem>>, vector<1x2x8x2x16xbf16>,
    %25 = vector.extract_strided_slice %20 {offsets = [0, 0, 0, 0], sizes = [1, 8, 2, 16], strides = [1, 1, 1, 1]} : vector<2x8x2x16xf32> to vector<1x8x2x16xf32>
    %26 = vector.shape_cast %25 : vector<1x8x2x16xf32> to vector<8x2x16xf32>
    %27 = vector.extract_strided_slice %20 {offsets = [1, 0, 0, 0], sizes = [1, 8, 2, 16], strides = [1, 1, 1, 1]} : vector<2x8x2x16xf32> to vector<1x8x2x16xf32>
    %28 = vector.shape_cast %27 : vector<1x8x2x16xf32> to vector<8x2x16xf32>
    %29 = arith.maximumf %26, %28 : vector<8x2x16xf32>
    %cst_17 = arith.constant dense<0xFF800000> : vector<8x16xf32>
    %30 = vector.multi_reduction <maximumf>, %29, %cst_17 [1] : vector<8x2x16xf32> to vector<8x16xf32>
    %31 = arith.truncf %30 : vector<8x16xf32> to vector<8x16xbf16>
    %c0_18 = arith.constant 0 : index
    %c0_19 = arith.constant 0 : index
    %c0_20 = arith.constant 0 : index
    %c0_21 = arith.constant 0 : index
    %32 = vector.load %arg8[%c0_18, %c0_19, %c0_20, %c0_21] : memref<1x1x8x16xbf16, #tpu.memory_space<vmem>>, vector<1x1x8x16xbf16>
    %33 = vector.shape_cast %32 : vector<1x1x8x16xbf16> to vector<8x16xbf16>
    %34 = vector.shape_cast %31 : vector<8x16xbf16> to vector<1x1x8x16xbf16>
    tpu.vector_store %arg8[%c0_18, %c0_19, %c0_20, %c0_21], %34 {strides = array<i32>} : memref<1x1x8x16xbf16, #tpu.memory_space<vmem>>, vector<1x1x8x16xbf16>,
    return
  }
  func.func @transform_0(%arg0: i32, %arg1: i32) -> (i32, i32, i32, i32, i32) {
    %c0_i32 = arith.constant 0 : i32
    %c0_i32_0 = arith.constant 0 : i32
    %c0_i32_1 = arith.constant 0 : i32
    %c0_i32_2 = arith.constant 0 : i32
    return %arg0, %arg1, %c0_i32, %c0_i32_0, %c0_i32_1 : i32, i32, i32, i32, i32
  }
  func.func @transform_1(%arg0: i32, %arg1: i32) -> (i32, i32) {
    %c0_i32 = arith.constant 0 : i32
    %c0_i32_0 = arith.constant 0 : i32
    %c0_i32_1 = arith.constant 0 : i32
    return %c0_i32, %c0_i32_0 : i32, i32
  }
  func.func @transform_2(%arg0: i32, %arg1: i32) -> (i32, i32) {
    %c0_i32 = arith.constant 0 : i32
    %c0_i32_0 = arith.constant 0 : i32
    %c0_i32_1 = arith.constant 0 : i32
    return %c0_i32, %c0_i32_0 : i32, i32
  }
  func.func @transform_3(%arg0: i32, %arg1: i32) -> (i32, i32) {
    %c0_i32 = arith.constant 0 : i32
    %c0_i32_0 = arith.constant 0 : i32
    %c0_i32_1 = arith.constant 0 : i32
    return %c0_i32, %c0_i32_0 : i32, i32
  }
  func.func @transform_4(%arg0: i32, %arg1: i32) -> (i32, i32) {
    %c0_i32 = arith.constant 0 : i32
    %c0_i32_0 = arith.constant 0 : i32
    %c0_i32_1 = arith.constant 0 : i32
    return %c0_i32, %c0_i32_0 : i32, i32
  }
  func.func @transform_5(%arg0: i32, %arg1: i32) -> (i32, i32, i32, i32, i32) {
    %c0_i32 = arith.constant 0 : i32
    %c0_i32_0 = arith.constant 0 : i32
    %c0_i32_1 = arith.constant 0 : i32
    %c0_i32_2 = arith.constant 0 : i32
    return %arg0, %arg1, %c0_i32, %c0_i32_0, %c0_i32_1 : i32, i32, i32, i32, i32
  }
  func.func @transform_6(%arg0: i32, %arg1: i32) -> (i32, i32, i32, i32) {
    %c0_i32 = arith.constant 0 : i32
    %c0_i32_0 = arith.constant 0 : i32
    %c0_i32_1 = arith.constant 0 : i32
    return %arg0, %arg1, %c0_i32, %c0_i32_0 : i32, i32, i32, i32
  }
}

module attributes {stable_mosaic.version = 11 : i64} {
  func.func @_conv3x3_kernel(%arg0: i32, %arg1: i32, %arg2: memref<1x1x10x16xbf16, #tpu.memory_space<vmem>>, %arg3: memref<1x1x10x16xbf16, #tpu.memory_space<vmem>>, %arg4: memref<1x1x10x16xbf16, #tpu.memory_space<vmem>>, %arg5: memref<3x3x16x32xbf16, #tpu.memory_space<vmem>>, %arg6: memref<1x32xf32, #tpu.memory_space<vmem>>, %arg7: memref<1x1x8x32xbf16, #tpu.memory_space<vmem>>, %arg8: memref<1x32xf32, #tpu.memory_space<vmem>>, %arg9: memref<1x32xf32, #tpu.memory_space<vmem>>) attributes {dimension_semantics = [#tpu.dimension_semantics<arbitrary>, #tpu.dimension_semantics<arbitrary>], iteration_bounds = array<i64: 2, 8>, scalar_prefetch = 0 : i64, scratch_operands = 0 : i64, tpu.core_type = #tpu.core_type<tc>, window_params = [{transform_indices = @transform_0, window_bounds = array<i64: 1, 1, 10, 16>}, {transform_indices = @transform_1, window_bounds = array<i64: 1, 1, 10, 16>}, {transform_indices = @transform_2, window_bounds = array<i64: 1, 1, 10, 16>}, {pipeline_mode = #tpu.pipeline_mode<synchronous>, transform_indices = @transform_3, window_bounds = array<i64: 3, 3, 16, 32>}, {pipeline_mode = #tpu.pipeline_mode<synchronous>, transform_indices = @transform_4, window_bounds = array<i64: 1, 32>}, {transform_indices = @transform_5, window_bounds = array<i64: 1, 1, 8, 32>}, {pipeline_mode = #tpu.pipeline_mode<synchronous>, transform_indices = @transform_6, window_bounds = array<i64: 1, 32>}, {pipeline_mode = #tpu.pipeline_mode<synchronous>, transform_indices = @transform_7, window_bounds = array<i64: 1, 32>}]} {
    %c0 = arith.constant 0 : index
    %c0_0 = arith.constant 0 : index
    %c0_1 = arith.constant 0 : index
    %c0_2 = arith.constant 0 : index
    %0 = vector.load %arg2[%c0, %c0_0, %c0_1, %c0_2] : memref<1x1x10x16xbf16, #tpu.memory_space<vmem>>, vector<1x1x10x16xbf16>
    %1 = vector.shape_cast %0 : vector<1x1x10x16xbf16> to vector<10x16xbf16>
    %c0_3 = arith.constant 0 : index
    %c0_4 = arith.constant 0 : index
    %c0_5 = arith.constant 0 : index
    %c0_6 = arith.constant 0 : index
    %2 = vector.load %arg3[%c0_3, %c0_4, %c0_5, %c0_6] : memref<1x1x10x16xbf16, #tpu.memory_space<vmem>>, vector<1x1x10x16xbf16>
    %3 = vector.shape_cast %2 : vector<1x1x10x16xbf16> to vector<10x16xbf16>
    %c0_7 = arith.constant 0 : index
    %c0_8 = arith.constant 0 : index
    %c0_9 = arith.constant 0 : index
    %c0_10 = arith.constant 0 : index
    %4 = vector.load %arg4[%c0_7, %c0_8, %c0_9, %c0_10] : memref<1x1x10x16xbf16, #tpu.memory_space<vmem>>, vector<1x1x10x16xbf16>
    %5 = vector.shape_cast %4 : vector<1x1x10x16xbf16> to vector<10x16xbf16>
    %cst = arith.constant 0.000000e+00 : f32
    %6 = vector.broadcast %cst : f32 to vector<8x32xf32>
    %7 = vector.extract_strided_slice %1 {offsets = [0, 0], sizes = [8, 16], strides = [1, 1]} : vector<10x16xbf16> to vector<8x16xbf16>
    %c0_11 = arith.constant 0 : index
    %c0_12 = arith.constant 0 : index
    %c0_13 = arith.constant 0 : index
    %c0_14 = arith.constant 0 : index
    %8 = vector.load %arg5[%c0_11, %c0_12, %c0_13, %c0_14] : memref<3x3x16x32xbf16, #tpu.memory_space<vmem>>, vector<1x1x16x32xbf16>
    %9 = vector.shape_cast %8 : vector<1x1x16x32xbf16> to vector<16x32xbf16>
    %cst_15 = arith.constant dense<0.000000e+00> : vector<8x32xf32>
    %10 = tpu.matmul %7, %9, %cst_15 {dimension_numbers = #tpu.dot_dimension_numbers<[1], [0], [0], [1], [0, 0, 1, 1], [], []>} : vector<8x16xbf16>, vector<16x32xbf16>, vector<8x32xf32> -> vector<8x32xf32>
    %11 = arith.addf %6, %10 : vector<8x32xf32>
    %12 = vector.extract_strided_slice %1 {offsets = [1, 0], sizes = [8, 16], strides = [1, 1]} : vector<10x16xbf16> to vector<8x16xbf16>
    %c0_16 = arith.constant 0 : index
    %c1 = arith.constant 1 : index
    %c0_17 = arith.constant 0 : index
    %c0_18 = arith.constant 0 : index
    %13 = vector.load %arg5[%c0_16, %c1, %c0_17, %c0_18] : memref<3x3x16x32xbf16, #tpu.memory_space<vmem>>, vector<1x1x16x32xbf16>
    %14 = vector.shape_cast %13 : vector<1x1x16x32xbf16> to vector<16x32xbf16>
    %cst_19 = arith.constant dense<0.000000e+00> : vector<8x32xf32>
    %15 = tpu.matmul %12, %14, %cst_19 {dimension_numbers = #tpu.dot_dimension_numbers<[1], [0], [0], [1], [0, 0, 1, 1], [], []>} : vector<8x16xbf16>, vector<16x32xbf16>, vector<8x32xf32> -> vector<8x32xf32>
    %16 = arith.addf %11, %15 : vector<8x32xf32>
    %17 = vector.extract_strided_slice %1 {offsets = [2, 0], sizes = [8, 16], strides = [1, 1]} : vector<10x16xbf16> to vector<8x16xbf16>
    %c0_20 = arith.constant 0 : index
    %c2 = arith.constant 2 : index
    %c0_21 = arith.constant 0 : index
    %c0_22 = arith.constant 0 : index
    %18 = vector.load %arg5[%c0_20, %c2, %c0_21, %c0_22] : memref<3x3x16x32xbf16, #tpu.memory_space<vmem>>, vector<1x1x16x32xbf16>
    %19 = vector.shape_cast %18 : vector<1x1x16x32xbf16> to vector<16x32xbf16>
    %cst_23 = arith.constant dense<0.000000e+00> : vector<8x32xf32>
    %20 = tpu.matmul %17, %19, %cst_23 {dimension_numbers = #tpu.dot_dimension_numbers<[1], [0], [0], [1], [0, 0, 1, 1], [], []>} : vector<8x16xbf16>, vector<16x32xbf16>, vector<8x32xf32> -> vector<8x32xf32>
    %21 = arith.addf %16, %20 : vector<8x32xf32>
    %22 = vector.extract_strided_slice %3 {offsets = [0, 0], sizes = [8, 16], strides = [1, 1]} : vector<10x16xbf16> to vector<8x16xbf16>
    %c1_24 = arith.constant 1 : index
    %c0_25 = arith.constant 0 : index
    %c0_26 = arith.constant 0 : index
    %c0_27 = arith.constant 0 : index
    %23 = vector.load %arg5[%c1_24, %c0_25, %c0_26, %c0_27] : memref<3x3x16x32xbf16, #tpu.memory_space<vmem>>, vector<1x1x16x32xbf16>
    %24 = vector.shape_cast %23 : vector<1x1x16x32xbf16> to vector<16x32xbf16>
    %cst_28 = arith.constant dense<0.000000e+00> : vector<8x32xf32>
    %25 = tpu.matmul %22, %24, %cst_28 {dimension_numbers = #tpu.dot_dimension_numbers<[1], [0], [0], [1], [0, 0, 1, 1], [], []>} : vector<8x16xbf16>, vector<16x32xbf16>, vector<8x32xf32> -> vector<8x32xf32>
    %26 = arith.addf %21, %25 : vector<8x32xf32>
    %27 = vector.extract_strided_slice %3 {offsets = [1, 0], sizes = [8, 16], strides = [1, 1]} : vector<10x16xbf16> to vector<8x16xbf16>
    %c1_29 = arith.constant 1 : index
    %c1_30 = arith.constant 1 : index
    %c0_31 = arith.constant 0 : index
    %c0_32 = arith.constant 0 : index
    %28 = vector.load %arg5[%c1_29, %c1_30, %c0_31, %c0_32] : memref<3x3x16x32xbf16, #tpu.memory_space<vmem>>, vector<1x1x16x32xbf16>
    %29 = vector.shape_cast %28 : vector<1x1x16x32xbf16> to vector<16x32xbf16>
    %cst_33 = arith.constant dense<0.000000e+00> : vector<8x32xf32>
    %30 = tpu.matmul %27, %29, %cst_33 {dimension_numbers = #tpu.dot_dimension_numbers<[1], [0], [0], [1], [0, 0, 1, 1], [], []>} : vector<8x16xbf16>, vector<16x32xbf16>, vector<8x32xf32> -> vector<8x32xf32>
    %31 = arith.addf %26, %30 : vector<8x32xf32>
    %32 = vector.extract_strided_slice %3 {offsets = [2, 0], sizes = [8, 16], strides = [1, 1]} : vector<10x16xbf16> to vector<8x16xbf16>
    %c1_34 = arith.constant 1 : index
    %c2_35 = arith.constant 2 : index
    %c0_36 = arith.constant 0 : index
    %c0_37 = arith.constant 0 : index
    %33 = vector.load %arg5[%c1_34, %c2_35, %c0_36, %c0_37] : memref<3x3x16x32xbf16, #tpu.memory_space<vmem>>, vector<1x1x16x32xbf16>
    %34 = vector.shape_cast %33 : vector<1x1x16x32xbf16> to vector<16x32xbf16>
    %cst_38 = arith.constant dense<0.000000e+00> : vector<8x32xf32>
    %35 = tpu.matmul %32, %34, %cst_38 {dimension_numbers = #tpu.dot_dimension_numbers<[1], [0], [0], [1], [0, 0, 1, 1], [], []>} : vector<8x16xbf16>, vector<16x32xbf16>, vector<8x32xf32> -> vector<8x32xf32>
    %36 = arith.addf %31, %35 : vector<8x32xf32>
    %37 = vector.extract_strided_slice %5 {offsets = [0, 0], sizes = [8, 16], strides = [1, 1]} : vector<10x16xbf16> to vector<8x16xbf16>
    %c2_39 = arith.constant 2 : index
    %c0_40 = arith.constant 0 : index
    %c0_41 = arith.constant 0 : index
    %c0_42 = arith.constant 0 : index
    %38 = vector.load %arg5[%c2_39, %c0_40, %c0_41, %c0_42] : memref<3x3x16x32xbf16, #tpu.memory_space<vmem>>, vector<1x1x16x32xbf16>
    %39 = vector.shape_cast %38 : vector<1x1x16x32xbf16> to vector<16x32xbf16>
    %cst_43 = arith.constant dense<0.000000e+00> : vector<8x32xf32>
    %40 = tpu.matmul %37, %39, %cst_43 {dimension_numbers = #tpu.dot_dimension_numbers<[1], [0], [0], [1], [0, 0, 1, 1], [], []>} : vector<8x16xbf16>, vector<16x32xbf16>, vector<8x32xf32> -> vector<8x32xf32>
    %41 = arith.addf %36, %40 : vector<8x32xf32>
    %42 = vector.extract_strided_slice %5 {offsets = [1, 0], sizes = [8, 16], strides = [1, 1]} : vector<10x16xbf16> to vector<8x16xbf16>
    %c2_44 = arith.constant 2 : index
    %c1_45 = arith.constant 1 : index
    %c0_46 = arith.constant 0 : index
    %c0_47 = arith.constant 0 : index
    %43 = vector.load %arg5[%c2_44, %c1_45, %c0_46, %c0_47] : memref<3x3x16x32xbf16, #tpu.memory_space<vmem>>, vector<1x1x16x32xbf16>
    %44 = vector.shape_cast %43 : vector<1x1x16x32xbf16> to vector<16x32xbf16>
    %cst_48 = arith.constant dense<0.000000e+00> : vector<8x32xf32>
    %45 = tpu.matmul %42, %44, %cst_48 {dimension_numbers = #tpu.dot_dimension_numbers<[1], [0], [0], [1], [0, 0, 1, 1], [], []>} : vector<8x16xbf16>, vector<16x32xbf16>, vector<8x32xf32> -> vector<8x32xf32>
    %46 = arith.addf %41, %45 : vector<8x32xf32>
    %47 = vector.extract_strided_slice %5 {offsets = [2, 0], sizes = [8, 16], strides = [1, 1]} : vector<10x16xbf16> to vector<8x16xbf16>
    %c2_49 = arith.constant 2 : index
    %c2_50 = arith.constant 2 : index
    %c0_51 = arith.constant 0 : index
    %c0_52 = arith.constant 0 : index
    %48 = vector.load %arg5[%c2_49, %c2_50, %c0_51, %c0_52] : memref<3x3x16x32xbf16, #tpu.memory_space<vmem>>, vector<1x1x16x32xbf16>
    %49 = vector.shape_cast %48 : vector<1x1x16x32xbf16> to vector<16x32xbf16>
    %cst_53 = arith.constant dense<0.000000e+00> : vector<8x32xf32>
    %50 = tpu.matmul %47, %49, %cst_53 {dimension_numbers = #tpu.dot_dimension_numbers<[1], [0], [0], [1], [0, 0, 1, 1], [], []>} : vector<8x16xbf16>, vector<16x32xbf16>, vector<8x32xf32> -> vector<8x32xf32>
    %51 = arith.addf %46, %50 : vector<8x32xf32>
    %c0_54 = arith.constant 0 : index
    %c0_55 = arith.constant 0 : index
    %52 = vector.load %arg6[%c0_54, %c0_55] : memref<1x32xf32, #tpu.memory_space<vmem>>, vector<1x32xf32>
    %53 = vector.broadcast %52 : vector<1x32xf32> to vector<8x32xf32>
    %54 = arith.addf %51, %53 : vector<8x32xf32>
    %55 = arith.truncf %54 : vector<8x32xf32> to vector<8x32xbf16>
    %c0_56 = arith.constant 0 : index
    %c0_57 = arith.constant 0 : index
    %c0_58 = arith.constant 0 : index
    %c0_59 = arith.constant 0 : index
    %56 = vector.load %arg7[%c0_56, %c0_57, %c0_58, %c0_59] : memref<1x1x8x32xbf16, #tpu.memory_space<vmem>>, vector<1x1x8x32xbf16>
    %57 = vector.shape_cast %56 : vector<1x1x8x32xbf16> to vector<8x32xbf16>
    %58 = vector.shape_cast %55 : vector<8x32xbf16> to vector<1x1x8x32xbf16>
    tpu.vector_store %arg7[%c0_56, %c0_57, %c0_58, %c0_59], %58 {strides = array<i32>} : memref<1x1x8x32xbf16, #tpu.memory_space<vmem>>, vector<1x1x8x32xbf16>,
    %c0_i32 = arith.constant 0 : i32
    %59 = arith.cmpi eq, %arg0, %c0_i32 : i32
    %c0_i32_60 = arith.constant 0 : i32
    %60 = arith.cmpi eq, %arg1, %c0_i32_60 : i32
    %61 = arith.andi %59, %60 : i1
    %62 = arith.extui %61 : i1 to i32
    %c0_i32_61 = arith.constant 0 : i32
    %63 = arith.cmpi ne, %62, %c0_i32_61 : i32
    scf.if %63 {
      %cst_72 = arith.constant 0.000000e+00 : f32
      %75 = vector.broadcast %cst_72 : f32 to vector<1x32xf32>
      %c0_73 = arith.constant 0 : index
      %c0_74 = arith.constant 0 : index
      %76 = vector.load %arg8[%c0_73, %c0_74] : memref<1x32xf32, #tpu.memory_space<vmem>>, vector<1x32xf32>
      tpu.vector_store %arg8[%c0_73, %c0_74], %75 {strides = array<i32>} : memref<1x32xf32, #tpu.memory_space<vmem>>, vector<1x32xf32>,
      %cst_75 = arith.constant 0.000000e+00 : f32
      %77 = vector.broadcast %cst_75 : f32 to vector<1x32xf32>
      %c0_76 = arith.constant 0 : index
      %c0_77 = arith.constant 0 : index
      %78 = vector.load %arg9[%c0_76, %c0_77] : memref<1x32xf32, #tpu.memory_space<vmem>>, vector<1x32xf32>
      tpu.vector_store %arg9[%c0_76, %c0_77], %77 {strides = array<i32>} : memref<1x32xf32, #tpu.memory_space<vmem>>, vector<1x32xf32>,
    } else {
    }
    %c0_62 = arith.constant 0 : index
    %c0_63 = arith.constant 0 : index
    %64 = vector.load %arg8[%c0_62, %c0_63] : memref<1x32xf32, #tpu.memory_space<vmem>>, vector<1x32xf32>
    %cst_64 = arith.constant dense<0.000000e+00> : vector<32xf32>
    %65 = vector.multi_reduction <add>, %54, %cst_64 [0] : vector<8x32xf32> to vector<32xf32>
    %66 = vector.shape_cast %65 : vector<32xf32> to vector<1x32xf32>
    %67 = arith.addf %64, %66 : vector<1x32xf32>
    %c0_65 = arith.constant 0 : index
    %c0_66 = arith.constant 0 : index
    %68 = vector.load %arg8[%c0_65, %c0_66] : memref<1x32xf32, #tpu.memory_space<vmem>>, vector<1x32xf32>
    tpu.vector_store %arg8[%c0_65, %c0_66], %67 {strides = array<i32>} : memref<1x32xf32, #tpu.memory_space<vmem>>, vector<1x32xf32>,
    %c0_67 = arith.constant 0 : index
    %c0_68 = arith.constant 0 : index
    %69 = vector.load %arg9[%c0_67, %c0_68] : memref<1x32xf32, #tpu.memory_space<vmem>>, vector<1x32xf32>
    %70 = arith.mulf %54, %54 : vector<8x32xf32>
    %cst_69 = arith.constant dense<0.000000e+00> : vector<32xf32>
    %71 = vector.multi_reduction <add>, %70, %cst_69 [0] : vector<8x32xf32> to vector<32xf32>
    %72 = vector.shape_cast %71 : vector<32xf32> to vector<1x32xf32>
    %73 = arith.addf %69, %72 : vector<1x32xf32>
    %c0_70 = arith.constant 0 : index
    %c0_71 = arith.constant 0 : index
    %74 = vector.load %arg9[%c0_70, %c0_71] : memref<1x32xf32, #tpu.memory_space<vmem>>, vector<1x32xf32>
    tpu.vector_store %arg9[%c0_70, %c0_71], %73 {strides = array<i32>} : memref<1x32xf32, #tpu.memory_space<vmem>>, vector<1x32xf32>,
    return
  }
  func.func @transform_0(%arg0: i32, %arg1: i32) -> (i32, i32, i32, i32) {
    %c0_i32 = arith.constant 0 : i32
    %0 = arith.addi %arg1, %c0_i32 : i32
    %c0_i32_0 = arith.constant 0 : i32
    %c0_i32_1 = arith.constant 0 : i32
    %c0_i32_2 = arith.constant 0 : i32
    return %arg0, %0, %c0_i32_0, %c0_i32_1 : i32, i32, i32, i32
  }
  func.func @transform_1(%arg0: i32, %arg1: i32) -> (i32, i32, i32, i32) {
    %c1_i32 = arith.constant 1 : i32
    %0 = arith.addi %arg1, %c1_i32 : i32
    %c0_i32 = arith.constant 0 : i32
    %c0_i32_0 = arith.constant 0 : i32
    %c0_i32_1 = arith.constant 0 : i32
    return %arg0, %0, %c0_i32, %c0_i32_0 : i32, i32, i32, i32
  }
  func.func @transform_2(%arg0: i32, %arg1: i32) -> (i32, i32, i32, i32) {
    %c2_i32 = arith.constant 2 : i32
    %0 = arith.addi %arg1, %c2_i32 : i32
    %c0_i32 = arith.constant 0 : i32
    %c0_i32_0 = arith.constant 0 : i32
    %c0_i32_1 = arith.constant 0 : i32
    return %arg0, %0, %c0_i32, %c0_i32_0 : i32, i32, i32, i32
  }
  func.func @transform_3(%arg0: i32, %arg1: i32) -> (i32, i32, i32, i32) {
    %c0_i32 = arith.constant 0 : i32
    %c0_i32_0 = arith.constant 0 : i32
    %c0_i32_1 = arith.constant 0 : i32
    %c0_i32_2 = arith.constant 0 : i32
    %c0_i32_3 = arith.constant 0 : i32
    return %c0_i32, %c0_i32_0, %c0_i32_1, %c0_i32_2 : i32, i32, i32, i32
  }
  func.func @transform_4(%arg0: i32, %arg1: i32) -> (i32, i32) {
    %c0_i32 = arith.constant 0 : i32
    %c0_i32_0 = arith.constant 0 : i32
    %c0_i32_1 = arith.constant 0 : i32
    return %c0_i32, %c0_i32_0 : i32, i32
  }
  func.func @transform_5(%arg0: i32, %arg1: i32) -> (i32, i32, i32, i32) {
    %c0_i32 = arith.constant 0 : i32
    %c0_i32_0 = arith.constant 0 : i32
    %c0_i32_1 = arith.constant 0 : i32
    return %arg0, %arg1, %c0_i32, %c0_i32_0 : i32, i32, i32, i32
  }
  func.func @transform_6(%arg0: i32, %arg1: i32) -> (i32, i32) {
    %c0_i32 = arith.constant 0 : i32
    %c0_i32_0 = arith.constant 0 : i32
    %c0_i32_1 = arith.constant 0 : i32
    return %c0_i32, %c0_i32_0 : i32, i32
  }
  func.func @transform_7(%arg0: i32, %arg1: i32) -> (i32, i32) {
    %c0_i32 = arith.constant 0 : i32
    %c0_i32_0 = arith.constant 0 : i32
    %c0_i32_1 = arith.constant 0 : i32
    return %c0_i32, %c0_i32_0 : i32, i32
  }
}

module attributes {stable_mosaic.version = 11 : i64} {
  func.func @_bn_act_kernel(%arg0: i32, %arg1: memref<128x32xbf16, #tpu.memory_space<vmem>>, %arg2: memref<1x32xf32, #tpu.memory_space<vmem>>, %arg3: memref<1x32xf32, #tpu.memory_space<vmem>>, %arg4: memref<1x32xf32, #tpu.memory_space<vmem>>, %arg5: memref<1x32xf32, #tpu.memory_space<vmem>>, %arg6: memref<128x32xbf16, #tpu.memory_space<vmem>>) attributes {dimension_semantics = [#tpu.dimension_semantics<parallel>], iteration_bounds = array<i64: 1>, scalar_prefetch = 0 : i64, scratch_operands = 0 : i64, tpu.core_type = #tpu.core_type<tc>, window_params = [{transform_indices = @transform_0, window_bounds = array<i64: 128, 32>}, {pipeline_mode = #tpu.pipeline_mode<synchronous>, transform_indices = @transform_1, window_bounds = array<i64: 1, 32>}, {pipeline_mode = #tpu.pipeline_mode<synchronous>, transform_indices = @transform_2, window_bounds = array<i64: 1, 32>}, {pipeline_mode = #tpu.pipeline_mode<synchronous>, transform_indices = @transform_3, window_bounds = array<i64: 1, 32>}, {pipeline_mode = #tpu.pipeline_mode<synchronous>, transform_indices = @transform_4, window_bounds = array<i64: 1, 32>}, {transform_indices = @transform_5, window_bounds = array<i64: 128, 32>}]} {
    %c0 = arith.constant 0 : index
    %c0_0 = arith.constant 0 : index
    %0 = vector.load %arg1[%c0, %c0_0] : memref<128x32xbf16, #tpu.memory_space<vmem>>, vector<128x32xbf16>
    %1 = arith.extf %0 : vector<128x32xbf16> to vector<128x32xf32>
    %c0_1 = arith.constant 0 : index
    %c0_2 = arith.constant 0 : index
    %2 = vector.load %arg2[%c0_1, %c0_2] : memref<1x32xf32, #tpu.memory_space<vmem>>, vector<1x32xf32>
    %3 = vector.broadcast %2 : vector<1x32xf32> to vector<128x32xf32>
    %4 = arith.subf %1, %3 : vector<128x32xf32>
    %c0_3 = arith.constant 0 : index
    %c0_4 = arith.constant 0 : index
    %5 = vector.load %arg3[%c0_3, %c0_4] : memref<1x32xf32, #tpu.memory_space<vmem>>, vector<1x32xf32>
    %6 = vector.broadcast %5 : vector<1x32xf32> to vector<128x32xf32>
    %7 = arith.mulf %4, %6 : vector<128x32xf32>
    %c0_5 = arith.constant 0 : index
    %c0_6 = arith.constant 0 : index
    %8 = vector.load %arg4[%c0_5, %c0_6] : memref<1x32xf32, #tpu.memory_space<vmem>>, vector<1x32xf32>
    %9 = vector.broadcast %8 : vector<1x32xf32> to vector<128x32xf32>
    %10 = arith.mulf %7, %9 : vector<128x32xf32>
    %c0_7 = arith.constant 0 : index
    %c0_8 = arith.constant 0 : index
    %11 = vector.load %arg5[%c0_7, %c0_8] : memref<1x32xf32, #tpu.memory_space<vmem>>, vector<1x32xf32>
    %12 = vector.broadcast %11 : vector<1x32xf32> to vector<128x32xf32>
    %13 = arith.addf %10, %12 : vector<128x32xf32>
    %cst = arith.constant 0.000000e+00 : f32
    %14 = vector.broadcast %cst : f32 to vector<128x32xf32>
    %15 = arith.maximumf %13, %14 : vector<128x32xf32>
    %16 = arith.truncf %15 : vector<128x32xf32> to vector<128x32xbf16>
    %c0_9 = arith.constant 0 : index
    %c0_10 = arith.constant 0 : index
    %17 = vector.load %arg6[%c0_9, %c0_10] : memref<128x32xbf16, #tpu.memory_space<vmem>>, vector<128x32xbf16>
    tpu.vector_store %arg6[%c0_9, %c0_10], %16 {strides = array<i32>} : memref<128x32xbf16, #tpu.memory_space<vmem>>, vector<128x32xbf16>,
    return
  }
  func.func @transform_0(%arg0: i32) -> (i32, i32) {
    %c0_i32 = arith.constant 0 : i32
    %c0_i32_0 = arith.constant 0 : i32
    return %arg0, %c0_i32 : i32, i32
  }
  func.func @transform_1(%arg0: i32) -> (i32, i32) {
    %c0_i32 = arith.constant 0 : i32
    %c0_i32_0 = arith.constant 0 : i32
    %c0_i32_1 = arith.constant 0 : i32
    return %c0_i32, %c0_i32_0 : i32, i32
  }
  func.func @transform_2(%arg0: i32) -> (i32, i32) {
    %c0_i32 = arith.constant 0 : i32
    %c0_i32_0 = arith.constant 0 : i32
    %c0_i32_1 = arith.constant 0 : i32
    return %c0_i32, %c0_i32_0 : i32, i32
  }
  func.func @transform_3(%arg0: i32) -> (i32, i32) {
    %c0_i32 = arith.constant 0 : i32
    %c0_i32_0 = arith.constant 0 : i32
    %c0_i32_1 = arith.constant 0 : i32
    return %c0_i32, %c0_i32_0 : i32, i32
  }
  func.func @transform_4(%arg0: i32) -> (i32, i32) {
    %c0_i32 = arith.constant 0 : i32
    %c0_i32_0 = arith.constant 0 : i32
    %c0_i32_1 = arith.constant 0 : i32
    return %c0_i32, %c0_i32_0 : i32, i32
  }
  func.func @transform_5(%arg0: i32) -> (i32, i32) {
    %c0_i32 = arith.constant 0 : i32
    %c0_i32_0 = arith.constant 0 : i32
    return %arg0, %c0_i32 : i32, i32
  }
}

module attributes {stable_mosaic.version = 11 : i64} {
  func.func @_bn_act_pool_kernel(%arg0: i32, %arg1: i32, %arg2: memref<1x2x4x2x32xbf16, #tpu.memory_space<vmem>>, %arg3: memref<1x32xf32, #tpu.memory_space<vmem>>, %arg4: memref<1x32xf32, #tpu.memory_space<vmem>>, %arg5: memref<1x32xf32, #tpu.memory_space<vmem>>, %arg6: memref<1x32xf32, #tpu.memory_space<vmem>>, %arg7: memref<1x2x4x2x32xbf16, #tpu.memory_space<vmem>>, %arg8: memref<1x1x4x32xbf16, #tpu.memory_space<vmem>>) attributes {dimension_semantics = [#tpu.dimension_semantics<parallel>, #tpu.dimension_semantics<parallel>], iteration_bounds = array<i64: 2, 4>, scalar_prefetch = 0 : i64, scratch_operands = 0 : i64, tpu.core_type = #tpu.core_type<tc>, window_params = [{transform_indices = @transform_0, window_bounds = array<i64: 1, 2, 4, 2, 32>}, {pipeline_mode = #tpu.pipeline_mode<synchronous>, transform_indices = @transform_1, window_bounds = array<i64: 1, 32>}, {pipeline_mode = #tpu.pipeline_mode<synchronous>, transform_indices = @transform_2, window_bounds = array<i64: 1, 32>}, {pipeline_mode = #tpu.pipeline_mode<synchronous>, transform_indices = @transform_3, window_bounds = array<i64: 1, 32>}, {pipeline_mode = #tpu.pipeline_mode<synchronous>, transform_indices = @transform_4, window_bounds = array<i64: 1, 32>}, {transform_indices = @transform_5, window_bounds = array<i64: 1, 2, 4, 2, 32>}, {transform_indices = @transform_6, window_bounds = array<i64: 1, 1, 4, 32>}]} {
    %c0 = arith.constant 0 : index
    %c0_0 = arith.constant 0 : index
    %c0_1 = arith.constant 0 : index
    %c0_2 = arith.constant 0 : index
    %c0_3 = arith.constant 0 : index
    %0 = vector.load %arg2[%c0, %c0_0, %c0_1, %c0_2, %c0_3] : memref<1x2x4x2x32xbf16, #tpu.memory_space<vmem>>, vector<1x2x4x2x32xbf16>
    %1 = vector.shape_cast %0 : vector<1x2x4x2x32xbf16> to vector<2x4x2x32xbf16>
    %2 = arith.extf %1 : vector<2x4x2x32xbf16> to vector<2x4x2x32xf32>
    %c0_4 = arith.constant 0 : index
    %c0_5 = arith.constant 0 : index
    %3 = vector.load %arg3[%c0_4, %c0_5] : memref<1x32xf32, #tpu.memory_space<vmem>>, vector<1x32xf32>
    %4 = vector.shape_cast %3 : vector<1x32xf32> to vector<1x1x1x32xf32>
    %5 = vector.broadcast %4 : vector<1x1x1x32xf32> to vector<2x4x2x32xf32>
    %6 = arith.subf %2, %5 : vector<2x4x2x32xf32>
    %c0_6 = arith.constant 0 : index
    %c0_7 = arith.constant 0 : index
    %7 = vector.load %arg4[%c0_6, %c0_7] : memref<1x32xf32, #tpu.memory_space<vmem>>, vector<1x32xf32>
    %8 = vector.shape_cast %7 : vector<1x32xf32> to vector<1x1x1x32xf32>
    %9 = vector.broadcast %8 : vector<1x1x1x32xf32> to vector<2x4x2x32xf32>
    %10 = arith.mulf %6, %9 : vector<2x4x2x32xf32>
    %c0_8 = arith.constant 0 : index
    %c0_9 = arith.constant 0 : index
    %11 = vector.load %arg5[%c0_8, %c0_9] : memref<1x32xf32, #tpu.memory_space<vmem>>, vector<1x32xf32>
    %12 = vector.shape_cast %11 : vector<1x32xf32> to vector<1x1x1x32xf32>
    %13 = vector.broadcast %12 : vector<1x1x1x32xf32> to vector<2x4x2x32xf32>
    %14 = arith.mulf %10, %13 : vector<2x4x2x32xf32>
    %c0_10 = arith.constant 0 : index
    %c0_11 = arith.constant 0 : index
    %15 = vector.load %arg6[%c0_10, %c0_11] : memref<1x32xf32, #tpu.memory_space<vmem>>, vector<1x32xf32>
    %16 = vector.shape_cast %15 : vector<1x32xf32> to vector<1x1x1x32xf32>
    %17 = vector.broadcast %16 : vector<1x1x1x32xf32> to vector<2x4x2x32xf32>
    %18 = arith.addf %14, %17 : vector<2x4x2x32xf32>
    %cst = arith.constant 0.000000e+00 : f32
    %19 = vector.broadcast %cst : f32 to vector<2x4x2x32xf32>
    %20 = arith.maximumf %18, %19 : vector<2x4x2x32xf32>
    %21 = arith.truncf %20 : vector<2x4x2x32xf32> to vector<2x4x2x32xbf16>
    %c0_12 = arith.constant 0 : index
    %c0_13 = arith.constant 0 : index
    %c0_14 = arith.constant 0 : index
    %c0_15 = arith.constant 0 : index
    %c0_16 = arith.constant 0 : index
    %22 = vector.load %arg7[%c0_12, %c0_13, %c0_14, %c0_15, %c0_16] : memref<1x2x4x2x32xbf16, #tpu.memory_space<vmem>>, vector<1x2x4x2x32xbf16>
    %23 = vector.shape_cast %22 : vector<1x2x4x2x32xbf16> to vector<2x4x2x32xbf16>
    %24 = vector.shape_cast %21 : vector<2x4x2x32xbf16> to vector<1x2x4x2x32xbf16>
    tpu.vector_store %arg7[%c0_12, %c0_13, %c0_14, %c0_15, %c0_16], %24 {strides = array<i32>} : memref<1x2x4x2x32xbf16, #tpu.memory_space<vmem>>, vector<1x2x4x2x32xbf16>,
    %25 = vector.extract_strided_slice %20 {offsets = [0, 0, 0, 0], sizes = [1, 4, 2, 32], strides = [1, 1, 1, 1]} : vector<2x4x2x32xf32> to vector<1x4x2x32xf32>
    %26 = vector.shape_cast %25 : vector<1x4x2x32xf32> to vector<4x2x32xf32>
    %27 = vector.extract_strided_slice %20 {offsets = [1, 0, 0, 0], sizes = [1, 4, 2, 32], strides = [1, 1, 1, 1]} : vector<2x4x2x32xf32> to vector<1x4x2x32xf32>
    %28 = vector.shape_cast %27 : vector<1x4x2x32xf32> to vector<4x2x32xf32>
    %29 = arith.maximumf %26, %28 : vector<4x2x32xf32>
    %cst_17 = arith.constant dense<0xFF800000> : vector<4x32xf32>
    %30 = vector.multi_reduction <maximumf>, %29, %cst_17 [1] : vector<4x2x32xf32> to vector<4x32xf32>
    %31 = arith.truncf %30 : vector<4x32xf32> to vector<4x32xbf16>
    %c0_18 = arith.constant 0 : index
    %c0_19 = arith.constant 0 : index
    %c0_20 = arith.constant 0 : index
    %c0_21 = arith.constant 0 : index
    %32 = vector.load %arg8[%c0_18, %c0_19, %c0_20, %c0_21] : memref<1x1x4x32xbf16, #tpu.memory_space<vmem>>, vector<1x1x4x32xbf16>
    %33 = vector.shape_cast %32 : vector<1x1x4x32xbf16> to vector<4x32xbf16>
    %34 = vector.shape_cast %31 : vector<4x32xbf16> to vector<1x1x4x32xbf16>
    tpu.vector_store %arg8[%c0_18, %c0_19, %c0_20, %c0_21], %34 {strides = array<i32>} : memref<1x1x4x32xbf16, #tpu.memory_space<vmem>>, vector<1x1x4x32xbf16>,
    return
  }
  func.func @transform_0(%arg0: i32, %arg1: i32) -> (i32, i32, i32, i32, i32) {
    %c0_i32 = arith.constant 0 : i32
    %c0_i32_0 = arith.constant 0 : i32
    %c0_i32_1 = arith.constant 0 : i32
    %c0_i32_2 = arith.constant 0 : i32
    return %arg0, %arg1, %c0_i32, %c0_i32_0, %c0_i32_1 : i32, i32, i32, i32, i32
  }
  func.func @transform_1(%arg0: i32, %arg1: i32) -> (i32, i32) {
    %c0_i32 = arith.constant 0 : i32
    %c0_i32_0 = arith.constant 0 : i32
    %c0_i32_1 = arith.constant 0 : i32
    return %c0_i32, %c0_i32_0 : i32, i32
  }
  func.func @transform_2(%arg0: i32, %arg1: i32) -> (i32, i32) {
    %c0_i32 = arith.constant 0 : i32
    %c0_i32_0 = arith.constant 0 : i32
    %c0_i32_1 = arith.constant 0 : i32
    return %c0_i32, %c0_i32_0 : i32, i32
  }
  func.func @transform_3(%arg0: i32, %arg1: i32) -> (i32, i32) {
    %c0_i32 = arith.constant 0 : i32
    %c0_i32_0 = arith.constant 0 : i32
    %c0_i32_1 = arith.constant 0 : i32
    return %c0_i32, %c0_i32_0 : i32, i32
  }
  func.func @transform_4(%arg0: i32, %arg1: i32) -> (i32, i32) {
    %c0_i32 = arith.constant 0 : i32
    %c0_i32_0 = arith.constant 0 : i32
    %c0_i32_1 = arith.constant 0 : i32
    return %c0_i32, %c0_i32_0 : i32, i32
  }
  func.func @transform_5(%arg0: i32, %arg1: i32) -> (i32, i32, i32, i32, i32) {
    %c0_i32 = arith.constant 0 : i32
    %c0_i32_0 = arith.constant 0 : i32
    %c0_i32_1 = arith.constant 0 : i32
    %c0_i32_2 = arith.constant 0 : i32
    return %arg0, %arg1, %c0_i32, %c0_i32_0, %c0_i32_1 : i32, i32, i32, i32, i32
  }
  func.func @transform_6(%arg0: i32, %arg1: i32) -> (i32, i32, i32, i32) {
    %c0_i32 = arith.constant 0 : i32
    %c0_i32_0 = arith.constant 0 : i32
    %c0_i32_1 = arith.constant 0 : i32
    return %arg0, %arg1, %c0_i32, %c0_i32_0 : i32, i32, i32, i32
  }
}

module attributes {stable_mosaic.version = 11 : i64} {
  func.func @_conv3x3_kernel(%arg0: i32, %arg1: i32, %arg2: memref<1x1x10x32xbf16, #tpu.memory_space<vmem>>, %arg3: memref<1x1x10x32xbf16, #tpu.memory_space<vmem>>, %arg4: memref<1x1x10x32xbf16, #tpu.memory_space<vmem>>, %arg5: memref<3x3x32x32xbf16, #tpu.memory_space<vmem>>, %arg6: memref<1x32xf32, #tpu.memory_space<vmem>>, %arg7: memref<1x1x8x32xbf16, #tpu.memory_space<vmem>>, %arg8: memref<1x32xf32, #tpu.memory_space<vmem>>, %arg9: memref<1x32xf32, #tpu.memory_space<vmem>>) attributes {dimension_semantics = [#tpu.dimension_semantics<arbitrary>, #tpu.dimension_semantics<arbitrary>], iteration_bounds = array<i64: 2, 8>, scalar_prefetch = 0 : i64, scratch_operands = 0 : i64, tpu.core_type = #tpu.core_type<tc>, window_params = [{transform_indices = @transform_0, window_bounds = array<i64: 1, 1, 10, 32>}, {transform_indices = @transform_1, window_bounds = array<i64: 1, 1, 10, 32>}, {transform_indices = @transform_2, window_bounds = array<i64: 1, 1, 10, 32>}, {pipeline_mode = #tpu.pipeline_mode<synchronous>, transform_indices = @transform_3, window_bounds = array<i64: 3, 3, 32, 32>}, {pipeline_mode = #tpu.pipeline_mode<synchronous>, transform_indices = @transform_4, window_bounds = array<i64: 1, 32>}, {transform_indices = @transform_5, window_bounds = array<i64: 1, 1, 8, 32>}, {pipeline_mode = #tpu.pipeline_mode<synchronous>, transform_indices = @transform_6, window_bounds = array<i64: 1, 32>}, {pipeline_mode = #tpu.pipeline_mode<synchronous>, transform_indices = @transform_7, window_bounds = array<i64: 1, 32>}]} {
    %c0 = arith.constant 0 : index
    %c0_0 = arith.constant 0 : index
    %c0_1 = arith.constant 0 : index
    %c0_2 = arith.constant 0 : index
    %0 = vector.load %arg2[%c0, %c0_0, %c0_1, %c0_2] : memref<1x1x10x32xbf16, #tpu.memory_space<vmem>>, vector<1x1x10x32xbf16>
    %1 = vector.shape_cast %0 : vector<1x1x10x32xbf16> to vector<10x32xbf16>
    %c0_3 = arith.constant 0 : index
    %c0_4 = arith.constant 0 : index
    %c0_5 = arith.constant 0 : index
    %c0_6 = arith.constant 0 : index
    %2 = vector.load %arg3[%c0_3, %c0_4, %c0_5, %c0_6] : memref<1x1x10x32xbf16, #tpu.memory_space<vmem>>, vector<1x1x10x32xbf16>
    %3 = vector.shape_cast %2 : vector<1x1x10x32xbf16> to vector<10x32xbf16>
    %c0_7 = arith.constant 0 : index
    %c0_8 = arith.constant 0 : index
    %c0_9 = arith.constant 0 : index
    %c0_10 = arith.constant 0 : index
    %4 = vector.load %arg4[%c0_7, %c0_8, %c0_9, %c0_10] : memref<1x1x10x32xbf16, #tpu.memory_space<vmem>>, vector<1x1x10x32xbf16>
    %5 = vector.shape_cast %4 : vector<1x1x10x32xbf16> to vector<10x32xbf16>
    %cst = arith.constant 0.000000e+00 : f32
    %6 = vector.broadcast %cst : f32 to vector<8x32xf32>
    %7 = vector.extract_strided_slice %1 {offsets = [0, 0], sizes = [8, 32], strides = [1, 1]} : vector<10x32xbf16> to vector<8x32xbf16>
    %c0_11 = arith.constant 0 : index
    %c0_12 = arith.constant 0 : index
    %c0_13 = arith.constant 0 : index
    %c0_14 = arith.constant 0 : index
    %8 = vector.load %arg5[%c0_11, %c0_12, %c0_13, %c0_14] : memref<3x3x32x32xbf16, #tpu.memory_space<vmem>>, vector<1x1x32x32xbf16>
    %9 = vector.shape_cast %8 : vector<1x1x32x32xbf16> to vector<32x32xbf16>
    %cst_15 = arith.constant dense<0.000000e+00> : vector<8x32xf32>
    %10 = tpu.matmul %7, %9, %cst_15 {dimension_numbers = #tpu.dot_dimension_numbers<[1], [0], [0], [1], [0, 0, 1, 1], [], []>} : vector<8x32xbf16>, vector<32x32xbf16>, vector<8x32xf32> -> vector<8x32xf32>
    %11 = arith.addf %6, %10 : vector<8x32xf32>
    %12 = vector.extract_strided_slice %1 {offsets = [1, 0], sizes = [8, 32], strides = [1, 1]} : vector<10x32xbf16> to vector<8x32xbf16>
    %c0_16 = arith.constant 0 : index
    %c1 = arith.constant 1 : index
    %c0_17 = arith.constant 0 : index
    %c0_18 = arith.constant 0 : index
    %13 = vector.load %arg5[%c0_16, %c1, %c0_17, %c0_18] : memref<3x3x32x32xbf16, #tpu.memory_space<vmem>>, vector<1x1x32x32xbf16>
    %14 = vector.shape_cast %13 : vector<1x1x32x32xbf16> to vector<32x32xbf16>
    %cst_19 = arith.constant dense<0.000000e+00> : vector<8x32xf32>
    %15 = tpu.matmul %12, %14, %cst_19 {dimension_numbers = #tpu.dot_dimension_numbers<[1], [0], [0], [1], [0, 0, 1, 1], [], []>} : vector<8x32xbf16>, vector<32x32xbf16>, vector<8x32xf32> -> vector<8x32xf32>
    %16 = arith.addf %11, %15 : vector<8x32xf32>
    %17 = vector.extract_strided_slice %1 {offsets = [2, 0], sizes = [8, 32], strides = [1, 1]} : vector<10x32xbf16> to vector<8x32xbf16>
    %c0_20 = arith.constant 0 : index
    %c2 = arith.constant 2 : index
    %c0_21 = arith.constant 0 : index
    %c0_22 = arith.constant 0 : index
    %18 = vector.load %arg5[%c0_20, %c2, %c0_21, %c0_22] : memref<3x3x32x32xbf16, #tpu.memory_space<vmem>>, vector<1x1x32x32xbf16>
    %19 = vector.shape_cast %18 : vector<1x1x32x32xbf16> to vector<32x32xbf16>
    %cst_23 = arith.constant dense<0.000000e+00> : vector<8x32xf32>
    %20 = tpu.matmul %17, %19, %cst_23 {dimension_numbers = #tpu.dot_dimension_numbers<[1], [0], [0], [1], [0, 0, 1, 1], [], []>} : vector<8x32xbf16>, vector<32x32xbf16>, vector<8x32xf32> -> vector<8x32xf32>
    %21 = arith.addf %16, %20 : vector<8x32xf32>
    %22 = vector.extract_strided_slice %3 {offsets = [0, 0], sizes = [8, 32], strides = [1, 1]} : vector<10x32xbf16> to vector<8x32xbf16>
    %c1_24 = arith.constant 1 : index
    %c0_25 = arith.constant 0 : index
    %c0_26 = arith.constant 0 : index
    %c0_27 = arith.constant 0 : index
    %23 = vector.load %arg5[%c1_24, %c0_25, %c0_26, %c0_27] : memref<3x3x32x32xbf16, #tpu.memory_space<vmem>>, vector<1x1x32x32xbf16>
    %24 = vector.shape_cast %23 : vector<1x1x32x32xbf16> to vector<32x32xbf16>
    %cst_28 = arith.constant dense<0.000000e+00> : vector<8x32xf32>
    %25 = tpu.matmul %22, %24, %cst_28 {dimension_numbers = #tpu.dot_dimension_numbers<[1], [0], [0], [1], [0, 0, 1, 1], [], []>} : vector<8x32xbf16>, vector<32x32xbf16>, vector<8x32xf32> -> vector<8x32xf32>
    %26 = arith.addf %21, %25 : vector<8x32xf32>
    %27 = vector.extract_strided_slice %3 {offsets = [1, 0], sizes = [8, 32], strides = [1, 1]} : vector<10x32xbf16> to vector<8x32xbf16>
    %c1_29 = arith.constant 1 : index
    %c1_30 = arith.constant 1 : index
    %c0_31 = arith.constant 0 : index
    %c0_32 = arith.constant 0 : index
    %28 = vector.load %arg5[%c1_29, %c1_30, %c0_31, %c0_32] : memref<3x3x32x32xbf16, #tpu.memory_space<vmem>>, vector<1x1x32x32xbf16>
    %29 = vector.shape_cast %28 : vector<1x1x32x32xbf16> to vector<32x32xbf16>
    %cst_33 = arith.constant dense<0.000000e+00> : vector<8x32xf32>
    %30 = tpu.matmul %27, %29, %cst_33 {dimension_numbers = #tpu.dot_dimension_numbers<[1], [0], [0], [1], [0, 0, 1, 1], [], []>} : vector<8x32xbf16>, vector<32x32xbf16>, vector<8x32xf32> -> vector<8x32xf32>
    %31 = arith.addf %26, %30 : vector<8x32xf32>
    %32 = vector.extract_strided_slice %3 {offsets = [2, 0], sizes = [8, 32], strides = [1, 1]} : vector<10x32xbf16> to vector<8x32xbf16>
    %c1_34 = arith.constant 1 : index
    %c2_35 = arith.constant 2 : index
    %c0_36 = arith.constant 0 : index
    %c0_37 = arith.constant 0 : index
    %33 = vector.load %arg5[%c1_34, %c2_35, %c0_36, %c0_37] : memref<3x3x32x32xbf16, #tpu.memory_space<vmem>>, vector<1x1x32x32xbf16>
    %34 = vector.shape_cast %33 : vector<1x1x32x32xbf16> to vector<32x32xbf16>
    %cst_38 = arith.constant dense<0.000000e+00> : vector<8x32xf32>
    %35 = tpu.matmul %32, %34, %cst_38 {dimension_numbers = #tpu.dot_dimension_numbers<[1], [0], [0], [1], [0, 0, 1, 1], [], []>} : vector<8x32xbf16>, vector<32x32xbf16>, vector<8x32xf32> -> vector<8x32xf32>
    %36 = arith.addf %31, %35 : vector<8x32xf32>
    %37 = vector.extract_strided_slice %5 {offsets = [0, 0], sizes = [8, 32], strides = [1, 1]} : vector<10x32xbf16> to vector<8x32xbf16>
    %c2_39 = arith.constant 2 : index
    %c0_40 = arith.constant 0 : index
    %c0_41 = arith.constant 0 : index
    %c0_42 = arith.constant 0 : index
    %38 = vector.load %arg5[%c2_39, %c0_40, %c0_41, %c0_42] : memref<3x3x32x32xbf16, #tpu.memory_space<vmem>>, vector<1x1x32x32xbf16>
    %39 = vector.shape_cast %38 : vector<1x1x32x32xbf16> to vector<32x32xbf16>
    %cst_43 = arith.constant dense<0.000000e+00> : vector<8x32xf32>
    %40 = tpu.matmul %37, %39, %cst_43 {dimension_numbers = #tpu.dot_dimension_numbers<[1], [0], [0], [1], [0, 0, 1, 1], [], []>} : vector<8x32xbf16>, vector<32x32xbf16>, vector<8x32xf32> -> vector<8x32xf32>
    %41 = arith.addf %36, %40 : vector<8x32xf32>
    %42 = vector.extract_strided_slice %5 {offsets = [1, 0], sizes = [8, 32], strides = [1, 1]} : vector<10x32xbf16> to vector<8x32xbf16>
    %c2_44 = arith.constant 2 : index
    %c1_45 = arith.constant 1 : index
    %c0_46 = arith.constant 0 : index
    %c0_47 = arith.constant 0 : index
    %43 = vector.load %arg5[%c2_44, %c1_45, %c0_46, %c0_47] : memref<3x3x32x32xbf16, #tpu.memory_space<vmem>>, vector<1x1x32x32xbf16>
    %44 = vector.shape_cast %43 : vector<1x1x32x32xbf16> to vector<32x32xbf16>
    %cst_48 = arith.constant dense<0.000000e+00> : vector<8x32xf32>
    %45 = tpu.matmul %42, %44, %cst_48 {dimension_numbers = #tpu.dot_dimension_numbers<[1], [0], [0], [1], [0, 0, 1, 1], [], []>} : vector<8x32xbf16>, vector<32x32xbf16>, vector<8x32xf32> -> vector<8x32xf32>
    %46 = arith.addf %41, %45 : vector<8x32xf32>
    %47 = vector.extract_strided_slice %5 {offsets = [2, 0], sizes = [8, 32], strides = [1, 1]} : vector<10x32xbf16> to vector<8x32xbf16>
    %c2_49 = arith.constant 2 : index
    %c2_50 = arith.constant 2 : index
    %c0_51 = arith.constant 0 : index
    %c0_52 = arith.constant 0 : index
    %48 = vector.load %arg5[%c2_49, %c2_50, %c0_51, %c0_52] : memref<3x3x32x32xbf16, #tpu.memory_space<vmem>>, vector<1x1x32x32xbf16>
    %49 = vector.shape_cast %48 : vector<1x1x32x32xbf16> to vector<32x32xbf16>
    %cst_53 = arith.constant dense<0.000000e+00> : vector<8x32xf32>
    %50 = tpu.matmul %47, %49, %cst_53 {dimension_numbers = #tpu.dot_dimension_numbers<[1], [0], [0], [1], [0, 0, 1, 1], [], []>} : vector<8x32xbf16>, vector<32x32xbf16>, vector<8x32xf32> -> vector<8x32xf32>
    %51 = arith.addf %46, %50 : vector<8x32xf32>
    %c0_54 = arith.constant 0 : index
    %c0_55 = arith.constant 0 : index
    %52 = vector.load %arg6[%c0_54, %c0_55] : memref<1x32xf32, #tpu.memory_space<vmem>>, vector<1x32xf32>
    %53 = vector.broadcast %52 : vector<1x32xf32> to vector<8x32xf32>
    %54 = arith.addf %51, %53 : vector<8x32xf32>
    %55 = arith.truncf %54 : vector<8x32xf32> to vector<8x32xbf16>
    %c0_56 = arith.constant 0 : index
    %c0_57 = arith.constant 0 : index
    %c0_58 = arith.constant 0 : index
    %c0_59 = arith.constant 0 : index
    %56 = vector.load %arg7[%c0_56, %c0_57, %c0_58, %c0_59] : memref<1x1x8x32xbf16, #tpu.memory_space<vmem>>, vector<1x1x8x32xbf16>
    %57 = vector.shape_cast %56 : vector<1x1x8x32xbf16> to vector<8x32xbf16>
    %58 = vector.shape_cast %55 : vector<8x32xbf16> to vector<1x1x8x32xbf16>
    tpu.vector_store %arg7[%c0_56, %c0_57, %c0_58, %c0_59], %58 {strides = array<i32>} : memref<1x1x8x32xbf16, #tpu.memory_space<vmem>>, vector<1x1x8x32xbf16>,
    %c0_i32 = arith.constant 0 : i32
    %59 = arith.cmpi eq, %arg0, %c0_i32 : i32
    %c0_i32_60 = arith.constant 0 : i32
    %60 = arith.cmpi eq, %arg1, %c0_i32_60 : i32
    %61 = arith.andi %59, %60 : i1
    %62 = arith.extui %61 : i1 to i32
    %c0_i32_61 = arith.constant 0 : i32
    %63 = arith.cmpi ne, %62, %c0_i32_61 : i32
    scf.if %63 {
      %cst_72 = arith.constant 0.000000e+00 : f32
      %75 = vector.broadcast %cst_72 : f32 to vector<1x32xf32>
      %c0_73 = arith.constant 0 : index
      %c0_74 = arith.constant 0 : index
      %76 = vector.load %arg8[%c0_73, %c0_74] : memref<1x32xf32, #tpu.memory_space<vmem>>, vector<1x32xf32>
      tpu.vector_store %arg8[%c0_73, %c0_74], %75 {strides = array<i32>} : memref<1x32xf32, #tpu.memory_space<vmem>>, vector<1x32xf32>,
      %cst_75 = arith.constant 0.000000e+00 : f32
      %77 = vector.broadcast %cst_75 : f32 to vector<1x32xf32>
      %c0_76 = arith.constant 0 : index
      %c0_77 = arith.constant 0 : index
      %78 = vector.load %arg9[%c0_76, %c0_77] : memref<1x32xf32, #tpu.memory_space<vmem>>, vector<1x32xf32>
      tpu.vector_store %arg9[%c0_76, %c0_77], %77 {strides = array<i32>} : memref<1x32xf32, #tpu.memory_space<vmem>>, vector<1x32xf32>,
    } else {
    }
    %c0_62 = arith.constant 0 : index
    %c0_63 = arith.constant 0 : index
    %64 = vector.load %arg8[%c0_62, %c0_63] : memref<1x32xf32, #tpu.memory_space<vmem>>, vector<1x32xf32>
    %cst_64 = arith.constant dense<0.000000e+00> : vector<32xf32>
    %65 = vector.multi_reduction <add>, %54, %cst_64 [0] : vector<8x32xf32> to vector<32xf32>
    %66 = vector.shape_cast %65 : vector<32xf32> to vector<1x32xf32>
    %67 = arith.addf %64, %66 : vector<1x32xf32>
    %c0_65 = arith.constant 0 : index
    %c0_66 = arith.constant 0 : index
    %68 = vector.load %arg8[%c0_65, %c0_66] : memref<1x32xf32, #tpu.memory_space<vmem>>, vector<1x32xf32>
    tpu.vector_store %arg8[%c0_65, %c0_66], %67 {strides = array<i32>} : memref<1x32xf32, #tpu.memory_space<vmem>>, vector<1x32xf32>,
    %c0_67 = arith.constant 0 : index
    %c0_68 = arith.constant 0 : index
    %69 = vector.load %arg9[%c0_67, %c0_68] : memref<1x32xf32, #tpu.memory_space<vmem>>, vector<1x32xf32>
    %70 = arith.mulf %54, %54 : vector<8x32xf32>
    %cst_69 = arith.constant dense<0.000000e+00> : vector<32xf32>
    %71 = vector.multi_reduction <add>, %70, %cst_69 [0] : vector<8x32xf32> to vector<32xf32>
    %72 = vector.shape_cast %71 : vector<32xf32> to vector<1x32xf32>
    %73 = arith.addf %69, %72 : vector<1x32xf32>
    %c0_70 = arith.constant 0 : index
    %c0_71 = arith.constant 0 : index
    %74 = vector.load %arg9[%c0_70, %c0_71] : memref<1x32xf32, #tpu.memory_space<vmem>>, vector<1x32xf32>
    tpu.vector_store %arg9[%c0_70, %c0_71], %73 {strides = array<i32>} : memref<1x32xf32, #tpu.memory_space<vmem>>, vector<1x32xf32>,
    return
  }
  func.func @transform_0(%arg0: i32, %arg1: i32) -> (i32, i32, i32, i32) {
    %c0_i32 = arith.constant 0 : i32
    %0 = arith.addi %arg1, %c0_i32 : i32
    %c0_i32_0 = arith.constant 0 : i32
    %c0_i32_1 = arith.constant 0 : i32
    %c0_i32_2 = arith.constant 0 : i32
    return %arg0, %0, %c0_i32_0, %c0_i32_1 : i32, i32, i32, i32
  }
  func.func @transform_1(%arg0: i32, %arg1: i32) -> (i32, i32, i32, i32) {
    %c1_i32 = arith.constant 1 : i32
    %0 = arith.addi %arg1, %c1_i32 : i32
    %c0_i32 = arith.constant 0 : i32
    %c0_i32_0 = arith.constant 0 : i32
    %c0_i32_1 = arith.constant 0 : i32
    return %arg0, %0, %c0_i32, %c0_i32_0 : i32, i32, i32, i32
  }
  func.func @transform_2(%arg0: i32, %arg1: i32) -> (i32, i32, i32, i32) {
    %c2_i32 = arith.constant 2 : i32
    %0 = arith.addi %arg1, %c2_i32 : i32
    %c0_i32 = arith.constant 0 : i32
    %c0_i32_0 = arith.constant 0 : i32
    %c0_i32_1 = arith.constant 0 : i32
    return %arg0, %0, %c0_i32, %c0_i32_0 : i32, i32, i32, i32
  }
  func.func @transform_3(%arg0: i32, %arg1: i32) -> (i32, i32, i32, i32) {
    %c0_i32 = arith.constant 0 : i32
    %c0_i32_0 = arith.constant 0 : i32
    %c0_i32_1 = arith.constant 0 : i32
    %c0_i32_2 = arith.constant 0 : i32
    %c0_i32_3 = arith.constant 0 : i32
    return %c0_i32, %c0_i32_0, %c0_i32_1, %c0_i32_2 : i32, i32, i32, i32
  }
  func.func @transform_4(%arg0: i32, %arg1: i32) -> (i32, i32) {
    %c0_i32 = arith.constant 0 : i32
    %c0_i32_0 = arith.constant 0 : i32
    %c0_i32_1 = arith.constant 0 : i32
    return %c0_i32, %c0_i32_0 : i32, i32
  }
  func.func @transform_5(%arg0: i32, %arg1: i32) -> (i32, i32, i32, i32) {
    %c0_i32 = arith.constant 0 : i32
    %c0_i32_0 = arith.constant 0 : i32
    %c0_i32_1 = arith.constant 0 : i32
    return %arg0, %arg1, %c0_i32, %c0_i32_0 : i32, i32, i32, i32
  }
  func.func @transform_6(%arg0: i32, %arg1: i32) -> (i32, i32) {
    %c0_i32 = arith.constant 0 : i32
    %c0_i32_0 = arith.constant 0 : i32
    %c0_i32_1 = arith.constant 0 : i32
    return %c0_i32, %c0_i32_0 : i32, i32
  }
  func.func @transform_7(%arg0: i32, %arg1: i32) -> (i32, i32) {
    %c0_i32 = arith.constant 0 : i32
    %c0_i32_0 = arith.constant 0 : i32
    %c0_i32_1 = arith.constant 0 : i32
    return %c0_i32, %c0_i32_0 : i32, i32
  }
}

module attributes {stable_mosaic.version = 11 : i64} {
  func.func @_bn_act_kernel(%arg0: i32, %arg1: memref<32x64xbf16, #tpu.memory_space<vmem>>, %arg2: memref<1x64xf32, #tpu.memory_space<vmem>>, %arg3: memref<1x64xf32, #tpu.memory_space<vmem>>, %arg4: memref<1x64xf32, #tpu.memory_space<vmem>>, %arg5: memref<1x64xf32, #tpu.memory_space<vmem>>, %arg6: memref<32x64xbf16, #tpu.memory_space<vmem>>) attributes {dimension_semantics = [#tpu.dimension_semantics<parallel>], iteration_bounds = array<i64: 1>, scalar_prefetch = 0 : i64, scratch_operands = 0 : i64, tpu.core_type = #tpu.core_type<tc>, window_params = [{transform_indices = @transform_0, window_bounds = array<i64: 32, 64>}, {pipeline_mode = #tpu.pipeline_mode<synchronous>, transform_indices = @transform_1, window_bounds = array<i64: 1, 64>}, {pipeline_mode = #tpu.pipeline_mode<synchronous>, transform_indices = @transform_2, window_bounds = array<i64: 1, 64>}, {pipeline_mode = #tpu.pipeline_mode<synchronous>, transform_indices = @transform_3, window_bounds = array<i64: 1, 64>}, {pipeline_mode = #tpu.pipeline_mode<synchronous>, transform_indices = @transform_4, window_bounds = array<i64: 1, 64>}, {transform_indices = @transform_5, window_bounds = array<i64: 32, 64>}]} {
    %c0 = arith.constant 0 : index
    %c0_0 = arith.constant 0 : index
    %0 = vector.load %arg1[%c0, %c0_0] : memref<32x64xbf16, #tpu.memory_space<vmem>>, vector<32x64xbf16>
    %1 = arith.extf %0 : vector<32x64xbf16> to vector<32x64xf32>
    %c0_1 = arith.constant 0 : index
    %c0_2 = arith.constant 0 : index
    %2 = vector.load %arg2[%c0_1, %c0_2] : memref<1x64xf32, #tpu.memory_space<vmem>>, vector<1x64xf32>
    %3 = vector.broadcast %2 : vector<1x64xf32> to vector<32x64xf32>
    %4 = arith.subf %1, %3 : vector<32x64xf32>
    %c0_3 = arith.constant 0 : index
    %c0_4 = arith.constant 0 : index
    %5 = vector.load %arg3[%c0_3, %c0_4] : memref<1x64xf32, #tpu.memory_space<vmem>>, vector<1x64xf32>
    %6 = vector.broadcast %5 : vector<1x64xf32> to vector<32x64xf32>
    %7 = arith.mulf %4, %6 : vector<32x64xf32>
    %c0_5 = arith.constant 0 : index
    %c0_6 = arith.constant 0 : index
    %8 = vector.load %arg4[%c0_5, %c0_6] : memref<1x64xf32, #tpu.memory_space<vmem>>, vector<1x64xf32>
    %9 = vector.broadcast %8 : vector<1x64xf32> to vector<32x64xf32>
    %10 = arith.mulf %7, %9 : vector<32x64xf32>
    %c0_7 = arith.constant 0 : index
    %c0_8 = arith.constant 0 : index
    %11 = vector.load %arg5[%c0_7, %c0_8] : memref<1x64xf32, #tpu.memory_space<vmem>>, vector<1x64xf32>
    %12 = vector.broadcast %11 : vector<1x64xf32> to vector<32x64xf32>
    %13 = arith.addf %10, %12 : vector<32x64xf32>
    %cst = arith.constant 0.000000e+00 : f32
    %14 = vector.broadcast %cst : f32 to vector<32x64xf32>
    %15 = arith.maximumf %13, %14 : vector<32x64xf32>
    %16 = arith.truncf %15 : vector<32x64xf32> to vector<32x64xbf16>
    %c0_9 = arith.constant 0 : index
    %c0_10 = arith.constant 0 : index
    %17 = vector.load %arg6[%c0_9, %c0_10] : memref<32x64xbf16, #tpu.memory_space<vmem>>, vector<32x64xbf16>
    tpu.vector_store %arg6[%c0_9, %c0_10], %16 {strides = array<i32>} : memref<32x64xbf16, #tpu.memory_space<vmem>>, vector<32x64xbf16>,
    return
  }
  func.func @transform_0(%arg0: i32) -> (i32, i32) {
    %c0_i32 = arith.constant 0 : i32
    %c0_i32_0 = arith.constant 0 : i32
    return %arg0, %c0_i32 : i32, i32
  }
  func.func @transform_1(%arg0: i32) -> (i32, i32) {
    %c0_i32 = arith.constant 0 : i32
    %c0_i32_0 = arith.constant 0 : i32
    %c0_i32_1 = arith.constant 0 : i32
    return %c0_i32, %c0_i32_0 : i32, i32
  }
  func.func @transform_2(%arg0: i32) -> (i32, i32) {
    %c0_i32 = arith.constant 0 : i32
    %c0_i32_0 = arith.constant 0 : i32
    %c0_i32_1 = arith.constant 0 : i32
    return %c0_i32, %c0_i32_0 : i32, i32
  }
  func.func @transform_3(%arg0: i32) -> (i32, i32) {
    %c0_i32 = arith.constant 0 : i32
    %c0_i32_0 = arith.constant 0 : i32
    %c0_i32_1 = arith.constant 0 : i32
    return %c0_i32, %c0_i32_0 : i32, i32
  }
  func.func @transform_4(%arg0: i32) -> (i32, i32) {
    %c0_i32 = arith.constant 0 : i32
    %c0_i32_0 = arith.constant 0 : i32
    %c0_i32_1 = arith.constant 0 : i32
    return %c0_i32, %c0_i32_0 : i32, i32
  }
  func.func @transform_5(%arg0: i32) -> (i32, i32) {
    %c0_i32 = arith.constant 0 : i32
    %c0_i32_0 = arith.constant 0 : i32
    return %arg0, %c0_i32 : i32, i32
  }
}

module attributes {stable_mosaic.version = 11 : i64} {
  func.func @_conv3x3_kernel(%arg0: i32, %arg1: i32, %arg2: memref<1x1x6x32xbf16, #tpu.memory_space<vmem>>, %arg3: memref<1x1x6x32xbf16, #tpu.memory_space<vmem>>, %arg4: memref<1x1x6x32xbf16, #tpu.memory_space<vmem>>, %arg5: memref<3x3x32x64xbf16, #tpu.memory_space<vmem>>, %arg6: memref<1x64xf32, #tpu.memory_space<vmem>>, %arg7: memref<1x1x4x64xbf16, #tpu.memory_space<vmem>>, %arg8: memref<1x64xf32, #tpu.memory_space<vmem>>, %arg9: memref<1x64xf32, #tpu.memory_space<vmem>>) attributes {dimension_semantics = [#tpu.dimension_semantics<arbitrary>, #tpu.dimension_semantics<arbitrary>], iteration_bounds = array<i64: 2, 4>, scalar_prefetch = 0 : i64, scratch_operands = 0 : i64, tpu.core_type = #tpu.core_type<tc>, window_params = [{transform_indices = @transform_0, window_bounds = array<i64: 1, 1, 6, 32>}, {transform_indices = @transform_1, window_bounds = array<i64: 1, 1, 6, 32>}, {transform_indices = @transform_2, window_bounds = array<i64: 1, 1, 6, 32>}, {pipeline_mode = #tpu.pipeline_mode<synchronous>, transform_indices = @transform_3, window_bounds = array<i64: 3, 3, 32, 64>}, {pipeline_mode = #tpu.pipeline_mode<synchronous>, transform_indices = @transform_4, window_bounds = array<i64: 1, 64>}, {transform_indices = @transform_5, window_bounds = array<i64: 1, 1, 4, 64>}, {pipeline_mode = #tpu.pipeline_mode<synchronous>, transform_indices = @transform_6, window_bounds = array<i64: 1, 64>}, {pipeline_mode = #tpu.pipeline_mode<synchronous>, transform_indices = @transform_7, window_bounds = array<i64: 1, 64>}]} {
    %c0 = arith.constant 0 : index
    %c0_0 = arith.constant 0 : index
    %c0_1 = arith.constant 0 : index
    %c0_2 = arith.constant 0 : index
    %0 = vector.load %arg2[%c0, %c0_0, %c0_1, %c0_2] : memref<1x1x6x32xbf16, #tpu.memory_space<vmem>>, vector<1x1x6x32xbf16>
    %1 = vector.shape_cast %0 : vector<1x1x6x32xbf16> to vector<6x32xbf16>
    %c0_3 = arith.constant 0 : index
    %c0_4 = arith.constant 0 : index
    %c0_5 = arith.constant 0 : index
    %c0_6 = arith.constant 0 : index
    %2 = vector.load %arg3[%c0_3, %c0_4, %c0_5, %c0_6] : memref<1x1x6x32xbf16, #tpu.memory_space<vmem>>, vector<1x1x6x32xbf16>
    %3 = vector.shape_cast %2 : vector<1x1x6x32xbf16> to vector<6x32xbf16>
    %c0_7 = arith.constant 0 : index
    %c0_8 = arith.constant 0 : index
    %c0_9 = arith.constant 0 : index
    %c0_10 = arith.constant 0 : index
    %4 = vector.load %arg4[%c0_7, %c0_8, %c0_9, %c0_10] : memref<1x1x6x32xbf16, #tpu.memory_space<vmem>>, vector<1x1x6x32xbf16>
    %5 = vector.shape_cast %4 : vector<1x1x6x32xbf16> to vector<6x32xbf16>
    %cst = arith.constant 0.000000e+00 : f32
    %6 = vector.broadcast %cst : f32 to vector<4x64xf32>
    %7 = vector.extract_strided_slice %1 {offsets = [0, 0], sizes = [4, 32], strides = [1, 1]} : vector<6x32xbf16> to vector<4x32xbf16>
    %c0_11 = arith.constant 0 : index
    %c0_12 = arith.constant 0 : index
    %c0_13 = arith.constant 0 : index
    %c0_14 = arith.constant 0 : index
    %8 = vector.load %arg5[%c0_11, %c0_12, %c0_13, %c0_14] : memref<3x3x32x64xbf16, #tpu.memory_space<vmem>>, vector<1x1x32x64xbf16>
    %9 = vector.shape_cast %8 : vector<1x1x32x64xbf16> to vector<32x64xbf16>
    %cst_15 = arith.constant dense<0.000000e+00> : vector<4x64xf32>
    %10 = tpu.matmul %7, %9, %cst_15 {dimension_numbers = #tpu.dot_dimension_numbers<[1], [0], [0], [1], [0, 0, 1, 1], [], []>} : vector<4x32xbf16>, vector<32x64xbf16>, vector<4x64xf32> -> vector<4x64xf32>
    %11 = arith.addf %6, %10 : vector<4x64xf32>
    %12 = vector.extract_strided_slice %1 {offsets = [1, 0], sizes = [4, 32], strides = [1, 1]} : vector<6x32xbf16> to vector<4x32xbf16>
    %c0_16 = arith.constant 0 : index
    %c1 = arith.constant 1 : index
    %c0_17 = arith.constant 0 : index
    %c0_18 = arith.constant 0 : index
    %13 = vector.load %arg5[%c0_16, %c1, %c0_17, %c0_18] : memref<3x3x32x64xbf16, #tpu.memory_space<vmem>>, vector<1x1x32x64xbf16>
    %14 = vector.shape_cast %13 : vector<1x1x32x64xbf16> to vector<32x64xbf16>
    %cst_19 = arith.constant dense<0.000000e+00> : vector<4x64xf32>
    %15 = tpu.matmul %12, %14, %cst_19 {dimension_numbers = #tpu.dot_dimension_numbers<[1], [0], [0], [1], [0, 0, 1, 1], [], []>} : vector<4x32xbf16>, vector<32x64xbf16>, vector<4x64xf32> -> vector<4x64xf32>
    %16 = arith.addf %11, %15 : vector<4x64xf32>
    %17 = vector.extract_strided_slice %1 {offsets = [2, 0], sizes = [4, 32], strides = [1, 1]} : vector<6x32xbf16> to vector<4x32xbf16>
    %c0_20 = arith.constant 0 : index
    %c2 = arith.constant 2 : index
    %c0_21 = arith.constant 0 : index
    %c0_22 = arith.constant 0 : index
    %18 = vector.load %arg5[%c0_20, %c2, %c0_21, %c0_22] : memref<3x3x32x64xbf16, #tpu.memory_space<vmem>>, vector<1x1x32x64xbf16>
    %19 = vector.shape_cast %18 : vector<1x1x32x64xbf16> to vector<32x64xbf16>
    %cst_23 = arith.constant dense<0.000000e+00> : vector<4x64xf32>
    %20 = tpu.matmul %17, %19, %cst_23 {dimension_numbers = #tpu.dot_dimension_numbers<[1], [0], [0], [1], [0, 0, 1, 1], [], []>} : vector<4x32xbf16>, vector<32x64xbf16>, vector<4x64xf32> -> vector<4x64xf32>
    %21 = arith.addf %16, %20 : vector<4x64xf32>
    %22 = vector.extract_strided_slice %3 {offsets = [0, 0], sizes = [4, 32], strides = [1, 1]} : vector<6x32xbf16> to vector<4x32xbf16>
    %c1_24 = arith.constant 1 : index
    %c0_25 = arith.constant 0 : index
    %c0_26 = arith.constant 0 : index
    %c0_27 = arith.constant 0 : index
    %23 = vector.load %arg5[%c1_24, %c0_25, %c0_26, %c0_27] : memref<3x3x32x64xbf16, #tpu.memory_space<vmem>>, vector<1x1x32x64xbf16>
    %24 = vector.shape_cast %23 : vector<1x1x32x64xbf16> to vector<32x64xbf16>
    %cst_28 = arith.constant dense<0.000000e+00> : vector<4x64xf32>
    %25 = tpu.matmul %22, %24, %cst_28 {dimension_numbers = #tpu.dot_dimension_numbers<[1], [0], [0], [1], [0, 0, 1, 1], [], []>} : vector<4x32xbf16>, vector<32x64xbf16>, vector<4x64xf32> -> vector<4x64xf32>
    %26 = arith.addf %21, %25 : vector<4x64xf32>
    %27 = vector.extract_strided_slice %3 {offsets = [1, 0], sizes = [4, 32], strides = [1, 1]} : vector<6x32xbf16> to vector<4x32xbf16>
    %c1_29 = arith.constant 1 : index
    %c1_30 = arith.constant 1 : index
    %c0_31 = arith.constant 0 : index
    %c0_32 = arith.constant 0 : index
    %28 = vector.load %arg5[%c1_29, %c1_30, %c0_31, %c0_32] : memref<3x3x32x64xbf16, #tpu.memory_space<vmem>>, vector<1x1x32x64xbf16>
    %29 = vector.shape_cast %28 : vector<1x1x32x64xbf16> to vector<32x64xbf16>
    %cst_33 = arith.constant dense<0.000000e+00> : vector<4x64xf32>
    %30 = tpu.matmul %27, %29, %cst_33 {dimension_numbers = #tpu.dot_dimension_numbers<[1], [0], [0], [1], [0, 0, 1, 1], [], []>} : vector<4x32xbf16>, vector<32x64xbf16>, vector<4x64xf32> -> vector<4x64xf32>
    %31 = arith.addf %26, %30 : vector<4x64xf32>
    %32 = vector.extract_strided_slice %3 {offsets = [2, 0], sizes = [4, 32], strides = [1, 1]} : vector<6x32xbf16> to vector<4x32xbf16>
    %c1_34 = arith.constant 1 : index
    %c2_35 = arith.constant 2 : index
    %c0_36 = arith.constant 0 : index
    %c0_37 = arith.constant 0 : index
    %33 = vector.load %arg5[%c1_34, %c2_35, %c0_36, %c0_37] : memref<3x3x32x64xbf16, #tpu.memory_space<vmem>>, vector<1x1x32x64xbf16>
    %34 = vector.shape_cast %33 : vector<1x1x32x64xbf16> to vector<32x64xbf16>
    %cst_38 = arith.constant dense<0.000000e+00> : vector<4x64xf32>
    %35 = tpu.matmul %32, %34, %cst_38 {dimension_numbers = #tpu.dot_dimension_numbers<[1], [0], [0], [1], [0, 0, 1, 1], [], []>} : vector<4x32xbf16>, vector<32x64xbf16>, vector<4x64xf32> -> vector<4x64xf32>
    %36 = arith.addf %31, %35 : vector<4x64xf32>
    %37 = vector.extract_strided_slice %5 {offsets = [0, 0], sizes = [4, 32], strides = [1, 1]} : vector<6x32xbf16> to vector<4x32xbf16>
    %c2_39 = arith.constant 2 : index
    %c0_40 = arith.constant 0 : index
    %c0_41 = arith.constant 0 : index
    %c0_42 = arith.constant 0 : index
    %38 = vector.load %arg5[%c2_39, %c0_40, %c0_41, %c0_42] : memref<3x3x32x64xbf16, #tpu.memory_space<vmem>>, vector<1x1x32x64xbf16>
    %39 = vector.shape_cast %38 : vector<1x1x32x64xbf16> to vector<32x64xbf16>
    %cst_43 = arith.constant dense<0.000000e+00> : vector<4x64xf32>
    %40 = tpu.matmul %37, %39, %cst_43 {dimension_numbers = #tpu.dot_dimension_numbers<[1], [0], [0], [1], [0, 0, 1, 1], [], []>} : vector<4x32xbf16>, vector<32x64xbf16>, vector<4x64xf32> -> vector<4x64xf32>
    %41 = arith.addf %36, %40 : vector<4x64xf32>
    %42 = vector.extract_strided_slice %5 {offsets = [1, 0], sizes = [4, 32], strides = [1, 1]} : vector<6x32xbf16> to vector<4x32xbf16>
    %c2_44 = arith.constant 2 : index
    %c1_45 = arith.constant 1 : index
    %c0_46 = arith.constant 0 : index
    %c0_47 = arith.constant 0 : index
    %43 = vector.load %arg5[%c2_44, %c1_45, %c0_46, %c0_47] : memref<3x3x32x64xbf16, #tpu.memory_space<vmem>>, vector<1x1x32x64xbf16>
    %44 = vector.shape_cast %43 : vector<1x1x32x64xbf16> to vector<32x64xbf16>
    %cst_48 = arith.constant dense<0.000000e+00> : vector<4x64xf32>
    %45 = tpu.matmul %42, %44, %cst_48 {dimension_numbers = #tpu.dot_dimension_numbers<[1], [0], [0], [1], [0, 0, 1, 1], [], []>} : vector<4x32xbf16>, vector<32x64xbf16>, vector<4x64xf32> -> vector<4x64xf32>
    %46 = arith.addf %41, %45 : vector<4x64xf32>
    %47 = vector.extract_strided_slice %5 {offsets = [2, 0], sizes = [4, 32], strides = [1, 1]} : vector<6x32xbf16> to vector<4x32xbf16>
    %c2_49 = arith.constant 2 : index
    %c2_50 = arith.constant 2 : index
    %c0_51 = arith.constant 0 : index
    %c0_52 = arith.constant 0 : index
    %48 = vector.load %arg5[%c2_49, %c2_50, %c0_51, %c0_52] : memref<3x3x32x64xbf16, #tpu.memory_space<vmem>>, vector<1x1x32x64xbf16>
    %49 = vector.shape_cast %48 : vector<1x1x32x64xbf16> to vector<32x64xbf16>
    %cst_53 = arith.constant dense<0.000000e+00> : vector<4x64xf32>
    %50 = tpu.matmul %47, %49, %cst_53 {dimension_numbers = #tpu.dot_dimension_numbers<[1], [0], [0], [1], [0, 0, 1, 1], [], []>} : vector<4x32xbf16>, vector<32x64xbf16>, vector<4x64xf32> -> vector<4x64xf32>
    %51 = arith.addf %46, %50 : vector<4x64xf32>
    %c0_54 = arith.constant 0 : index
    %c0_55 = arith.constant 0 : index
    %52 = vector.load %arg6[%c0_54, %c0_55] : memref<1x64xf32, #tpu.memory_space<vmem>>, vector<1x64xf32>
    %53 = vector.broadcast %52 : vector<1x64xf32> to vector<4x64xf32>
    %54 = arith.addf %51, %53 : vector<4x64xf32>
    %55 = arith.truncf %54 : vector<4x64xf32> to vector<4x64xbf16>
    %c0_56 = arith.constant 0 : index
    %c0_57 = arith.constant 0 : index
    %c0_58 = arith.constant 0 : index
    %c0_59 = arith.constant 0 : index
    %56 = vector.load %arg7[%c0_56, %c0_57, %c0_58, %c0_59] : memref<1x1x4x64xbf16, #tpu.memory_space<vmem>>, vector<1x1x4x64xbf16>
    %57 = vector.shape_cast %56 : vector<1x1x4x64xbf16> to vector<4x64xbf16>
    %58 = vector.shape_cast %55 : vector<4x64xbf16> to vector<1x1x4x64xbf16>
    tpu.vector_store %arg7[%c0_56, %c0_57, %c0_58, %c0_59], %58 {strides = array<i32>} : memref<1x1x4x64xbf16, #tpu.memory_space<vmem>>, vector<1x1x4x64xbf16>,
    %c0_i32 = arith.constant 0 : i32
    %59 = arith.cmpi eq, %arg0, %c0_i32 : i32
    %c0_i32_60 = arith.constant 0 : i32
    %60 = arith.cmpi eq, %arg1, %c0_i32_60 : i32
    %61 = arith.andi %59, %60 : i1
    %62 = arith.extui %61 : i1 to i32
    %c0_i32_61 = arith.constant 0 : i32
    %63 = arith.cmpi ne, %62, %c0_i32_61 : i32
    scf.if %63 {
      %cst_72 = arith.constant 0.000000e+00 : f32
      %75 = vector.broadcast %cst_72 : f32 to vector<1x64xf32>
      %c0_73 = arith.constant 0 : index
      %c0_74 = arith.constant 0 : index
      %76 = vector.load %arg8[%c0_73, %c0_74] : memref<1x64xf32, #tpu.memory_space<vmem>>, vector<1x64xf32>
      tpu.vector_store %arg8[%c0_73, %c0_74], %75 {strides = array<i32>} : memref<1x64xf32, #tpu.memory_space<vmem>>, vector<1x64xf32>,
      %cst_75 = arith.constant 0.000000e+00 : f32
      %77 = vector.broadcast %cst_75 : f32 to vector<1x64xf32>
      %c0_76 = arith.constant 0 : index
      %c0_77 = arith.constant 0 : index
      %78 = vector.load %arg9[%c0_76, %c0_77] : memref<1x64xf32, #tpu.memory_space<vmem>>, vector<1x64xf32>
      tpu.vector_store %arg9[%c0_76, %c0_77], %77 {strides = array<i32>} : memref<1x64xf32, #tpu.memory_space<vmem>>, vector<1x64xf32>,
    } else {
    }
    %c0_62 = arith.constant 0 : index
    %c0_63 = arith.constant 0 : index
    %64 = vector.load %arg8[%c0_62, %c0_63] : memref<1x64xf32, #tpu.memory_space<vmem>>, vector<1x64xf32>
    %cst_64 = arith.constant dense<0.000000e+00> : vector<64xf32>
    %65 = vector.multi_reduction <add>, %54, %cst_64 [0] : vector<4x64xf32> to vector<64xf32>
    %66 = vector.shape_cast %65 : vector<64xf32> to vector<1x64xf32>
    %67 = arith.addf %64, %66 : vector<1x64xf32>
    %c0_65 = arith.constant 0 : index
    %c0_66 = arith.constant 0 : index
    %68 = vector.load %arg8[%c0_65, %c0_66] : memref<1x64xf32, #tpu.memory_space<vmem>>, vector<1x64xf32>
    tpu.vector_store %arg8[%c0_65, %c0_66], %67 {strides = array<i32>} : memref<1x64xf32, #tpu.memory_space<vmem>>, vector<1x64xf32>,
    %c0_67 = arith.constant 0 : index
    %c0_68 = arith.constant 0 : index
    %69 = vector.load %arg9[%c0_67, %c0_68] : memref<1x64xf32, #tpu.memory_space<vmem>>, vector<1x64xf32>
    %70 = arith.mulf %54, %54 : vector<4x64xf32>
    %cst_69 = arith.constant dense<0.000000e+00> : vector<64xf32>
    %71 = vector.multi_reduction <add>, %70, %cst_69 [0] : vector<4x64xf32> to vector<64xf32>
    %72 = vector.shape_cast %71 : vector<64xf32> to vector<1x64xf32>
    %73 = arith.addf %69, %72 : vector<1x64xf32>
    %c0_70 = arith.constant 0 : index
    %c0_71 = arith.constant 0 : index
    %74 = vector.load %arg9[%c0_70, %c0_71] : memref<1x64xf32, #tpu.memory_space<vmem>>, vector<1x64xf32>
    tpu.vector_store %arg9[%c0_70, %c0_71], %73 {strides = array<i32>} : memref<1x64xf32, #tpu.memory_space<vmem>>, vector<1x64xf32>,
    return
  }
  func.func @transform_0(%arg0: i32, %arg1: i32) -> (i32, i32, i32, i32) {
    %c0_i32 = arith.constant 0 : i32
    %0 = arith.addi %arg1, %c0_i32 : i32
    %c0_i32_0 = arith.constant 0 : i32
    %c0_i32_1 = arith.constant 0 : i32
    %c0_i32_2 = arith.constant 0 : i32
    return %arg0, %0, %c0_i32_0, %c0_i32_1 : i32, i32, i32, i32
  }
  func.func @transform_1(%arg0: i32, %arg1: i32) -> (i32, i32, i32, i32) {
    %c1_i32 = arith.constant 1 : i32
    %0 = arith.addi %arg1, %c1_i32 : i32
    %c0_i32 = arith.constant 0 : i32
    %c0_i32_0 = arith.constant 0 : i32
    %c0_i32_1 = arith.constant 0 : i32
    return %arg0, %0, %c0_i32, %c0_i32_0 : i32, i32, i32, i32
  }
  func.func @transform_2(%arg0: i32, %arg1: i32) -> (i32, i32, i32, i32) {
    %c2_i32 = arith.constant 2 : i32
    %0 = arith.addi %arg1, %c2_i32 : i32
    %c0_i32 = arith.constant 0 : i32
    %c0_i32_0 = arith.constant 0 : i32
    %c0_i32_1 = arith.constant 0 : i32
    return %arg0, %0, %c0_i32, %c0_i32_0 : i32, i32, i32, i32
  }
  func.func @transform_3(%arg0: i32, %arg1: i32) -> (i32, i32, i32, i32) {
    %c0_i32 = arith.constant 0 : i32
    %c0_i32_0 = arith.constant 0 : i32
    %c0_i32_1 = arith.constant 0 : i32
    %c0_i32_2 = arith.constant 0 : i32
    %c0_i32_3 = arith.constant 0 : i32
    return %c0_i32, %c0_i32_0, %c0_i32_1, %c0_i32_2 : i32, i32, i32, i32
  }
  func.func @transform_4(%arg0: i32, %arg1: i32) -> (i32, i32) {
    %c0_i32 = arith.constant 0 : i32
    %c0_i32_0 = arith.constant 0 : i32
    %c0_i32_1 = arith.constant 0 : i32
    return %c0_i32, %c0_i32_0 : i32, i32
  }
  func.func @transform_5(%arg0: i32, %arg1: i32) -> (i32, i32, i32, i32) {
    %c0_i32 = arith.constant 0 : i32
    %c0_i32_0 = arith.constant 0 : i32
    %c0_i32_1 = arith.constant 0 : i32
    return %arg0, %arg1, %c0_i32, %c0_i32_0 : i32, i32, i32, i32
  }
  func.func @transform_6(%arg0: i32, %arg1: i32) -> (i32, i32) {
    %c0_i32 = arith.constant 0 : i32
    %c0_i32_0 = arith.constant 0 : i32
    %c0_i32_1 = arith.constant 0 : i32
    return %c0_i32, %c0_i32_0 : i32, i32
  }
  func.func @transform_7(%arg0: i32, %arg1: i32) -> (i32, i32) {
    %c0_i32 = arith.constant 0 : i32
    %c0_i32_0 = arith.constant 0 : i32
    %c0_i32_1 = arith.constant 0 : i32
    return %c0_i32, %c0_i32_0 : i32, i32
  }
}

module attributes {stable_mosaic.version = 11 : i64} {
  func.func @_conv3x3_kernel(%arg0: i32, %arg1: i32, %arg2: memref<1x1x6x64xbf16, #tpu.memory_space<vmem>>, %arg3: memref<1x1x6x64xbf16, #tpu.memory_space<vmem>>, %arg4: memref<1x1x6x64xbf16, #tpu.memory_space<vmem>>, %arg5: memref<3x3x64x64xbf16, #tpu.memory_space<vmem>>, %arg6: memref<1x64xf32, #tpu.memory_space<vmem>>, %arg7: memref<1x1x4x64xbf16, #tpu.memory_space<vmem>>, %arg8: memref<1x64xf32, #tpu.memory_space<vmem>>, %arg9: memref<1x64xf32, #tpu.memory_space<vmem>>) attributes {dimension_semantics = [#tpu.dimension_semantics<arbitrary>, #tpu.dimension_semantics<arbitrary>], iteration_bounds = array<i64: 2, 4>, scalar_prefetch = 0 : i64, scratch_operands = 0 : i64, tpu.core_type = #tpu.core_type<tc>, window_params = [{transform_indices = @transform_0, window_bounds = array<i64: 1, 1, 6, 64>}, {transform_indices = @transform_1, window_bounds = array<i64: 1, 1, 6, 64>}, {transform_indices = @transform_2, window_bounds = array<i64: 1, 1, 6, 64>}, {pipeline_mode = #tpu.pipeline_mode<synchronous>, transform_indices = @transform_3, window_bounds = array<i64: 3, 3, 64, 64>}, {pipeline_mode = #tpu.pipeline_mode<synchronous>, transform_indices = @transform_4, window_bounds = array<i64: 1, 64>}, {transform_indices = @transform_5, window_bounds = array<i64: 1, 1, 4, 64>}, {pipeline_mode = #tpu.pipeline_mode<synchronous>, transform_indices = @transform_6, window_bounds = array<i64: 1, 64>}, {pipeline_mode = #tpu.pipeline_mode<synchronous>, transform_indices = @transform_7, window_bounds = array<i64: 1, 64>}]} {
    %c0 = arith.constant 0 : index
    %c0_0 = arith.constant 0 : index
    %c0_1 = arith.constant 0 : index
    %c0_2 = arith.constant 0 : index
    %0 = vector.load %arg2[%c0, %c0_0, %c0_1, %c0_2] : memref<1x1x6x64xbf16, #tpu.memory_space<vmem>>, vector<1x1x6x64xbf16>
    %1 = vector.shape_cast %0 : vector<1x1x6x64xbf16> to vector<6x64xbf16>
    %c0_3 = arith.constant 0 : index
    %c0_4 = arith.constant 0 : index
    %c0_5 = arith.constant 0 : index
    %c0_6 = arith.constant 0 : index
    %2 = vector.load %arg3[%c0_3, %c0_4, %c0_5, %c0_6] : memref<1x1x6x64xbf16, #tpu.memory_space<vmem>>, vector<1x1x6x64xbf16>
    %3 = vector.shape_cast %2 : vector<1x1x6x64xbf16> to vector<6x64xbf16>
    %c0_7 = arith.constant 0 : index
    %c0_8 = arith.constant 0 : index
    %c0_9 = arith.constant 0 : index
    %c0_10 = arith.constant 0 : index
    %4 = vector.load %arg4[%c0_7, %c0_8, %c0_9, %c0_10] : memref<1x1x6x64xbf16, #tpu.memory_space<vmem>>, vector<1x1x6x64xbf16>
    %5 = vector.shape_cast %4 : vector<1x1x6x64xbf16> to vector<6x64xbf16>
    %cst = arith.constant 0.000000e+00 : f32
    %6 = vector.broadcast %cst : f32 to vector<4x64xf32>
    %7 = vector.extract_strided_slice %1 {offsets = [0, 0], sizes = [4, 64], strides = [1, 1]} : vector<6x64xbf16> to vector<4x64xbf16>
    %c0_11 = arith.constant 0 : index
    %c0_12 = arith.constant 0 : index
    %c0_13 = arith.constant 0 : index
    %c0_14 = arith.constant 0 : index
    %8 = vector.load %arg5[%c0_11, %c0_12, %c0_13, %c0_14] : memref<3x3x64x64xbf16, #tpu.memory_space<vmem>>, vector<1x1x64x64xbf16>
    %9 = vector.shape_cast %8 : vector<1x1x64x64xbf16> to vector<64x64xbf16>
    %cst_15 = arith.constant dense<0.000000e+00> : vector<4x64xf32>
    %10 = tpu.matmul %7, %9, %cst_15 {dimension_numbers = #tpu.dot_dimension_numbers<[1], [0], [0], [1], [0, 0, 1, 1], [], []>} : vector<4x64xbf16>, vector<64x64xbf16>, vector<4x64xf32> -> vector<4x64xf32>
    %11 = arith.addf %6, %10 : vector<4x64xf32>
    %12 = vector.extract_strided_slice %1 {offsets = [1, 0], sizes = [4, 64], strides = [1, 1]} : vector<6x64xbf16> to vector<4x64xbf16>
    %c0_16 = arith.constant 0 : index
    %c1 = arith.constant 1 : index
    %c0_17 = arith.constant 0 : index
    %c0_18 = arith.constant 0 : index
    %13 = vector.load %arg5[%c0_16, %c1, %c0_17, %c0_18] : memref<3x3x64x64xbf16, #tpu.memory_space<vmem>>, vector<1x1x64x64xbf16>
    %14 = vector.shape_cast %13 : vector<1x1x64x64xbf16> to vector<64x64xbf16>
    %cst_19 = arith.constant dense<0.000000e+00> : vector<4x64xf32>
    %15 = tpu.matmul %12, %14, %cst_19 {dimension_numbers = #tpu.dot_dimension_numbers<[1], [0], [0], [1], [0, 0, 1, 1], [], []>} : vector<4x64xbf16>, vector<64x64xbf16>, vector<4x64xf32> -> vector<4x64xf32>
    %16 = arith.addf %11, %15 : vector<4x64xf32>
    %17 = vector.extract_strided_slice %1 {offsets = [2, 0], sizes = [4, 64], strides = [1, 1]} : vector<6x64xbf16> to vector<4x64xbf16>
    %c0_20 = arith.constant 0 : index
    %c2 = arith.constant 2 : index
    %c0_21 = arith.constant 0 : index
    %c0_22 = arith.constant 0 : index
    %18 = vector.load %arg5[%c0_20, %c2, %c0_21, %c0_22] : memref<3x3x64x64xbf16, #tpu.memory_space<vmem>>, vector<1x1x64x64xbf16>
    %19 = vector.shape_cast %18 : vector<1x1x64x64xbf16> to vector<64x64xbf16>
    %cst_23 = arith.constant dense<0.000000e+00> : vector<4x64xf32>
    %20 = tpu.matmul %17, %19, %cst_23 {dimension_numbers = #tpu.dot_dimension_numbers<[1], [0], [0], [1], [0, 0, 1, 1], [], []>} : vector<4x64xbf16>, vector<64x64xbf16>, vector<4x64xf32> -> vector<4x64xf32>
    %21 = arith.addf %16, %20 : vector<4x64xf32>
    %22 = vector.extract_strided_slice %3 {offsets = [0, 0], sizes = [4, 64], strides = [1, 1]} : vector<6x64xbf16> to vector<4x64xbf16>
    %c1_24 = arith.constant 1 : index
    %c0_25 = arith.constant 0 : index
    %c0_26 = arith.constant 0 : index
    %c0_27 = arith.constant 0 : index
    %23 = vector.load %arg5[%c1_24, %c0_25, %c0_26, %c0_27] : memref<3x3x64x64xbf16, #tpu.memory_space<vmem>>, vector<1x1x64x64xbf16>
    %24 = vector.shape_cast %23 : vector<1x1x64x64xbf16> to vector<64x64xbf16>
    %cst_28 = arith.constant dense<0.000000e+00> : vector<4x64xf32>
    %25 = tpu.matmul %22, %24, %cst_28 {dimension_numbers = #tpu.dot_dimension_numbers<[1], [0], [0], [1], [0, 0, 1, 1], [], []>} : vector<4x64xbf16>, vector<64x64xbf16>, vector<4x64xf32> -> vector<4x64xf32>
    %26 = arith.addf %21, %25 : vector<4x64xf32>
    %27 = vector.extract_strided_slice %3 {offsets = [1, 0], sizes = [4, 64], strides = [1, 1]} : vector<6x64xbf16> to vector<4x64xbf16>
    %c1_29 = arith.constant 1 : index
    %c1_30 = arith.constant 1 : index
    %c0_31 = arith.constant 0 : index
    %c0_32 = arith.constant 0 : index
    %28 = vector.load %arg5[%c1_29, %c1_30, %c0_31, %c0_32] : memref<3x3x64x64xbf16, #tpu.memory_space<vmem>>, vector<1x1x64x64xbf16>
    %29 = vector.shape_cast %28 : vector<1x1x64x64xbf16> to vector<64x64xbf16>
    %cst_33 = arith.constant dense<0.000000e+00> : vector<4x64xf32>
    %30 = tpu.matmul %27, %29, %cst_33 {dimension_numbers = #tpu.dot_dimension_numbers<[1], [0], [0], [1], [0, 0, 1, 1], [], []>} : vector<4x64xbf16>, vector<64x64xbf16>, vector<4x64xf32> -> vector<4x64xf32>
    %31 = arith.addf %26, %30 : vector<4x64xf32>
    %32 = vector.extract_strided_slice %3 {offsets = [2, 0], sizes = [4, 64], strides = [1, 1]} : vector<6x64xbf16> to vector<4x64xbf16>
    %c1_34 = arith.constant 1 : index
    %c2_35 = arith.constant 2 : index
    %c0_36 = arith.constant 0 : index
    %c0_37 = arith.constant 0 : index
    %33 = vector.load %arg5[%c1_34, %c2_35, %c0_36, %c0_37] : memref<3x3x64x64xbf16, #tpu.memory_space<vmem>>, vector<1x1x64x64xbf16>
    %34 = vector.shape_cast %33 : vector<1x1x64x64xbf16> to vector<64x64xbf16>
    %cst_38 = arith.constant dense<0.000000e+00> : vector<4x64xf32>
    %35 = tpu.matmul %32, %34, %cst_38 {dimension_numbers = #tpu.dot_dimension_numbers<[1], [0], [0], [1], [0, 0, 1, 1], [], []>} : vector<4x64xbf16>, vector<64x64xbf16>, vector<4x64xf32> -> vector<4x64xf32>
    %36 = arith.addf %31, %35 : vector<4x64xf32>
    %37 = vector.extract_strided_slice %5 {offsets = [0, 0], sizes = [4, 64], strides = [1, 1]} : vector<6x64xbf16> to vector<4x64xbf16>
    %c2_39 = arith.constant 2 : index
    %c0_40 = arith.constant 0 : index
    %c0_41 = arith.constant 0 : index
    %c0_42 = arith.constant 0 : index
    %38 = vector.load %arg5[%c2_39, %c0_40, %c0_41, %c0_42] : memref<3x3x64x64xbf16, #tpu.memory_space<vmem>>, vector<1x1x64x64xbf16>
    %39 = vector.shape_cast %38 : vector<1x1x64x64xbf16> to vector<64x64xbf16>
    %cst_43 = arith.constant dense<0.000000e+00> : vector<4x64xf32>
    %40 = tpu.matmul %37, %39, %cst_43 {dimension_numbers = #tpu.dot_dimension_numbers<[1], [0], [0], [1], [0, 0, 1, 1], [], []>} : vector<4x64xbf16>, vector<64x64xbf16>, vector<4x64xf32> -> vector<4x64xf32>
    %41 = arith.addf %36, %40 : vector<4x64xf32>
    %42 = vector.extract_strided_slice %5 {offsets = [1, 0], sizes = [4, 64], strides = [1, 1]} : vector<6x64xbf16> to vector<4x64xbf16>
    %c2_44 = arith.constant 2 : index
    %c1_45 = arith.constant 1 : index
    %c0_46 = arith.constant 0 : index
    %c0_47 = arith.constant 0 : index
    %43 = vector.load %arg5[%c2_44, %c1_45, %c0_46, %c0_47] : memref<3x3x64x64xbf16, #tpu.memory_space<vmem>>, vector<1x1x64x64xbf16>
    %44 = vector.shape_cast %43 : vector<1x1x64x64xbf16> to vector<64x64xbf16>
    %cst_48 = arith.constant dense<0.000000e+00> : vector<4x64xf32>
    %45 = tpu.matmul %42, %44, %cst_48 {dimension_numbers = #tpu.dot_dimension_numbers<[1], [0], [0], [1], [0, 0, 1, 1], [], []>} : vector<4x64xbf16>, vector<64x64xbf16>, vector<4x64xf32> -> vector<4x64xf32>
    %46 = arith.addf %41, %45 : vector<4x64xf32>
    %47 = vector.extract_strided_slice %5 {offsets = [2, 0], sizes = [4, 64], strides = [1, 1]} : vector<6x64xbf16> to vector<4x64xbf16>
    %c2_49 = arith.constant 2 : index
    %c2_50 = arith.constant 2 : index
    %c0_51 = arith.constant 0 : index
    %c0_52 = arith.constant 0 : index
    %48 = vector.load %arg5[%c2_49, %c2_50, %c0_51, %c0_52] : memref<3x3x64x64xbf16, #tpu.memory_space<vmem>>, vector<1x1x64x64xbf16>
    %49 = vector.shape_cast %48 : vector<1x1x64x64xbf16> to vector<64x64xbf16>
    %cst_53 = arith.constant dense<0.000000e+00> : vector<4x64xf32>
    %50 = tpu.matmul %47, %49, %cst_53 {dimension_numbers = #tpu.dot_dimension_numbers<[1], [0], [0], [1], [0, 0, 1, 1], [], []>} : vector<4x64xbf16>, vector<64x64xbf16>, vector<4x64xf32> -> vector<4x64xf32>
    %51 = arith.addf %46, %50 : vector<4x64xf32>
    %c0_54 = arith.constant 0 : index
    %c0_55 = arith.constant 0 : index
    %52 = vector.load %arg6[%c0_54, %c0_55] : memref<1x64xf32, #tpu.memory_space<vmem>>, vector<1x64xf32>
    %53 = vector.broadcast %52 : vector<1x64xf32> to vector<4x64xf32>
    %54 = arith.addf %51, %53 : vector<4x64xf32>
    %55 = arith.truncf %54 : vector<4x64xf32> to vector<4x64xbf16>
    %c0_56 = arith.constant 0 : index
    %c0_57 = arith.constant 0 : index
    %c0_58 = arith.constant 0 : index
    %c0_59 = arith.constant 0 : index
    %56 = vector.load %arg7[%c0_56, %c0_57, %c0_58, %c0_59] : memref<1x1x4x64xbf16, #tpu.memory_space<vmem>>, vector<1x1x4x64xbf16>
    %57 = vector.shape_cast %56 : vector<1x1x4x64xbf16> to vector<4x64xbf16>
    %58 = vector.shape_cast %55 : vector<4x64xbf16> to vector<1x1x4x64xbf16>
    tpu.vector_store %arg7[%c0_56, %c0_57, %c0_58, %c0_59], %58 {strides = array<i32>} : memref<1x1x4x64xbf16, #tpu.memory_space<vmem>>, vector<1x1x4x64xbf16>,
    %c0_i32 = arith.constant 0 : i32
    %59 = arith.cmpi eq, %arg0, %c0_i32 : i32
    %c0_i32_60 = arith.constant 0 : i32
    %60 = arith.cmpi eq, %arg1, %c0_i32_60 : i32
    %61 = arith.andi %59, %60 : i1
    %62 = arith.extui %61 : i1 to i32
    %c0_i32_61 = arith.constant 0 : i32
    %63 = arith.cmpi ne, %62, %c0_i32_61 : i32
    scf.if %63 {
      %cst_72 = arith.constant 0.000000e+00 : f32
      %75 = vector.broadcast %cst_72 : f32 to vector<1x64xf32>
      %c0_73 = arith.constant 0 : index
      %c0_74 = arith.constant 0 : index
      %76 = vector.load %arg8[%c0_73, %c0_74] : memref<1x64xf32, #tpu.memory_space<vmem>>, vector<1x64xf32>
      tpu.vector_store %arg8[%c0_73, %c0_74], %75 {strides = array<i32>} : memref<1x64xf32, #tpu.memory_space<vmem>>, vector<1x64xf32>,
      %cst_75 = arith.constant 0.000000e+00 : f32
      %77 = vector.broadcast %cst_75 : f32 to vector<1x64xf32>
      %c0_76 = arith.constant 0 : index
      %c0_77 = arith.constant 0 : index
      %78 = vector.load %arg9[%c0_76, %c0_77] : memref<1x64xf32, #tpu.memory_space<vmem>>, vector<1x64xf32>
      tpu.vector_store %arg9[%c0_76, %c0_77], %77 {strides = array<i32>} : memref<1x64xf32, #tpu.memory_space<vmem>>, vector<1x64xf32>,
    } else {
    }
    %c0_62 = arith.constant 0 : index
    %c0_63 = arith.constant 0 : index
    %64 = vector.load %arg8[%c0_62, %c0_63] : memref<1x64xf32, #tpu.memory_space<vmem>>, vector<1x64xf32>
    %cst_64 = arith.constant dense<0.000000e+00> : vector<64xf32>
    %65 = vector.multi_reduction <add>, %54, %cst_64 [0] : vector<4x64xf32> to vector<64xf32>
    %66 = vector.shape_cast %65 : vector<64xf32> to vector<1x64xf32>
    %67 = arith.addf %64, %66 : vector<1x64xf32>
    %c0_65 = arith.constant 0 : index
    %c0_66 = arith.constant 0 : index
    %68 = vector.load %arg8[%c0_65, %c0_66] : memref<1x64xf32, #tpu.memory_space<vmem>>, vector<1x64xf32>
    tpu.vector_store %arg8[%c0_65, %c0_66], %67 {strides = array<i32>} : memref<1x64xf32, #tpu.memory_space<vmem>>, vector<1x64xf32>,
    %c0_67 = arith.constant 0 : index
    %c0_68 = arith.constant 0 : index
    %69 = vector.load %arg9[%c0_67, %c0_68] : memref<1x64xf32, #tpu.memory_space<vmem>>, vector<1x64xf32>
    %70 = arith.mulf %54, %54 : vector<4x64xf32>
    %cst_69 = arith.constant dense<0.000000e+00> : vector<64xf32>
    %71 = vector.multi_reduction <add>, %70, %cst_69 [0] : vector<4x64xf32> to vector<64xf32>
    %72 = vector.shape_cast %71 : vector<64xf32> to vector<1x64xf32>
    %73 = arith.addf %69, %72 : vector<1x64xf32>
    %c0_70 = arith.constant 0 : index
    %c0_71 = arith.constant 0 : index
    %74 = vector.load %arg9[%c0_70, %c0_71] : memref<1x64xf32, #tpu.memory_space<vmem>>, vector<1x64xf32>
    tpu.vector_store %arg9[%c0_70, %c0_71], %73 {strides = array<i32>} : memref<1x64xf32, #tpu.memory_space<vmem>>, vector<1x64xf32>,
    return
  }
  func.func @transform_0(%arg0: i32, %arg1: i32) -> (i32, i32, i32, i32) {
    %c0_i32 = arith.constant 0 : i32
    %0 = arith.addi %arg1, %c0_i32 : i32
    %c0_i32_0 = arith.constant 0 : i32
    %c0_i32_1 = arith.constant 0 : i32
    %c0_i32_2 = arith.constant 0 : i32
    return %arg0, %0, %c0_i32_0, %c0_i32_1 : i32, i32, i32, i32
  }
  func.func @transform_1(%arg0: i32, %arg1: i32) -> (i32, i32, i32, i32) {
    %c1_i32 = arith.constant 1 : i32
    %0 = arith.addi %arg1, %c1_i32 : i32
    %c0_i32 = arith.constant 0 : i32
    %c0_i32_0 = arith.constant 0 : i32
    %c0_i32_1 = arith.constant 0 : i32
    return %arg0, %0, %c0_i32, %c0_i32_0 : i32, i32, i32, i32
  }
  func.func @transform_2(%arg0: i32, %arg1: i32) -> (i32, i32, i32, i32) {
    %c2_i32 = arith.constant 2 : i32
    %0 = arith.addi %arg1, %c2_i32 : i32
    %c0_i32 = arith.constant 0 : i32
    %c0_i32_0 = arith.constant 0 : i32
    %c0_i32_1 = arith.constant 0 : i32
    return %arg0, %0, %c0_i32, %c0_i32_0 : i32, i32, i32, i32
  }
  func.func @transform_3(%arg0: i32, %arg1: i32) -> (i32, i32, i32, i32) {
    %c0_i32 = arith.constant 0 : i32
    %c0_i32_0 = arith.constant 0 : i32
    %c0_i32_1 = arith.constant 0 : i32
    %c0_i32_2 = arith.constant 0 : i32
    %c0_i32_3 = arith.constant 0 : i32
    return %c0_i32, %c0_i32_0, %c0_i32_1, %c0_i32_2 : i32, i32, i32, i32
  }
  func.func @transform_4(%arg0: i32, %arg1: i32) -> (i32, i32) {
    %c0_i32 = arith.constant 0 : i32
    %c0_i32_0 = arith.constant 0 : i32
    %c0_i32_1 = arith.constant 0 : i32
    return %c0_i32, %c0_i32_0 : i32, i32
  }
  func.func @transform_5(%arg0: i32, %arg1: i32) -> (i32, i32, i32, i32) {
    %c0_i32 = arith.constant 0 : i32
    %c0_i32_0 = arith.constant 0 : i32
    %c0_i32_1 = arith.constant 0 : i32
    return %arg0, %arg1, %c0_i32, %c0_i32_0 : i32, i32, i32, i32
  }
  func.func @transform_6(%arg0: i32, %arg1: i32) -> (i32, i32) {
    %c0_i32 = arith.constant 0 : i32
    %c0_i32_0 = arith.constant 0 : i32
    %c0_i32_1 = arith.constant 0 : i32
    return %c0_i32, %c0_i32_0 : i32, i32
  }
  func.func @transform_7(%arg0: i32, %arg1: i32) -> (i32, i32) {
    %c0_i32 = arith.constant 0 : i32
    %c0_i32_0 = arith.constant 0 : i32
    %c0_i32_1 = arith.constant 0 : i32
    return %c0_i32, %c0_i32_0 : i32, i32
  }
}

module attributes {stable_mosaic.version = 11 : i64} {
  func.func @_convT_kernel(%arg0: i32, %arg1: i32, %arg2: memref<1x1x4x64xbf16, #tpu.memory_space<vmem>>, %arg3: memref<64x64xbf16, #tpu.memory_space<vmem>>, %arg4: memref<64x64xbf16, #tpu.memory_space<vmem>>, %arg5: memref<1x64xf32, #tpu.memory_space<vmem>>, %arg6: memref<1x1x2x4x64xbf16, #tpu.memory_space<vmem>>) attributes {dimension_semantics = [#tpu.dimension_semantics<parallel>, #tpu.dimension_semantics<parallel>], iteration_bounds = array<i64: 2, 4>, scalar_prefetch = 0 : i64, scratch_operands = 0 : i64, tpu.core_type = #tpu.core_type<tc>, window_params = [{transform_indices = @transform_0, window_bounds = array<i64: 1, 1, 4, 64>}, {pipeline_mode = #tpu.pipeline_mode<synchronous>, transform_indices = @transform_1, window_bounds = array<i64: 64, 64>}, {pipeline_mode = #tpu.pipeline_mode<synchronous>, transform_indices = @transform_2, window_bounds = array<i64: 64, 64>}, {pipeline_mode = #tpu.pipeline_mode<synchronous>, transform_indices = @transform_3, window_bounds = array<i64: 1, 64>}, {transform_indices = @transform_4, window_bounds = array<i64: 1, 1, 2, 4, 64>}]} {
    %c0 = arith.constant 0 : index
    %c0_0 = arith.constant 0 : index
    %c0_1 = arith.constant 0 : index
    %c0_2 = arith.constant 0 : index
    %0 = vector.load %arg2[%c0, %c0_0, %c0_1, %c0_2] : memref<1x1x4x64xbf16, #tpu.memory_space<vmem>>, vector<1x1x4x64xbf16>
    %1 = vector.shape_cast %0 : vector<1x1x4x64xbf16> to vector<4x64xbf16>
    %c0_3 = arith.constant 0 : index
    %c0_4 = arith.constant 0 : index
    %2 = vector.load %arg3[%c0_3, %c0_4] : memref<64x64xbf16, #tpu.memory_space<vmem>>, vector<64x64xbf16>
    %cst = arith.constant dense<0.000000e+00> : vector<4x64xf32>
    %3 = tpu.matmul %1, %2, %cst {dimension_numbers = #tpu.dot_dimension_numbers<[1], [0], [0], [1], [0, 0, 1, 1], [], []>} : vector<4x64xbf16>, vector<64x64xbf16>, vector<4x64xf32> -> vector<4x64xf32>
    %c0_5 = arith.constant 0 : index
    %c0_6 = arith.constant 0 : index
    %4 = vector.load %arg5[%c0_5, %c0_6] : memref<1x64xf32, #tpu.memory_space<vmem>>, vector<1x64xf32>
    %5 = vector.broadcast %4 : vector<1x64xf32> to vector<4x64xf32>
    %6 = arith.addf %3, %5 : vector<4x64xf32>
    %c0_7 = arith.constant 0 : index
    %c0_8 = arith.constant 0 : index
    %7 = vector.load %arg4[%c0_7, %c0_8] : memref<64x64xbf16, #tpu.memory_space<vmem>>, vector<64x64xbf16>
    %cst_9 = arith.constant dense<0.000000e+00> : vector<4x64xf32>
    %8 = tpu.matmul %1, %7, %cst_9 {dimension_numbers = #tpu.dot_dimension_numbers<[1], [0], [0], [1], [0, 0, 1, 1], [], []>} : vector<4x64xbf16>, vector<64x64xbf16>, vector<4x64xf32> -> vector<4x64xf32>
    %c0_10 = arith.constant 0 : index
    %c0_11 = arith.constant 0 : index
    %9 = vector.load %arg5[%c0_10, %c0_11] : memref<1x64xf32, #tpu.memory_space<vmem>>, vector<1x64xf32>
    %10 = vector.broadcast %9 : vector<1x64xf32> to vector<4x64xf32>
    %11 = arith.addf %8, %10 : vector<4x64xf32>
    %12 = arith.truncf %6 : vector<4x64xf32> to vector<4x64xbf16>
    %c0_12 = arith.constant 0 : index
    %c0_13 = arith.constant 0 : index
    %c0_14 = arith.constant 0 : index
    %c0_15 = arith.constant 0 : index
    %c0_16 = arith.constant 0 : index
    %13 = vector.load %arg6[%c0_12, %c0_13, %c0_14, %c0_15, %c0_16] : memref<1x1x2x4x64xbf16, #tpu.memory_space<vmem>>, vector<1x1x1x4x64xbf16>
    %14 = vector.shape_cast %13 : vector<1x1x1x4x64xbf16> to vector<4x64xbf16>
    %15 = vector.shape_cast %12 : vector<4x64xbf16> to vector<1x1x1x4x64xbf16>
    tpu.vector_store %arg6[%c0_12, %c0_13, %c0_14, %c0_15, %c0_16], %15 {strides = array<i32>} : memref<1x1x2x4x64xbf16, #tpu.memory_space<vmem>>, vector<1x1x1x4x64xbf16>,
    %16 = arith.truncf %11 : vector<4x64xf32> to vector<4x64xbf16>
    %c0_17 = arith.constant 0 : index
    %c0_18 = arith.constant 0 : index
    %c1 = arith.constant 1 : index
    %c0_19 = arith.constant 0 : index
    %c0_20 = arith.constant 0 : index
    %17 = vector.load %arg6[%c0_17, %c0_18, %c1, %c0_19, %c0_20] : memref<1x1x2x4x64xbf16, #tpu.memory_space<vmem>>, vector<1x1x1x4x64xbf16>
    %18 = vector.shape_cast %17 : vector<1x1x1x4x64xbf16> to vector<4x64xbf16>
    %19 = vector.shape_cast %16 : vector<4x64xbf16> to vector<1x1x1x4x64xbf16>
    tpu.vector_store %arg6[%c0_17, %c0_18, %c1, %c0_19, %c0_20], %19 {strides = array<i32>} : memref<1x1x2x4x64xbf16, #tpu.memory_space<vmem>>, vector<1x1x1x4x64xbf16>,
    return
  }
  func.func @transform_0(%arg0: i32, %arg1: i32) -> (i32, i32, i32, i32) {
    %c0_i32 = arith.constant 0 : i32
    %c0_i32_0 = arith.constant 0 : i32
    %c0_i32_1 = arith.constant 0 : i32
    return %arg0, %arg1, %c0_i32, %c0_i32_0 : i32, i32, i32, i32
  }
  func.func @transform_1(%arg0: i32, %arg1: i32) -> (i32, i32) {
    %c0_i32 = arith.constant 0 : i32
    %c0_i32_0 = arith.constant 0 : i32
    %c0_i32_1 = arith.constant 0 : i32
    return %c0_i32, %c0_i32_0 : i32, i32
  }
  func.func @transform_2(%arg0: i32, %arg1: i32) -> (i32, i32) {
    %c0_i32 = arith.constant 0 : i32
    %c0_i32_0 = arith.constant 0 : i32
    %c0_i32_1 = arith.constant 0 : i32
    return %c0_i32, %c0_i32_0 : i32, i32
  }
  func.func @transform_3(%arg0: i32, %arg1: i32) -> (i32, i32) {
    %c0_i32 = arith.constant 0 : i32
    %c0_i32_0 = arith.constant 0 : i32
    %c0_i32_1 = arith.constant 0 : i32
    return %c0_i32, %c0_i32_0 : i32, i32
  }
  func.func @transform_4(%arg0: i32, %arg1: i32) -> (i32, i32, i32, i32, i32) {
    %c0_i32 = arith.constant 0 : i32
    %c0_i32_0 = arith.constant 0 : i32
    %c0_i32_1 = arith.constant 0 : i32
    %c0_i32_2 = arith.constant 0 : i32
    return %arg0, %arg1, %c0_i32, %c0_i32_0, %c0_i32_1 : i32, i32, i32, i32, i32
  }
}

module attributes {stable_mosaic.version = 11 : i64} {
  func.func @_att_pre_kernel(%arg0: i32, %arg1: memref<128x32xbf16, #tpu.memory_space<vmem>>, %arg2: memref<128x32xbf16, #tpu.memory_space<vmem>>, %arg3: memref<64x32xbf16, #tpu.memory_space<vmem>>, %arg4: memref<1x32xf32, #tpu.memory_space<vmem>>, %arg5: memref<128x32xbf16, #tpu.memory_space<vmem>>, %arg6: memref<1x32xf32, #tpu.memory_space<vmem>>, %arg7: memref<1x32xf32, #tpu.memory_space<vmem>>) attributes {dimension_semantics = [#tpu.dimension_semantics<arbitrary>], iteration_bounds = array<i64: 1>, scalar_prefetch = 0 : i64, scratch_operands = 0 : i64, tpu.core_type = #tpu.core_type<tc>, window_params = [{transform_indices = @transform_0, window_bounds = array<i64: 128, 32>}, {transform_indices = @transform_1, window_bounds = array<i64: 128, 32>}, {pipeline_mode = #tpu.pipeline_mode<synchronous>, transform_indices = @transform_2, window_bounds = array<i64: 64, 32>}, {pipeline_mode = #tpu.pipeline_mode<synchronous>, transform_indices = @transform_3, window_bounds = array<i64: 1, 32>}, {transform_indices = @transform_4, window_bounds = array<i64: 128, 32>}, {pipeline_mode = #tpu.pipeline_mode<synchronous>, transform_indices = @transform_5, window_bounds = array<i64: 1, 32>}, {pipeline_mode = #tpu.pipeline_mode<synchronous>, transform_indices = @transform_6, window_bounds = array<i64: 1, 32>}]} {
    %c0 = arith.constant 0 : index
    %c0_0 = arith.constant 0 : index
    %0 = vector.load %arg1[%c0, %c0_0] : memref<128x32xbf16, #tpu.memory_space<vmem>>, vector<128x32xbf16>
    %c0_1 = arith.constant 0 : index
    %c0_2 = arith.constant 0 : index
    %1 = vector.load %arg2[%c0_1, %c0_2] : memref<128x32xbf16, #tpu.memory_space<vmem>>, vector<128x32xbf16>
    %2 = tpu.concatenate %0, %1 in 1 : vector<128x32xbf16>, vector<128x32xbf16> -> vector<128x64xbf16>
    %c0_3 = arith.constant 0 : index
    %c0_4 = arith.constant 0 : index
    %3 = vector.load %arg3[%c0_3, %c0_4] : memref<64x32xbf16, #tpu.memory_space<vmem>>, vector<64x32xbf16>
    %cst = arith.constant dense<0.000000e+00> : vector<128x32xf32>
    %4 = tpu.matmul %2, %3, %cst {dimension_numbers = #tpu.dot_dimension_numbers<[1], [0], [0], [1], [0, 0, 1, 1], [], []>} : vector<128x64xbf16>, vector<64x32xbf16>, vector<128x32xf32> -> vector<128x32xf32>
    %c0_5 = arith.constant 0 : index
    %c0_6 = arith.constant 0 : index
    %5 = vector.load %arg4[%c0_5, %c0_6] : memref<1x32xf32, #tpu.memory_space<vmem>>, vector<1x32xf32>
    %6 = vector.broadcast %5 : vector<1x32xf32> to vector<128x32xf32>
    %7 = arith.addf %4, %6 : vector<128x32xf32>
    %8 = arith.truncf %7 : vector<128x32xf32> to vector<128x32xbf16>
    %c0_7 = arith.constant 0 : index
    %c0_8 = arith.constant 0 : index
    %9 = vector.load %arg5[%c0_7, %c0_8] : memref<128x32xbf16, #tpu.memory_space<vmem>>, vector<128x32xbf16>
    tpu.vector_store %arg5[%c0_7, %c0_8], %8 {strides = array<i32>} : memref<128x32xbf16, #tpu.memory_space<vmem>>, vector<128x32xbf16>,
    %c0_i32 = arith.constant 0 : i32
    %10 = arith.cmpi eq, %arg0, %c0_i32 : i32
    %11 = arith.extui %10 : i1 to i32
    %c0_i32_9 = arith.constant 0 : i32
    %12 = arith.cmpi ne, %11, %c0_i32_9 : i32
    scf.if %12 {
      %cst_20 = arith.constant 0.000000e+00 : f32
      %24 = vector.broadcast %cst_20 : f32 to vector<1x32xf32>
      %c0_21 = arith.constant 0 : index
      %c0_22 = arith.constant 0 : index
      %25 = vector.load %arg6[%c0_21, %c0_22] : memref<1x32xf32, #tpu.memory_space<vmem>>, vector<1x32xf32>
      tpu.vector_store %arg6[%c0_21, %c0_22], %24 {strides = array<i32>} : memref<1x32xf32, #tpu.memory_space<vmem>>, vector<1x32xf32>,
      %cst_23 = arith.constant 0.000000e+00 : f32
      %26 = vector.broadcast %cst_23 : f32 to vector<1x32xf32>
      %c0_24 = arith.constant 0 : index
      %c0_25 = arith.constant 0 : index
      %27 = vector.load %arg7[%c0_24, %c0_25] : memref<1x32xf32, #tpu.memory_space<vmem>>, vector<1x32xf32>
      tpu.vector_store %arg7[%c0_24, %c0_25], %26 {strides = array<i32>} : memref<1x32xf32, #tpu.memory_space<vmem>>, vector<1x32xf32>,
    } else {
    }
    %c0_10 = arith.constant 0 : index
    %c0_11 = arith.constant 0 : index
    %13 = vector.load %arg6[%c0_10, %c0_11] : memref<1x32xf32, #tpu.memory_space<vmem>>, vector<1x32xf32>
    %cst_12 = arith.constant dense<0.000000e+00> : vector<32xf32>
    %14 = vector.multi_reduction <add>, %7, %cst_12 [0] : vector<128x32xf32> to vector<32xf32>
    %15 = vector.shape_cast %14 : vector<32xf32> to vector<1x32xf32>
    %16 = arith.addf %13, %15 : vector<1x32xf32>
    %c0_13 = arith.constant 0 : index
    %c0_14 = arith.constant 0 : index
    %17 = vector.load %arg6[%c0_13, %c0_14] : memref<1x32xf32, #tpu.memory_space<vmem>>, vector<1x32xf32>
    tpu.vector_store %arg6[%c0_13, %c0_14], %16 {strides = array<i32>} : memref<1x32xf32, #tpu.memory_space<vmem>>, vector<1x32xf32>,
    %c0_15 = arith.constant 0 : index
    %c0_16 = arith.constant 0 : index
    %18 = vector.load %arg7[%c0_15, %c0_16] : memref<1x32xf32, #tpu.memory_space<vmem>>, vector<1x32xf32>
    %19 = arith.mulf %7, %7 : vector<128x32xf32>
    %cst_17 = arith.constant dense<0.000000e+00> : vector<32xf32>
    %20 = vector.multi_reduction <add>, %19, %cst_17 [0] : vector<128x32xf32> to vector<32xf32>
    %21 = vector.shape_cast %20 : vector<32xf32> to vector<1x32xf32>
    %22 = arith.addf %18, %21 : vector<1x32xf32>
    %c0_18 = arith.constant 0 : index
    %c0_19 = arith.constant 0 : index
    %23 = vector.load %arg7[%c0_18, %c0_19] : memref<1x32xf32, #tpu.memory_space<vmem>>, vector<1x32xf32>
    tpu.vector_store %arg7[%c0_18, %c0_19], %22 {strides = array<i32>} : memref<1x32xf32, #tpu.memory_space<vmem>>, vector<1x32xf32>,
    return
  }
  func.func @transform_0(%arg0: i32) -> (i32, i32) {
    %c0_i32 = arith.constant 0 : i32
    %c0_i32_0 = arith.constant 0 : i32
    return %arg0, %c0_i32 : i32, i32
  }
  func.func @transform_1(%arg0: i32) -> (i32, i32) {
    %c0_i32 = arith.constant 0 : i32
    %c0_i32_0 = arith.constant 0 : i32
    return %arg0, %c0_i32 : i32, i32
  }
  func.func @transform_2(%arg0: i32) -> (i32, i32) {
    %c0_i32 = arith.constant 0 : i32
    %c0_i32_0 = arith.constant 0 : i32
    %c0_i32_1 = arith.constant 0 : i32
    return %c0_i32, %c0_i32_0 : i32, i32
  }
  func.func @transform_3(%arg0: i32) -> (i32, i32) {
    %c0_i32 = arith.constant 0 : i32
    %c0_i32_0 = arith.constant 0 : i32
    %c0_i32_1 = arith.constant 0 : i32
    return %c0_i32, %c0_i32_0 : i32, i32
  }
  func.func @transform_4(%arg0: i32) -> (i32, i32) {
    %c0_i32 = arith.constant 0 : i32
    %c0_i32_0 = arith.constant 0 : i32
    return %arg0, %c0_i32 : i32, i32
  }
  func.func @transform_5(%arg0: i32) -> (i32, i32) {
    %c0_i32 = arith.constant 0 : i32
    %c0_i32_0 = arith.constant 0 : i32
    %c0_i32_1 = arith.constant 0 : i32
    return %c0_i32, %c0_i32_0 : i32, i32
  }
  func.func @transform_6(%arg0: i32) -> (i32, i32) {
    %c0_i32 = arith.constant 0 : i32
    %c0_i32_0 = arith.constant 0 : i32
    %c0_i32_1 = arith.constant 0 : i32
    return %c0_i32, %c0_i32_0 : i32, i32
  }
}

module attributes {stable_mosaic.version = 11 : i64} {
  func.func @_att_post_kernel(%arg0: i32, %arg1: memref<128x32xbf16, #tpu.memory_space<vmem>>, %arg2: memref<128x32xbf16, #tpu.memory_space<vmem>>, %arg3: memref<1x32xf32, #tpu.memory_space<vmem>>, %arg4: memref<1x32xf32, #tpu.memory_space<vmem>>, %arg5: memref<1x32xf32, #tpu.memory_space<vmem>>, %arg6: memref<1x32xf32, #tpu.memory_space<vmem>>, %arg7: memref<1x32xf32, #tpu.memory_space<vmem>>, %arg8: memref<1x1xf32, #tpu.memory_space<vmem>>, %arg9: memref<128x32xbf16, #tpu.memory_space<vmem>>) attributes {dimension_semantics = [#tpu.dimension_semantics<parallel>], iteration_bounds = array<i64: 1>, scalar_prefetch = 0 : i64, scratch_operands = 0 : i64, tpu.core_type = #tpu.core_type<tc>, window_params = [{transform_indices = @transform_0, window_bounds = array<i64: 128, 32>}, {transform_indices = @transform_1, window_bounds = array<i64: 128, 32>}, {pipeline_mode = #tpu.pipeline_mode<synchronous>, transform_indices = @transform_2, window_bounds = array<i64: 1, 32>}, {pipeline_mode = #tpu.pipeline_mode<synchronous>, transform_indices = @transform_3, window_bounds = array<i64: 1, 32>}, {pipeline_mode = #tpu.pipeline_mode<synchronous>, transform_indices = @transform_4, window_bounds = array<i64: 1, 32>}, {pipeline_mode = #tpu.pipeline_mode<synchronous>, transform_indices = @transform_5, window_bounds = array<i64: 1, 32>}, {pipeline_mode = #tpu.pipeline_mode<synchronous>, transform_indices = @transform_6, window_bounds = array<i64: 1, 32>}, {pipeline_mode = #tpu.pipeline_mode<synchronous>, transform_indices = @transform_7, window_bounds = array<i64: 1, 1>}, {transform_indices = @transform_8, window_bounds = array<i64: 128, 32>}]} {
    %c0 = arith.constant 0 : index
    %c0_0 = arith.constant 0 : index
    %0 = vector.load %arg1[%c0, %c0_0] : memref<128x32xbf16, #tpu.memory_space<vmem>>, vector<128x32xbf16>
    %1 = arith.extf %0 : vector<128x32xbf16> to vector<128x32xf32>
    %c0_1 = arith.constant 0 : index
    %c0_2 = arith.constant 0 : index
    %2 = vector.load %arg3[%c0_1, %c0_2] : memref<1x32xf32, #tpu.memory_space<vmem>>, vector<1x32xf32>
    %3 = vector.broadcast %2 : vector<1x32xf32> to vector<128x32xf32>
    %4 = arith.subf %1, %3 : vector<128x32xf32>
    %c0_3 = arith.constant 0 : index
    %c0_4 = arith.constant 0 : index
    %5 = vector.load %arg4[%c0_3, %c0_4] : memref<1x32xf32, #tpu.memory_space<vmem>>, vector<1x32xf32>
    %6 = vector.broadcast %5 : vector<1x32xf32> to vector<128x32xf32>
    %7 = arith.mulf %4, %6 : vector<128x32xf32>
    %c0_5 = arith.constant 0 : index
    %c0_6 = arith.constant 0 : index
    %8 = vector.load %arg5[%c0_5, %c0_6] : memref<1x32xf32, #tpu.memory_space<vmem>>, vector<1x32xf32>
    %9 = vector.broadcast %8 : vector<1x32xf32> to vector<128x32xf32>
    %10 = arith.mulf %7, %9 : vector<128x32xf32>
    %c0_7 = arith.constant 0 : index
    %c0_8 = arith.constant 0 : index
    %11 = vector.load %arg6[%c0_7, %c0_8] : memref<1x32xf32, #tpu.memory_space<vmem>>, vector<1x32xf32>
    %12 = vector.broadcast %11 : vector<1x32xf32> to vector<128x32xf32>
    %13 = arith.addf %10, %12 : vector<128x32xf32>
    %cst = arith.constant 0.000000e+00 : f32
    %14 = vector.broadcast %cst : f32 to vector<128x32xf32>
    %15 = arith.maximumf %13, %14 : vector<128x32xf32>
    %c0_9 = arith.constant 0 : index
    %c0_10 = arith.constant 0 : index
    %16 = vector.load %arg7[%c0_9, %c0_10] : memref<1x32xf32, #tpu.memory_space<vmem>>, vector<1x32xf32>
    %17 = vector.broadcast %16 : vector<1x32xf32> to vector<128x32xf32>
    %18 = arith.mulf %15, %17 : vector<128x32xf32>
    %cst_11 = arith.constant dense<0.000000e+00> : vector<128xf32>
    %19 = vector.multi_reduction <add>, %18, %cst_11 [1] : vector<128x32xf32> to vector<128xf32>
    %20 = vector.shape_cast %19 : vector<128xf32> to vector<128x1xf32>
    %c0_12 = arith.constant 0 : index
    %c0_13 = arith.constant 0 : index
    %21 = vector.load %arg8[%c0_12, %c0_13] : memref<1x1xf32, #tpu.memory_space<vmem>>, vector<1x1xf32>
    %22 = vector.broadcast %21 : vector<1x1xf32> to vector<128x1xf32>
    %23 = arith.addf %20, %22 : vector<128x1xf32>
    %24 = arith.negf %23 : vector<128x1xf32>
    %25 = math.exp %24 : vector<128x1xf32>
    %cst_14 = arith.constant 1.000000e+00 : f32
    %26 = vector.broadcast %cst_14 : f32 to vector<128x1xf32>
    %27 = arith.addf %26, %25 : vector<128x1xf32>
    %28 = arith.divf %26, %27 : vector<128x1xf32>
    %c0_15 = arith.constant 0 : index
    %c0_16 = arith.constant 0 : index
    %29 = vector.load %arg2[%c0_15, %c0_16] : memref<128x32xbf16, #tpu.memory_space<vmem>>, vector<128x32xbf16>
    %30 = arith.extf %29 : vector<128x32xbf16> to vector<128x32xf32>
    %31 = vector.broadcast %28 : vector<128x1xf32> to vector<128x32xf32>
    %32 = arith.mulf %31, %30 : vector<128x32xf32>
    %33 = arith.truncf %32 : vector<128x32xf32> to vector<128x32xbf16>
    %c0_17 = arith.constant 0 : index
    %c0_18 = arith.constant 0 : index
    %34 = vector.load %arg9[%c0_17, %c0_18] : memref<128x32xbf16, #tpu.memory_space<vmem>>, vector<128x32xbf16>
    tpu.vector_store %arg9[%c0_17, %c0_18], %33 {strides = array<i32>} : memref<128x32xbf16, #tpu.memory_space<vmem>>, vector<128x32xbf16>,
    return
  }
  func.func @transform_0(%arg0: i32) -> (i32, i32) {
    %c0_i32 = arith.constant 0 : i32
    %c0_i32_0 = arith.constant 0 : i32
    return %arg0, %c0_i32 : i32, i32
  }
  func.func @transform_1(%arg0: i32) -> (i32, i32) {
    %c0_i32 = arith.constant 0 : i32
    %c0_i32_0 = arith.constant 0 : i32
    return %arg0, %c0_i32 : i32, i32
  }
  func.func @transform_2(%arg0: i32) -> (i32, i32) {
    %c0_i32 = arith.constant 0 : i32
    %c0_i32_0 = arith.constant 0 : i32
    %c0_i32_1 = arith.constant 0 : i32
    return %c0_i32, %c0_i32_0 : i32, i32
  }
  func.func @transform_3(%arg0: i32) -> (i32, i32) {
    %c0_i32 = arith.constant 0 : i32
    %c0_i32_0 = arith.constant 0 : i32
    %c0_i32_1 = arith.constant 0 : i32
    return %c0_i32, %c0_i32_0 : i32, i32
  }
  func.func @transform_4(%arg0: i32) -> (i32, i32) {
    %c0_i32 = arith.constant 0 : i32
    %c0_i32_0 = arith.constant 0 : i32
    %c0_i32_1 = arith.constant 0 : i32
    return %c0_i32, %c0_i32_0 : i32, i32
  }
  func.func @transform_5(%arg0: i32) -> (i32, i32) {
    %c0_i32 = arith.constant 0 : i32
    %c0_i32_0 = arith.constant 0 : i32
    %c0_i32_1 = arith.constant 0 : i32
    return %c0_i32, %c0_i32_0 : i32, i32
  }
  func.func @transform_6(%arg0: i32) -> (i32, i32) {
    %c0_i32 = arith.constant 0 : i32
    %c0_i32_0 = arith.constant 0 : i32
    %c0_i32_1 = arith.constant 0 : i32
    return %c0_i32, %c0_i32_0 : i32, i32
  }
  func.func @transform_7(%arg0: i32) -> (i32, i32) {
    %c0_i32 = arith.constant 0 : i32
    %c0_i32_0 = arith.constant 0 : i32
    %c0_i32_1 = arith.constant 0 : i32
    return %c0_i32, %c0_i32_0 : i32, i32
  }
  func.func @transform_8(%arg0: i32) -> (i32, i32) {
    %c0_i32 = arith.constant 0 : i32
    %c0_i32_0 = arith.constant 0 : i32
    return %arg0, %c0_i32 : i32, i32
  }
}

module attributes {stable_mosaic.version = 11 : i64} {
  func.func @_conv3x3_kernel(%arg0: i32, %arg1: i32, %arg2: memref<1x1x10x64xbf16, #tpu.memory_space<vmem>>, %arg3: memref<1x1x10x64xbf16, #tpu.memory_space<vmem>>, %arg4: memref<1x1x10x64xbf16, #tpu.memory_space<vmem>>, %arg5: memref<3x3x64x32xbf16, #tpu.memory_space<vmem>>, %arg6: memref<1x32xf32, #tpu.memory_space<vmem>>, %arg7: memref<1x1x8x32xbf16, #tpu.memory_space<vmem>>, %arg8: memref<1x32xf32, #tpu.memory_space<vmem>>, %arg9: memref<1x32xf32, #tpu.memory_space<vmem>>) attributes {dimension_semantics = [#tpu.dimension_semantics<arbitrary>, #tpu.dimension_semantics<arbitrary>], iteration_bounds = array<i64: 2, 8>, scalar_prefetch = 0 : i64, scratch_operands = 0 : i64, tpu.core_type = #tpu.core_type<tc>, window_params = [{transform_indices = @transform_0, window_bounds = array<i64: 1, 1, 10, 64>}, {transform_indices = @transform_1, window_bounds = array<i64: 1, 1, 10, 64>}, {transform_indices = @transform_2, window_bounds = array<i64: 1, 1, 10, 64>}, {pipeline_mode = #tpu.pipeline_mode<synchronous>, transform_indices = @transform_3, window_bounds = array<i64: 3, 3, 64, 32>}, {pipeline_mode = #tpu.pipeline_mode<synchronous>, transform_indices = @transform_4, window_bounds = array<i64: 1, 32>}, {transform_indices = @transform_5, window_bounds = array<i64: 1, 1, 8, 32>}, {pipeline_mode = #tpu.pipeline_mode<synchronous>, transform_indices = @transform_6, window_bounds = array<i64: 1, 32>}, {pipeline_mode = #tpu.pipeline_mode<synchronous>, transform_indices = @transform_7, window_bounds = array<i64: 1, 32>}]} {
    %c0 = arith.constant 0 : index
    %c0_0 = arith.constant 0 : index
    %c0_1 = arith.constant 0 : index
    %c0_2 = arith.constant 0 : index
    %0 = vector.load %arg2[%c0, %c0_0, %c0_1, %c0_2] : memref<1x1x10x64xbf16, #tpu.memory_space<vmem>>, vector<1x1x10x64xbf16>
    %1 = vector.shape_cast %0 : vector<1x1x10x64xbf16> to vector<10x64xbf16>
    %c0_3 = arith.constant 0 : index
    %c0_4 = arith.constant 0 : index
    %c0_5 = arith.constant 0 : index
    %c0_6 = arith.constant 0 : index
    %2 = vector.load %arg3[%c0_3, %c0_4, %c0_5, %c0_6] : memref<1x1x10x64xbf16, #tpu.memory_space<vmem>>, vector<1x1x10x64xbf16>
    %3 = vector.shape_cast %2 : vector<1x1x10x64xbf16> to vector<10x64xbf16>
    %c0_7 = arith.constant 0 : index
    %c0_8 = arith.constant 0 : index
    %c0_9 = arith.constant 0 : index
    %c0_10 = arith.constant 0 : index
    %4 = vector.load %arg4[%c0_7, %c0_8, %c0_9, %c0_10] : memref<1x1x10x64xbf16, #tpu.memory_space<vmem>>, vector<1x1x10x64xbf16>
    %5 = vector.shape_cast %4 : vector<1x1x10x64xbf16> to vector<10x64xbf16>
    %cst = arith.constant 0.000000e+00 : f32
    %6 = vector.broadcast %cst : f32 to vector<8x32xf32>
    %7 = vector.extract_strided_slice %1 {offsets = [0, 0], sizes = [8, 64], strides = [1, 1]} : vector<10x64xbf16> to vector<8x64xbf16>
    %c0_11 = arith.constant 0 : index
    %c0_12 = arith.constant 0 : index
    %c0_13 = arith.constant 0 : index
    %c0_14 = arith.constant 0 : index
    %8 = vector.load %arg5[%c0_11, %c0_12, %c0_13, %c0_14] : memref<3x3x64x32xbf16, #tpu.memory_space<vmem>>, vector<1x1x64x32xbf16>
    %9 = vector.shape_cast %8 : vector<1x1x64x32xbf16> to vector<64x32xbf16>
    %cst_15 = arith.constant dense<0.000000e+00> : vector<8x32xf32>
    %10 = tpu.matmul %7, %9, %cst_15 {dimension_numbers = #tpu.dot_dimension_numbers<[1], [0], [0], [1], [0, 0, 1, 1], [], []>} : vector<8x64xbf16>, vector<64x32xbf16>, vector<8x32xf32> -> vector<8x32xf32>
    %11 = arith.addf %6, %10 : vector<8x32xf32>
    %12 = vector.extract_strided_slice %1 {offsets = [1, 0], sizes = [8, 64], strides = [1, 1]} : vector<10x64xbf16> to vector<8x64xbf16>
    %c0_16 = arith.constant 0 : index
    %c1 = arith.constant 1 : index
    %c0_17 = arith.constant 0 : index
    %c0_18 = arith.constant 0 : index
    %13 = vector.load %arg5[%c0_16, %c1, %c0_17, %c0_18] : memref<3x3x64x32xbf16, #tpu.memory_space<vmem>>, vector<1x1x64x32xbf16>
    %14 = vector.shape_cast %13 : vector<1x1x64x32xbf16> to vector<64x32xbf16>
    %cst_19 = arith.constant dense<0.000000e+00> : vector<8x32xf32>
    %15 = tpu.matmul %12, %14, %cst_19 {dimension_numbers = #tpu.dot_dimension_numbers<[1], [0], [0], [1], [0, 0, 1, 1], [], []>} : vector<8x64xbf16>, vector<64x32xbf16>, vector<8x32xf32> -> vector<8x32xf32>
    %16 = arith.addf %11, %15 : vector<8x32xf32>
    %17 = vector.extract_strided_slice %1 {offsets = [2, 0], sizes = [8, 64], strides = [1, 1]} : vector<10x64xbf16> to vector<8x64xbf16>
    %c0_20 = arith.constant 0 : index
    %c2 = arith.constant 2 : index
    %c0_21 = arith.constant 0 : index
    %c0_22 = arith.constant 0 : index
    %18 = vector.load %arg5[%c0_20, %c2, %c0_21, %c0_22] : memref<3x3x64x32xbf16, #tpu.memory_space<vmem>>, vector<1x1x64x32xbf16>
    %19 = vector.shape_cast %18 : vector<1x1x64x32xbf16> to vector<64x32xbf16>
    %cst_23 = arith.constant dense<0.000000e+00> : vector<8x32xf32>
    %20 = tpu.matmul %17, %19, %cst_23 {dimension_numbers = #tpu.dot_dimension_numbers<[1], [0], [0], [1], [0, 0, 1, 1], [], []>} : vector<8x64xbf16>, vector<64x32xbf16>, vector<8x32xf32> -> vector<8x32xf32>
    %21 = arith.addf %16, %20 : vector<8x32xf32>
    %22 = vector.extract_strided_slice %3 {offsets = [0, 0], sizes = [8, 64], strides = [1, 1]} : vector<10x64xbf16> to vector<8x64xbf16>
    %c1_24 = arith.constant 1 : index
    %c0_25 = arith.constant 0 : index
    %c0_26 = arith.constant 0 : index
    %c0_27 = arith.constant 0 : index
    %23 = vector.load %arg5[%c1_24, %c0_25, %c0_26, %c0_27] : memref<3x3x64x32xbf16, #tpu.memory_space<vmem>>, vector<1x1x64x32xbf16>
    %24 = vector.shape_cast %23 : vector<1x1x64x32xbf16> to vector<64x32xbf16>
    %cst_28 = arith.constant dense<0.000000e+00> : vector<8x32xf32>
    %25 = tpu.matmul %22, %24, %cst_28 {dimension_numbers = #tpu.dot_dimension_numbers<[1], [0], [0], [1], [0, 0, 1, 1], [], []>} : vector<8x64xbf16>, vector<64x32xbf16>, vector<8x32xf32> -> vector<8x32xf32>
    %26 = arith.addf %21, %25 : vector<8x32xf32>
    %27 = vector.extract_strided_slice %3 {offsets = [1, 0], sizes = [8, 64], strides = [1, 1]} : vector<10x64xbf16> to vector<8x64xbf16>
    %c1_29 = arith.constant 1 : index
    %c1_30 = arith.constant 1 : index
    %c0_31 = arith.constant 0 : index
    %c0_32 = arith.constant 0 : index
    %28 = vector.load %arg5[%c1_29, %c1_30, %c0_31, %c0_32] : memref<3x3x64x32xbf16, #tpu.memory_space<vmem>>, vector<1x1x64x32xbf16>
    %29 = vector.shape_cast %28 : vector<1x1x64x32xbf16> to vector<64x32xbf16>
    %cst_33 = arith.constant dense<0.000000e+00> : vector<8x32xf32>
    %30 = tpu.matmul %27, %29, %cst_33 {dimension_numbers = #tpu.dot_dimension_numbers<[1], [0], [0], [1], [0, 0, 1, 1], [], []>} : vector<8x64xbf16>, vector<64x32xbf16>, vector<8x32xf32> -> vector<8x32xf32>
    %31 = arith.addf %26, %30 : vector<8x32xf32>
    %32 = vector.extract_strided_slice %3 {offsets = [2, 0], sizes = [8, 64], strides = [1, 1]} : vector<10x64xbf16> to vector<8x64xbf16>
    %c1_34 = arith.constant 1 : index
    %c2_35 = arith.constant 2 : index
    %c0_36 = arith.constant 0 : index
    %c0_37 = arith.constant 0 : index
    %33 = vector.load %arg5[%c1_34, %c2_35, %c0_36, %c0_37] : memref<3x3x64x32xbf16, #tpu.memory_space<vmem>>, vector<1x1x64x32xbf16>
    %34 = vector.shape_cast %33 : vector<1x1x64x32xbf16> to vector<64x32xbf16>
    %cst_38 = arith.constant dense<0.000000e+00> : vector<8x32xf32>
    %35 = tpu.matmul %32, %34, %cst_38 {dimension_numbers = #tpu.dot_dimension_numbers<[1], [0], [0], [1], [0, 0, 1, 1], [], []>} : vector<8x64xbf16>, vector<64x32xbf16>, vector<8x32xf32> -> vector<8x32xf32>
    %36 = arith.addf %31, %35 : vector<8x32xf32>
    %37 = vector.extract_strided_slice %5 {offsets = [0, 0], sizes = [8, 64], strides = [1, 1]} : vector<10x64xbf16> to vector<8x64xbf16>
    %c2_39 = arith.constant 2 : index
    %c0_40 = arith.constant 0 : index
    %c0_41 = arith.constant 0 : index
    %c0_42 = arith.constant 0 : index
    %38 = vector.load %arg5[%c2_39, %c0_40, %c0_41, %c0_42] : memref<3x3x64x32xbf16, #tpu.memory_space<vmem>>, vector<1x1x64x32xbf16>
    %39 = vector.shape_cast %38 : vector<1x1x64x32xbf16> to vector<64x32xbf16>
    %cst_43 = arith.constant dense<0.000000e+00> : vector<8x32xf32>
    %40 = tpu.matmul %37, %39, %cst_43 {dimension_numbers = #tpu.dot_dimension_numbers<[1], [0], [0], [1], [0, 0, 1, 1], [], []>} : vector<8x64xbf16>, vector<64x32xbf16>, vector<8x32xf32> -> vector<8x32xf32>
    %41 = arith.addf %36, %40 : vector<8x32xf32>
    %42 = vector.extract_strided_slice %5 {offsets = [1, 0], sizes = [8, 64], strides = [1, 1]} : vector<10x64xbf16> to vector<8x64xbf16>
    %c2_44 = arith.constant 2 : index
    %c1_45 = arith.constant 1 : index
    %c0_46 = arith.constant 0 : index
    %c0_47 = arith.constant 0 : index
    %43 = vector.load %arg5[%c2_44, %c1_45, %c0_46, %c0_47] : memref<3x3x64x32xbf16, #tpu.memory_space<vmem>>, vector<1x1x64x32xbf16>
    %44 = vector.shape_cast %43 : vector<1x1x64x32xbf16> to vector<64x32xbf16>
    %cst_48 = arith.constant dense<0.000000e+00> : vector<8x32xf32>
    %45 = tpu.matmul %42, %44, %cst_48 {dimension_numbers = #tpu.dot_dimension_numbers<[1], [0], [0], [1], [0, 0, 1, 1], [], []>} : vector<8x64xbf16>, vector<64x32xbf16>, vector<8x32xf32> -> vector<8x32xf32>
    %46 = arith.addf %41, %45 : vector<8x32xf32>
    %47 = vector.extract_strided_slice %5 {offsets = [2, 0], sizes = [8, 64], strides = [1, 1]} : vector<10x64xbf16> to vector<8x64xbf16>
    %c2_49 = arith.constant 2 : index
    %c2_50 = arith.constant 2 : index
    %c0_51 = arith.constant 0 : index
    %c0_52 = arith.constant 0 : index
    %48 = vector.load %arg5[%c2_49, %c2_50, %c0_51, %c0_52] : memref<3x3x64x32xbf16, #tpu.memory_space<vmem>>, vector<1x1x64x32xbf16>
    %49 = vector.shape_cast %48 : vector<1x1x64x32xbf16> to vector<64x32xbf16>
    %cst_53 = arith.constant dense<0.000000e+00> : vector<8x32xf32>
    %50 = tpu.matmul %47, %49, %cst_53 {dimension_numbers = #tpu.dot_dimension_numbers<[1], [0], [0], [1], [0, 0, 1, 1], [], []>} : vector<8x64xbf16>, vector<64x32xbf16>, vector<8x32xf32> -> vector<8x32xf32>
    %51 = arith.addf %46, %50 : vector<8x32xf32>
    %c0_54 = arith.constant 0 : index
    %c0_55 = arith.constant 0 : index
    %52 = vector.load %arg6[%c0_54, %c0_55] : memref<1x32xf32, #tpu.memory_space<vmem>>, vector<1x32xf32>
    %53 = vector.broadcast %52 : vector<1x32xf32> to vector<8x32xf32>
    %54 = arith.addf %51, %53 : vector<8x32xf32>
    %55 = arith.truncf %54 : vector<8x32xf32> to vector<8x32xbf16>
    %c0_56 = arith.constant 0 : index
    %c0_57 = arith.constant 0 : index
    %c0_58 = arith.constant 0 : index
    %c0_59 = arith.constant 0 : index
    %56 = vector.load %arg7[%c0_56, %c0_57, %c0_58, %c0_59] : memref<1x1x8x32xbf16, #tpu.memory_space<vmem>>, vector<1x1x8x32xbf16>
    %57 = vector.shape_cast %56 : vector<1x1x8x32xbf16> to vector<8x32xbf16>
    %58 = vector.shape_cast %55 : vector<8x32xbf16> to vector<1x1x8x32xbf16>
    tpu.vector_store %arg7[%c0_56, %c0_57, %c0_58, %c0_59], %58 {strides = array<i32>} : memref<1x1x8x32xbf16, #tpu.memory_space<vmem>>, vector<1x1x8x32xbf16>,
    %c0_i32 = arith.constant 0 : i32
    %59 = arith.cmpi eq, %arg0, %c0_i32 : i32
    %c0_i32_60 = arith.constant 0 : i32
    %60 = arith.cmpi eq, %arg1, %c0_i32_60 : i32
    %61 = arith.andi %59, %60 : i1
    %62 = arith.extui %61 : i1 to i32
    %c0_i32_61 = arith.constant 0 : i32
    %63 = arith.cmpi ne, %62, %c0_i32_61 : i32
    scf.if %63 {
      %cst_72 = arith.constant 0.000000e+00 : f32
      %75 = vector.broadcast %cst_72 : f32 to vector<1x32xf32>
      %c0_73 = arith.constant 0 : index
      %c0_74 = arith.constant 0 : index
      %76 = vector.load %arg8[%c0_73, %c0_74] : memref<1x32xf32, #tpu.memory_space<vmem>>, vector<1x32xf32>
      tpu.vector_store %arg8[%c0_73, %c0_74], %75 {strides = array<i32>} : memref<1x32xf32, #tpu.memory_space<vmem>>, vector<1x32xf32>,
      %cst_75 = arith.constant 0.000000e+00 : f32
      %77 = vector.broadcast %cst_75 : f32 to vector<1x32xf32>
      %c0_76 = arith.constant 0 : index
      %c0_77 = arith.constant 0 : index
      %78 = vector.load %arg9[%c0_76, %c0_77] : memref<1x32xf32, #tpu.memory_space<vmem>>, vector<1x32xf32>
      tpu.vector_store %arg9[%c0_76, %c0_77], %77 {strides = array<i32>} : memref<1x32xf32, #tpu.memory_space<vmem>>, vector<1x32xf32>,
    } else {
    }
    %c0_62 = arith.constant 0 : index
    %c0_63 = arith.constant 0 : index
    %64 = vector.load %arg8[%c0_62, %c0_63] : memref<1x32xf32, #tpu.memory_space<vmem>>, vector<1x32xf32>
    %cst_64 = arith.constant dense<0.000000e+00> : vector<32xf32>
    %65 = vector.multi_reduction <add>, %54, %cst_64 [0] : vector<8x32xf32> to vector<32xf32>
    %66 = vector.shape_cast %65 : vector<32xf32> to vector<1x32xf32>
    %67 = arith.addf %64, %66 : vector<1x32xf32>
    %c0_65 = arith.constant 0 : index
    %c0_66 = arith.constant 0 : index
    %68 = vector.load %arg8[%c0_65, %c0_66] : memref<1x32xf32, #tpu.memory_space<vmem>>, vector<1x32xf32>
    tpu.vector_store %arg8[%c0_65, %c0_66], %67 {strides = array<i32>} : memref<1x32xf32, #tpu.memory_space<vmem>>, vector<1x32xf32>,
    %c0_67 = arith.constant 0 : index
    %c0_68 = arith.constant 0 : index
    %69 = vector.load %arg9[%c0_67, %c0_68] : memref<1x32xf32, #tpu.memory_space<vmem>>, vector<1x32xf32>
    %70 = arith.mulf %54, %54 : vector<8x32xf32>
    %cst_69 = arith.constant dense<0.000000e+00> : vector<32xf32>
    %71 = vector.multi_reduction <add>, %70, %cst_69 [0] : vector<8x32xf32> to vector<32xf32>
    %72 = vector.shape_cast %71 : vector<32xf32> to vector<1x32xf32>
    %73 = arith.addf %69, %72 : vector<1x32xf32>
    %c0_70 = arith.constant 0 : index
    %c0_71 = arith.constant 0 : index
    %74 = vector.load %arg9[%c0_70, %c0_71] : memref<1x32xf32, #tpu.memory_space<vmem>>, vector<1x32xf32>
    tpu.vector_store %arg9[%c0_70, %c0_71], %73 {strides = array<i32>} : memref<1x32xf32, #tpu.memory_space<vmem>>, vector<1x32xf32>,
    return
  }
  func.func @transform_0(%arg0: i32, %arg1: i32) -> (i32, i32, i32, i32) {
    %c0_i32 = arith.constant 0 : i32
    %0 = arith.addi %arg1, %c0_i32 : i32
    %c0_i32_0 = arith.constant 0 : i32
    %c0_i32_1 = arith.constant 0 : i32
    %c0_i32_2 = arith.constant 0 : i32
    return %arg0, %0, %c0_i32_0, %c0_i32_1 : i32, i32, i32, i32
  }
  func.func @transform_1(%arg0: i32, %arg1: i32) -> (i32, i32, i32, i32) {
    %c1_i32 = arith.constant 1 : i32
    %0 = arith.addi %arg1, %c1_i32 : i32
    %c0_i32 = arith.constant 0 : i32
    %c0_i32_0 = arith.constant 0 : i32
    %c0_i32_1 = arith.constant 0 : i32
    return %arg0, %0, %c0_i32, %c0_i32_0 : i32, i32, i32, i32
  }
  func.func @transform_2(%arg0: i32, %arg1: i32) -> (i32, i32, i32, i32) {
    %c2_i32 = arith.constant 2 : i32
    %0 = arith.addi %arg1, %c2_i32 : i32
    %c0_i32 = arith.constant 0 : i32
    %c0_i32_0 = arith.constant 0 : i32
    %c0_i32_1 = arith.constant 0 : i32
    return %arg0, %0, %c0_i32, %c0_i32_0 : i32, i32, i32, i32
  }
  func.func @transform_3(%arg0: i32, %arg1: i32) -> (i32, i32, i32, i32) {
    %c0_i32 = arith.constant 0 : i32
    %c0_i32_0 = arith.constant 0 : i32
    %c0_i32_1 = arith.constant 0 : i32
    %c0_i32_2 = arith.constant 0 : i32
    %c0_i32_3 = arith.constant 0 : i32
    return %c0_i32, %c0_i32_0, %c0_i32_1, %c0_i32_2 : i32, i32, i32, i32
  }
  func.func @transform_4(%arg0: i32, %arg1: i32) -> (i32, i32) {
    %c0_i32 = arith.constant 0 : i32
    %c0_i32_0 = arith.constant 0 : i32
    %c0_i32_1 = arith.constant 0 : i32
    return %c0_i32, %c0_i32_0 : i32, i32
  }
  func.func @transform_5(%arg0: i32, %arg1: i32) -> (i32, i32, i32, i32) {
    %c0_i32 = arith.constant 0 : i32
    %c0_i32_0 = arith.constant 0 : i32
    %c0_i32_1 = arith.constant 0 : i32
    return %arg0, %arg1, %c0_i32, %c0_i32_0 : i32, i32, i32, i32
  }
  func.func @transform_6(%arg0: i32, %arg1: i32) -> (i32, i32) {
    %c0_i32 = arith.constant 0 : i32
    %c0_i32_0 = arith.constant 0 : i32
    %c0_i32_1 = arith.constant 0 : i32
    return %c0_i32, %c0_i32_0 : i32, i32
  }
  func.func @transform_7(%arg0: i32, %arg1: i32) -> (i32, i32) {
    %c0_i32 = arith.constant 0 : i32
    %c0_i32_0 = arith.constant 0 : i32
    %c0_i32_1 = arith.constant 0 : i32
    return %c0_i32, %c0_i32_0 : i32, i32
  }
}

module attributes {stable_mosaic.version = 11 : i64} {
  func.func @_convT_kernel(%arg0: i32, %arg1: i32, %arg2: memref<1x1x8x32xbf16, #tpu.memory_space<vmem>>, %arg3: memref<32x32xbf16, #tpu.memory_space<vmem>>, %arg4: memref<32x32xbf16, #tpu.memory_space<vmem>>, %arg5: memref<1x32xf32, #tpu.memory_space<vmem>>, %arg6: memref<1x1x2x8x32xbf16, #tpu.memory_space<vmem>>) attributes {dimension_semantics = [#tpu.dimension_semantics<parallel>, #tpu.dimension_semantics<parallel>], iteration_bounds = array<i64: 2, 8>, scalar_prefetch = 0 : i64, scratch_operands = 0 : i64, tpu.core_type = #tpu.core_type<tc>, window_params = [{transform_indices = @transform_0, window_bounds = array<i64: 1, 1, 8, 32>}, {pipeline_mode = #tpu.pipeline_mode<synchronous>, transform_indices = @transform_1, window_bounds = array<i64: 32, 32>}, {pipeline_mode = #tpu.pipeline_mode<synchronous>, transform_indices = @transform_2, window_bounds = array<i64: 32, 32>}, {pipeline_mode = #tpu.pipeline_mode<synchronous>, transform_indices = @transform_3, window_bounds = array<i64: 1, 32>}, {transform_indices = @transform_4, window_bounds = array<i64: 1, 1, 2, 8, 32>}]} {
    %c0 = arith.constant 0 : index
    %c0_0 = arith.constant 0 : index
    %c0_1 = arith.constant 0 : index
    %c0_2 = arith.constant 0 : index
    %0 = vector.load %arg2[%c0, %c0_0, %c0_1, %c0_2] : memref<1x1x8x32xbf16, #tpu.memory_space<vmem>>, vector<1x1x8x32xbf16>
    %1 = vector.shape_cast %0 : vector<1x1x8x32xbf16> to vector<8x32xbf16>
    %c0_3 = arith.constant 0 : index
    %c0_4 = arith.constant 0 : index
    %2 = vector.load %arg3[%c0_3, %c0_4] : memref<32x32xbf16, #tpu.memory_space<vmem>>, vector<32x32xbf16>
    %cst = arith.constant dense<0.000000e+00> : vector<8x32xf32>
    %3 = tpu.matmul %1, %2, %cst {dimension_numbers = #tpu.dot_dimension_numbers<[1], [0], [0], [1], [0, 0, 1, 1], [], []>} : vector<8x32xbf16>, vector<32x32xbf16>, vector<8x32xf32> -> vector<8x32xf32>
    %c0_5 = arith.constant 0 : index
    %c0_6 = arith.constant 0 : index
    %4 = vector.load %arg5[%c0_5, %c0_6] : memref<1x32xf32, #tpu.memory_space<vmem>>, vector<1x32xf32>
    %5 = vector.broadcast %4 : vector<1x32xf32> to vector<8x32xf32>
    %6 = arith.addf %3, %5 : vector<8x32xf32>
    %c0_7 = arith.constant 0 : index
    %c0_8 = arith.constant 0 : index
    %7 = vector.load %arg4[%c0_7, %c0_8] : memref<32x32xbf16, #tpu.memory_space<vmem>>, vector<32x32xbf16>
    %cst_9 = arith.constant dense<0.000000e+00> : vector<8x32xf32>
    %8 = tpu.matmul %1, %7, %cst_9 {dimension_numbers = #tpu.dot_dimension_numbers<[1], [0], [0], [1], [0, 0, 1, 1], [], []>} : vector<8x32xbf16>, vector<32x32xbf16>, vector<8x32xf32> -> vector<8x32xf32>
    %c0_10 = arith.constant 0 : index
    %c0_11 = arith.constant 0 : index
    %9 = vector.load %arg5[%c0_10, %c0_11] : memref<1x32xf32, #tpu.memory_space<vmem>>, vector<1x32xf32>
    %10 = vector.broadcast %9 : vector<1x32xf32> to vector<8x32xf32>
    %11 = arith.addf %8, %10 : vector<8x32xf32>
    %12 = arith.truncf %6 : vector<8x32xf32> to vector<8x32xbf16>
    %c0_12 = arith.constant 0 : index
    %c0_13 = arith.constant 0 : index
    %c0_14 = arith.constant 0 : index
    %c0_15 = arith.constant 0 : index
    %c0_16 = arith.constant 0 : index
    %13 = vector.load %arg6[%c0_12, %c0_13, %c0_14, %c0_15, %c0_16] : memref<1x1x2x8x32xbf16, #tpu.memory_space<vmem>>, vector<1x1x1x8x32xbf16>
    %14 = vector.shape_cast %13 : vector<1x1x1x8x32xbf16> to vector<8x32xbf16>
    %15 = vector.shape_cast %12 : vector<8x32xbf16> to vector<1x1x1x8x32xbf16>
    tpu.vector_store %arg6[%c0_12, %c0_13, %c0_14, %c0_15, %c0_16], %15 {strides = array<i32>} : memref<1x1x2x8x32xbf16, #tpu.memory_space<vmem>>, vector<1x1x1x8x32xbf16>,
    %16 = arith.truncf %11 : vector<8x32xf32> to vector<8x32xbf16>
    %c0_17 = arith.constant 0 : index
    %c0_18 = arith.constant 0 : index
    %c1 = arith.constant 1 : index
    %c0_19 = arith.constant 0 : index
    %c0_20 = arith.constant 0 : index
    %17 = vector.load %arg6[%c0_17, %c0_18, %c1, %c0_19, %c0_20] : memref<1x1x2x8x32xbf16, #tpu.memory_space<vmem>>, vector<1x1x1x8x32xbf16>
    %18 = vector.shape_cast %17 : vector<1x1x1x8x32xbf16> to vector<8x32xbf16>
    %19 = vector.shape_cast %16 : vector<8x32xbf16> to vector<1x1x1x8x32xbf16>
    tpu.vector_store %arg6[%c0_17, %c0_18, %c1, %c0_19, %c0_20], %19 {strides = array<i32>} : memref<1x1x2x8x32xbf16, #tpu.memory_space<vmem>>, vector<1x1x1x8x32xbf16>,
    return
  }
  func.func @transform_0(%arg0: i32, %arg1: i32) -> (i32, i32, i32, i32) {
    %c0_i32 = arith.constant 0 : i32
    %c0_i32_0 = arith.constant 0 : i32
    %c0_i32_1 = arith.constant 0 : i32
    return %arg0, %arg1, %c0_i32, %c0_i32_0 : i32, i32, i32, i32
  }
  func.func @transform_1(%arg0: i32, %arg1: i32) -> (i32, i32) {
    %c0_i32 = arith.constant 0 : i32
    %c0_i32_0 = arith.constant 0 : i32
    %c0_i32_1 = arith.constant 0 : i32
    return %c0_i32, %c0_i32_0 : i32, i32
  }
  func.func @transform_2(%arg0: i32, %arg1: i32) -> (i32, i32) {
    %c0_i32 = arith.constant 0 : i32
    %c0_i32_0 = arith.constant 0 : i32
    %c0_i32_1 = arith.constant 0 : i32
    return %c0_i32, %c0_i32_0 : i32, i32
  }
  func.func @transform_3(%arg0: i32, %arg1: i32) -> (i32, i32) {
    %c0_i32 = arith.constant 0 : i32
    %c0_i32_0 = arith.constant 0 : i32
    %c0_i32_1 = arith.constant 0 : i32
    return %c0_i32, %c0_i32_0 : i32, i32
  }
  func.func @transform_4(%arg0: i32, %arg1: i32) -> (i32, i32, i32, i32, i32) {
    %c0_i32 = arith.constant 0 : i32
    %c0_i32_0 = arith.constant 0 : i32
    %c0_i32_1 = arith.constant 0 : i32
    %c0_i32_2 = arith.constant 0 : i32
    return %arg0, %arg1, %c0_i32, %c0_i32_0, %c0_i32_1 : i32, i32, i32, i32, i32
  }
}

module attributes {stable_mosaic.version = 11 : i64} {
  func.func @_conv3x3_kernel(%arg0: i32, %arg1: i32, %arg2: memref<1x1x18x32xbf16, #tpu.memory_space<vmem>>, %arg3: memref<1x1x18x32xbf16, #tpu.memory_space<vmem>>, %arg4: memref<1x1x18x32xbf16, #tpu.memory_space<vmem>>, %arg5: memref<3x3x32x16xbf16, #tpu.memory_space<vmem>>, %arg6: memref<1x16xf32, #tpu.memory_space<vmem>>, %arg7: memref<1x1x16x16xbf16, #tpu.memory_space<vmem>>, %arg8: memref<1x16xf32, #tpu.memory_space<vmem>>, %arg9: memref<1x16xf32, #tpu.memory_space<vmem>>) attributes {dimension_semantics = [#tpu.dimension_semantics<arbitrary>, #tpu.dimension_semantics<arbitrary>], iteration_bounds = array<i64: 2, 16>, scalar_prefetch = 0 : i64, scratch_operands = 0 : i64, tpu.core_type = #tpu.core_type<tc>, window_params = [{transform_indices = @transform_0, window_bounds = array<i64: 1, 1, 18, 32>}, {transform_indices = @transform_1, window_bounds = array<i64: 1, 1, 18, 32>}, {transform_indices = @transform_2, window_bounds = array<i64: 1, 1, 18, 32>}, {pipeline_mode = #tpu.pipeline_mode<synchronous>, transform_indices = @transform_3, window_bounds = array<i64: 3, 3, 32, 16>}, {pipeline_mode = #tpu.pipeline_mode<synchronous>, transform_indices = @transform_4, window_bounds = array<i64: 1, 16>}, {transform_indices = @transform_5, window_bounds = array<i64: 1, 1, 16, 16>}, {pipeline_mode = #tpu.pipeline_mode<synchronous>, transform_indices = @transform_6, window_bounds = array<i64: 1, 16>}, {pipeline_mode = #tpu.pipeline_mode<synchronous>, transform_indices = @transform_7, window_bounds = array<i64: 1, 16>}]} {
    %c0 = arith.constant 0 : index
    %c0_0 = arith.constant 0 : index
    %c0_1 = arith.constant 0 : index
    %c0_2 = arith.constant 0 : index
    %0 = vector.load %arg2[%c0, %c0_0, %c0_1, %c0_2] : memref<1x1x18x32xbf16, #tpu.memory_space<vmem>>, vector<1x1x18x32xbf16>
    %1 = vector.shape_cast %0 : vector<1x1x18x32xbf16> to vector<18x32xbf16>
    %c0_3 = arith.constant 0 : index
    %c0_4 = arith.constant 0 : index
    %c0_5 = arith.constant 0 : index
    %c0_6 = arith.constant 0 : index
    %2 = vector.load %arg3[%c0_3, %c0_4, %c0_5, %c0_6] : memref<1x1x18x32xbf16, #tpu.memory_space<vmem>>, vector<1x1x18x32xbf16>
    %3 = vector.shape_cast %2 : vector<1x1x18x32xbf16> to vector<18x32xbf16>
    %c0_7 = arith.constant 0 : index
    %c0_8 = arith.constant 0 : index
    %c0_9 = arith.constant 0 : index
    %c0_10 = arith.constant 0 : index
    %4 = vector.load %arg4[%c0_7, %c0_8, %c0_9, %c0_10] : memref<1x1x18x32xbf16, #tpu.memory_space<vmem>>, vector<1x1x18x32xbf16>
    %5 = vector.shape_cast %4 : vector<1x1x18x32xbf16> to vector<18x32xbf16>
    %cst = arith.constant 0.000000e+00 : f32
    %6 = vector.broadcast %cst : f32 to vector<16x16xf32>
    %7 = vector.extract_strided_slice %1 {offsets = [0, 0], sizes = [16, 32], strides = [1, 1]} : vector<18x32xbf16> to vector<16x32xbf16>
    %c0_11 = arith.constant 0 : index
    %c0_12 = arith.constant 0 : index
    %c0_13 = arith.constant 0 : index
    %c0_14 = arith.constant 0 : index
    %8 = vector.load %arg5[%c0_11, %c0_12, %c0_13, %c0_14] : memref<3x3x32x16xbf16, #tpu.memory_space<vmem>>, vector<1x1x32x16xbf16>
    %9 = vector.shape_cast %8 : vector<1x1x32x16xbf16> to vector<32x16xbf16>
    %cst_15 = arith.constant dense<0.000000e+00> : vector<16x16xf32>
    %10 = tpu.matmul %7, %9, %cst_15 {dimension_numbers = #tpu.dot_dimension_numbers<[1], [0], [0], [1], [0, 0, 1, 1], [], []>} : vector<16x32xbf16>, vector<32x16xbf16>, vector<16x16xf32> -> vector<16x16xf32>
    %11 = arith.addf %6, %10 : vector<16x16xf32>
    %12 = vector.extract_strided_slice %1 {offsets = [1, 0], sizes = [16, 32], strides = [1, 1]} : vector<18x32xbf16> to vector<16x32xbf16>
    %c0_16 = arith.constant 0 : index
    %c1 = arith.constant 1 : index
    %c0_17 = arith.constant 0 : index
    %c0_18 = arith.constant 0 : index
    %13 = vector.load %arg5[%c0_16, %c1, %c0_17, %c0_18] : memref<3x3x32x16xbf16, #tpu.memory_space<vmem>>, vector<1x1x32x16xbf16>
    %14 = vector.shape_cast %13 : vector<1x1x32x16xbf16> to vector<32x16xbf16>
    %cst_19 = arith.constant dense<0.000000e+00> : vector<16x16xf32>
    %15 = tpu.matmul %12, %14, %cst_19 {dimension_numbers = #tpu.dot_dimension_numbers<[1], [0], [0], [1], [0, 0, 1, 1], [], []>} : vector<16x32xbf16>, vector<32x16xbf16>, vector<16x16xf32> -> vector<16x16xf32>
    %16 = arith.addf %11, %15 : vector<16x16xf32>
    %17 = vector.extract_strided_slice %1 {offsets = [2, 0], sizes = [16, 32], strides = [1, 1]} : vector<18x32xbf16> to vector<16x32xbf16>
    %c0_20 = arith.constant 0 : index
    %c2 = arith.constant 2 : index
    %c0_21 = arith.constant 0 : index
    %c0_22 = arith.constant 0 : index
    %18 = vector.load %arg5[%c0_20, %c2, %c0_21, %c0_22] : memref<3x3x32x16xbf16, #tpu.memory_space<vmem>>, vector<1x1x32x16xbf16>
    %19 = vector.shape_cast %18 : vector<1x1x32x16xbf16> to vector<32x16xbf16>
    %cst_23 = arith.constant dense<0.000000e+00> : vector<16x16xf32>
    %20 = tpu.matmul %17, %19, %cst_23 {dimension_numbers = #tpu.dot_dimension_numbers<[1], [0], [0], [1], [0, 0, 1, 1], [], []>} : vector<16x32xbf16>, vector<32x16xbf16>, vector<16x16xf32> -> vector<16x16xf32>
    %21 = arith.addf %16, %20 : vector<16x16xf32>
    %22 = vector.extract_strided_slice %3 {offsets = [0, 0], sizes = [16, 32], strides = [1, 1]} : vector<18x32xbf16> to vector<16x32xbf16>
    %c1_24 = arith.constant 1 : index
    %c0_25 = arith.constant 0 : index
    %c0_26 = arith.constant 0 : index
    %c0_27 = arith.constant 0 : index
    %23 = vector.load %arg5[%c1_24, %c0_25, %c0_26, %c0_27] : memref<3x3x32x16xbf16, #tpu.memory_space<vmem>>, vector<1x1x32x16xbf16>
    %24 = vector.shape_cast %23 : vector<1x1x32x16xbf16> to vector<32x16xbf16>
    %cst_28 = arith.constant dense<0.000000e+00> : vector<16x16xf32>
    %25 = tpu.matmul %22, %24, %cst_28 {dimension_numbers = #tpu.dot_dimension_numbers<[1], [0], [0], [1], [0, 0, 1, 1], [], []>} : vector<16x32xbf16>, vector<32x16xbf16>, vector<16x16xf32> -> vector<16x16xf32>
    %26 = arith.addf %21, %25 : vector<16x16xf32>
    %27 = vector.extract_strided_slice %3 {offsets = [1, 0], sizes = [16, 32], strides = [1, 1]} : vector<18x32xbf16> to vector<16x32xbf16>
    %c1_29 = arith.constant 1 : index
    %c1_30 = arith.constant 1 : index
    %c0_31 = arith.constant 0 : index
    %c0_32 = arith.constant 0 : index
    %28 = vector.load %arg5[%c1_29, %c1_30, %c0_31, %c0_32] : memref<3x3x32x16xbf16, #tpu.memory_space<vmem>>, vector<1x1x32x16xbf16>
    %29 = vector.shape_cast %28 : vector<1x1x32x16xbf16> to vector<32x16xbf16>
    %cst_33 = arith.constant dense<0.000000e+00> : vector<16x16xf32>
    %30 = tpu.matmul %27, %29, %cst_33 {dimension_numbers = #tpu.dot_dimension_numbers<[1], [0], [0], [1], [0, 0, 1, 1], [], []>} : vector<16x32xbf16>, vector<32x16xbf16>, vector<16x16xf32> -> vector<16x16xf32>
    %31 = arith.addf %26, %30 : vector<16x16xf32>
    %32 = vector.extract_strided_slice %3 {offsets = [2, 0], sizes = [16, 32], strides = [1, 1]} : vector<18x32xbf16> to vector<16x32xbf16>
    %c1_34 = arith.constant 1 : index
    %c2_35 = arith.constant 2 : index
    %c0_36 = arith.constant 0 : index
    %c0_37 = arith.constant 0 : index
    %33 = vector.load %arg5[%c1_34, %c2_35, %c0_36, %c0_37] : memref<3x3x32x16xbf16, #tpu.memory_space<vmem>>, vector<1x1x32x16xbf16>
    %34 = vector.shape_cast %33 : vector<1x1x32x16xbf16> to vector<32x16xbf16>
    %cst_38 = arith.constant dense<0.000000e+00> : vector<16x16xf32>
    %35 = tpu.matmul %32, %34, %cst_38 {dimension_numbers = #tpu.dot_dimension_numbers<[1], [0], [0], [1], [0, 0, 1, 1], [], []>} : vector<16x32xbf16>, vector<32x16xbf16>, vector<16x16xf32> -> vector<16x16xf32>
    %36 = arith.addf %31, %35 : vector<16x16xf32>
    %37 = vector.extract_strided_slice %5 {offsets = [0, 0], sizes = [16, 32], strides = [1, 1]} : vector<18x32xbf16> to vector<16x32xbf16>
    %c2_39 = arith.constant 2 : index
    %c0_40 = arith.constant 0 : index
    %c0_41 = arith.constant 0 : index
    %c0_42 = arith.constant 0 : index
    %38 = vector.load %arg5[%c2_39, %c0_40, %c0_41, %c0_42] : memref<3x3x32x16xbf16, #tpu.memory_space<vmem>>, vector<1x1x32x16xbf16>
    %39 = vector.shape_cast %38 : vector<1x1x32x16xbf16> to vector<32x16xbf16>
    %cst_43 = arith.constant dense<0.000000e+00> : vector<16x16xf32>
    %40 = tpu.matmul %37, %39, %cst_43 {dimension_numbers = #tpu.dot_dimension_numbers<[1], [0], [0], [1], [0, 0, 1, 1], [], []>} : vector<16x32xbf16>, vector<32x16xbf16>, vector<16x16xf32> -> vector<16x16xf32>
    %41 = arith.addf %36, %40 : vector<16x16xf32>
    %42 = vector.extract_strided_slice %5 {offsets = [1, 0], sizes = [16, 32], strides = [1, 1]} : vector<18x32xbf16> to vector<16x32xbf16>
    %c2_44 = arith.constant 2 : index
    %c1_45 = arith.constant 1 : index
    %c0_46 = arith.constant 0 : index
    %c0_47 = arith.constant 0 : index
    %43 = vector.load %arg5[%c2_44, %c1_45, %c0_46, %c0_47] : memref<3x3x32x16xbf16, #tpu.memory_space<vmem>>, vector<1x1x32x16xbf16>
    %44 = vector.shape_cast %43 : vector<1x1x32x16xbf16> to vector<32x16xbf16>
    %cst_48 = arith.constant dense<0.000000e+00> : vector<16x16xf32>
    %45 = tpu.matmul %42, %44, %cst_48 {dimension_numbers = #tpu.dot_dimension_numbers<[1], [0], [0], [1], [0, 0, 1, 1], [], []>} : vector<16x32xbf16>, vector<32x16xbf16>, vector<16x16xf32> -> vector<16x16xf32>
    %46 = arith.addf %41, %45 : vector<16x16xf32>
    %47 = vector.extract_strided_slice %5 {offsets = [2, 0], sizes = [16, 32], strides = [1, 1]} : vector<18x32xbf16> to vector<16x32xbf16>
    %c2_49 = arith.constant 2 : index
    %c2_50 = arith.constant 2 : index
    %c0_51 = arith.constant 0 : index
    %c0_52 = arith.constant 0 : index
    %48 = vector.load %arg5[%c2_49, %c2_50, %c0_51, %c0_52] : memref<3x3x32x16xbf16, #tpu.memory_space<vmem>>, vector<1x1x32x16xbf16>
    %49 = vector.shape_cast %48 : vector<1x1x32x16xbf16> to vector<32x16xbf16>
    %cst_53 = arith.constant dense<0.000000e+00> : vector<16x16xf32>
    %50 = tpu.matmul %47, %49, %cst_53 {dimension_numbers = #tpu.dot_dimension_numbers<[1], [0], [0], [1], [0, 0, 1, 1], [], []>} : vector<16x32xbf16>, vector<32x16xbf16>, vector<16x16xf32> -> vector<16x16xf32>
    %51 = arith.addf %46, %50 : vector<16x16xf32>
    %c0_54 = arith.constant 0 : index
    %c0_55 = arith.constant 0 : index
    %52 = vector.load %arg6[%c0_54, %c0_55] : memref<1x16xf32, #tpu.memory_space<vmem>>, vector<1x16xf32>
    %53 = vector.broadcast %52 : vector<1x16xf32> to vector<16x16xf32>
    %54 = arith.addf %51, %53 : vector<16x16xf32>
    %55 = arith.truncf %54 : vector<16x16xf32> to vector<16x16xbf16>
    %c0_56 = arith.constant 0 : index
    %c0_57 = arith.constant 0 : index
    %c0_58 = arith.constant 0 : index
    %c0_59 = arith.constant 0 : index
    %56 = vector.load %arg7[%c0_56, %c0_57, %c0_58, %c0_59] : memref<1x1x16x16xbf16, #tpu.memory_space<vmem>>, vector<1x1x16x16xbf16>
    %57 = vector.shape_cast %56 : vector<1x1x16x16xbf16> to vector<16x16xbf16>
    %58 = vector.shape_cast %55 : vector<16x16xbf16> to vector<1x1x16x16xbf16>
    tpu.vector_store %arg7[%c0_56, %c0_57, %c0_58, %c0_59], %58 {strides = array<i32>} : memref<1x1x16x16xbf16, #tpu.memory_space<vmem>>, vector<1x1x16x16xbf16>,
    %c0_i32 = arith.constant 0 : i32
    %59 = arith.cmpi eq, %arg0, %c0_i32 : i32
    %c0_i32_60 = arith.constant 0 : i32
    %60 = arith.cmpi eq, %arg1, %c0_i32_60 : i32
    %61 = arith.andi %59, %60 : i1
    %62 = arith.extui %61 : i1 to i32
    %c0_i32_61 = arith.constant 0 : i32
    %63 = arith.cmpi ne, %62, %c0_i32_61 : i32
    scf.if %63 {
      %cst_72 = arith.constant 0.000000e+00 : f32
      %75 = vector.broadcast %cst_72 : f32 to vector<1x16xf32>
      %c0_73 = arith.constant 0 : index
      %c0_74 = arith.constant 0 : index
      %76 = vector.load %arg8[%c0_73, %c0_74] : memref<1x16xf32, #tpu.memory_space<vmem>>, vector<1x16xf32>
      tpu.vector_store %arg8[%c0_73, %c0_74], %75 {strides = array<i32>} : memref<1x16xf32, #tpu.memory_space<vmem>>, vector<1x16xf32>,
      %cst_75 = arith.constant 0.000000e+00 : f32
      %77 = vector.broadcast %cst_75 : f32 to vector<1x16xf32>
      %c0_76 = arith.constant 0 : index
      %c0_77 = arith.constant 0 : index
      %78 = vector.load %arg9[%c0_76, %c0_77] : memref<1x16xf32, #tpu.memory_space<vmem>>, vector<1x16xf32>
      tpu.vector_store %arg9[%c0_76, %c0_77], %77 {strides = array<i32>} : memref<1x16xf32, #tpu.memory_space<vmem>>, vector<1x16xf32>,
    } else {
    }
    %c0_62 = arith.constant 0 : index
    %c0_63 = arith.constant 0 : index
    %64 = vector.load %arg8[%c0_62, %c0_63] : memref<1x16xf32, #tpu.memory_space<vmem>>, vector<1x16xf32>
    %cst_64 = arith.constant dense<0.000000e+00> : vector<16xf32>
    %65 = vector.multi_reduction <add>, %54, %cst_64 [0] : vector<16x16xf32> to vector<16xf32>
    %66 = vector.shape_cast %65 : vector<16xf32> to vector<1x16xf32>
    %67 = arith.addf %64, %66 : vector<1x16xf32>
    %c0_65 = arith.constant 0 : index
    %c0_66 = arith.constant 0 : index
    %68 = vector.load %arg8[%c0_65, %c0_66] : memref<1x16xf32, #tpu.memory_space<vmem>>, vector<1x16xf32>
    tpu.vector_store %arg8[%c0_65, %c0_66], %67 {strides = array<i32>} : memref<1x16xf32, #tpu.memory_space<vmem>>, vector<1x16xf32>,
    %c0_67 = arith.constant 0 : index
    %c0_68 = arith.constant 0 : index
    %69 = vector.load %arg9[%c0_67, %c0_68] : memref<1x16xf32, #tpu.memory_space<vmem>>, vector<1x16xf32>
    %70 = arith.mulf %54, %54 : vector<16x16xf32>
    %cst_69 = arith.constant dense<0.000000e+00> : vector<16xf32>
    %71 = vector.multi_reduction <add>, %70, %cst_69 [0] : vector<16x16xf32> to vector<16xf32>
    %72 = vector.shape_cast %71 : vector<16xf32> to vector<1x16xf32>
    %73 = arith.addf %69, %72 : vector<1x16xf32>
    %c0_70 = arith.constant 0 : index
    %c0_71 = arith.constant 0 : index
    %74 = vector.load %arg9[%c0_70, %c0_71] : memref<1x16xf32, #tpu.memory_space<vmem>>, vector<1x16xf32>
    tpu.vector_store %arg9[%c0_70, %c0_71], %73 {strides = array<i32>} : memref<1x16xf32, #tpu.memory_space<vmem>>, vector<1x16xf32>,
    return
  }
  func.func @transform_0(%arg0: i32, %arg1: i32) -> (i32, i32, i32, i32) {
    %c0_i32 = arith.constant 0 : i32
    %0 = arith.addi %arg1, %c0_i32 : i32
    %c0_i32_0 = arith.constant 0 : i32
    %c0_i32_1 = arith.constant 0 : i32
    %c0_i32_2 = arith.constant 0 : i32
    return %arg0, %0, %c0_i32_0, %c0_i32_1 : i32, i32, i32, i32
  }
  func.func @transform_1(%arg0: i32, %arg1: i32) -> (i32, i32, i32, i32) {
    %c1_i32 = arith.constant 1 : i32
    %0 = arith.addi %arg1, %c1_i32 : i32
    %c0_i32 = arith.constant 0 : i32
    %c0_i32_0 = arith.constant 0 : i32
    %c0_i32_1 = arith.constant 0 : i32
    return %arg0, %0, %c0_i32, %c0_i32_0 : i32, i32, i32, i32
  }
  func.func @transform_2(%arg0: i32, %arg1: i32) -> (i32, i32, i32, i32) {
    %c2_i32 = arith.constant 2 : i32
    %0 = arith.addi %arg1, %c2_i32 : i32
    %c0_i32 = arith.constant 0 : i32
    %c0_i32_0 = arith.constant 0 : i32
    %c0_i32_1 = arith.constant 0 : i32
    return %arg0, %0, %c0_i32, %c0_i32_0 : i32, i32, i32, i32
  }
  func.func @transform_3(%arg0: i32, %arg1: i32) -> (i32, i32, i32, i32) {
    %c0_i32 = arith.constant 0 : i32
    %c0_i32_0 = arith.constant 0 : i32
    %c0_i32_1 = arith.constant 0 : i32
    %c0_i32_2 = arith.constant 0 : i32
    %c0_i32_3 = arith.constant 0 : i32
    return %c0_i32, %c0_i32_0, %c0_i32_1, %c0_i32_2 : i32, i32, i32, i32
  }
  func.func @transform_4(%arg0: i32, %arg1: i32) -> (i32, i32) {
    %c0_i32 = arith.constant 0 : i32
    %c0_i32_0 = arith.constant 0 : i32
    %c0_i32_1 = arith.constant 0 : i32
    return %c0_i32, %c0_i32_0 : i32, i32
  }
  func.func @transform_5(%arg0: i32, %arg1: i32) -> (i32, i32, i32, i32) {
    %c0_i32 = arith.constant 0 : i32
    %c0_i32_0 = arith.constant 0 : i32
    %c0_i32_1 = arith.constant 0 : i32
    return %arg0, %arg1, %c0_i32, %c0_i32_0 : i32, i32, i32, i32
  }
  func.func @transform_6(%arg0: i32, %arg1: i32) -> (i32, i32) {
    %c0_i32 = arith.constant 0 : i32
    %c0_i32_0 = arith.constant 0 : i32
    %c0_i32_1 = arith.constant 0 : i32
    return %c0_i32, %c0_i32_0 : i32, i32
  }
  func.func @transform_7(%arg0: i32, %arg1: i32) -> (i32, i32) {
    %c0_i32 = arith.constant 0 : i32
    %c0_i32_0 = arith.constant 0 : i32
    %c0_i32_1 = arith.constant 0 : i32
    return %c0_i32, %c0_i32_0 : i32, i32
  }
}

module attributes {stable_mosaic.version = 11 : i64} {
  func.func @_matmul_bias_kernel(%arg0: i32, %arg1: memref<256x16xbf16, #tpu.memory_space<vmem>>, %arg2: memref<16x2xbf16, #tpu.memory_space<vmem>>, %arg3: memref<1x2xf32, #tpu.memory_space<vmem>>, %arg4: memref<256x2xf32, #tpu.memory_space<vmem>>) attributes {dimension_semantics = [#tpu.dimension_semantics<parallel>], iteration_bounds = array<i64: 2>, scalar_prefetch = 0 : i64, scratch_operands = 0 : i64, tpu.core_type = #tpu.core_type<tc>, window_params = [{transform_indices = @transform_0, window_bounds = array<i64: 256, 16>}, {pipeline_mode = #tpu.pipeline_mode<synchronous>, transform_indices = @transform_1, window_bounds = array<i64: 16, 2>}, {pipeline_mode = #tpu.pipeline_mode<synchronous>, transform_indices = @transform_2, window_bounds = array<i64: 1, 2>}, {transform_indices = @transform_3, window_bounds = array<i64: 256, 2>}]} {
    %c0 = arith.constant 0 : index
    %c0_0 = arith.constant 0 : index
    %0 = vector.load %arg1[%c0, %c0_0] : memref<256x16xbf16, #tpu.memory_space<vmem>>, vector<256x16xbf16>
    %c0_1 = arith.constant 0 : index
    %c0_2 = arith.constant 0 : index
    %1 = vector.load %arg2[%c0_1, %c0_2] : memref<16x2xbf16, #tpu.memory_space<vmem>>, vector<16x2xbf16>
    %cst = arith.constant dense<0.000000e+00> : vector<256x2xf32>
    %2 = tpu.matmul %0, %1, %cst {dimension_numbers = #tpu.dot_dimension_numbers<[1], [0], [0], [1], [0, 0, 1, 1], [], []>} : vector<256x16xbf16>, vector<16x2xbf16>, vector<256x2xf32> -> vector<256x2xf32>
    %c0_3 = arith.constant 0 : index
    %c0_4 = arith.constant 0 : index
    %3 = vector.load %arg3[%c0_3, %c0_4] : memref<1x2xf32, #tpu.memory_space<vmem>>, vector<1x2xf32>
    %4 = vector.broadcast %3 : vector<1x2xf32> to vector<256x2xf32>
    %5 = arith.addf %2, %4 : vector<256x2xf32>
    %c0_5 = arith.constant 0 : index
    %c0_6 = arith.constant 0 : index
    %6 = vector.load %arg4[%c0_5, %c0_6] : memref<256x2xf32, #tpu.memory_space<vmem>>, vector<256x2xf32>
    tpu.vector_store %arg4[%c0_5, %c0_6], %5 {strides = array<i32>} : memref<256x2xf32, #tpu.memory_space<vmem>>, vector<256x2xf32>,
    return
  }
  func.func @transform_0(%arg0: i32) -> (i32, i32) {
    %c0_i32 = arith.constant 0 : i32
    %c0_i32_0 = arith.constant 0 : i32
    return %arg0, %c0_i32 : i32, i32
  }
  func.func @transform_1(%arg0: i32) -> (i32, i32) {
    %c0_i32 = arith.constant 0 : i32
    %c0_i32_0 = arith.constant 0 : i32
    %c0_i32_1 = arith.constant 0 : i32
    return %c0_i32, %c0_i32_0 : i32, i32
  }
  func.func @transform_2(%arg0: i32) -> (i32, i32) {
    %c0_i32 = arith.constant 0 : i32
    %c0_i32_0 = arith.constant 0 : i32
    %c0_i32_1 = arith.constant 0 : i32
    return %c0_i32, %c0_i32_0 : i32, i32
  }
  func.func @transform_3(%arg0: i32) -> (i32, i32) {
    %c0_i32 = arith.constant 0 : i32
    %c0_i32_0 = arith.constant 0 : i32
    return %arg0, %c0_i32 : i32, i32
  }
}

</mosaic_0001>

<bundles_post_ra>
// kernel: attention_unet_forward.25
= control target key start
LH: loop header
LB: loop body
LE: loop exit
PB: predicated region body
PF: predicated region fallthrough
CT: control target
= control target key end

     0   :  { %s1057_s24 = smov 0   ;;  %s1059_s25 = smov 0   ;;  %s1217_s0 = inlined_call_operand.vmem [shape: bf16[2,18,18,3], index: 0, kind: input, shape index: {}, may-alias: {0,1,2}]   ;;  %s1218_s1 = inlined_call_operand.vmem [shape: bf16[2,18,18,3], index: 1, kind: input, shape index: {}, may-alias: {0,1,2}]   ;;  %s1219_s2 = inlined_call_operand.vmem [shape: bf16[2,18,18,3], index: 2, kind: input, shape index: {}, may-alias: {0,1,2}]   ;;  %s1220_s3 = inlined_call_operand.vmem [shape: bf16[3,3,3,16], index: 3, kind: input, shape index: {}]   ;;  %s1221_s4 = inlined_call_operand.vmem [shape: f32[1,16], index: 4, kind: input, shape index: {}]   ;;  %s1222_s5 = inlined_call_operand.vmem [shape: bf16[2,16,16,16], index: 5, kind: output, shape index: {0}]   ;;  %s1223_s6 = inlined_call_operand.vmem [shape: f32[1,16], index: 6, kind: output, shape index: {1}]   ;;  %s1224_s7 = inlined_call_operand.vmem [shape: f32[1,16], index: 7, kind: output, shape index: {2}]  }
   0x1   :  { %s1061_s26 = smov 0   ;;  %s1063_s27 = smov 0  }
   0x2   :  { %s1065_s28 = smov 0  }
   0x3 LB: > { %s27_s29 = sadd.s32 1, %s1005_s26  ;;  %s30_s30 = sadd.s32 1, %s1009_s27  ;;  %s1013_s28 = sphi %s1065_s28, %s18_s28   ;;  %s1009_s27 = sphi %s1063_s27, %s1229_s27   ;;  %s1005_s26 = sphi %s1061_s26, %s1228_s26   ;;  %s1001_s25 = sphi %s1059_s25, %s1227_s25   ;;  %s997_s24 = sphi %s1057_s24, %s1226_s24  }
   0x4   : > { %p28_p0 = scmp.ge.s32.totalorder %s27_s29, 16  ;;  %p887_p1 = scmp.ge.s32.totalorder %s1013_s28, 1 }
   0x5   : > { %p292_p2 = scmp.lt.s32.totalorder %s1013_s28, 33 }
   0x6   : > { %s1231_s29 = smov (%p28_p0, %s27_s29), 0  ;;  %s1233_s30 = smov (!%p28_p0, %s30_s30), %s1009_s27 }
   0x7   : > { %p293_p3 = pnand %p887_p1, %p292_p2  ;;  %p32_p4 = scmp.ge.s32.totalorder %s1233_s30, 2 }
   0x8   : > { %p352_p5 = scmp.lt.s32.totalorder (!%p293_p3), %s1001_s25, 1  ;;  %p354_p6 = scmp.lt.s32.totalorder (!%p293_p3), %s997_s24, 17 }
   0x9   : > { %s1235_s30 = smov (%p32_p4, %s1233_s30), 0  ;;  %296 = sbr.rel (%p293_p3) target bundleno = 228 (0xe4), region = 40 }
   0xa   : > { %s361_s23 = sadd.s32 (!%p293_p3), 1, %s997_s24  ;;  %s372_s13 = sadd.s32 (!%p293_p3), 2, %s997_s24 }
   0xb   : > { %p364_p7 = scmp.lt.s32.totalorder (!%p293_p3), %s361_s23, 17  ;;  %p375_p8 = scmp.lt.s32.totalorder (!%p293_p3), %s372_s13, 17 }
   0xc   : > { %p697_p9 = scmp.eq.s32.totalorder (!%p293_p3), %s1001_s25, 0  ;;  %p698_p10 = scmp.eq.s32.totalorder (!%p293_p3), %s997_s24, 0 }
   0xd   : > { %p385_p12 = scmp.lt.s32.totalorder (!%p293_p3), %s997_s24, 15 }
   0xe   : > { %vm430_vm0 = vcmask 1040384   ;;  %vm431_vm1 = vcmask 1041408   ;;  %v901_v0 = vld [vmem:[%s1220_s3 + $0x4] sm:$0x3]  ;;  %v1015_v1 = vmov 65535   ;;  %s1108_s16 = scalar_select %p352_p5, %s1001_s25, 1 }
   0xf   : > { %v432_v2 = vsel %vm430_vm0, 4294967295, %v1015_v1  ;;  %v894_v3 = vld [vmem:[%s1220_s3 + $0x2] sm:$0x3]  ;;  %v402_v4 = vld [vmem:[%s1220_s3] sm:$0x3]  ;;  %s355_s17 = scalar_select %p354_p6, %s997_s24, 17 }
  0x10   : > { %v1102_v5 = vsel %vm431_vm1, %v432_v2, 0  ;;  %v903_v6 = vld [vmem:[%s1220_s3 + $0x6] sm:$0x3]  ;;  %v909_v11 = vld [vmem:[%s1220_s3 + $0x8] sm:$0x3]  ;;  %s1122_s22 = smul.u32 54, %s1108_s16  ;;  %p1169_p11 = pnand %p698_p10, %p697_p9 }
  0x11   : > { %v480_v7 = vand.u32 %v901_v0, %v1102_v5  ;;  %v435_v8 = vand.u32 %v894_v3, %v1102_v5  ;;  %v454_v9 = vand.u32 %v1102_v5, %v402_v4  ;;  %v509_v10 = vand.u32 %v903_v6, %v1102_v5  ;;  %v913_v12 = vld [vmem:[%s1220_s3 + $0xc] sm:$0x3]  ;;  %v919_v15 = vld [vmem:[%s1220_s3 + $0xe] sm:$0x3]  ;;  %s928_s10 = smul.u32 3, %s355_s17  ;;  %s1237_s23 = smov (!%p364_p7, %s361_s23), 17 }
  0x12   : > { %v547_v13 = vand.u32 %v909_v11, %v1102_v5  ;;  %v603_v14 = vand.u32 %v913_v12, %v1102_v5  ;;  %v641_v16 = vand.u32 %v919_v15, %v1102_v5  ;;  %v911_v17 = vld [vmem:[%s1220_s3 + $0xa] sm:$0x3]  ;;  %vm426_vm2 = vcmask 23552   ;;  %s1239_s13 = smov (!%p375_p8, %s372_s13), 17  ;;  %s930_s20 = smul.u32 3, %s1237_s23 }
  0x13   : > { %489 = vmatpush.bf16.msra.mxu2 %v480_v7  ;;  %444 = vmatpush.bf16.msra.mxu0 %v435_v8  ;;  %v574_v18 = vand.u32 %v911_v17, %v1102_v5  ;;  %s358_s14 = sadd.s32 %s1122_s22, %s928_s10  ;;  %s931_s21 = smul.u32 3, %s1239_s13  ;;  %vm472_vm3 = vcmask 1046528   ;;  %v921_v27 = vld [vmem:[%s1220_s3 + $0x10] sm:$0x3]  ;;  %vm413_vm4 = vsmask.f32 7424 }
  0x14   : > { %463 = vmatpush.bf16.msra.mxu1 %v454_v9  ;;  %518 = vmatpush.bf16.msra.mxu3 %v509_v10  ;;  %s888_s15 = sshll.u32 %s358_s14, 2  ;;  %s368_s8 = sadd.s32 %s930_s20, %s1122_s22  ;;  %v668_v35 = vand.u32 %v921_v27, %v1102_v5  ;;  %vm694_vm5 = vcmask 125952  }
  0x15   : > { %s360_s19 = scalar_lea.vmem %s1217_s0, %s888_s15  ;;  %s889_s11 = sshll.u32 %s368_s8, 2 }
  0x16   : > { %v925_v19 = vld [vmem:[%s360_s19] sm:$0xff]  ;;  %v395_v20 = vld [vmem:[%s360_s19 + $0x8] sm:$0x1]  ;;  %s379_s12 = sadd.s32 %s931_s21, %s1122_s22  ;;  %s370_s23 = scalar_lea.vmem %s1218_s1, %s889_s11 }
  0x17   : > { %556 = vmatpush.bf16.msrb.mxu0 %v547_v13  ;;  %612 = vmatpush.bf16.msrb.mxu2 %v603_v14  ;;  %v410_v21 = vunpack.c.l.b16 %v395_v20  ;;  %v415_v22 = vshrl.u32 %v925_v19, 16  ;;  %v417_v23 = vshll.u32 %v925_v19, 16  ;;  %v473_v25 = vrot.slane %v925_v19, 1  ;;  %s890_s17 = sshll.u32 %s379_s12, 2  ;;  %v926_v33 = vld [vmem:[%s370_s23] sm:$0xff]  ;;  %s1241_s24 = smov (!%p385_p12, %s997_s24), 15 }
  0x18   : > { %650 = vmatpush.bf16.msrb.mxu3 %v641_v16  ;;  %583 = vmatpush.bf16.msrb.mxu1 %v574_v18  ;;  %s381_s19 = scalar_lea.vmem %s1219_s2, %s890_s17  ;;  %v398_v34 = vld [vmem:[%s370_s23 + $0x8] sm:$0x1]  ;;  %v534_v43 = vshll.u32 %v926_v33, 16  ;;  %v567_v45 = vrot.slane %v926_v33, 1  ;;  %v532_v50 = vshrl.u32 %v926_v33, 16  ;;  %s891_s25 = sshll.u32 %s1241_s24, 1 }
  0x19   : > { %900 = vmatmul.msk.bf16.vlgmr.msra.gmra.mxu1 %vm426_vm2, %v925_v19  ;;  %v412_v24 = vpack.c.b16 %v410_v21, %v410_v21  ;;  %v419_v26 = vrot.slane %v417_v23, 1  ;;  %v927_v36 = vld [vmem:[%s381_s19] sm:$0xff]  ;;  %v530_v37 = vunpack.c.l.b16 %v398_v34  ;;  %v401_v38 = vld [vmem:[%s381_s19 + $0x8] sm:$0x1]  ;;  %908 = vmatmul.msk.bf16.vlgmr.msra.gmra.mxu3 %vm426_vm2, %v926_v33  ;;  %s892_s20 = sshll.u32 %s1108_s16, 5 }
  0x1a   : > { %v624_v40 = vunpack.c.l.b16 %v401_v38  ;;  %v628_v42 = vshll.u32 %v927_v36, 16  ;;  %v626_v47 = vshrl.u32 %v927_v36, 16  ;;  %v536_v51 = vrot.slane %v534_v43, 1  ;;  %s389_s21 = sadd.s32 %s892_s20, %s891_s25 }
  0x1b   : > { %v474_v28 = vrot.slane %v412_v24, 1  ;;  %v422_v29 = vshll.u32 %v412_v24, 16  ;;  %v420_v30 = vor.u32 %v419_v26, %v415_v22  ;;  %v531_v41 = vpack.c.b16 %v530_v37, %v530_v37  ;;  %s893_s10 = sshll.u32 %s389_s21, 2 }
  0x1c   : > { %v625_v44 = vpack.c.b16 %v624_v40, %v624_v40  ;;  %v630_v48 = vrot.slane %v628_v42, 1  ;;  %v537_v56 = vor.u32 %v536_v51, %v532_v50  ;;  %v661_v60 = vrot.slane %v927_v36, 1  ;;  %s391_s24 = scalar_lea.vmem %s1222_s5, %s893_s10 }
  0x1d   : > { %v475_v31 = vsel %vm472_vm3, %v473_v25, %v474_v28  ;;  %v424_v32 = vrot.slane %v422_v29, 1  ;;  %v568_v46 = vrot.slane %v531_v41, 1  ;;  %v539_v52 = vshll.u32 %v531_v41, 16  ;;  %v974_v25 = vld [vmem:[%s1221_s4] ss:$0 sm:$0xff] }
  0x1e   : > { %902 = vmatmul.msk.bf16.vlgmr.msra.gmra.mxu2 %vm426_vm2, %v475_v31  ;;  %v633_v49 = vshll.u32 %v625_v44, 16  ;;  %v631_v54 = vor.u32 %v630_v48, %v626_v47  ;;  %v662_v61 = vrot.slane %v625_v44, 1 }
  0x1f   : > { %v425_v39 = vsel %vm413_vm4, %v420_v30, %v424_v32  ;;  %v569_v53 = vsel %vm472_vm3, %v567_v45, %v568_v46  ;;  %v541_v57 = vrot.slane %v539_v52, 1 }
  0x20   : > { %899 = vmatmul.msk.bf16.vlgmr.msra.gmra.mxu0 %vm426_vm2, %v425_v39  ;;  %v635_v55 = vrot.slane %v633_v49, 1  ;;  %v663_v62 = vsel %vm472_vm3, %v661_v60, %v662_v61 }
  0x21   : > { %677 = vmatpush.bf16.msra.mxu0 %v668_v35  ;;  %v542_v59 = vsel %vm413_vm4, %v537_v56, %v541_v57 }
  0x22   : > { %v636_v58 = vsel %vm413_vm4, %v631_v54, %v635_v55 }
  0x29   : > { %912 = vmatmul.msk.bf16.vlgmr.msrb.gmra.mxu1 %vm426_vm2, %v569_v53  ;;  %920 = vmatmul.msk.bf16.vlgmr.msrb.gmra.mxu3 %vm426_vm2, %v636_v58 }
  0x2e   : > { %918 = vmatmul.msk.bf16.vlgmr.msrb.gmra.mxu2 %vm426_vm2, %v927_v36 }
  0x30   : > { %910 = vmatmul.msk.bf16.vlgmr.msrb.gmra.mxu0 %vm426_vm2, %v542_v59 }
  0x40   : > { %922 = vmatmul.msk.bf16.vlgmr.msra.gmra.mxu0 %vm426_vm2, %v663_v62 }
  0x96   : > { %v465_v0 = vpop.f32.mrf.mxu1 }
  0x9c   : > { %v520_v2 = vpop.f32.mrf.mxu3 }
  0x9d   : > { %v446_v63 = vpop.f32.mrf.mxu0 }
  0x9e   : > { %v467_v4 = vpop.f32.mrf.mxu1  ;;  %v466_v5 = vadd.f32 %v465_v0, %v446_v63 }
  0xa1   : > { %v491_v1 = vpop.f32.mrf.mxu2 }
  0xa2   : > { %v496_v7 = vadd.f32 %v491_v1, %v466_v5 }
  0xa4   : > { %v522_v8 = vpop.f32.mrf.mxu3  ;;  %v525_v10 = vadd.f32 %v520_v2, %v496_v7 }
  0xa5   : > { %v448_v3 = vpop.f32.mrf.mxu0 }
  0xa6   : > { %v585_v11 = vpop.f32.mrf.mxu1  ;;  %v468_v12 = vadd.f32 %v467_v4, %v448_v3 }
  0xa9   : > { %v493_v6 = vpop.f32.mrf.mxu2 }
  0xaa   : > { %v497_v14 = vadd.f32 %v493_v6, %v468_v12 }
  0xac   : > { %v526_v18 = vadd.f32 %v522_v8, %v497_v14  ;;  %v652_v19 = vpop.f32.mrf.mxu3 }
  0xad   : > { %v558_v9 = vpop.f32.mrf.mxu0 }
  0xae   : > { %v563_v13 = vadd.f32 %v558_v9, %v525_v10  ;;  %v587_v22 = vpop.f32.mrf.mxu1 }
  0xb0   : > { %v590_v16 = vadd.f32 %v585_v11, %v563_v13 }
  0xb1   : > { %v614_v15 = vpop.f32.mrf.mxu2 }
  0xb2   : > { %v619_v20 = vadd.f32 %v614_v15, %v590_v16 }
  0xb4   : > { %v657_v23 = vadd.f32 %v652_v19, %v619_v20  ;;  %v654_v31 = vpop.f32.mrf.mxu3 }
  0xb5   : > { %v560_v17 = vpop.f32.mrf.mxu0 }
  0xb6   : > { %v564_v21 = vadd.f32 %v560_v17, %v526_v18 }
  0xb8   : > { %v591_v24 = vadd.f32 %v587_v22, %v564_v21 }
  0xb9   : > { %v616_v26 = vpop.f32.mrf.mxu2 }
  0xba   : > { %v620_v29 = vadd.f32 %v616_v26, %v591_v24 }
  0xbc   : > { %v658_v33 = vadd.f32 %v654_v31, %v620_v29 }
  0xbd   : > { %v679_v27 = vpop.f32.mrf.mxu0 }
  0xbe   : > { %v684_v28 = vadd.f32 %v679_v27, %v657_v23 }
  0xc0   : > { %v690_v30 = vadd.f32 %v974_v25, %v684_v28 }
  0xc2   : > { %v692_v32 = vpack.c.bf16 %v690_v30, %v690_v30 }
  0xc4   : > { %695 = vst.msk [vmem:[%s391_s24] sm:$0xf] %vm694_vm5, %v692_v32 }
  0xc5   : > { %v681_v34 = vpop.f32.mrf.mxu0 }
  0xc6   : > { %v685_v35 = vadd.f32 %v681_v34, %v658_v33 }
  0xc8   : > { %v691_v36 = vadd.f32 %v974_v25, %v685_v35  ;;  %702 = sbr.rel (%p1169_p11) target bundleno = 208 (0xd0), region = 44 }
  0xca   : > { %v693_v37 = vpack.c.bf16 %v691_v36, %v691_v36 }
  0xcc   : > { %696 = vst.msk [vmem:[%s391_s24 + $0x4] sm:$0xf] %vm694_vm5, %v693_v37 }
  0xcd   : > { %vm703_vm6 = vcmask 122880   ;;  %v1016_v38 = vmov 0.0  }
  0xce   : > { %704 = vst.msk [vmem:[%s1223_s6] sm:$0x1] %vm703_vm6, %v1016_v38 }
  0xcf   : > { %705 = vst.msk [vmem:[%s1224_s7] sm:$0x1] %vm703_vm6, %v1016_v38 }
  0xd0 PF: > { %vm707_vm7 = vcmask 130048   ;;  %v721_v39 = vmul.f32 %v690_v30, %v690_v30  ;;  %v722_v40 = vmul.f32 %v691_v36, %v691_v36  ;;  %vm718_vm8 = vcmask 122880  }
  0xd1   : > { %v708_v41 = vsel %vm707_vm7, %v690_v30, 0.0  ;;  %v709_v42 = vsel %vm707_vm7, %v691_v36, 0.0 }
  0xd2   : > { %v710_v43 = vadd.f32 %v709_v42, %v708_v41  ;;  %v723_v44 = vsel %vm707_vm7, %v721_v39, 0.0  ;;  %v724_v45 = vsel %vm707_vm7, %v722_v40, 0.0 }
  0xd3   : > { %v725_v46 = vadd.f32 %v724_v45, %v723_v44 }
  0xd4   : > { %v711_v47 = vrot.slane %v710_v43, 4 }
  0xd5   : > { %v726_v48 = vrot.slane %v725_v46, 4  ;;  %v706_v56 = vld [vmem:[%s1223_s6] sm:$0x1] }
  0xd6   : > { %v712_v49 = vadd.f32 %v711_v47, %v710_v43  ;;  %v720_v59 = vld [vmem:[%s1224_s7] sm:$0x1] }
  0xd7   : > { %v727_v50 = vadd.f32 %v726_v48, %v725_v46 }
  0xd8   : > { %v713_v51 = vrot.slane %v712_v49, 2 }
  0xd9   : > { %v728_v52 = vrot.slane %v727_v50, 2 }
  0xda   : > { %v714_v53 = vadd.f32 %v713_v51, %v712_v49 }
  0xdb   : > { %v729_v54 = vadd.f32 %v728_v52, %v727_v50 }
  0xdc   : > { %v715_v55 = vrot.slane %v714_v53, 1 }
  0xdd   : > { %v730_v57 = vrot.slane %v729_v54, 1 }
  0xde   : > { %v716_v58 = vadd.f32 %v715_v55, %v714_v53 }
  0xdf   : > { %v731_v60 = vadd.f32 %v730_v57, %v729_v54 }
  0xe0   : > { %v717_v61 = vadd.f32 %v716_v58, %v706_v56 }
  0xe1   : > { %v732_v62 = vadd.f32 %v731_v60, %v720_v59 }
  0xe2   : > { %719 = vst.msk [vmem:[%s1223_s6] sm:$0x1] %vm718_vm8, %v717_v61 }
  0xe3   : > { %733 = vst.msk [vmem:[%s1224_s7] sm:$0x1] %vm718_vm8, %v732_v62 }
  0xe4 PF: > { %s18_s28 = sadd.s32 1, %s1013_s28   ;;  %s1226_s24 = smov %s1005_s26 }
  0xe5   : > { %p15_p13 = scmp.ge.s32.totalorder %s18_s28, 34   ;;  %s1227_s25 = smov %s1009_s27 }
  0xe6   : > { %s1228_s26 = smov %s1231_s29  ;;  %s1229_s27 = smov %s1235_s30 }
  0xe7   :  { %17 = sbr.rel (!%p15_p13) target bundleno = 3 (0x3), region = 104 }

// kernel: attention_unet_forward.26
= control target key start
LH: loop header
LB: loop body
LE: loop exit
PB: predicated region body
PF: predicated region fallthrough
CT: control target
= control target key end

     0   :  { %s729_s18 = smov 0   ;;  %s985_s0 = inlined_call_operand.vmem [shape: bf16[512,16], index: 0, kind: input, shape index: {}]   ;;  %s986_s1 = inlined_call_operand.vmem [shape: f32[1,16], index: 1, kind: input, shape index: {}]   ;;  %s987_s2 = inlined_call_operand.vmem [shape: f32[1,16], index: 2, kind: input, shape index: {}]   ;;  %s988_s3 = inlined_call_operand.vmem [shape: f32[1,16], index: 3, kind: input, shape index: {}]   ;;  %s989_s4 = inlined_call_operand.vmem [shape: f32[1,16], index: 4, kind: input, shape index: {}]   ;;  %s990_s5 = inlined_call_operand.vmem [shape: bf16[512,16], index: 5, kind: output, shape index: {}]  }
   0x1 LB: > { %s589_s19 = sadd.s32 4294967295, %s697_s18   ;;  %p593_p0 = scmp.ge.s32.totalorder %s697_s18, 1  ;;  %s697_s18 = sphi %s729_s18, %s15_s18  }
   0x2   : > { %p188_p1 = scmp.lt.s32.totalorder %s697_s18, 3 }
   0x4   : > { %p189_p2 = pnand %p593_p0, %p188_p1 }
   0x5   : > { %s594_s20 = sshll.u32 (!%p189_p2), %s589_s19, 5 }
   0x6   : > { %192 = sbr.rel (%p189_p2) target bundleno = 79 (0x4f), region = 40  ;;  %p217_p3 = scmp.lt.s32.totalorder (!%p189_p2), %s594_s20, 63 }
   0xb   : > { %s992_s20 = smov (!%p217_p3, %s594_s20), 63  ;;  %v750_v0 = vld [vmem:[%s986_s1] ss:$0 sm:$0xff]  ;;  %vm500_vm0 = vcmask 125952  }
   0xc   : > { %s595_s21 = sshll.u32 %s992_s20, 2  ;;  %v758_v5 = vld [vmem:[%s987_s2] ss:$0 sm:$0xff] }
   0xd   : > { %s745_s24 = scalar_lea.vmem %s985_s0, %s595_s21  ;;  %v765_v15 = vld [vmem:[%s988_s3] ss:$0 sm:$0xff]  ;;  %s808_s10 = scalar_lea.vmem %s990_s5, %s595_s21 }
   0xe   : > { %v601_v1 = vld [vmem:[%s745_s24] sm:$0xff]   ;;  %v664_v2 = vld [vmem:[%s745_s24 + $0x8] sm:$0xff]   ;;  %v665_v3 = vld [vmem:[%s745_s24 + $0x10] sm:$0xff]  }
   0xf   : > { %v602_v4 = vunpack.c.l.bf16 %v601_v1  ;;  %v603_v6 = vunpack.c.h.bf16 %v601_v1  ;;  %v606_v7 = vunpack.c.l.bf16 %v664_v2  ;;  %v607_v8 = vunpack.c.h.bf16 %v664_v2  ;;  %v666_v9 = vld [vmem:[%s745_s24 + $0x18] sm:$0xff]   ;;  %v778_v24 = vld [vmem:[%s989_s4] ss:$0 sm:$0xff]  ;;  %v668_v57 = vld [vmem:[%s745_s24 + $0x28] sm:$0xff]  }
  0x10   : > { %v610_v10 = vunpack.c.l.bf16 %v665_v3  ;;  %v611_v11 = vunpack.c.h.bf16 %v665_v3  ;;  %v614_v12 = vunpack.c.l.bf16 %v666_v9  ;;  %v615_v13 = vunpack.c.h.bf16 %v666_v9  ;;  %v667_v56 = vld [vmem:[%s745_s24 + $0x20] sm:$0xff]   ;;  %v669_v62 = vld [vmem:[%s745_s24 + $0x30] sm:$0xff]   ;;  %v670_v63 = vld [vmem:[%s745_s24 + $0x38] sm:$0xff]  }
  0x11   : > { %v296_v14 = vsub.f32 %v602_v4, %v750_v0  ;;  %v297_v16 = vsub.f32 %v603_v6, %v750_v0  ;;  %v298_v17 = vsub.f32 %v606_v7, %v750_v0  ;;  %v299_v18 = vsub.f32 %v607_v8, %v750_v0 }
  0x12   : > { %v300_v19 = vsub.f32 %v610_v10, %v750_v0  ;;  %v301_v20 = vsub.f32 %v611_v11, %v750_v0  ;;  %v302_v21 = vsub.f32 %v614_v12, %v750_v0  ;;  %v303_v22 = vsub.f32 %v615_v13, %v750_v0 }
  0x13   : > { %v332_v23 = vmul.f32 %v758_v5, %v296_v14  ;;  %v333_v25 = vmul.f32 %v758_v5, %v297_v16  ;;  %v334_v26 = vmul.f32 %v758_v5, %v298_v17  ;;  %v335_v27 = vmul.f32 %v758_v5, %v299_v18 }
  0x14   : > { %v336_v28 = vmul.f32 %v758_v5, %v300_v19  ;;  %v337_v29 = vmul.f32 %v758_v5, %v301_v20  ;;  %v338_v30 = vmul.f32 %v758_v5, %v302_v21  ;;  %v339_v31 = vmul.f32 %v758_v5, %v303_v22 }
  0x15   : > { %v368_v32 = vmul.f32 %v765_v15, %v332_v23  ;;  %v369_v33 = vmul.f32 %v765_v15, %v333_v25  ;;  %v370_v34 = vmul.f32 %v765_v15, %v334_v26  ;;  %v371_v35 = vmul.f32 %v765_v15, %v335_v27 }
  0x16   : > { %v372_v36 = vmul.f32 %v765_v15, %v336_v28  ;;  %v373_v37 = vmul.f32 %v765_v15, %v337_v29  ;;  %v374_v38 = vmul.f32 %v765_v15, %v338_v30  ;;  %v375_v39 = vmul.f32 %v765_v15, %v339_v31 }
  0x17   : > { %v404_v40 = vadd.f32 %v778_v24, %v368_v32  ;;  %v405_v41 = vadd.f32 %v778_v24, %v369_v33  ;;  %v406_v42 = vadd.f32 %v778_v24, %v370_v34  ;;  %v407_v43 = vadd.f32 %v778_v24, %v371_v35 }
  0x18   : > { %v408_v44 = vadd.f32 %v778_v24, %v372_v36  ;;  %v409_v45 = vadd.f32 %v778_v24, %v373_v37  ;;  %v410_v46 = vadd.f32 %v778_v24, %v374_v38  ;;  %v411_v47 = vadd.f32 %v778_v24, %v375_v39 }
  0x19   : > { %v436_v48 = vmax.f32 %v404_v40, 0.0  ;;  %v437_v49 = vmax.f32 %v405_v41, 0.0  ;;  %v438_v50 = vmax.f32 %v406_v42, 0.0  ;;  %v439_v51 = vmax.f32 %v407_v43, 0.0 }
  0x1a   : > { %v440_v52 = vmax.f32 %v408_v44, 0.0  ;;  %v441_v53 = vmax.f32 %v409_v45, 0.0  ;;  %v442_v54 = vmax.f32 %v410_v46, 0.0  ;;  %v443_v55 = vmax.f32 %v411_v47, 0.0 }
  0x1b   : > { %v468_v58 = vpack.c.bf16 %v436_v48, %v436_v48  ;;  %v469_v59 = vpack.c.bf16 %v437_v49, %v437_v49  ;;  %v470_v60 = vpack.c.bf16 %v438_v50, %v438_v50  ;;  %v471_v61 = vpack.c.bf16 %v439_v51, %v439_v51 }
  0x1c   : > { %v472_v1 = vpack.c.bf16 %v440_v52, %v440_v52  ;;  %v473_v2 = vpack.c.bf16 %v441_v53, %v441_v53  ;;  %v474_v3 = vpack.c.bf16 %v442_v54, %v442_v54  ;;  %v475_v4 = vpack.c.bf16 %v443_v55, %v443_v55 }
  0x1d   : > { %501 = vst.msk [vmem:[%s808_s10] sm:$0xf] %vm500_vm0, %v468_v58  ;;  %v618_v6 = vunpack.c.l.bf16 %v667_v56  ;;  %v619_v7 = vunpack.c.h.bf16 %v667_v56  ;;  %v622_v8 = vunpack.c.l.bf16 %v668_v57  ;;  %v623_v9 = vunpack.c.h.bf16 %v668_v57  ;;  %v671_v56 = vld [vmem:[%s745_s24 + $0x40] sm:$0xff]   ;;  %v672_v57 = vld [vmem:[%s745_s24 + $0x48] sm:$0xff]  }
  0x1e   : > { %502 = vst.msk [vmem:[%s808_s10 + $0x4] sm:$0xf] %vm500_vm0, %v469_v59  ;;  %v626_v10 = vunpack.c.l.bf16 %v669_v62  ;;  %v627_v11 = vunpack.c.h.bf16 %v669_v62  ;;  %v630_v12 = vunpack.c.l.bf16 %v670_v63  ;;  %v631_v13 = vunpack.c.h.bf16 %v670_v63  ;;  %v673_v62 = vld [vmem:[%s745_s24 + $0x50] sm:$0xff]   ;;  %v674_v63 = vld [vmem:[%s745_s24 + $0x58] sm:$0xff]  }
  0x1f   : > { %503 = vst.msk [vmem:[%s808_s10 + $0x8] sm:$0xf] %vm500_vm0, %v470_v60  ;;  %v304_v14 = vsub.f32 %v618_v6, %v750_v0  ;;  %v305_v16 = vsub.f32 %v619_v7, %v750_v0  ;;  %v306_v17 = vsub.f32 %v622_v8, %v750_v0  ;;  %v307_v18 = vsub.f32 %v623_v9, %v750_v0 }
  0x20   : > { %504 = vst.msk [vmem:[%s808_s10 + $0xc] sm:$0xf] %vm500_vm0, %v471_v61  ;;  %v308_v19 = vsub.f32 %v626_v10, %v750_v0  ;;  %v309_v20 = vsub.f32 %v627_v11, %v750_v0  ;;  %v310_v21 = vsub.f32 %v630_v12, %v750_v0  ;;  %v311_v22 = vsub.f32 %v631_v13, %v750_v0 }
  0x21   : > { %505 = vst.msk [vmem:[%s808_s10 + $0x10] sm:$0xf] %vm500_vm0, %v472_v1  ;;  %v340_v23 = vmul.f32 %v758_v5, %v304_v14  ;;  %v341_v25 = vmul.f32 %v758_v5, %v305_v16  ;;  %v342_v26 = vmul.f32 %v758_v5, %v306_v17  ;;  %v343_v27 = vmul.f32 %v758_v5, %v307_v18 }
  0x22   : > { %506 = vst.msk [vmem:[%s808_s10 + $0x14] sm:$0xf] %vm500_vm0, %v473_v2  ;;  %v344_v28 = vmul.f32 %v758_v5, %v308_v19  ;;  %v345_v29 = vmul.f32 %v758_v5, %v309_v20  ;;  %v346_v30 = vmul.f32 %v758_v5, %v310_v21  ;;  %v347_v31 = vmul.f32 %v758_v5, %v311_v22 }
  0x23   : > { %507 = vst.msk [vmem:[%s808_s10 + $0x18] sm:$0xf] %vm500_vm0, %v474_v3  ;;  %v376_v32 = vmul.f32 %v765_v15, %v340_v23  ;;  %v377_v33 = vmul.f32 %v765_v15, %v341_v25  ;;  %v378_v34 = vmul.f32 %v765_v15, %v342_v26  ;;  %v379_v35 = vmul.f32 %v765_v15, %v343_v27 }
  0x24   : > { %508 = vst.msk [vmem:[%s808_s10 + $0x1c] sm:$0xf] %vm500_vm0, %v475_v4  ;;  %v380_v36 = vmul.f32 %v765_v15, %v344_v28  ;;  %v381_v37 = vmul.f32 %v765_v15, %v345_v29  ;;  %v382_v38 = vmul.f32 %v765_v15, %v346_v30  ;;  %v383_v39 = vmul.f32 %v765_v15, %v347_v31 }
  0x25   : > { %v412_v40 = vadd.f32 %v778_v24, %v376_v32  ;;  %v413_v41 = vadd.f32 %v778_v24, %v377_v33  ;;  %v414_v42 = vadd.f32 %v778_v24, %v378_v34  ;;  %v415_v43 = vadd.f32 %v778_v24, %v379_v35 }
  0x26   : > { %v416_v44 = vadd.f32 %v778_v24, %v380_v36  ;;  %v417_v45 = vadd.f32 %v778_v24, %v381_v37  ;;  %v418_v46 = vadd.f32 %v778_v24, %v382_v38  ;;  %v419_v47 = vadd.f32 %v778_v24, %v383_v39 }
  0x27   : > { %v444_v48 = vmax.f32 %v412_v40, 0.0  ;;  %v445_v49 = vmax.f32 %v413_v41, 0.0  ;;  %v446_v50 = vmax.f32 %v414_v42, 0.0  ;;  %v447_v51 = vmax.f32 %v415_v43, 0.0 }
  0x28   : > { %v448_v52 = vmax.f32 %v416_v44, 0.0  ;;  %v449_v53 = vmax.f32 %v417_v45, 0.0  ;;  %v450_v54 = vmax.f32 %v418_v46, 0.0  ;;  %v451_v55 = vmax.f32 %v419_v47, 0.0 }
  0x29   : > { %v476_v58 = vpack.c.bf16 %v444_v48, %v444_v48  ;;  %v477_v59 = vpack.c.bf16 %v445_v49, %v445_v49  ;;  %v478_v60 = vpack.c.bf16 %v446_v50, %v446_v50  ;;  %v479_v61 = vpack.c.bf16 %v447_v51, %v447_v51 }
  0x2a   : > { %v480_v1 = vpack.c.bf16 %v448_v52, %v448_v52  ;;  %v481_v2 = vpack.c.bf16 %v449_v53, %v449_v53  ;;  %v482_v3 = vpack.c.bf16 %v450_v54, %v450_v54  ;;  %v483_v4 = vpack.c.bf16 %v451_v55, %v451_v55 }
  0x2b   : > { %509 = vst.msk [vmem:[%s808_s10 + $0x20] sm:$0xf] %vm500_vm0, %v476_v58  ;;  %v634_v6 = vunpack.c.l.bf16 %v671_v56  ;;  %v635_v7 = vunpack.c.h.bf16 %v671_v56  ;;  %v638_v8 = vunpack.c.l.bf16 %v672_v57  ;;  %v639_v9 = vunpack.c.h.bf16 %v672_v57  ;;  %v675_v56 = vld [vmem:[%s745_s24 + $0x60] sm:$0xff]   ;;  %v676_v57 = vld [vmem:[%s745_s24 + $0x68] sm:$0xff]  }
  0x2c   : > { %510 = vst.msk [vmem:[%s808_s10 + $0x24] sm:$0xf] %vm500_vm0, %v477_v59  ;;  %v642_v10 = vunpack.c.l.bf16 %v673_v62  ;;  %v643_v11 = vunpack.c.h.bf16 %v673_v62  ;;  %v646_v12 = vunpack.c.l.bf16 %v674_v63  ;;  %v647_v13 = vunpack.c.h.bf16 %v674_v63  ;;  %v677_v62 = vld [vmem:[%s745_s24 + $0x70] sm:$0xff]   ;;  %v678_v63 = vld [vmem:[%s745_s24 + $0x78] sm:$0xff]  }
  0x2d   : > { %511 = vst.msk [vmem:[%s808_s10 + $0x28] sm:$0xf] %vm500_vm0, %v478_v60  ;;  %v312_v14 = vsub.f32 %v634_v6, %v750_v0  ;;  %v313_v16 = vsub.f32 %v635_v7, %v750_v0  ;;  %v314_v17 = vsub.f32 %v638_v8, %v750_v0  ;;  %v315_v18 = vsub.f32 %v639_v9, %v750_v0 }
  0x2e   : > { %512 = vst.msk [vmem:[%s808_s10 + $0x2c] sm:$0xf] %vm500_vm0, %v479_v61  ;;  %v316_v19 = vsub.f32 %v642_v10, %v750_v0  ;;  %v317_v20 = vsub.f32 %v643_v11, %v750_v0  ;;  %v318_v21 = vsub.f32 %v646_v12, %v750_v0  ;;  %v319_v22 = vsub.f32 %v647_v13, %v750_v0 }
  0x2f   : > { %513 = vst.msk [vmem:[%s808_s10 + $0x30] sm:$0xf] %vm500_vm0, %v480_v1  ;;  %v348_v23 = vmul.f32 %v758_v5, %v312_v14  ;;  %v349_v25 = vmul.f32 %v758_v5, %v313_v16  ;;  %v350_v26 = vmul.f32 %v758_v5, %v314_v17  ;;  %v351_v27 = vmul.f32 %v758_v5, %v315_v18 }
  0x30   : > { %514 = vst.msk [vmem:[%s808_s10 + $0x34] sm:$0xf] %vm500_vm0, %v481_v2  ;;  %v352_v28 = vmul.f32 %v758_v5, %v316_v19  ;;  %v353_v29 = vmul.f32 %v758_v5, %v317_v20  ;;  %v354_v30 = vmul.f32 %v758_v5, %v318_v21  ;;  %v355_v31 = vmul.f32 %v758_v5, %v319_v22 }
  0x31   : > { %515 = vst.msk [vmem:[%s808_s10 + $0x38] sm:$0xf] %vm500_vm0, %v482_v3  ;;  %v384_v32 = vmul.f32 %v765_v15, %v348_v23  ;;  %v385_v33 = vmul.f32 %v765_v15, %v349_v25  ;;  %v386_v34 = vmul.f32 %v765_v15, %v350_v26  ;;  %v387_v35 = vmul.f32 %v765_v15, %v351_v27 }
  0x32   : > { %516 = vst.msk [vmem:[%s808_s10 + $0x3c] sm:$0xf] %vm500_vm0, %v483_v4  ;;  %v388_v36 = vmul.f32 %v765_v15, %v352_v28  ;;  %v389_v37 = vmul.f32 %v765_v15, %v353_v29  ;;  %v390_v38 = vmul.f32 %v765_v15, %v354_v30  ;;  %v391_v39 = vmul.f32 %v765_v15, %v355_v31 }
  0x33   : > { %v420_v40 = vadd.f32 %v778_v24, %v384_v32  ;;  %v421_v41 = vadd.f32 %v778_v24, %v385_v33  ;;  %v422_v42 = vadd.f32 %v778_v24, %v386_v34  ;;  %v423_v43 = vadd.f32 %v778_v24, %v387_v35 }
  0x34   : > { %v424_v44 = vadd.f32 %v778_v24, %v388_v36  ;;  %v425_v45 = vadd.f32 %v778_v24, %v389_v37  ;;  %v426_v46 = vadd.f32 %v778_v24, %v390_v38  ;;  %v427_v47 = vadd.f32 %v778_v24, %v391_v39 }
  0x35   : > { %v452_v48 = vmax.f32 %v420_v40, 0.0  ;;  %v453_v49 = vmax.f32 %v421_v41, 0.0  ;;  %v454_v50 = vmax.f32 %v422_v42, 0.0  ;;  %v455_v51 = vmax.f32 %v423_v43, 0.0 }
  0x36   : > { %v456_v52 = vmax.f32 %v424_v44, 0.0  ;;  %v457_v53 = vmax.f32 %v425_v45, 0.0  ;;  %v458_v54 = vmax.f32 %v426_v46, 0.0  ;;  %v459_v55 = vmax.f32 %v427_v47, 0.0 }
  0x37   : > { %v484_v58 = vpack.c.bf16 %v452_v48, %v452_v48  ;;  %v485_v59 = vpack.c.bf16 %v453_v49, %v453_v49  ;;  %v486_v60 = vpack.c.bf16 %v454_v50, %v454_v50  ;;  %v487_v61 = vpack.c.bf16 %v455_v51, %v455_v51 }
  0x38   : > { %v488_v1 = vpack.c.bf16 %v456_v52, %v456_v52  ;;  %v489_v2 = vpack.c.bf16 %v457_v53, %v457_v53  ;;  %v490_v3 = vpack.c.bf16 %v458_v54, %v458_v54  ;;  %v491_v4 = vpack.c.bf16 %v459_v55, %v459_v55 }
  0x39   : > { %517 = vst.msk [vmem:[%s808_s10 + $0x40] sm:$0xf] %vm500_vm0, %v484_v58  ;;  %v650_v6 = vunpack.c.l.bf16 %v675_v56  ;;  %v651_v7 = vunpack.c.h.bf16 %v675_v56  ;;  %v654_v8 = vunpack.c.l.bf16 %v676_v57  ;;  %v655_v9 = vunpack.c.h.bf16 %v676_v57 }
  0x3a   : > { %518 = vst.msk [vmem:[%s808_s10 + $0x44] sm:$0xf] %vm500_vm0, %v485_v59  ;;  %v658_v10 = vunpack.c.l.bf16 %v677_v62  ;;  %v659_v11 = vunpack.c.h.bf16 %v677_v62  ;;  %v662_v12 = vunpack.c.l.bf16 %v678_v63  ;;  %v663_v13 = vunpack.c.h.bf16 %v678_v63 }
  0x3b   : > { %519 = vst.msk [vmem:[%s808_s10 + $0x48] sm:$0xf] %vm500_vm0, %v486_v60  ;;  %v320_v14 = vsub.f32 %v650_v6, %v750_v0  ;;  %v321_v16 = vsub.f32 %v651_v7, %v750_v0  ;;  %v322_v17 = vsub.f32 %v654_v8, %v750_v0  ;;  %v323_v18 = vsub.f32 %v655_v9, %v750_v0 }
  0x3c   : > { %520 = vst.msk [vmem:[%s808_s10 + $0x4c] sm:$0xf] %vm500_vm0, %v487_v61  ;;  %v324_v19 = vsub.f32 %v658_v10, %v750_v0  ;;  %v325_v20 = vsub.f32 %v659_v11, %v750_v0  ;;  %v326_v21 = vsub.f32 %v662_v12, %v750_v0  ;;  %v327_v22 = vsub.f32 %v663_v13, %v750_v0 }
  0x3d   : > { %521 = vst.msk [vmem:[%s808_s10 + $0x50] sm:$0xf] %vm500_vm0, %v488_v1  ;;  %v356_v23 = vmul.f32 %v758_v5, %v320_v14  ;;  %v357_v25 = vmul.f32 %v758_v5, %v321_v16  ;;  %v358_v26 = vmul.f32 %v758_v5, %v322_v17  ;;  %v359_v27 = vmul.f32 %v758_v5, %v323_v18 }
  0x3e   : > { %522 = vst.msk [vmem:[%s808_s10 + $0x54] sm:$0xf] %vm500_vm0, %v489_v2  ;;  %v360_v28 = vmul.f32 %v758_v5, %v324_v19  ;;  %v361_v29 = vmul.f32 %v758_v5, %v325_v20  ;;  %v362_v30 = vmul.f32 %v758_v5, %v326_v21  ;;  %v363_v0 = vmul.f32 %v758_v5, %v327_v22 }
  0x3f   : > { %523 = vst.msk [vmem:[%s808_s10 + $0x58] sm:$0xf] %vm500_vm0, %v490_v3  ;;  %v392_v31 = vmul.f32 %v765_v15, %v356_v23  ;;  %v393_v32 = vmul.f32 %v765_v15, %v357_v25  ;;  %v394_v33 = vmul.f32 %v765_v15, %v358_v26  ;;  %v395_v34 = vmul.f32 %v765_v15, %v359_v27 }
  0x40   : > { %524 = vst.msk [vmem:[%s808_s10 + $0x5c] sm:$0xf] %vm500_vm0, %v491_v4  ;;  %v396_v35 = vmul.f32 %v765_v15, %v360_v28  ;;  %v397_v36 = vmul.f32 %v765_v15, %v361_v29  ;;  %v398_v37 = vmul.f32 %v765_v15, %v362_v30  ;;  %v399_v5 = vmul.f32 %v765_v15, %v363_v0 }
  0x41   : > { %v428_v38 = vadd.f32 %v778_v24, %v392_v31  ;;  %v429_v39 = vadd.f32 %v778_v24, %v393_v32  ;;  %v430_v40 = vadd.f32 %v778_v24, %v394_v33  ;;  %v431_v41 = vadd.f32 %v778_v24, %v395_v34 }
  0x42   : > { %v432_v42 = vadd.f32 %v778_v24, %v396_v35  ;;  %v433_v43 = vadd.f32 %v778_v24, %v397_v36  ;;  %v434_v44 = vadd.f32 %v778_v24, %v398_v37  ;;  %v435_v45 = vadd.f32 %v778_v24, %v399_v5 }
  0x43   : > { %v460_v46 = vmax.f32 %v428_v38, 0.0  ;;  %v461_v15 = vmax.f32 %v429_v39, 0.0  ;;  %v462_v47 = vmax.f32 %v430_v40, 0.0  ;;  %v463_v48 = vmax.f32 %v431_v41, 0.0 }
  0x44   : > { %v464_v49 = vmax.f32 %v432_v42, 0.0  ;;  %v465_v50 = vmax.f32 %v433_v43, 0.0  ;;  %v466_v54 = vmax.f32 %v434_v44, 0.0  ;;  %v467_v56 = vmax.f32 %v435_v45, 0.0 }
  0x45   : > { %v492_v51 = vpack.c.bf16 %v460_v46, %v460_v46  ;;  %v493_v52 = vpack.c.bf16 %v461_v15, %v461_v15  ;;  %v494_v53 = vpack.c.bf16 %v462_v47, %v462_v47  ;;  %v495_v55 = vpack.c.bf16 %v463_v48, %v463_v48 }
  0x46   : > { %v496_v24 = vpack.c.bf16 %v464_v49, %v464_v49  ;;  %v497_v57 = vpack.c.bf16 %v465_v50, %v465_v50  ;;  %v498_v58 = vpack.c.bf16 %v466_v54, %v466_v54  ;;  %v499_v59 = vpack.c.bf16 %v467_v56, %v467_v56 }
  0x47   : > { %525 = vst.msk [vmem:[%s808_s10 + $0x60] sm:$0xf] %vm500_vm0, %v492_v51 }
  0x48   : > { %526 = vst.msk [vmem:[%s808_s10 + $0x64] sm:$0xf] %vm500_vm0, %v493_v52 }
  0x49   : > { %527 = vst.msk [vmem:[%s808_s10 + $0x68] sm:$0xf] %vm500_vm0, %v494_v53 }
  0x4a   : > { %528 = vst.msk [vmem:[%s808_s10 + $0x6c] sm:$0xf] %vm500_vm0, %v495_v55 }
  0x4b   : > { %529 = vst.msk [vmem:[%s808_s10 + $0x70] sm:$0xf] %vm500_vm0, %v496_v24 }
  0x4c   : > { %530 = vst.msk [vmem:[%s808_s10 + $0x74] sm:$0xf] %vm500_vm0, %v497_v57 }
  0x4d   : > { %531 = vst.msk [vmem:[%s808_s10 + $0x78] sm:$0xf] %vm500_vm0, %v498_v58 }
  0x4e   : > { %532 = vst.msk [vmem:[%s808_s10 + $0x7c] sm:$0xf] %vm500_vm0, %v499_v59 }
  0x4f PF: > { %s15_s18 = sadd.s32 1, %s697_s18  }
  0x50   : > { %p12_p4 = scmp.ge.s32.totalorder %s15_s18, 4  }
  0x52   :  { %14 = sbr.rel (!%p12_p4) target bundleno = 1 (0x1), region = 70 }

// kernel: attention_unet_forward.27
= control target key start
LH: loop header
LB: loop body
LE: loop exit
PB: predicated region body
PF: predicated region fallthrough
CT: control target
= control target key end

     0   :  { %s1139_s24 = smov 0   ;;  %s1141_s25 = smov 0   ;;  %s1298_s0 = inlined_call_operand.vmem [shape: bf16[2,18,18,16], index: 0, kind: input, shape index: {}, may-alias: {0,1,2}]   ;;  %s1299_s1 = inlined_call_operand.vmem [shape: bf16[2,18,18,16], index: 1, kind: input, shape index: {}, may-alias: {0,1,2}]   ;;  %s1300_s2 = inlined_call_operand.vmem [shape: bf16[2,18,18,16], index: 2, kind: input, shape index: {}, may-alias: {0,1,2}]   ;;  %s1301_s3 = inlined_call_operand.vmem [shape: bf16[3,3,16,16], index: 3, kind: input, shape index: {}]   ;;  %s1302_s4 = inlined_call_operand.vmem [shape: f32[1,16], index: 4, kind: input, shape index: {}]   ;;  %s1303_s5 = inlined_call_operand.vmem [shape: bf16[2,16,16,16], index: 5, kind: output, shape index: {0}]   ;;  %s1304_s6 = inlined_call_operand.vmem [shape: f32[1,16], index: 6, kind: output, shape index: {1}]   ;;  %s1305_s7 = inlined_call_operand.vmem [shape: f32[1,16], index: 7, kind: output, shape index: {2}]  }
   0x1   :  { %s1143_s26 = smov 0   ;;  %s1145_s27 = smov 0  }
   0x2   :  { %s1147_s28 = smov 0  }
   0x3 LB: > { %s27_s29 = sadd.s32 1, %s1088_s26  ;;  %s30_s30 = sadd.s32 1, %s1092_s27  ;;  %s1096_s28 = sphi %s1147_s28, %s18_s28   ;;  %s1092_s27 = sphi %s1145_s27, %s1311_s27   ;;  %s1088_s26 = sphi %s1143_s26, %s1310_s26   ;;  %s1084_s25 = sphi %s1141_s25, %s1309_s25   ;;  %s1080_s24 = sphi %s1139_s24, %s1308_s24  }
   0x4   : > { %p28_p0 = scmp.ge.s32.totalorder %s27_s29, 16  ;;  %p918_p1 = scmp.ge.s32.totalorder %s1096_s28, 1 }
   0x5   : > { %p292_p2 = scmp.lt.s32.totalorder %s1096_s28, 33 }
   0x6   : > { %s1313_s29 = smov (%p28_p0, %s27_s29), 0  ;;  %s1315_s30 = smov (!%p28_p0, %s30_s30), %s1092_s27 }
   0x7   : > { %p293_p3 = pnand %p918_p1, %p292_p2  ;;  %p32_p4 = scmp.ge.s32.totalorder %s1315_s30, 2 }
   0x8   : > { %p352_p5 = scmp.lt.s32.totalorder (!%p293_p3), %s1084_s25, 1  ;;  %p354_p6 = scmp.lt.s32.totalorder (!%p293_p3), %s1080_s24, 17 }
   0x9   : > { %s1317_s30 = smov (%p32_p4, %s1315_s30), 0  ;;  %296 = sbr.rel (%p293_p3) target bundleno = 228 (0xe4), region = 40 }
   0xa   : > { %s361_s16 = sadd.s32 (!%p293_p3), 1, %s1080_s24  ;;  %s372_s13 = sadd.s32 (!%p293_p3), 2, %s1080_s24 }
   0xb   : > { %p364_p7 = scmp.lt.s32.totalorder (!%p293_p3), %s361_s16, 17  ;;  %p1212_p8 = scmp.lt.s32.totalorder (!%p293_p3), %s372_s13, 17 }
   0xc   : > { %p729_p9 = scmp.eq.s32.totalorder (!%p293_p3), %s1084_s25, 0  ;;  %p730_p10 = scmp.eq.s32.totalorder (!%p293_p3), %s1080_s24, 0 }
   0xd   : > { %p385_p12 = scmp.lt.s32.totalorder (!%p293_p3), %s1080_s24, 15 }
   0xe   : > { %v1005_v0 = vld [vmem:[%s1301_s3 + $0x10] sm:$0xff]  ;;  %v1004_v1 = vld [vmem:[%s1301_s3 + $0x8] sm:$0xff]  ;;  %v1003_v2 = vld [vmem:[%s1301_s3] sm:$0xff]  ;;  %s1192_s19 = scalar_select %p352_p5, %s1084_s25, 1  ;;  %vm434_vm0 = vcmask 130048   ;;  %vm477_vm1 = vcmask 1046528  }
   0xf   : > { %v1006_v3 = vld [vmem:[%s1301_s3 + $0x18] sm:$0xff]  ;;  %v1007_v4 = vld [vmem:[%s1301_s3 + $0x20] sm:$0xff]  ;;  %497 = vmatpush.bf16.msra.mxu2 %v1005_v0  ;;  %445 = vmatpush.bf16.msra.mxu0 %v1004_v1  ;;  %v1009_v5 = vld [vmem:[%s1301_s3 + $0x30] sm:$0xff]  ;;  %s355_s10 = scalar_select %p354_p6, %s1080_s24, 17  ;;  %vm415_vm2 = vsmask.f32 7424 }
  0x10   : > { %v1010_v6 = vld [vmem:[%s1301_s3 + $0x38] sm:$0xff]  ;;  %v1008_v7 = vld [vmem:[%s1301_s3 + $0x28] sm:$0xff]  ;;  %467 = vmatpush.bf16.msra.mxu1 %v1003_v2  ;;  %530 = vmatpush.bf16.msra.mxu3 %v1006_v3  ;;  %s1205_s11 = smul.u32 54, %s1192_s19  ;;  %s1319_s16 = smov (!%p364_p7, %s361_s16), 17  ;;  %v1011_v24 = vld [vmem:[%s1301_s3 + $0x40] sm:$0xff]  ;;  %vm726_vm3 = vcmask 125952  }
  0x11   : > { %s1012_s12 = smul.u32 3, %s355_s10  ;;  %s1321_s13 = smov (!%p1212_p8, %s372_s13), 17 }
  0x12   : > { %s1014_s17 = smul.u32 3, %s1319_s16  ;;  %p1246_p11 = pnand %p730_p10, %p729_p9 }
  0x13   : > { %572 = vmatpush.bf16.msrb.mxu0 %v1007_v4  ;;  %636 = vmatpush.bf16.msrb.mxu2 %v1009_v5  ;;  %s358_s14 = sadd.s32 %s1205_s11, %s1012_s12  ;;  %s1015_s12 = smul.u32 3, %s1321_s13 }
  0x14   : > { %678 = vmatpush.bf16.msrb.mxu3 %v1010_v6  ;;  %603 = vmatpush.bf16.msrb.mxu1 %v1008_v7  ;;  %s919_s15 = sshll.u32 %s358_s14, 2  ;;  %s368_s23 = sadd.s32 %s1014_s17, %s1205_s11 }
  0x15   : > { %s360_s21 = scalar_lea.vmem %s1298_s0, %s919_s15  ;;  %s920_s8 = sshll.u32 %s368_s23, 2 }
  0x16   : > { %v1000_v8 = vld [vmem:[%s360_s21] sm:$0xff]  ;;  %v395_v9 = vld [vmem:[%s360_s21 + $0x8] sm:$0x1]  ;;  %s370_s10 = scalar_lea.vmem %s1299_s1, %s920_s8  ;;  %s379_s14 = sadd.s32 %s1015_s12, %s1205_s11 }
  0x17   : > { %v412_v10 = vunpack.c.l.b16 %v395_v9  ;;  %v417_v11 = vshrl.u32 %v1000_v8, 16  ;;  %v419_v12 = vshll.u32 %v1000_v8, 16  ;;  %940 = vmatmul.msk.bf16.vlgmr.msra.gmra.mxu1 %vm434_vm0, %v1000_v8  ;;  %v478_v14 = vrot.slane %v1000_v8, 1  ;;  %v1001_v15 = vld [vmem:[%s370_s10] sm:$0xff]  ;;  %v398_v16 = vld [vmem:[%s370_s10 + $0x8] sm:$0x1] }
  0x18   : > { %958 = vmatmul.msk.bf16.vlgmr.msra.gmra.mxu3 %vm434_vm0, %v1001_v15  ;;  %v543_v20 = vunpack.c.l.b16 %v398_v16  ;;  %s921_s18 = sshll.u32 %s379_s14, 2  ;;  %v547_v29 = vshll.u32 %v1001_v15, 16  ;;  %v584_v31 = vrot.slane %v1001_v15, 1  ;;  %v545_v36 = vshrl.u32 %v1001_v15, 16  ;;  %s1323_s24 = smov (!%p385_p12, %s1080_s24), 15 }
  0x19   : > { %v414_v13 = vpack.c.b16 %v412_v10, %v412_v10  ;;  %v421_v17 = vrot.slane %v419_v12, 1  ;;  %s381_s13 = scalar_lea.vmem %s1300_s2, %s921_s18  ;;  %s922_s25 = sshll.u32 %s1323_s24, 1 }
  0x1a   : > { %v544_v26 = vpack.c.b16 %v543_v20, %v543_v20  ;;  %v1002_v27 = vld [vmem:[%s381_s13] sm:$0xff]  ;;  %v401_v28 = vld [vmem:[%s381_s13 + $0x8] sm:$0x1]  ;;  %v549_v38 = vrot.slane %v547_v29, 1  ;;  %s923_s22 = sshll.u32 %s1192_s19, 5 }
  0x1b   : > { %v479_v18 = vrot.slane %v414_v13, 1  ;;  %v424_v19 = vshll.u32 %v414_v13, 16  ;;  %v422_v21 = vor.u32 %v421_v17, %v417_v11  ;;  %v649_v30 = vunpack.c.l.b16 %v401_v28  ;;  %s389_s23 = sadd.s32 %s923_s22, %s922_s25  ;;  %v1057_v13 = vld [vmem:[%s1302_s4] ss:$0 sm:$0xff] }
  0x1c   : > { %v585_v32 = vrot.slane %v544_v26, 1  ;;  %v651_v33 = vshrl.u32 %v1002_v27, 16  ;;  %v653_v34 = vshll.u32 %v1002_v27, 16  ;;  %v552_v39 = vshll.u32 %v544_v26, 16  ;;  %s924_s9 = sshll.u32 %s389_s23, 2 }
  0x1d   : > { %v480_v22 = vsel %vm477_vm1, %v478_v14, %v479_v18  ;;  %v426_v23 = vrot.slane %v424_v19, 1  ;;  %v650_v35 = vpack.c.b16 %v649_v30, %v649_v30  ;;  %v550_v44 = vor.u32 %v549_v38, %v545_v36  ;;  %s391_s24 = scalar_lea.vmem %s1303_s5, %s924_s9 }
  0x1e   : > { %947 = vmatmul.msk.bf16.vlgmr.msra.gmra.mxu2 %vm434_vm0, %v480_v22  ;;  %v655_v37 = vrot.slane %v653_v34, 1  ;;  %v586_v41 = vsel %vm477_vm1, %v584_v31, %v585_v32  ;;  %v554_v45 = vrot.slane %v552_v39, 1  ;;  %v690_v48 = vrot.slane %v1002_v27, 1 }
  0x1f   : > { %v427_v25 = vsel %vm415_vm2, %v422_v21, %v426_v23  ;;  %v658_v40 = vshll.u32 %v650_v35, 16  ;;  %v691_v49 = vrot.slane %v650_v35, 1 }
  0x20   : > { %935 = vmatmul.msk.bf16.vlgmr.msra.gmra.mxu0 %vm434_vm0, %v427_v25  ;;  %v656_v42 = vor.u32 %v655_v37, %v651_v33  ;;  %v555_v47 = vsel %vm415_vm2, %v550_v44, %v554_v45 }
  0x21   : > { %709 = vmatpush.bf16.msra.mxu0 %v1011_v24  ;;  %v660_v43 = vrot.slane %v658_v40, 1  ;;  %v692_v50 = vsel %vm477_vm1, %v690_v48, %v691_v49 }
  0x23   : > { %v661_v46 = vsel %vm415_vm2, %v656_v42, %v660_v43 }
  0x27   : > { %972 = vmatmul.msk.bf16.vlgmr.msrb.gmra.mxu1 %vm434_vm0, %v586_v41 }
  0x28   : > { %990 = vmatmul.msk.bf16.vlgmr.msrb.gmra.mxu3 %vm434_vm0, %v661_v46 }
  0x2e   : > { %983 = vmatmul.msk.bf16.vlgmr.msrb.gmra.mxu2 %vm434_vm0, %v1002_v27 }
  0x30   : > { %965 = vmatmul.msk.bf16.vlgmr.msrb.gmra.mxu0 %vm434_vm0, %v555_v47 }
  0x40   : > { %997 = vmatmul.msk.bf16.vlgmr.msra.gmra.mxu0 %vm434_vm0, %v692_v50 }
  0x94   : > { %v469_v52 = vpop.f32.mrf.mxu1 }
  0x9b   : > { %v532_v54 = vpop.f32.mrf.mxu3 }
  0x9c   : > { %v471_v56 = vpop.f32.mrf.mxu1 }
  0x9d   : > { %v447_v51 = vpop.f32.mrf.mxu0 }
  0x9e   : > { %v470_v57 = vadd.f32 %v469_v52, %v447_v51 }
  0xa1   : > { %v499_v53 = vpop.f32.mrf.mxu2 }
  0xa2   : > { %v504_v59 = vadd.f32 %v499_v53, %v470_v57 }
  0xa3   : > { %v534_v60 = vpop.f32.mrf.mxu3 }
  0xa4   : > { %v537_v62 = vadd.f32 %v532_v54, %v504_v59  ;;  %v605_v63 = vpop.f32.mrf.mxu1 }
  0xa5   : > { %v449_v55 = vpop.f32.mrf.mxu0 }
  0xa6   : > { %v472_v0 = vadd.f32 %v471_v56, %v449_v55 }
  0xa9   : > { %v501_v58 = vpop.f32.mrf.mxu2 }
  0xaa   : > { %v505_v2 = vadd.f32 %v501_v58, %v472_v0 }
  0xab   : > { %v680_v7 = vpop.f32.mrf.mxu3 }
  0xac   : > { %v538_v6 = vadd.f32 %v534_v60, %v505_v2  ;;  %v607_v10 = vpop.f32.mrf.mxu1 }
  0xad   : > { %v574_v61 = vpop.f32.mrf.mxu0 }
  0xae   : > { %v579_v1 = vadd.f32 %v574_v61, %v537_v62 }
  0xb0   : > { %v610_v4 = vadd.f32 %v605_v63, %v579_v1 }
  0xb1   : > { %v638_v3 = vpop.f32.mrf.mxu2 }
  0xb2   : > { %v643_v8 = vadd.f32 %v638_v3, %v610_v4 }
  0xb3   : > { %v682_v19 = vpop.f32.mrf.mxu3 }
  0xb4   : > { %v685_v11 = vadd.f32 %v680_v7, %v643_v8 }
  0xb5   : > { %v576_v5 = vpop.f32.mrf.mxu0 }
  0xb6   : > { %v580_v9 = vadd.f32 %v576_v5, %v538_v6 }
  0xb8   : > { %v611_v12 = vadd.f32 %v607_v10, %v580_v9 }
  0xb9   : > { %v640_v14 = vpop.f32.mrf.mxu2 }
  0xba   : > { %v644_v17 = vadd.f32 %v640_v14, %v611_v12 }
  0xbc   : > { %v686_v21 = vadd.f32 %v682_v19, %v644_v17 }
  0xbd   : > { %v711_v15 = vpop.f32.mrf.mxu0 }
  0xbe   : > { %v716_v16 = vadd.f32 %v711_v15, %v685_v11 }
  0xc0   : > { %v722_v18 = vadd.f32 %v1057_v13, %v716_v16 }
  0xc2   : > { %v724_v20 = vpack.c.bf16 %v722_v18, %v722_v18 }
  0xc4   : > { %727 = vst.msk [vmem:[%s391_s24] sm:$0xf] %vm726_vm3, %v724_v20 }
  0xc5   : > { %v713_v22 = vpop.f32.mrf.mxu0 }
  0xc6   : > { %v717_v23 = vadd.f32 %v713_v22, %v686_v21 }
  0xc8   : > { %v723_v24 = vadd.f32 %v1057_v13, %v717_v23  ;;  %734 = sbr.rel (%p1246_p11) target bundleno = 208 (0xd0), region = 44 }
  0xca   : > { %v725_v25 = vpack.c.bf16 %v723_v24, %v723_v24 }
  0xcc   : > { %728 = vst.msk [vmem:[%s391_s24 + $0x4] sm:$0xf] %vm726_vm3, %v725_v25 }
  0xcd   : > { %vm735_vm4 = vcmask 122880   ;;  %v1098_v26 = vmov 0.0  }
  0xce   : > { %736 = vst.msk [vmem:[%s1304_s6] sm:$0x1] %vm735_vm4, %v1098_v26 }
  0xcf   : > { %737 = vst.msk [vmem:[%s1305_s7] sm:$0x1] %vm735_vm4, %v1098_v26 }
  0xd0 PF: > { %v739_v27 = vsel %vm434_vm0, %v722_v18, 0.0  ;;  %v740_v28 = vsel %vm434_vm0, %v723_v24, 0.0  ;;  %v752_v29 = vmul.f32 %v722_v18, %v722_v18  ;;  %v753_v31 = vmul.f32 %v723_v24, %v723_v24 }
  0xd1   : > { %v741_v30 = vadd.f32 %v740_v28, %v739_v27  ;;  %vm749_vm5 = vcmask 122880  }
  0xd2   : > { %v754_v32 = vsel %vm434_vm0, %v752_v29, 0.0  ;;  %v755_v34 = vsel %vm434_vm0, %v753_v31, 0.0 }
  0xd3   : > { %v742_v33 = vrot.slane %v741_v30, 4  ;;  %v756_v35 = vadd.f32 %v755_v34, %v754_v32 }
  0xd5   : > { %v743_v36 = vadd.f32 %v742_v33, %v741_v30  ;;  %v757_v37 = vrot.slane %v756_v35, 4  ;;  %v738_v43 = vld [vmem:[%s1304_s6] sm:$0x1] }
  0xd6   : > { %v751_v48 = vld [vmem:[%s1305_s7] sm:$0x1] }
  0xd7   : > { %v744_v38 = vrot.slane %v743_v36, 2  ;;  %v758_v39 = vadd.f32 %v757_v37, %v756_v35 }
  0xd9   : > { %v745_v40 = vadd.f32 %v744_v38, %v743_v36  ;;  %v759_v41 = vrot.slane %v758_v39, 2 }
  0xdb   : > { %v746_v42 = vrot.slane %v745_v40, 1  ;;  %v760_v44 = vadd.f32 %v759_v41, %v758_v39 }
  0xdd   : > { %v747_v45 = vadd.f32 %v746_v42, %v745_v40  ;;  %v761_v46 = vrot.slane %v760_v44, 1 }
  0xdf   : > { %v748_v47 = vadd.f32 %v747_v45, %v738_v43  ;;  %v762_v49 = vadd.f32 %v761_v46, %v760_v44 }
  0xe1   : > { %750 = vst.msk [vmem:[%s1304_s6] sm:$0x1] %vm749_vm5, %v748_v47  ;;  %v763_v50 = vadd.f32 %v762_v49, %v751_v48 }
  0xe3   : > { %764 = vst.msk [vmem:[%s1305_s7] sm:$0x1] %vm749_vm5, %v763_v50 }
  0xe4 PF: > { %s18_s28 = sadd.s32 1, %s1096_s28   ;;  %s1308_s24 = smov %s1088_s26 }
  0xe5   : > { %p15_p13 = scmp.ge.s32.totalorder %s18_s28, 34   ;;  %s1309_s25 = smov %s1092_s27 }
  0xe6   : > { %s1310_s26 = smov %s1313_s29  ;;  %s1311_s27 = smov %s1317_s30 }
  0xe7   :  { %17 = sbr.rel (!%p15_p13) target bundleno = 3 (0x3), region = 104 }

// kernel: attention_unet_forward.28
= control target key start
LH: loop header
LB: loop body
LE: loop exit
PB: predicated region body
PF: predicated region fallthrough
CT: control target
= control target key end

     0   :  { %s851_s21 = smov 0   ;;  %s853_s22 = smov 0   ;;  %s1102_s0 = inlined_call_operand.vmem [shape: bf16[2,16,8,2,16], index: 0, kind: input, shape index: {}]   ;;  %s1103_s1 = inlined_call_operand.vmem [shape: f32[1,16], index: 1, kind: input, shape index: {}]   ;;  %s1104_s2 = inlined_call_operand.vmem [shape: f32[1,16], index: 2, kind: input, shape index: {}]   ;;  %s1105_s3 = inlined_call_operand.vmem [shape: f32[1,16], index: 3, kind: input, shape index: {}]   ;;  %s1106_s4 = inlined_call_operand.vmem [shape: f32[1,16], index: 4, kind: input, shape index: {}]   ;;  %s1107_s5 = inlined_call_operand.vmem [shape: bf16[2,16,8,2,16], index: 5, kind: output, shape index: {0}]   ;;  %s1108_s6 = inlined_call_operand.vmem [shape: bf16[2,8,8,16], index: 6, kind: output, shape index: {1}]  }
   0x1   :  { %s855_s23 = smov 0   ;;  %s857_s24 = smov 0  }
   0x2   :  { %s859_s25 = smov 0  }
   0x3 LB: > { %s26_s26 = sadd.s32 1, %s806_s23  ;;  %s29_s27 = sadd.s32 1, %s810_s24  ;;  %s814_s25 = sphi %s859_s25, %s17_s25   ;;  %s810_s24 = sphi %s857_s24, %s1112_s24   ;;  %s806_s23 = sphi %s855_s23, %s1111_s23   ;;  %s802_s22 = sphi %s853_s22, %s1110_s22   ;;  %s798_s21 = sphi %s851_s21, %s1109_s21  }
   0x4   : > { %p27_p0 = scmp.ge.s32.totalorder %s26_s26, 8  ;;  %p721_p1 = scmp.ge.s32.totalorder %s814_s25, 1 }
   0x5   : > { %p238_p2 = scmp.lt.s32.totalorder %s814_s25, 17 }
   0x6   : > { %s1114_s26 = smov (%p27_p0, %s26_s26), 0  ;;  %s1116_s27 = smov (!%p27_p0, %s29_s27), %s810_s24 }
   0x7   : > { %p239_p3 = pnand %p721_p1, %p238_p2  ;;  %p31_p4 = scmp.ge.s32.totalorder %s1116_s27, 2 }
   0x8   : > { %s722_s28 = sshll.u32 (!%p239_p3), %s798_s21, 1  ;;  %p285_p5 = scmp.lt.s32.totalorder (!%p239_p3), %s802_s22, 1 }
   0x9   : > { %s1118_s27 = smov (%p31_p4, %s1116_s27), 0  ;;  %242 = sbr.rel (%p239_p3) target bundleno = 82 (0x52), region = 40 }
   0xa   : > { %p287_p6 = scmp.lt.s32.totalorder (!%p239_p3), %s722_s28, 15  ;;  %p306_p7 = scmp.lt.s32.totalorder (!%p239_p3), %s798_s21, 7 }
   0xe   : > { %s1120_s22 = smov (!%p285_p5, %s802_s22), 1  ;;  %s1122_s28 = smov (!%p287_p6, %s722_s28), 15  ;;  %v898_v0 = vld [vmem:[%s1103_s1] ss:$0 sm:$0xff]  ;;  %vm456_vm0 = vcmask 122880   ;;  %vm481_vm1 = vcmask 123904  }
   0xf   : > { %s724_s29 = sshll.u32 %s1120_s22, 7  ;;  %s723_s30 = sshll.u32 %s1122_s28, 3  ;;  %v903_v1 = vld [vmem:[%s1104_s2] ss:$0 sm:$0xff]  ;;  %vm562_vm2 = vcmask 1041409   ;;  %vm564_vm3 = vcmask 1042434  }
  0x10   : > { %s887_s7 = sadd.s32 %s724_s29, %s723_s30  ;;  %v917_v17 = vld [vmem:[%s1105_s3] ss:$0 sm:$0xff]  ;;  %vm566_vm4 = vcmask 1043459   ;;  %vm568_vm5 = vcmask 1044484   ;;  %s1124_s21 = smov (!%p306_p7, %s798_s21), 7  ;;  %vm570_vm6 = vcmask 1045509  }
  0x11   : > { %s893_s10 = scalar_lea.vmem %s1102_s0, %s887_s7  ;;  %v928_v26 = vld [vmem:[%s1106_s4] ss:$0 sm:$0xff]  ;;  %s967_s28 = scalar_lea.vmem %s1107_s5, %s887_s7  ;;  %vm572_vm7 = vcmask 1046534   ;;  %vm574_vm8 = vcmask 1047559   ;;  %vm578_vm9 = vcmask 125952  }
  0x12   : > { %v312_v2 = vld [vmem:[%s893_s10] sm:$0x1]  ;;  %v313_v3 = vld [vmem:[%s893_s10 + $0x1] sm:$0x1]  ;;  %v314_v4 = vld [vmem:[%s893_s10 + $0x2] sm:$0x1] }
  0x13   : > { %v328_v5 = vunpack.c.l.bf16 %v312_v2  ;;  %v329_v6 = vunpack.c.l.bf16 %v313_v3  ;;  %v330_v7 = vunpack.c.l.bf16 %v314_v4  ;;  %v315_v8 = vld [vmem:[%s893_s10 + $0x3] sm:$0x1]  ;;  %v316_v9 = vld [vmem:[%s893_s10 + $0x4] sm:$0x1]  ;;  %v317_v10 = vld [vmem:[%s893_s10 + $0x5] sm:$0x1] }
  0x14   : > { %v331_v11 = vunpack.c.l.bf16 %v315_v8  ;;  %v332_v12 = vunpack.c.l.bf16 %v316_v9  ;;  %v333_v13 = vunpack.c.l.bf16 %v317_v10  ;;  %v318_v14 = vld [vmem:[%s893_s10 + $0x6] sm:$0x1]  ;;  %v319_v15 = vld [vmem:[%s893_s10 + $0x7] sm:$0x1]  ;;  %v320_v50 = vld [vmem:[%s893_s10 + $0x8] sm:$0x1] }
  0x15   : > { %v348_v16 = vsub.f32 %v328_v5, %v898_v0  ;;  %v349_v18 = vsub.f32 %v329_v6, %v898_v0  ;;  %v350_v19 = vsub.f32 %v330_v7, %v898_v0  ;;  %v334_v20 = vunpack.c.l.bf16 %v318_v14  ;;  %v321_v51 = vld [vmem:[%s893_s10 + $0x9] sm:$0x1]  ;;  %v322_v56 = vld [vmem:[%s893_s10 + $0xa] sm:$0x1]  ;;  %v323_v61 = vld [vmem:[%s893_s10 + $0xb] sm:$0x1] }
  0x16   : > { %v351_v21 = vsub.f32 %v331_v11, %v898_v0  ;;  %v352_v22 = vsub.f32 %v332_v12, %v898_v0  ;;  %v353_v23 = vsub.f32 %v333_v13, %v898_v0  ;;  %v335_v24 = vunpack.c.l.bf16 %v319_v15  ;;  %v324_v4 = vld [vmem:[%s893_s10 + $0xc] sm:$0x1]  ;;  %v325_v5 = vld [vmem:[%s893_s10 + $0xd] sm:$0x1]  ;;  %v326_v10 = vld [vmem:[%s893_s10 + $0xe] sm:$0x1] }
  0x17   : > { %v368_v25 = vmul.f32 %v903_v1, %v348_v16  ;;  %v369_v27 = vmul.f32 %v903_v1, %v349_v18  ;;  %v370_v28 = vmul.f32 %v903_v1, %v350_v19  ;;  %v354_v29 = vsub.f32 %v334_v20, %v898_v0  ;;  %v327_v15 = vld [vmem:[%s893_s10 + $0xf] sm:$0x1]  ;;  %s728_s29 = sshll.u32 %s1120_s22, 3 }
  0x18   : > { %v371_v30 = vmul.f32 %v903_v1, %v351_v21  ;;  %v372_v31 = vmul.f32 %v903_v1, %v352_v22  ;;  %v373_v32 = vmul.f32 %v903_v1, %v353_v23  ;;  %v355_v33 = vsub.f32 %v335_v24, %v898_v0  ;;  %s309_s30 = sadd.s32 %s728_s29, %s1124_s21 }
  0x19   : > { %v388_v34 = vmul.f32 %v917_v17, %v368_v25  ;;  %v389_v35 = vmul.f32 %v917_v17, %v369_v27  ;;  %v390_v36 = vmul.f32 %v917_v17, %v370_v28  ;;  %v374_v37 = vmul.f32 %v903_v1, %v354_v29  ;;  %s729_s7 = sshll.u32 %s309_s30, 2 }
  0x1a   : > { %v391_v38 = vmul.f32 %v917_v17, %v371_v30  ;;  %v392_v39 = vmul.f32 %v917_v17, %v372_v31  ;;  %v393_v40 = vmul.f32 %v917_v17, %v373_v32  ;;  %v375_v41 = vmul.f32 %v903_v1, %v355_v33  ;;  %s311_s10 = scalar_lea.vmem %s1108_s6, %s729_s7 }
  0x1b   : > { %v408_v42 = vadd.f32 %v928_v26, %v388_v34  ;;  %v409_v43 = vadd.f32 %v928_v26, %v389_v35  ;;  %v410_v44 = vadd.f32 %v928_v26, %v390_v36  ;;  %v394_v45 = vmul.f32 %v917_v17, %v374_v37 }
  0x1c   : > { %v411_v46 = vadd.f32 %v928_v26, %v391_v38  ;;  %v412_v47 = vadd.f32 %v928_v26, %v392_v39  ;;  %v413_v48 = vadd.f32 %v928_v26, %v393_v40  ;;  %v395_v49 = vmul.f32 %v917_v17, %v375_v41 }
  0x1d   : > { %v955_v52 = vmax.f32 %v408_v42, 0.0  ;;  %v957_v53 = vmax.f32 %v409_v43, 0.0  ;;  %v959_v54 = vmax.f32 %v410_v44, 0.0  ;;  %v414_v55 = vadd.f32 %v928_v26, %v394_v45 }
  0x1e   : > { %v969_v57 = vmax.f32 %v411_v46, 0.0  ;;  %v971_v58 = vmax.f32 %v412_v47, 0.0  ;;  %v973_v59 = vmax.f32 %v413_v48, 0.0  ;;  %v415_v60 = vadd.f32 %v928_v26, %v395_v49 }
  0x1f   : > { %v440_v62 = vpack.c.bf16 %v955_v52, %v955_v52  ;;  %v441_v63 = vpack.c.bf16 %v957_v53, %v957_v53  ;;  %v442_v2 = vpack.c.bf16 %v959_v54, %v959_v54  ;;  %v983_v3 = vmax.f32 %v414_v55, 0.0 }
  0x20   : > { %v443_v6 = vpack.c.bf16 %v969_v57, %v969_v57  ;;  %v444_v7 = vpack.c.bf16 %v971_v58, %v971_v58  ;;  %v445_v8 = vpack.c.bf16 %v973_v59, %v973_v59  ;;  %v993_v9 = vmax.f32 %v415_v60, 0.0 }
  0x21   : > { %457 = vst.msk [vmem:[%s967_s28] sm:$0x1] %vm456_vm0, %v440_v62  ;;  %v446_v11 = vpack.c.bf16 %v983_v3, %v983_v3  ;;  %v336_v12 = vunpack.c.l.bf16 %v320_v50  ;;  %v337_v13 = vunpack.c.l.bf16 %v321_v51  ;;  %v338_v14 = vunpack.c.l.bf16 %v322_v56 }
  0x22   : > { %458 = vst.msk [vmem:[%s967_s28 + $0x1] sm:$0x1] %vm456_vm0, %v441_v63  ;;  %v447_v16 = vpack.c.bf16 %v993_v9, %v993_v9  ;;  %v339_v18 = vunpack.c.l.bf16 %v323_v61  ;;  %v340_v19 = vunpack.c.l.bf16 %v324_v4  ;;  %v341_v20 = vunpack.c.l.bf16 %v325_v5 }
  0x23   : > { %459 = vst.msk [vmem:[%s967_s28 + $0x2] sm:$0x1] %vm456_vm0, %v442_v2  ;;  %v356_v21 = vsub.f32 %v336_v12, %v898_v0  ;;  %v357_v22 = vsub.f32 %v337_v13, %v898_v0  ;;  %v358_v23 = vsub.f32 %v338_v14, %v898_v0  ;;  %v342_v24 = vunpack.c.l.bf16 %v326_v10 }
  0x24   : > { %460 = vst.msk [vmem:[%s967_s28 + $0x3] sm:$0x1] %vm456_vm0, %v443_v6  ;;  %v359_v25 = vsub.f32 %v339_v18, %v898_v0  ;;  %v360_v27 = vsub.f32 %v340_v19, %v898_v0  ;;  %v361_v28 = vsub.f32 %v341_v20, %v898_v0  ;;  %v343_v29 = vunpack.c.l.bf16 %v327_v15 }
  0x25   : > { %461 = vst.msk [vmem:[%s967_s28 + $0x4] sm:$0x1] %vm456_vm0, %v444_v7  ;;  %v376_v30 = vmul.f32 %v903_v1, %v356_v21  ;;  %v377_v31 = vmul.f32 %v903_v1, %v357_v22  ;;  %v378_v32 = vmul.f32 %v903_v1, %v358_v23  ;;  %v362_v33 = vsub.f32 %v342_v24, %v898_v0 }
  0x26   : > { %462 = vst.msk [vmem:[%s967_s28 + $0x5] sm:$0x1] %vm456_vm0, %v445_v8  ;;  %v379_v34 = vmul.f32 %v903_v1, %v359_v25  ;;  %v380_v35 = vmul.f32 %v903_v1, %v360_v27  ;;  %v381_v36 = vmul.f32 %v903_v1, %v361_v28  ;;  %v363_v37 = vsub.f32 %v343_v29, %v898_v0 }
  0x27   : > { %463 = vst.msk [vmem:[%s967_s28 + $0x6] sm:$0x1] %vm456_vm0, %v446_v11  ;;  %v396_v38 = vmul.f32 %v917_v17, %v376_v30  ;;  %v397_v39 = vmul.f32 %v917_v17, %v377_v31  ;;  %v398_v40 = vmul.f32 %v917_v17, %v378_v32  ;;  %v382_v41 = vmul.f32 %v903_v1, %v362_v33 }
  0x28   : > { %464 = vst.msk [vmem:[%s967_s28 + $0x7] sm:$0x1] %vm456_vm0, %v447_v16  ;;  %v399_v42 = vmul.f32 %v917_v17, %v379_v34  ;;  %v400_v43 = vmul.f32 %v917_v17, %v380_v35  ;;  %v401_v44 = vmul.f32 %v917_v17, %v381_v36  ;;  %v383_v0 = vmul.f32 %v903_v1, %v363_v37 }
  0x29   : > { %v416_v45 = vadd.f32 %v928_v26, %v396_v38  ;;  %v417_v46 = vadd.f32 %v928_v26, %v397_v39  ;;  %v418_v47 = vadd.f32 %v928_v26, %v398_v40  ;;  %v402_v48 = vmul.f32 %v917_v17, %v382_v41 }
  0x2a   : > { %v419_v49 = vadd.f32 %v928_v26, %v399_v42  ;;  %v420_v50 = vadd.f32 %v928_v26, %v400_v43  ;;  %v421_v51 = vadd.f32 %v928_v26, %v401_v44  ;;  %v403_v55 = vmul.f32 %v917_v17, %v383_v0 }
  0x2b   : > { %v432_v56 = vmax.f32 %v416_v45, 0.0  ;;  %v433_v60 = vmax.f32 %v417_v46, 0.0  ;;  %v434_v1 = vmax.f32 %v418_v47, 0.0  ;;  %v422_v61 = vadd.f32 %v928_v26, %v402_v48 }
  0x2c   : > { %v435_v62 = vmax.f32 %v419_v49, 0.0  ;;  %v436_v63 = vmax.f32 %v420_v50, 0.0  ;;  %v437_v2 = vmax.f32 %v421_v51, 0.0  ;;  %v423_v4 = vadd.f32 %v928_v26, %v403_v55 }
  0x2d   : > { %v448_v5 = vpack.c.bf16 %v432_v56, %v432_v56  ;;  %v473_v6 = vmax.f32 %v955_v52, %v432_v56  ;;  %v449_v7 = vpack.c.bf16 %v433_v60, %v433_v60  ;;  %v474_v8 = vmax.f32 %v957_v53, %v433_v60 }
  0x2e   : > { %v450_v17 = vpack.c.bf16 %v434_v1, %v434_v1  ;;  %v475_v10 = vmax.f32 %v959_v54, %v434_v1  ;;  %v451_v11 = vpack.c.bf16 %v435_v62, %v435_v62  ;;  %v476_v12 = vmax.f32 %v969_v57, %v435_v62 }
  0x2f   : > { %465 = vst.msk [vmem:[%s967_s28 + $0x8] sm:$0x1] %vm456_vm0, %v448_v5  ;;  %v482_v13 = vsel %vm481_vm1, %v473_v6, -inf  ;;  %v489_v26 = vsel %vm481_vm1, %v474_v8, -inf  ;;  %v452_v14 = vpack.c.bf16 %v436_v63, %v436_v63  ;;  %v477_v52 = vmax.f32 %v971_v58, %v436_v63 }
  0x30   : > { %v483_v15 = vrot.slane %v482_v13, 4  ;;  %466 = vst.msk [vmem:[%s967_s28 + $0x9] sm:$0x1] %vm456_vm0, %v449_v7  ;;  %v490_v53 = vrot.slane %v489_v26, 4  ;;  %v496_v54 = vsel %vm481_vm1, %v475_v10, -inf  ;;  %v503_v16 = vsel %vm481_vm1, %v476_v12, -inf }
  0x31   : > { %467 = vst.msk [vmem:[%s967_s28 + $0xa] sm:$0x1] %vm456_vm0, %v450_v17  ;;  %v497_v57 = vrot.slane %v496_v54, 4  ;;  %v504_v18 = vrot.slane %v503_v16, 4  ;;  %v510_v19 = vsel %vm481_vm1, %v477_v52, -inf  ;;  %v453_v20 = vpack.c.bf16 %v437_v2, %v437_v2 }
  0x32   : > { %v484_v21 = vmax.f32 %v482_v13, %v483_v15  ;;  %v491_v22 = vmax.f32 %v489_v26, %v490_v53  ;;  %468 = vst.msk [vmem:[%s967_s28 + $0xb] sm:$0x1] %vm456_vm0, %v451_v11  ;;  %v511_v58 = vrot.slane %v510_v19, 4  ;;  %v478_v23 = vmax.f32 %v973_v59, %v437_v2 }
  0x33   : > { %v498_v24 = vmax.f32 %v496_v54, %v497_v57  ;;  %v505_v25 = vmax.f32 %v503_v16, %v504_v18  ;;  %469 = vst.msk [vmem:[%s967_s28 + $0xc] sm:$0x1] %vm456_vm0, %v452_v14  ;;  %v438_v27 = vmax.f32 %v422_v61, 0.0  ;;  %v439_v28 = vmax.f32 %v423_v4, 0.0 }
  0x34   : > { %v485_v29 = vrot.slane %v484_v21, 2  ;;  %v492_v30 = vrot.slane %v491_v22, 2  ;;  %v512_v31 = vmax.f32 %v510_v19, %v511_v58  ;;  %470 = vst.msk [vmem:[%s967_s28 + $0xd] sm:$0x1] %vm456_vm0, %v453_v20  ;;  %v517_v32 = vsel %vm481_vm1, %v478_v23, -inf }
  0x35   : > { %v499_v33 = vrot.slane %v498_v24, 2  ;;  %v506_v34 = vrot.slane %v505_v25, 2  ;;  %v518_v35 = vrot.slane %v517_v32, 4  ;;  %v454_v36 = vpack.c.bf16 %v438_v27, %v438_v27 }
  0x36   : > { %v486_v37 = vmax.f32 %v484_v21, %v485_v29  ;;  %v493_v59 = vmax.f32 %v491_v22, %v492_v30  ;;  %v513_v38 = vrot.slane %v512_v31, 2  ;;  %v479_v39 = vmax.f32 %v983_v3, %v438_v27 }
  0x37   : > { %v500_v40 = vmax.f32 %v498_v24, %v499_v33  ;;  %v507_v41 = vmax.f32 %v505_v25, %v506_v34  ;;  %v519_v42 = vmax.f32 %v517_v32, %v518_v35  ;;  %471 = vst.msk [vmem:[%s967_s28 + $0xe] sm:$0x1] %vm456_vm0, %v454_v36  ;;  %v455_v43 = vpack.c.bf16 %v439_v28, %v439_v28 }
  0x38   : > { %v487_v44 = vrot.slane %v486_v37, 1  ;;  %v494_v0 = vrot.slane %v493_v59, 1  ;;  %v514_v45 = vmax.f32 %v512_v31, %v513_v38  ;;  %v524_v46 = vsel %vm481_vm1, %v479_v39, -inf }
  0x39   : > { %v501_v47 = vrot.slane %v500_v40, 1  ;;  %v508_v48 = vrot.slane %v507_v41, 1  ;;  %v520_v49 = vrot.slane %v519_v42, 2  ;;  %v525_v50 = vrot.slane %v524_v46, 4  ;;  %472 = vst.msk [vmem:[%s967_s28 + $0xf] sm:$0x1] %vm456_vm0, %v455_v43 }
  0x3a   : > { %v488_v51 = vmax.f32 %v486_v37, %v487_v44  ;;  %v495_v55 = vmax.f32 %v493_v59, %v494_v0  ;;  %v515_v3 = vrot.slane %v514_v45, 1  ;;  %v480_v56 = vmax.f32 %v993_v9, %v439_v28 }
  0x3b   : > { %v502_v60 = vmax.f32 %v500_v40, %v501_v47  ;;  %v509_v1 = vmax.f32 %v507_v41, %v508_v48  ;;  %v521_v61 = vmax.f32 %v519_v42, %v520_v49  ;;  %v526_v62 = vmax.f32 %v524_v46, %v525_v50 }
  0x3c   : > { %v538_v63 = vpack.c.bf16 %v488_v51, %v488_v51  ;;  %v539_v2 = vpack.c.bf16 %v495_v55, %v495_v55  ;;  %v516_v4 = vmax.f32 %v514_v45, %v515_v3  ;;  %v531_v5 = vsel %vm481_vm1, %v480_v56, -inf }
  0x3d   : > { %v540_v6 = vpack.c.bf16 %v502_v60, %v502_v60  ;;  %v541_v7 = vpack.c.bf16 %v509_v1, %v509_v1  ;;  %v522_v8 = vrot.slane %v521_v61, 1  ;;  %v527_v17 = vrot.slane %v526_v62, 2 }
  0x3e   : > { %v554_v10 = vunpack.c.l.b16 %v538_v63  ;;  %v555_v11 = vunpack.c.l.b16 %v539_v2  ;;  %v542_v12 = vpack.c.bf16 %v516_v4, %v516_v4  ;;  %v532_v13 = vrot.slane %v531_v5, 4 }
  0x3f   : > { %v556_v26 = vunpack.c.l.b16 %v540_v6  ;;  %v557_v9 = vunpack.c.l.b16 %v541_v7  ;;  %v528_v14 = vmax.f32 %v526_v62, %v527_v17  ;;  %v523_v52 = vmax.f32 %v521_v61, %v522_v8 }
  0x40   : > { %v533_v15 = vmax.f32 %v531_v5, %v532_v13  ;;  %v558_v53 = vunpack.c.l.b16 %v542_v12  ;;  %v563_v57 = vsel %vm562_vm2, %v555_v11, %v554_v10 }
  0x41   : > { %v529_v54 = vrot.slane %v528_v14, 1  ;;  %v543_v16 = vpack.c.bf16 %v523_v52, %v523_v52  ;;  %v565_v19 = vsel %vm564_vm3, %v556_v26, %v563_v57 }
  0x42   : > { %v534_v18 = vrot.slane %v533_v15, 2  ;;  %v567_v21 = vsel %vm566_vm4, %v557_v9, %v565_v19 }
  0x43   : > { %v530_v20 = vmax.f32 %v528_v14, %v529_v54  ;;  %v559_v58 = vunpack.c.l.b16 %v543_v16  ;;  %v569_v24 = vsel %vm568_vm5, %v558_v53, %v567_v21 }
  0x44   : > { %v535_v22 = vmax.f32 %v533_v15, %v534_v18 }
  0x45   : > { %v544_v23 = vpack.c.bf16 %v530_v20, %v530_v20  ;;  %v571_v29 = vsel %vm570_vm6, %v559_v58, %v569_v24 }
  0x46   : > { %v536_v25 = vrot.slane %v535_v22, 1 }
  0x47   : > { %v560_v27 = vunpack.c.l.b16 %v544_v23 }
  0x48   : > { %v537_v28 = vmax.f32 %v535_v22, %v536_v25 }
  0x49   : > { %v573_v31 = vsel %vm572_vm7, %v560_v27, %v571_v29 }
  0x4a   : > { %v545_v30 = vpack.c.bf16 %v537_v28, %v537_v28 }
  0x4c   : > { %v561_v32 = vunpack.c.l.b16 %v545_v30 }
  0x4e   : > { %v575_v33 = vsel %vm574_vm8, %v561_v32, %v573_v31 }
  0x4f   : > { %v576_v34 = vpack.c.b16 %v575_v33, %v575_v33 }
  0x51   : > { %579 = vst.msk [vmem:[%s311_s10] sm:$0xf] %vm578_vm9, %v576_v34 }
  0x52 PF: > { %s17_s25 = sadd.s32 1, %s814_s25   ;;  %s1109_s21 = smov %s806_s23 }
  0x53   : > { %p14_p8 = scmp.ge.s32.totalorder %s17_s25, 18   ;;  %s1110_s22 = smov %s810_s24 }
  0x54   : > { %s1111_s23 = smov %s1114_s26  ;;  %s1112_s24 = smov %s1118_s27 }
  0x55   :  { %16 = sbr.rel (!%p14_p8) target bundleno = 3 (0x3), region = 82 }

// kernel: attention_unet_forward.30
= control target key start
LH: loop header
LB: loop body
LE: loop exit
PB: predicated region body
PF: predicated region fallthrough
CT: control target
= control target key end

     0   :  { %vm164_vm0 = vcmask 257024   ;;  %s430_s0 = inlined_call_operand.vmem [shape: bf16[128,32], index: 0, kind: input, shape index: {}]   ;;  %s431_s1 = inlined_call_operand.vmem [shape: f32[1,32], index: 1, kind: input, shape index: {}]   ;;  %s432_s2 = inlined_call_operand.vmem [shape: f32[1,32], index: 2, kind: input, shape index: {}]   ;;  %s433_s3 = inlined_call_operand.vmem [shape: f32[1,32], index: 3, kind: input, shape index: {}]   ;;  %s434_s4 = inlined_call_operand.vmem [shape: f32[1,32], index: 4, kind: input, shape index: {}]   ;;  %s435_s5 = inlined_call_operand.vmem [shape: bf16[128,32], index: 5, kind: output, shape index: {}]  }
   0x1   :  { %v186_v0 = vld [vmem:[%s430_s0] sm:$0xff]   ;;  %v217_v8 = vld [vmem:[%s430_s0 + $0x8] sm:$0xff]   ;;  %v218_v9 = vld [vmem:[%s430_s0 + $0x10] sm:$0xff]  }
   0x2   :  { %v264_v1 = vld [vmem:[%s431_s1] ss:$0 sm:$0xff]  ;;  %v187_v2 = vunpack.c.l.bf16 %v186_v0  ;;  %v188_v4 = vunpack.c.h.bf16 %v186_v0  ;;  %v219_v10 = vld [vmem:[%s430_s0 + $0x18] sm:$0xff]   ;;  %v191_v11 = vunpack.c.l.bf16 %v217_v8  ;;  %v192_v12 = vunpack.c.h.bf16 %v217_v8  ;;  %v221_v61 = vld [vmem:[%s430_s0 + $0x28] sm:$0xff]  }
   0x3   :  { %v269_v3 = vld [vmem:[%s432_s2] ss:$0 sm:$0xff]  ;;  %v195_v13 = vunpack.c.l.bf16 %v218_v9  ;;  %v196_v14 = vunpack.c.h.bf16 %v218_v9  ;;  %v199_v18 = vunpack.c.l.bf16 %v219_v10  ;;  %v200_v19 = vunpack.c.h.bf16 %v219_v10  ;;  %v222_v62 = vld [vmem:[%s430_s0 + $0x30] sm:$0xff]  }
   0x4   :  { %v274_v5 = vld [vmem:[%s433_s3] ss:$0 sm:$0xff]  ;;  %v56_v6 = vsub.f32 %v187_v2, %v264_v1  ;;  %v57_v7 = vsub.f32 %v188_v4, %v264_v1  ;;  %v58_v20 = vsub.f32 %v191_v11, %v264_v1  ;;  %v59_v21 = vsub.f32 %v192_v12, %v264_v1 }
   0x5   :  { %v291_v16 = vld [vmem:[%s434_s4] ss:$0 sm:$0xff]  ;;  %v60_v22 = vsub.f32 %v195_v13, %v264_v1  ;;  %v61_v23 = vsub.f32 %v196_v14, %v264_v1  ;;  %v62_v26 = vsub.f32 %v199_v18, %v264_v1  ;;  %v63_v27 = vsub.f32 %v200_v19, %v264_v1 }
   0x6   :  { %v76_v15 = vmul.f32 %v269_v3, %v56_v6  ;;  %v77_v17 = vmul.f32 %v269_v3, %v57_v7  ;;  %v78_v28 = vmul.f32 %v269_v3, %v58_v20  ;;  %v79_v29 = vmul.f32 %v269_v3, %v59_v21  ;;  %v220_v48 = vld [vmem:[%s430_s0 + $0x20] sm:$0xff]   ;;  %v223_v6 = vld [vmem:[%s430_s0 + $0x38] sm:$0xff]  }
   0x7   :  { %v80_v30 = vmul.f32 %v269_v3, %v60_v22  ;;  %v81_v31 = vmul.f32 %v269_v3, %v61_v23  ;;  %v82_v34 = vmul.f32 %v269_v3, %v62_v26  ;;  %v83_v35 = vmul.f32 %v269_v3, %v63_v27 }
   0x8   :  { %v96_v24 = vmul.f32 %v274_v5, %v76_v15  ;;  %v97_v25 = vmul.f32 %v274_v5, %v77_v17  ;;  %v98_v36 = vmul.f32 %v274_v5, %v78_v28  ;;  %v99_v37 = vmul.f32 %v274_v5, %v79_v29 }
   0x9   :  { %v100_v38 = vmul.f32 %v274_v5, %v80_v30  ;;  %v101_v39 = vmul.f32 %v274_v5, %v81_v31  ;;  %v102_v42 = vmul.f32 %v274_v5, %v82_v34  ;;  %v103_v43 = vmul.f32 %v274_v5, %v83_v35 }
   0xa   :  { %v116_v32 = vadd.f32 %v291_v16, %v96_v24  ;;  %v117_v33 = vadd.f32 %v291_v16, %v97_v25  ;;  %v118_v44 = vadd.f32 %v291_v16, %v98_v36  ;;  %v119_v45 = vadd.f32 %v291_v16, %v99_v37 }
   0xb   :  { %v120_v46 = vadd.f32 %v291_v16, %v100_v38  ;;  %v121_v47 = vadd.f32 %v291_v16, %v101_v39  ;;  %v122_v51 = vadd.f32 %v291_v16, %v102_v42  ;;  %v123_v52 = vadd.f32 %v291_v16, %v103_v43 }
   0xc   :  { %v132_v40 = vmax.f32 %v116_v32, 0.0  ;;  %v133_v41 = vmax.f32 %v117_v33, 0.0  ;;  %v134_v53 = vmax.f32 %v118_v44, 0.0  ;;  %v135_v54 = vmax.f32 %v119_v45, 0.0 }
   0xd   :  { %v136_v55 = vmax.f32 %v120_v46, 0.0  ;;  %v137_v56 = vmax.f32 %v121_v47, 0.0  ;;  %v138_v57 = vmax.f32 %v122_v51, 0.0  ;;  %v139_v58 = vmax.f32 %v123_v52, 0.0 }
   0xe   :  { %v148_v49 = vpack.c.bf16 %v132_v40, %v132_v40  ;;  %v149_v50 = vpack.c.bf16 %v133_v41, %v133_v41  ;;  %v203_v59 = vunpack.c.l.bf16 %v220_v48  ;;  %v204_v60 = vunpack.c.h.bf16 %v220_v48 }
   0xf   :  { %v150_v63 = vpack.c.bf16 %v134_v53, %v134_v53  ;;  %v151_v0 = vpack.c.bf16 %v135_v54, %v135_v54  ;;  %v152_v2 = vpack.c.bf16 %v136_v55, %v136_v55  ;;  %v153_v4 = vpack.c.bf16 %v137_v56, %v137_v56 }
  0x10   :  { %165 = vst.msk [vmem:[%s435_s5] sm:$0xf] %vm164_vm0, %v148_v49  ;;  %v154_v7 = vpack.c.bf16 %v138_v57, %v138_v57  ;;  %v155_v8 = vpack.c.bf16 %v139_v58, %v139_v58  ;;  %v64_v9 = vsub.f32 %v203_v59, %v264_v1  ;;  %v65_v10 = vsub.f32 %v204_v60, %v264_v1 }
  0x11   :  { %166 = vst.msk [vmem:[%s435_s5 + $0x4] sm:$0xf] %vm164_vm0, %v149_v50  ;;  %v207_v11 = vunpack.c.l.bf16 %v221_v61  ;;  %v208_v12 = vunpack.c.h.bf16 %v221_v61  ;;  %v211_v13 = vunpack.c.l.bf16 %v222_v62  ;;  %v212_v14 = vunpack.c.h.bf16 %v222_v62 }
  0x12   :  { %167 = vst.msk [vmem:[%s435_s5 + $0x8] sm:$0xf] %vm164_vm0, %v150_v63  ;;  %v84_v15 = vmul.f32 %v269_v3, %v64_v9  ;;  %v85_v17 = vmul.f32 %v269_v3, %v65_v10  ;;  %v215_v18 = vunpack.c.l.bf16 %v223_v6  ;;  %v216_v19 = vunpack.c.h.bf16 %v223_v6 }
  0x13   :  { %168 = vst.msk [vmem:[%s435_s5 + $0xc] sm:$0xf] %vm164_vm0, %v151_v0  ;;  %v66_v20 = vsub.f32 %v207_v11, %v264_v1  ;;  %v67_v21 = vsub.f32 %v208_v12, %v264_v1  ;;  %v68_v22 = vsub.f32 %v211_v13, %v264_v1  ;;  %v69_v23 = vsub.f32 %v212_v14, %v264_v1 }
  0x14   :  { %169 = vst.msk [vmem:[%s435_s5 + $0x10] sm:$0xf] %vm164_vm0, %v152_v2  ;;  %v104_v24 = vmul.f32 %v274_v5, %v84_v15  ;;  %v105_v25 = vmul.f32 %v274_v5, %v85_v17  ;;  %v70_v26 = vsub.f32 %v215_v18, %v264_v1  ;;  %v71_v27 = vsub.f32 %v216_v19, %v264_v1 }
  0x15   :  { %170 = vst.msk [vmem:[%s435_s5 + $0x14] sm:$0xf] %vm164_vm0, %v153_v4  ;;  %v86_v28 = vmul.f32 %v269_v3, %v66_v20  ;;  %v87_v29 = vmul.f32 %v269_v3, %v67_v21  ;;  %v88_v30 = vmul.f32 %v269_v3, %v68_v22  ;;  %v89_v31 = vmul.f32 %v269_v3, %v69_v23 }
  0x16   :  { %171 = vst.msk [vmem:[%s435_s5 + $0x18] sm:$0xf] %vm164_vm0, %v154_v7  ;;  %v124_v1 = vadd.f32 %v291_v16, %v104_v24  ;;  %v125_v32 = vadd.f32 %v291_v16, %v105_v25  ;;  %v90_v33 = vmul.f32 %v269_v3, %v70_v26  ;;  %v91_v34 = vmul.f32 %v269_v3, %v71_v27 }
  0x17   :  { %172 = vst.msk [vmem:[%s435_s5 + $0x1c] sm:$0xf] %vm164_vm0, %v155_v8  ;;  %v106_v35 = vmul.f32 %v274_v5, %v86_v28  ;;  %v107_v36 = vmul.f32 %v274_v5, %v87_v29  ;;  %v108_v37 = vmul.f32 %v274_v5, %v88_v30  ;;  %v109_v38 = vmul.f32 %v274_v5, %v89_v31 }
  0x18   :  { %v140_v39 = vmax.f32 %v124_v1, 0.0  ;;  %v141_v40 = vmax.f32 %v125_v32, 0.0  ;;  %v110_v41 = vmul.f32 %v274_v5, %v90_v33  ;;  %v111_v42 = vmul.f32 %v274_v5, %v91_v34 }
  0x19   :  { %v126_v43 = vadd.f32 %v291_v16, %v106_v35  ;;  %v127_v44 = vadd.f32 %v291_v16, %v107_v36  ;;  %v128_v3 = vadd.f32 %v291_v16, %v108_v37  ;;  %v129_v45 = vadd.f32 %v291_v16, %v109_v38 }
  0x1a   :  { %v156_v46 = vpack.c.bf16 %v140_v39, %v140_v39  ;;  %v157_v47 = vpack.c.bf16 %v141_v40, %v141_v40  ;;  %v130_v48 = vadd.f32 %v291_v16, %v110_v41  ;;  %v131_v49 = vadd.f32 %v291_v16, %v111_v42 }
  0x1b   :  { %v142_v50 = vmax.f32 %v126_v43, 0.0  ;;  %v143_v51 = vmax.f32 %v127_v44, 0.0  ;;  %v144_v52 = vmax.f32 %v128_v3, 0.0  ;;  %v145_v53 = vmax.f32 %v129_v45, 0.0 }
  0x1c   :  { %173 = vst.msk [vmem:[%s435_s5 + $0x20] sm:$0xf] %vm164_vm0, %v156_v46  ;;  %v146_v5 = vmax.f32 %v130_v48, 0.0  ;;  %v147_v54 = vmax.f32 %v131_v49, 0.0 }
  0x1d   :  { %174 = vst.msk [vmem:[%s435_s5 + $0x24] sm:$0xf] %vm164_vm0, %v157_v47  ;;  %v158_v55 = vpack.c.bf16 %v142_v50, %v142_v50  ;;  %v159_v56 = vpack.c.bf16 %v143_v51, %v143_v51  ;;  %v160_v57 = vpack.c.bf16 %v144_v52, %v144_v52  ;;  %v161_v16 = vpack.c.bf16 %v145_v53, %v145_v53 }
  0x1e   :  { %v162_v58 = vpack.c.bf16 %v146_v5, %v146_v5  ;;  %v163_v59 = vpack.c.bf16 %v147_v54, %v147_v54 }
  0x1f   :  { %175 = vst.msk [vmem:[%s435_s5 + $0x28] sm:$0xf] %vm164_vm0, %v158_v55 }
  0x20   :  { %176 = vst.msk [vmem:[%s435_s5 + $0x2c] sm:$0xf] %vm164_vm0, %v159_v56 }
  0x21   :  { %177 = vst.msk [vmem:[%s435_s5 + $0x30] sm:$0xf] %vm164_vm0, %v160_v57 }
  0x22   :  { %178 = vst.msk [vmem:[%s435_s5 + $0x34] sm:$0xf] %vm164_vm0, %v161_v16 }
  0x23   :  { %179 = vst.msk [vmem:[%s435_s5 + $0x38] sm:$0xf] %vm164_vm0, %v162_v58 }
  0x24   :  { %180 = vst.msk [vmem:[%s435_s5 + $0x3c] sm:$0xf] %vm164_vm0, %v163_v59 }

// kernel: attention_unet_forward.29
= control target key start
LH: loop header
LB: loop body
LE: loop exit
PB: predicated region body
PF: predicated region fallthrough
CT: control target
= control target key end

     0   :  { %s1075_s24 = smov 0   ;;  %s1077_s25 = smov 0   ;;  %s1213_s0 = inlined_call_operand.vmem [shape: bf16[2,10,10,16], index: 0, kind: input, shape index: {}, may-alias: {0,1,2}]   ;;  %s1214_s1 = inlined_call_operand.vmem [shape: bf16[2,10,10,16], index: 1, kind: input, shape index: {}, may-alias: {0,1,2}]   ;;  %s1215_s2 = inlined_call_operand.vmem [shape: bf16[2,10,10,16], index: 2, kind: input, shape index: {}, may-alias: {0,1,2}]   ;;  %s1216_s3 = inlined_call_operand.vmem [shape: bf16[3,3,16,32], index: 3, kind: input, shape index: {}]   ;;  %s1217_s4 = inlined_call_operand.vmem [shape: f32[1,32], index: 4, kind: input, shape index: {}]   ;;  %s1218_s5 = inlined_call_operand.vmem [shape: bf16[2,8,8,32], index: 5, kind: output, shape index: {0}]   ;;  %s1219_s6 = inlined_call_operand.vmem [shape: f32[1,32], index: 6, kind: output, shape index: {1}]   ;;  %s1220_s7 = inlined_call_operand.vmem [shape: f32[1,32], index: 7, kind: output, shape index: {2}]  }
   0x1   :  { %s1079_s26 = smov 0   ;;  %s1081_s27 = smov 0  }
   0x2   :  { %s1083_s28 = smov 0  }
   0x3 LB: > { %s27_s29 = sadd.s32 1, %s1024_s26  ;;  %s30_s30 = sadd.s32 1, %s1028_s27  ;;  %s1032_s28 = sphi %s1083_s28, %s18_s28   ;;  %s1028_s27 = sphi %s1081_s27, %s1225_s27   ;;  %s1024_s26 = sphi %s1079_s26, %s1224_s26   ;;  %s1020_s25 = sphi %s1077_s25, %s1223_s25   ;;  %s1016_s24 = sphi %s1075_s24, %s1222_s24  }
   0x4   : > { %p28_p0 = scmp.ge.s32.totalorder %s27_s29, 8  ;;  %p855_p1 = scmp.ge.s32.totalorder %s1032_s28, 1 }
   0x5   : > { %p292_p2 = scmp.lt.s32.totalorder %s1032_s28, 17 }
   0x6   : > { %s1227_s29 = smov (%p28_p0, %s27_s29), 0  ;;  %s1229_s30 = smov (!%p28_p0, %s30_s30), %s1028_s27 }
   0x7   : > { %p293_p3 = pnand %p855_p1, %p292_p2  ;;  %p32_p4 = scmp.ge.s32.totalorder %s1229_s30, 2 }
   0x8   : > { %p351_p5 = scmp.lt.s32.totalorder (!%p293_p3), %s1020_s25, 1  ;;  %p353_p6 = scmp.lt.s32.totalorder (!%p293_p3), %s1016_s24, 9 }
   0x9   : > { %s1231_s30 = smov (%p32_p4, %s1229_s30), 0  ;;  %296 = sbr.rel (%p293_p3) target bundleno = 217 (0xd9), region = 40 }
   0xa   : > { %s360_s16 = sadd.s32 (!%p293_p3), 1, %s1016_s24  ;;  %s371_s21 = sadd.s32 (!%p293_p3), 2, %s1016_s24 }
   0xb   : > { %p363_p7 = scmp.lt.s32.totalorder (!%p293_p3), %s360_s16, 9  ;;  %p374_p8 = scmp.lt.s32.totalorder (!%p293_p3), %s371_s21, 9 }
   0xc   : > { %p676_p9 = scmp.eq.s32.totalorder (!%p293_p3), %s1020_s25, 0  ;;  %p677_p10 = scmp.eq.s32.totalorder (!%p293_p3), %s1016_s24, 0 }
   0xd   : > { %p384_p12 = scmp.lt.s32.totalorder (!%p293_p3), %s1016_s24, 7 }
   0xe   : > { %v944_v0 = vld [vmem:[%s1216_s3 + $0x10] sm:$0xff]  ;;  %v945_v1 = vld [vmem:[%s1216_s3 + $0x18] sm:$0xff]  ;;  %v943_v2 = vld [vmem:[%s1216_s3 + $0x8] sm:$0xff]  ;;  %s1132_s22 = scalar_select %p351_p5, %s1020_s25, 1  ;;  %vm420_vm0 = vcmask 130048   ;;  %vm674_vm1 = vcmask 257024  }
   0xf   : > { %v942_v3 = vld [vmem:[%s1216_s3] sm:$0xff]  ;;  %v948_v5 = vld [vmem:[%s1216_s3 + $0x30] sm:$0xff]  ;;  %479 = vmatpush.bf16.msra.mxu2 %v944_v0  ;;  %505 = vmatpush.bf16.msra.mxu3 %v945_v1  ;;  %v949_v6 = vld [vmem:[%s1216_s3 + $0x38] sm:$0xff]  ;;  %s354_s11 = scalar_select %p353_p6, %s1016_s24, 9 }
  0x10   : > { %v946_v4 = vld [vmem:[%s1216_s3 + $0x20] sm:$0xff]  ;;  %v947_v7 = vld [vmem:[%s1216_s3 + $0x28] sm:$0xff]  ;;  %431 = vmatpush.bf16.msra.mxu0 %v943_v2  ;;  %453 = vmatpush.bf16.msra.mxu1 %v942_v3  ;;  %s951_s12 = smul.u32 20, %s1132_s22  ;;  %s1233_s16 = smov (!%p363_p7, %s360_s16), 9 }
  0x11   : > { %s856_s13 = sshll.u32 %s354_s11, 1  ;;  %s1235_s21 = smov (!%p374_p8, %s371_s21), 9  ;;  %v950_v16 = vld [vmem:[%s1216_s3 + $0x40] sm:$0xff] }
  0x12   : > { %s357_s14 = sadd.s32 %s951_s12, %s856_s13  ;;  %s858_s20 = sshll.u32 %s1233_s16, 1  ;;  %v993_v59 = vld [vmem:[%s1217_s4] ss:$0 sm:$0xff] }
  0x13   : > { %596 = vmatpush.bf16.msrb.mxu2 %v948_v5  ;;  %634 = vmatpush.bf16.msrb.mxu3 %v949_v6  ;;  %s857_s15 = sshll.u32 %s357_s14, 2  ;;  %s367_s23 = sadd.s32 %s951_s12, %s858_s20 }
  0x14   : > { %543 = vmatpush.bf16.msrb.mxu0 %v946_v4  ;;  %570 = vmatpush.bf16.msrb.mxu1 %v947_v7  ;;  %s359_s19 = scalar_lea.vmem %s1213_s0, %s857_s15  ;;  %s860_s8 = sshll.u32 %s1235_s21, 1 }
  0x15   : > { %v868_v8 = vld [vmem:[%s359_s19] sm:$0xf]  ;;  %v939_v9 = vld [vmem:[%s359_s19] sm:$0x10]  ;;  %s859_s9 = sshll.u32 %s367_s23, 2  ;;  %s378_s10 = sadd.s32 %s951_s12, %s860_s8 }
  0x16   : > { %v869_v10 = vor.u32 %v939_v9, %v868_v8  ;;  %v391_v11 = vld [vmem:[%s359_s19] sm:$0xf]  ;;  %s369_s14 = scalar_lea.vmem %s1214_s1, %s859_s9  ;;  %s861_s15 = sshll.u32 %s378_s10, 2 }
  0x17   : > { %879 = vmatmul.msk.bf16.vlgmr.msra.gmra.mxu1 %vm420_vm0, %v391_v11  ;;  %v393_v17 = vld [vmem:[%s369_s14] sm:$0xf]  ;;  %v940_v19 = vld [vmem:[%s369_s14] sm:$0x10]  ;;  %s380_s21 = scalar_lea.vmem %s1215_s2, %s861_s15  ;;  %p1165_p11 = pnand %p677_p10, %p676_p9 }
  0x18   : > { %v462_v12 = vrot.slane %v869_v10, 1  ;;  %v408_v13 = vshrl.u32 %v869_v10, 16  ;;  %v410_v14 = vshll.u32 %v869_v10, 16  ;;  %v898_v18 = vld [vmem:[%s369_s14] sm:$0xf]  ;;  %893 = vmatmul.msk.bf16.vlgmr.msra.gmra.mxu3 %vm420_vm0, %v393_v17  ;;  %s1237_s24 = smov (!%p384_p12, %s1016_s24), 7 }
  0x19   : > { %v923_v21 = vld [vmem:[%s380_s21] sm:$0xf]  ;;  %v941_v22 = vld [vmem:[%s380_s21] sm:$0x10]  ;;  %v899_v24 = vor.u32 %v940_v19, %v898_v18  ;;  %s862_s25 = sshll.u32 %s1132_s22, 3 }
  0x1a   : > { %886 = vmatmul.msk.bf16.vlgmr.msra.gmra.mxu2 %vm420_vm0, %v462_v12  ;;  %v412_v15 = vrot.slane %v410_v14, 1  ;;  %v924_v23 = vor.u32 %v941_v22, %v923_v21  ;;  %v395_v32 = vld [vmem:[%s380_s21] sm:$0xf]  ;;  %s387_s20 = sadd.s32 %s862_s25, %s1237_s24 }
  0x1b   : > { %v523_v26 = vshll.u32 %v899_v24, 16  ;;  %v553_v27 = vrot.slane %v899_v24, 1  ;;  %v521_v30 = vshrl.u32 %v899_v24, 16  ;;  %s863_s9 = sshll.u32 %s387_s20, 2 }
  0x1c   : > { %v413_v20 = vor.u32 %v412_v15, %v408_v13  ;;  %v614_v25 = vshll.u32 %v924_v23, 16  ;;  %v612_v28 = vshrl.u32 %v924_v23, 16  ;;  %v644_v35 = vrot.slane %v924_v23, 1  ;;  %s389_s13 = scalar_lea.vmem %s1218_s5, %s863_s9 }
  0x1d   : > { %v525_v31 = vrot.slane %v523_v26, 1 }
  0x1e   : > { %874 = vmatmul.msk.bf16.vlgmr.msra.gmra.mxu0 %vm420_vm0, %v413_v20  ;;  %v616_v29 = vrot.slane %v614_v25, 1 }
  0x1f   : > { %661 = vmatpush.bf16.msra.mxu0 %v950_v16  ;;  %v526_v34 = vor.u32 %v525_v31, %v521_v30 }
  0x20   : > { %v617_v33 = vor.u32 %v616_v29, %v612_v28 }
  0x27   : > { %911 = vmatmul.msk.bf16.vlgmr.msrb.gmra.mxu1 %vm420_vm0, %v553_v27 }
  0x28   : > { %929 = vmatmul.msk.bf16.vlgmr.msrb.gmra.mxu3 %vm420_vm0, %v617_v33 }
  0x2a   : > { %918 = vmatmul.msk.bf16.vlgmr.msrb.gmra.mxu2 %vm420_vm0, %v395_v32 }
  0x2e   : > { %904 = vmatmul.msk.bf16.vlgmr.msrb.gmra.mxu0 %vm420_vm0, %v526_v34 }
  0x3e   : > { %936 = vmatmul.msk.bf16.vlgmr.msra.gmra.mxu0 %vm420_vm0, %v644_v35 }
  0x94   : > { %v455_v36 = vpop.f32.mrf.mxu1 }
  0x9b   : > { %v433_v37 = vpop.f32.mrf.mxu0  ;;  %v507_v40 = vpop.f32.mrf.mxu3 }
  0x9c   : > { %v457_v38 = vpop.f32.mrf.mxu1  ;;  %v456_v42 = vadd.f32 %v455_v36, %v433_v37 }
  0x9d   : > { %v481_v39 = vpop.f32.mrf.mxu2 }
  0x9e   : > { %v485_v46 = vadd.f32 %v481_v39, %v456_v42 }
  0xa0   : > { %v511_v48 = vadd.f32 %v507_v40, %v485_v46 }
  0xa3   : > { %v435_v41 = vpop.f32.mrf.mxu0  ;;  %v509_v45 = vpop.f32.mrf.mxu3 }
  0xa4   : > { %v572_v43 = vpop.f32.mrf.mxu1 }
  0xa5   : > { %v483_v44 = vpop.f32.mrf.mxu2 }
  0xab   : > { %v545_v47 = vpop.f32.mrf.mxu0  ;;  %v636_v52 = vpop.f32.mrf.mxu3 }
  0xac   : > { %v574_v49 = vpop.f32.mrf.mxu1  ;;  %v549_v51 = vadd.f32 %v545_v47, %v511_v48 }
  0xad   : > { %v598_v50 = vpop.f32.mrf.mxu2 }
  0xae   : > { %v576_v53 = vadd.f32 %v572_v43, %v549_v51 }
  0xb0   : > { %v602_v56 = vadd.f32 %v598_v50, %v576_v53 }
  0xb2   : > { %v640_v58 = vadd.f32 %v636_v52, %v602_v56 }
  0xb3   : > { %v547_v54 = vpop.f32.mrf.mxu0  ;;  %v638_v57 = vpop.f32.mrf.mxu3 }
  0xb5   : > { %v600_v55 = vpop.f32.mrf.mxu2 }
  0xbb   : > { %v663_v60 = vpop.f32.mrf.mxu0 }
  0xbc   : > { %v667_v61 = vadd.f32 %v663_v60, %v640_v58 }
  0xbe   : > { %v672_v62 = vadd.f32 %v993_v59, %v667_v61 }
  0xbf   : > { %681 = sbr.rel (%p1165_p11) target bundleno = 199 (0xc7), region = 44 }
  0xc0   : > { %v673_v63 = vpack.c.bf16 %v672_v62, %v672_v62 }
  0xc2   : > { %675 = vst.msk [vmem:[%s389_s13] sm:$0xf] %vm674_vm1, %v673_v63 }
  0xc3   : > { %v665_v0 = vpop.f32.mrf.mxu0 }
  0xc4   : > { %vm682_vm2 = vcmask 253952   ;;  %v1034_v1 = vmov 0.0  }
  0xc5   : > { %683 = vst.msk [vmem:[%s1219_s6] sm:$0x1] %vm682_vm2, %v1034_v1 }
  0xc6   : > { %684 = vst.msk [vmem:[%s1220_s7] sm:$0x1] %vm682_vm2, %v1034_v1 }
  0xc7 PF: > { %vm686_vm3 = vcmask 261120   ;;  %v698_v2 = vmul.f32 %v672_v62, %v672_v62  ;;  %vm695_vm4 = vcmask 253952  }
  0xc8   : > { %v687_v3 = vsel %vm686_vm3, %v672_v62, 0.0 }
  0xc9   : > { %v688_v4 = vrot.slane %v687_v3, 4  ;;  %v699_v5 = vsel %vm686_vm3, %v698_v2, 0.0 }
  0xca   : > { %v700_v6 = vrot.slane %v699_v5, 4 }
  0xcb   : > { %v689_v7 = vadd.f32 %v688_v4, %v687_v3 }
  0xcc   : > { %v701_v8 = vadd.f32 %v700_v6, %v699_v5  ;;  %v685_v14 = vld [vmem:[%s1219_s6] sm:$0x1] }
  0xcd   : > { %v690_v9 = vrot.slane %v689_v7, 2  ;;  %v697_v17 = vld [vmem:[%s1220_s7] sm:$0x1] }
  0xce   : > { %v702_v10 = vrot.slane %v701_v8, 2 }
  0xcf   : > { %v691_v11 = vadd.f32 %v690_v9, %v689_v7 }
  0xd0   : > { %v703_v12 = vadd.f32 %v702_v10, %v701_v8 }
  0xd1   : > { %v692_v13 = vrot.slane %v691_v11, 1 }
  0xd2   : > { %v704_v15 = vrot.slane %v703_v12, 1 }
  0xd3   : > { %v693_v16 = vadd.f32 %v692_v13, %v691_v11 }
  0xd4   : > { %v705_v18 = vadd.f32 %v704_v15, %v703_v12 }
  0xd5   : > { %v694_v19 = vadd.f32 %v693_v16, %v685_v14 }
  0xd6   : > { %v706_v20 = vadd.f32 %v705_v18, %v697_v17 }
  0xd7   : > { %696 = vst.msk [vmem:[%s1219_s6] sm:$0x1] %vm695_vm4, %v694_v19 }
  0xd8   : > { %707 = vst.msk [vmem:[%s1220_s7] sm:$0x1] %vm695_vm4, %v706_v20 }
  0xd9 PF: > { %s18_s28 = sadd.s32 1, %s1032_s28   ;;  %s1222_s24 = smov %s1024_s26 }
  0xda   : > { %p15_p13 = scmp.ge.s32.totalorder %s18_s28, 18   ;;  %s1223_s25 = smov %s1028_s27 }
  0xdb   : > { %s1224_s26 = smov %s1227_s29  ;;  %s1225_s27 = smov %s1231_s30 }
  0xdc   :  { %17 = sbr.rel (!%p15_p13) target bundleno = 3 (0x3), region = 104 }

// kernel: attention_unet_forward.32
= control target key start
LH: loop header
LB: loop body
LE: loop exit
PB: predicated region body
PF: predicated region fallthrough
CT: control target
= control target key end

     0   :  { %s765_s21 = smov 0   ;;  %s767_s22 = smov 0   ;;  %s872_s0 = inlined_call_operand.vmem [shape: bf16[2,8,4,2,32], index: 0, kind: input, shape index: {}]   ;;  %s873_s1 = inlined_call_operand.vmem [shape: f32[1,32], index: 1, kind: input, shape index: {}]   ;;  %s874_s2 = inlined_call_operand.vmem [shape: f32[1,32], index: 2, kind: input, shape index: {}]   ;;  %s875_s3 = inlined_call_operand.vmem [shape: f32[1,32], index: 3, kind: input, shape index: {}]   ;;  %s876_s4 = inlined_call_operand.vmem [shape: f32[1,32], index: 4, kind: input, shape index: {}]   ;;  %s877_s5 = inlined_call_operand.vmem [shape: bf16[2,8,4,2,32], index: 5, kind: output, shape index: {0}]   ;;  %s878_s6 = inlined_call_operand.vmem [shape: bf16[2,4,4,32], index: 6, kind: output, shape index: {1}]  }
   0x1   :  { %s769_s23 = smov 0   ;;  %s771_s24 = smov 0  }
   0x2   :  { %s773_s25 = smov 0  }
   0x3 LB: > { %s26_s26 = sadd.s32 1, %s720_s23  ;;  %s29_s27 = sadd.s32 1, %s724_s24  ;;  %s728_s25 = sphi %s773_s25, %s17_s25   ;;  %s724_s24 = sphi %s771_s24, %s882_s24   ;;  %s720_s23 = sphi %s769_s23, %s881_s23   ;;  %s716_s22 = sphi %s767_s22, %s880_s22   ;;  %s712_s21 = sphi %s765_s21, %s879_s21  }
   0x4   : > { %p27_p0 = scmp.ge.s32.totalorder %s26_s26, 4  ;;  %p635_p1 = scmp.ge.s32.totalorder %s728_s25, 1 }
   0x5   : > { %p238_p2 = scmp.lt.s32.totalorder %s728_s25, 9 }
   0x6   : > { %s884_s26 = smov (%p27_p0, %s26_s26), 0  ;;  %s886_s27 = smov (!%p27_p0, %s29_s27), %s724_s24 }
   0x7   : > { %p239_p3 = pnand %p635_p1, %p238_p2  ;;  %p31_p4 = scmp.ge.s32.totalorder %s886_s27, 2 }
   0x8   : > { %s636_s28 = sshll.u32 (!%p239_p3), %s712_s21, 1  ;;  %p285_p5 = scmp.lt.s32.totalorder (!%p239_p3), %s716_s22, 1 }
   0x9   : > { %s888_s27 = smov (%p31_p4, %s886_s27), 0  ;;  %242 = sbr.rel (%p239_p3) target bundleno = 73 (0x49), region = 40 }
   0xa   : > { %p287_p6 = scmp.lt.s32.totalorder (!%p239_p3), %s636_s28, 7  ;;  %p306_p7 = scmp.lt.s32.totalorder (!%p239_p3), %s712_s21, 3 }
   0xe   : > { %s890_s22 = smov (!%p285_p5, %s716_s22), 1  ;;  %s892_s28 = smov (!%p287_p6, %s636_s28), 7  ;;  %v686_v0 = vld [vmem:[%s873_s1] ss:$0 sm:$0xff]  ;;  %vm405_vm0 = vcmask 254976   ;;  %vm392_vm1 = vcmask 253952  }
   0xf   : > { %s638_s29 = sshll.u32 %s890_s22, 5  ;;  %s637_s30 = sshll.u32 %s892_s28, 2  ;;  %v687_v1 = vld [vmem:[%s874_s2] ss:$0 sm:$0xff]  ;;  %vm446_vm2 = vcmask 1041408   ;;  %vm479_vm3 = vcmask 1041409  }
  0x10   : > { %s801_s7 = sadd.s32 %s638_s29, %s637_s30  ;;  %v688_v18 = vld [vmem:[%s875_s3] ss:$0 sm:$0xff]  ;;  %s894_s21 = smov (!%p306_p7, %s712_s21), 3  ;;  %vm482_vm4 = vcmask 1042434   ;;  %vm485_vm5 = vcmask 1043459  }
  0x11   : > { %s292_s10 = scalar_lea.vmem %s872_s0, %s801_s7  ;;  %v689_v27 = vld [vmem:[%s876_s4] ss:$0 sm:$0xff]  ;;  %s823_s28 = scalar_lea.vmem %s877_s5, %s801_s7 }
  0x12   : > { %v313_v2 = vld [vmem:[%s292_s10 + $0x1] sm:$0x1]  ;;  %v317_v3 = vld [vmem:[%s292_s10 + $0x5] sm:$0x1]  ;;  %v314_v4 = vld [vmem:[%s292_s10 + $0x2] sm:$0x1] }
  0x13   : > { %v321_v5 = vunpack.c.l.bf16 %v313_v2  ;;  %v325_v6 = vunpack.c.l.bf16 %v317_v3  ;;  %v318_v7 = vld [vmem:[%s292_s10 + $0x6] sm:$0x1]  ;;  %v322_v8 = vunpack.c.l.bf16 %v314_v4  ;;  %v312_v9 = vld [vmem:[%s292_s10] sm:$0x1]  ;;  %v316_v10 = vld [vmem:[%s292_s10 + $0x4] sm:$0x1] }
  0x14   : > { %v326_v11 = vunpack.c.l.bf16 %v318_v7  ;;  %v320_v12 = vunpack.c.l.bf16 %v312_v9  ;;  %v324_v13 = vunpack.c.l.bf16 %v316_v10  ;;  %v315_v14 = vld [vmem:[%s292_s10 + $0x3] sm:$0x1]  ;;  %v319_v15 = vld [vmem:[%s292_s10 + $0x7] sm:$0x1]  ;;  %s642_s29 = sshll.u32 %s890_s22, 2 }
  0x15   : > { %v333_v16 = vsub.f32 %v321_v5, %v686_v0  ;;  %v337_v17 = vsub.f32 %v325_v6, %v686_v0  ;;  %v334_v19 = vsub.f32 %v322_v8, %v686_v0  ;;  %v323_v20 = vunpack.c.l.bf16 %v315_v14  ;;  %s309_s30 = sadd.s32 %s642_s29, %s894_s21 }
  0x16   : > { %v338_v21 = vsub.f32 %v326_v11, %v686_v0  ;;  %v332_v22 = vsub.f32 %v320_v12, %v686_v0  ;;  %v336_v23 = vsub.f32 %v324_v13, %v686_v0  ;;  %v327_v24 = vunpack.c.l.bf16 %v319_v15  ;;  %s643_s7 = sshll.u32 %s309_s30, 1 }
  0x17   : > { %v345_v25 = vmul.f32 %v687_v1, %v333_v16  ;;  %v349_v26 = vmul.f32 %v687_v1, %v337_v17  ;;  %v346_v28 = vmul.f32 %v687_v1, %v334_v19  ;;  %v335_v29 = vsub.f32 %v323_v20, %v686_v0  ;;  %s311_s22 = scalar_lea.vmem %s878_s6, %s643_s7 }
  0x18   : > { %v350_v30 = vmul.f32 %v687_v1, %v338_v21  ;;  %v344_v31 = vmul.f32 %v687_v1, %v332_v22  ;;  %v348_v32 = vmul.f32 %v687_v1, %v336_v23  ;;  %v339_v33 = vsub.f32 %v327_v24, %v686_v0 }
  0x19   : > { %v357_v34 = vmul.f32 %v688_v18, %v345_v25  ;;  %v361_v35 = vmul.f32 %v688_v18, %v349_v26  ;;  %v358_v36 = vmul.f32 %v688_v18, %v346_v28  ;;  %v347_v37 = vmul.f32 %v687_v1, %v335_v29 }
  0x1a   : > { %v362_v38 = vmul.f32 %v688_v18, %v350_v30  ;;  %v356_v39 = vmul.f32 %v688_v18, %v344_v31  ;;  %v360_v40 = vmul.f32 %v688_v18, %v348_v32  ;;  %v351_v41 = vmul.f32 %v687_v1, %v339_v33 }
  0x1b   : > { %v369_v42 = vadd.f32 %v689_v27, %v357_v34  ;;  %v373_v43 = vadd.f32 %v689_v27, %v361_v35  ;;  %v370_v44 = vadd.f32 %v689_v27, %v358_v36  ;;  %v359_v45 = vmul.f32 %v688_v18, %v347_v37 }
  0x1c   : > { %v374_v46 = vadd.f32 %v689_v27, %v362_v38  ;;  %v368_v47 = vadd.f32 %v689_v27, %v356_v39  ;;  %v372_v48 = vadd.f32 %v689_v27, %v360_v40  ;;  %v363_v49 = vmul.f32 %v688_v18, %v351_v41 }
  0x1d   : > { %v377_v50 = vmax.f32 %v369_v42, 0.0  ;;  %v381_v51 = vmax.f32 %v373_v43, 0.0  ;;  %v378_v52 = vmax.f32 %v370_v44, 0.0  ;;  %v371_v53 = vadd.f32 %v689_v27, %v359_v45 }
  0x1e   : > { %v382_v54 = vmax.f32 %v374_v46, 0.0  ;;  %v376_v55 = vmax.f32 %v368_v47, 0.0  ;;  %v380_v56 = vmax.f32 %v372_v48, 0.0  ;;  %v375_v57 = vadd.f32 %v689_v27, %v363_v49 }
  0x1f   : > { %v402_v58 = vmax.f32 %v377_v50, %v381_v51  ;;  %v379_v59 = vmax.f32 %v371_v53, 0.0  ;;  %v385_v60 = vpack.c.bf16 %v377_v50, %v377_v50  ;;  %v386_v2 = vpack.c.bf16 %v378_v52, %v378_v52 }
  0x20   : > { %v403_v61 = vmax.f32 %v378_v52, %v382_v54  ;;  %v401_v62 = vmax.f32 %v376_v55, %v380_v56  ;;  %v383_v63 = vmax.f32 %v375_v57, 0.0  ;;  %v384_v0 = vpack.c.bf16 %v376_v55, %v376_v55 }
  0x21   : > { %v413_v1 = vsel %vm405_vm0, %v402_v58, -inf  ;;  %394 = vst.msk [vmem:[%s823_s28 + $0x1] sm:$0x1] %vm392_vm1, %v385_v60  ;;  %v387_v3 = vpack.c.bf16 %v379_v59, %v379_v59  ;;  %v388_v4 = vpack.c.bf16 %v380_v56, %v380_v56  ;;  %v389_v11 = vpack.c.bf16 %v381_v51, %v381_v51 }
  0x22   : > { %v414_v5 = vrot.slane %v413_v1, 4  ;;  %v420_v6 = vsel %vm405_vm0, %v403_v61, -inf  ;;  %v406_v7 = vsel %vm405_vm0, %v401_v62, -inf  ;;  %v404_v8 = vmax.f32 %v379_v59, %v383_v63  ;;  %393 = vst.msk [vmem:[%s823_s28] sm:$0x1] %vm392_vm1, %v384_v0 }
  0x23   : > { %v421_v9 = vrot.slane %v420_v6, 4  ;;  %v407_v10 = vrot.slane %v406_v7, 4  ;;  %395 = vst.msk [vmem:[%s823_s28 + $0x2] sm:$0x1] %vm392_vm1, %v386_v2  ;;  %v390_v12 = vpack.c.bf16 %v382_v54, %v382_v54  ;;  %v391_v15 = vpack.c.bf16 %v383_v63, %v383_v63 }
  0x24   : > { %v415_v13 = vmax.f32 %v413_v1, %v414_v5  ;;  %v427_v14 = vsel %vm405_vm0, %v404_v8, -inf  ;;  %396 = vst.msk [vmem:[%s823_s28 + $0x3] sm:$0x1] %vm392_vm1, %v387_v3 }
  0x25   : > { %v422_v16 = vmax.f32 %v420_v6, %v421_v9  ;;  %v408_v17 = vmax.f32 %v406_v7, %v407_v10  ;;  %v428_v18 = vrot.slane %v427_v14, 4  ;;  %397 = vst.msk [vmem:[%s823_s28 + $0x4] sm:$0x1] %vm392_vm1, %v388_v4 }
  0x26   : > { %v416_v19 = vrot.slane %v415_v13, 2  ;;  %398 = vst.msk [vmem:[%s823_s28 + $0x5] sm:$0x1] %vm392_vm1, %v389_v11 }
  0x27   : > { %v423_v20 = vrot.slane %v422_v16, 2  ;;  %v409_v21 = vrot.slane %v408_v17, 2  ;;  %v429_v22 = vmax.f32 %v427_v14, %v428_v18  ;;  %399 = vst.msk [vmem:[%s823_s28 + $0x6] sm:$0x1] %vm392_vm1, %v390_v12 }
  0x28   : > { %v417_v23 = vmax.f32 %v415_v13, %v416_v19  ;;  %400 = vst.msk [vmem:[%s823_s28 + $0x7] sm:$0x1] %vm392_vm1, %v391_v15 }
  0x29   : > { %v424_v24 = vmax.f32 %v422_v16, %v423_v20  ;;  %v410_v25 = vmax.f32 %v408_v17, %v409_v21  ;;  %v430_v26 = vrot.slane %v429_v22, 2 }
  0x2a   : > { %v418_v27 = vrot.slane %v417_v23, 1 }
  0x2b   : > { %v425_v28 = vrot.slane %v424_v24, 1  ;;  %v411_v29 = vrot.slane %v410_v25, 1  ;;  %v431_v30 = vmax.f32 %v429_v22, %v430_v26 }
  0x2c   : > { %v419_v31 = vmax.f32 %v417_v23, %v418_v27 }
  0x2d   : > { %v426_v32 = vmax.f32 %v424_v24, %v425_v28  ;;  %v412_v33 = vmax.f32 %v410_v25, %v411_v29  ;;  %v432_v34 = vrot.slane %v431_v30, 1 }
  0x2e   : > { %v435_v35 = vpack.c.bf16 %v419_v31, %v419_v31 }
  0x2f   : > { %v436_v36 = vpack.c.bf16 %v426_v32, %v426_v32  ;;  %v434_v37 = vpack.c.bf16 %v412_v33, %v412_v33  ;;  %v433_v38 = vmax.f32 %v431_v30, %v432_v34 }
  0x30   : > { %v443_v39 = vrot.slane %v435_v35, 2 }
  0x31   : > { %v444_v40 = vrot.slane %v436_v36, 2  ;;  %v442_v41 = vrot.slane %v434_v37, 2  ;;  %v437_v42 = vpack.c.bf16 %v433_v38, %v433_v38 }
  0x32   : > { %v452_v43 = vsel %vm446_vm2, %v435_v35, %v443_v39 }
  0x33   : > { %463 = vst [vmem:[#allocation1 + $0x10] ss:$2 sm:$0xff] %v452_v43  ;;  %v455_v44 = vsel %vm446_vm2, %v436_v36, %v444_v40  ;;  %v449_v45 = vsel %vm446_vm2, %v434_v37, %v442_v41  ;;  %v445_v46 = vrot.slane %v437_v42, 2 }
  0x34   : > { %467 = vst [vmem:[#allocation1 + $0x20] ss:$2 sm:$0xff] %v455_v44 }
  0x35   : > { %459 = vst [vmem:[#allocation1] ss:$2 sm:$0xff] %v449_v45  ;;  %v458_v47 = vsel %vm446_vm2, %v437_v42, %v445_v46 }
  0x36   : > { %471 = vst [vmem:[#allocation1 + $0x30] ss:$2 sm:$0xff] %v458_v47 }
  0x3a   : > { %v464_v48 = vld.sshfl [vmem:[#allocation1 + $0x10] sm:$0xff pattern:$0x75643120] }
  0x3b   : > { %v468_v49 = vld.sshfl [vmem:[#allocation1 + $0x20] sm:$0xff pattern:$0x75643120]  ;;  %v475_v50 = vunpack.c.l.b16 %v464_v48 }
  0x3c   : > { %v460_v51 = vld.sshfl [vmem:[#allocation1] sm:$0xff pattern:$0x75643120]  ;;  %v476_v52 = vunpack.c.l.b16 %v468_v49 }
  0x3d   : > { %v472_v53 = vld.sshfl [vmem:[#allocation1 + $0x30] sm:$0xff pattern:$0x75643120]  ;;  %v474_v54 = vunpack.c.l.b16 %v460_v51  ;;  %v478_v55 = vrot.slane %v475_v50, 7 }
  0x3e   : > { %v477_v56 = vunpack.c.l.b16 %v472_v53  ;;  %v481_v57 = vrot.slane %v476_v52, 6 }
  0x3f   : > { %v480_v58 = vsel %vm479_vm3, %v478_v55, %v474_v54 }
  0x40   : > { %v483_v59 = vsel %vm482_vm4, %v481_v57, %v480_v58  ;;  %v484_v60 = vrot.slane %v477_v56, 5 }
  0x42   : > { %v486_v61 = vsel %vm485_vm5, %v484_v60, %v483_v59 }
  0x43   : > { %v487_v62 = vpack.c.b16 %v486_v61, %v486_v61 }
  0x45   : > { %v488_v63 = vrot.slane %v487_v62, 2 }
  0x47   : > { %v491_v0 = vsel %vm446_vm2, %v487_v62, %v488_v63 }
  0x48   : > { %493 = vst.msk [vmem:[%s311_s22] sm:$0x3] %vm405_vm0, %v491_v0 }
  0x49 PF: > { %s17_s25 = sadd.s32 1, %s728_s25   ;;  %s879_s21 = smov %s720_s23 }
  0x4a   : > { %p14_p8 = scmp.ge.s32.totalorder %s17_s25, 10   ;;  %s880_s22 = smov %s724_s24 }
  0x4b   : > { %s881_s23 = smov %s884_s26  ;;  %s882_s24 = smov %s888_s27 }
  0x4c   :  { %16 = sbr.rel (!%p14_p8) target bundleno = 3 (0x3), region = 85 }

// kernel: attention_unet_forward.34
= control target key start
LH: loop header
LB: loop body
LE: loop exit
PB: predicated region body
PF: predicated region fallthrough
CT: control target
= control target key end

     0   :  { %vm68_vm0 = vcmask 519168   ;;  %s150_s0 = inlined_call_operand.vmem [shape: bf16[32,64], index: 0, kind: input, shape index: {}]   ;;  %s151_s1 = inlined_call_operand.vmem [shape: f32[1,64], index: 1, kind: input, shape index: {}]   ;;  %s152_s2 = inlined_call_operand.vmem [shape: f32[1,64], index: 2, kind: input, shape index: {}]   ;;  %s153_s3 = inlined_call_operand.vmem [shape: f32[1,64], index: 3, kind: input, shape index: {}]   ;;  %s154_s4 = inlined_call_operand.vmem [shape: f32[1,64], index: 4, kind: input, shape index: {}]   ;;  %s155_s5 = inlined_call_operand.vmem [shape: bf16[32,64], index: 5, kind: output, shape index: {}]  }
   0x1   :  { %v78_v0 = vld [vmem:[%s150_s0] sm:$0xff]   ;;  %v85_v8 = vld [vmem:[%s150_s0 + $0x8] sm:$0xff]  }
   0x2   :  { %v86_v1 = vld [vmem:[%s151_s1] ss:$0 sm:$0xff]  ;;  %v79_v2 = vunpack.c.l.bf16 %v78_v0  ;;  %v80_v4 = vunpack.c.h.bf16 %v78_v0  ;;  %v83_v9 = vunpack.c.l.bf16 %v85_v8  ;;  %v84_v10 = vunpack.c.h.bf16 %v85_v8 }
   0x3   :  { %v87_v3 = vld [vmem:[%s152_s2] ss:$0 sm:$0xff] }
   0x4   :  { %v32_v5 = vsub.f32 %v79_v2, %v86_v1  ;;  %v88_v6 = vld [vmem:[%s153_s3] ss:$0 sm:$0xff]  ;;  %v33_v7 = vsub.f32 %v80_v4, %v86_v1  ;;  %v34_v14 = vsub.f32 %v83_v9, %v86_v1  ;;  %v35_v15 = vsub.f32 %v84_v10, %v86_v1 }
   0x5   :  { %v89_v12 = vld [vmem:[%s154_s4] ss:$0 sm:$0xff] }
   0x6   :  { %v40_v11 = vmul.f32 %v87_v3, %v32_v5  ;;  %v41_v13 = vmul.f32 %v87_v3, %v33_v7  ;;  %v42_v18 = vmul.f32 %v87_v3, %v34_v14  ;;  %v43_v19 = vmul.f32 %v87_v3, %v35_v15 }
   0x8   :  { %v48_v16 = vmul.f32 %v88_v6, %v40_v11  ;;  %v49_v17 = vmul.f32 %v88_v6, %v41_v13  ;;  %v50_v22 = vmul.f32 %v88_v6, %v42_v18  ;;  %v51_v23 = vmul.f32 %v88_v6, %v43_v19 }
   0xa   :  { %v56_v20 = vadd.f32 %v89_v12, %v48_v16  ;;  %v57_v21 = vadd.f32 %v89_v12, %v49_v17  ;;  %v58_v26 = vadd.f32 %v89_v12, %v50_v22  ;;  %v59_v27 = vadd.f32 %v89_v12, %v51_v23 }
   0xc   :  { %v60_v24 = vmax.f32 %v56_v20, 0.0  ;;  %v61_v25 = vmax.f32 %v57_v21, 0.0  ;;  %v62_v30 = vmax.f32 %v58_v26, 0.0  ;;  %v63_v31 = vmax.f32 %v59_v27, 0.0 }
   0xe   :  { %v64_v28 = vpack.c.bf16 %v60_v24, %v60_v24  ;;  %v65_v29 = vpack.c.bf16 %v61_v25, %v61_v25  ;;  %v66_v32 = vpack.c.bf16 %v62_v30, %v62_v30  ;;  %v67_v33 = vpack.c.bf16 %v63_v31, %v63_v31 }
  0x10   :  { %69 = vst.msk [vmem:[%s155_s5] sm:$0xf] %vm68_vm0, %v64_v28 }
  0x11   :  { %70 = vst.msk [vmem:[%s155_s5 + $0x4] sm:$0xf] %vm68_vm0, %v65_v29 }
  0x12   :  { %71 = vst.msk [vmem:[%s155_s5 + $0x8] sm:$0xf] %vm68_vm0, %v66_v32 }
  0x13   :  { %72 = vst.msk [vmem:[%s155_s5 + $0xc] sm:$0xf] %vm68_vm0, %v67_v33 }

// kernel: attention_unet_forward.31
= control target key start
LH: loop header
LB: loop body
LE: loop exit
PB: predicated region body
PF: predicated region fallthrough
CT: control target
= control target key end

     0   :  { %s1207_s24 = smov 0   ;;  %s1209_s25 = smov 0   ;;  %s1399_s0 = inlined_call_operand.vmem [shape: bf16[2,10,10,32], index: 0, kind: input, shape index: {}, may-alias: {0,1,2}]   ;;  %s1400_s1 = inlined_call_operand.vmem [shape: bf16[2,10,10,32], index: 1, kind: input, shape index: {}, may-alias: {0,1,2}]   ;;  %s1401_s2 = inlined_call_operand.vmem [shape: bf16[2,10,10,32], index: 2, kind: input, shape index: {}, may-alias: {0,1,2}]   ;;  %s1402_s3 = inlined_call_operand.vmem [shape: bf16[3,3,32,32], index: 3, kind: input, shape index: {}]   ;;  %s1403_s4 = inlined_call_operand.vmem [shape: f32[1,32], index: 4, kind: input, shape index: {}]   ;;  %s1404_s5 = inlined_call_operand.vmem [shape: bf16[2,8,8,32], index: 5, kind: output, shape index: {0}]   ;;  %s1405_s6 = inlined_call_operand.vmem [shape: f32[1,32], index: 6, kind: output, shape index: {1}]   ;;  %s1406_s7 = inlined_call_operand.vmem [shape: f32[1,32], index: 7, kind: output, shape index: {2}]  }
   0x1   :  { %s1211_s26 = smov 0   ;;  %s1213_s27 = smov 0  }
   0x2   :  { %s1215_s28 = smov 0  }
   0x3 LB: > { %s27_s29 = sadd.s32 1, %s1156_s26  ;;  %s30_s30 = sadd.s32 1, %s1160_s27  ;;  %s1164_s28 = sphi %s1215_s28, %s18_s28   ;;  %s1160_s27 = sphi %s1213_s27, %s1413_s27   ;;  %s1156_s26 = sphi %s1211_s26, %s1412_s26   ;;  %s1152_s25 = sphi %s1209_s25, %s1411_s25   ;;  %s1148_s24 = sphi %s1207_s24, %s1410_s24  }
   0x4   : > { %p28_p0 = scmp.ge.s32.totalorder %s27_s29, 8  ;;  %p926_p1 = scmp.ge.s32.totalorder %s1164_s28, 1 }
   0x5   : > { %p292_p2 = scmp.lt.s32.totalorder %s1164_s28, 17 }
   0x6   : > { %s1415_s29 = smov (%p28_p0, %s27_s29), 0  ;;  %s1417_s30 = smov (!%p28_p0, %s30_s30), %s1160_s27 }
   0x7   : > { %p293_p3 = pnand %p926_p1, %p292_p2  ;;  %p32_p4 = scmp.ge.s32.totalorder %s1417_s30, 2 }
   0x8   : > { %p351_p5 = scmp.lt.s32.totalorder (!%p293_p3), %s1152_s25, 1  ;;  %p353_p6 = scmp.lt.s32.totalorder (!%p293_p3), %s1148_s24, 9 }
   0x9   : > { %s1419_s30 = smov (%p32_p4, %s1417_s30), 0  ;;  %296 = sbr.rel (%p293_p3) target bundleno = 217 (0xd9), region = 40 }
   0xa   : > { %s360_s16 = sadd.s32 (!%p293_p3), 1, %s1148_s24  ;;  %s371_s17 = sadd.s32 (!%p293_p3), 2, %s1148_s24 }
   0xb   : > { %p1284_p7 = scmp.lt.s32.totalorder (!%p293_p3), %s360_s16, 9  ;;  %p1297_p8 = scmp.lt.s32.totalorder (!%p293_p3), %s371_s17, 9 }
   0xc   : > { %p748_p9 = scmp.eq.s32.totalorder (!%p293_p3), %s1152_s25, 0  ;;  %p749_p10 = scmp.eq.s32.totalorder (!%p293_p3), %s1148_s24, 0 }
   0xd   : > { %p384_p12 = scmp.lt.s32.totalorder (!%p293_p3), %s1148_s24, 7 }
   0xe   : > { %v1070_v0 = vld [vmem:[%s1402_s3 + $0x28] sm:$0xff]  ;;  %v1072_v1 = vld [vmem:[%s1402_s3 + $0x38] sm:$0xff]  ;;  %v1069_v4 = vld [vmem:[%s1402_s3 + $0x20] sm:$0xff]  ;;  %s1264_s22 = scalar_select %p351_p5, %s1152_s25, 1  ;;  %vm430_vm0 = vcmask 261120   ;;  %vm746_vm1 = vcmask 257024  }
   0xf   : > { %v1068_v2 = vld [vmem:[%s1402_s3 + $0x18] sm:$0xff]  ;;  %v1066_v3 = vld [vmem:[%s1402_s3 + $0x8] sm:$0xff]  ;;  %502 = vmatpush.bf16.msra.mxu2 %v1070_v0  ;;  %536 = vmatpush.bf16.msra.mxu3 %v1072_v1  ;;  %v1071_v5 = vld [vmem:[%s1402_s3 + $0x30] sm:$0xff]  ;;  %s354_s23 = scalar_select %p353_p6, %s1148_s24, 9 }
  0x10   : > { %440 = vmatpush.bf16.msra.mxu0 %v1068_v2  ;;  %468 = vmatpush.bf16.msra.mxu1 %v1066_v3  ;;  %v1067_v6 = vld [vmem:[%s1402_s3 + $0x10] sm:$0xff]  ;;  %v1065_v7 = vld [vmem:[%s1402_s3] sm:$0xff]  ;;  %s1274_s12 = smul.u32 20, %s1264_s22  ;;  %v1074_v8 = vld [vmem:[%s1402_s3 + $0x48] sm:$0xff]  ;;  %s1421_s16 = smov (!%p1284_p7, %s360_s16), 9 }
  0x11   : > { %v1078_v9 = vld [vmem:[%s1402_s3 + $0x68] sm:$0xff]  ;;  %s927_s19 = sshll.u32 %s354_s23, 1  ;;  %v1080_v10 = vld [vmem:[%s1402_s3 + $0x78] sm:$0xff]  ;;  %v1073_v12 = vld [vmem:[%s1402_s3 + $0x40] sm:$0xff]  ;;  %s1423_s17 = smov (!%p1297_p8, %s371_s17), 9 }
  0x12   : > { %v1076_v11 = vld [vmem:[%s1402_s3 + $0x58] sm:$0xff]  ;;  %s357_s11 = sadd.s32 %s1274_s12, %s927_s19  ;;  %v1077_v13 = vld [vmem:[%s1402_s3 + $0x60] sm:$0xff]  ;;  %v1079_v14 = vld [vmem:[%s1402_s3 + $0x70] sm:$0xff]  ;;  %s929_s15 = sshll.u32 %s1421_s16, 1 }
  0x13   : > { %503 = vmatpush.bf16.msra.mxu2 %v1069_v4  ;;  %537 = vmatpush.bf16.msra.mxu3 %v1071_v5  ;;  %s928_s13 = sshll.u32 %s357_s11, 2  ;;  %v1075_v17 = vld [vmem:[%s1402_s3 + $0x50] sm:$0xff]  ;;  %s367_s21 = sadd.s32 %s1274_s12, %s929_s15  ;;  %v1082_v24 = vld [vmem:[%s1402_s3 + $0x88] sm:$0xff]  ;;  %v1081_v33 = vld [vmem:[%s1402_s3 + $0x80] sm:$0xff] }
  0x14   : > { %441 = vmatpush.bf16.msra.mxu0 %v1067_v6  ;;  %469 = vmatpush.bf16.msra.mxu1 %v1065_v7  ;;  %s359_s18 = scalar_lea.vmem %s1399_s0, %s928_s13  ;;  %s931_s20 = sshll.u32 %s1423_s17, 1  ;;  %v1125_v4 = vld [vmem:[%s1403_s4] ss:$0 sm:$0xff] }
  0x15   : > { %v941_v15 = vld [vmem:[%s359_s18] sm:$0xf]  ;;  %v1062_v16 = vld [vmem:[%s359_s18] sm:$0x10]  ;;  %s930_s8 = sshll.u32 %s367_s21, 2  ;;  %s378_s19 = sadd.s32 %s1274_s12, %s931_s20 }
  0x16   : > { %v942_v18 = vor.u32 %v1062_v16, %v941_v15  ;;  %v391_v19 = vld [vmem:[%s359_s18] sm:$0xf]  ;;  %s369_s23 = scalar_lea.vmem %s1400_s1, %s930_s8  ;;  %s932_s16 = sshll.u32 %s378_s19, 2 }
  0x17   : > { %651 = vmatpush.bf16.msrb.mxu2 %v1078_v9  ;;  %697 = vmatpush.bf16.msrb.mxu3 %v1080_v10  ;;  %v393_v25 = vld [vmem:[%s369_s23] sm:$0xf]  ;;  %v1063_v27 = vld [vmem:[%s369_s23] sm:$0x10]  ;;  %s380_s12 = scalar_lea.vmem %s1401_s2, %s932_s16  ;;  %p1349_p11 = pnand %p749_p10, %p748_p9 }
  0x18   : > { %582 = vmatpush.bf16.msrb.mxu0 %v1074_v8  ;;  %617 = vmatpush.bf16.msrb.mxu1 %v1076_v11  ;;  %v480_v20 = vrot.slane %v942_v18, 1  ;;  %v412_v21 = vshrl.u32 %v942_v18, 16  ;;  %v414_v22 = vshll.u32 %v942_v18, 16  ;;  %v993_v26 = vld [vmem:[%s369_s23] sm:$0xf]  ;;  %s1425_s24 = smov (!%p384_p12, %s1148_s24), 7 }
  0x19   : > { %960 = vmatmul.msk.bf16.vlgmr.msra.gmra.mxu1 %vm430_vm0, %v391_v19  ;;  %986 = vmatmul.msk.bf16.vlgmr.msra.gmra.mxu3 %vm430_vm0, %v393_v25  ;;  %v1036_v29 = vld [vmem:[%s380_s12] sm:$0xf]  ;;  %v1064_v30 = vld [vmem:[%s380_s12] sm:$0x10]  ;;  %v994_v32 = vor.u32 %v1063_v27, %v993_v26  ;;  %s933_s25 = sshll.u32 %s1264_s22, 3 }
  0x1a   : > { %973 = vmatmul.msk.bf16.vlgmr.msra.gmra.mxu2 %vm430_vm0, %v480_v20  ;;  %v416_v23 = vrot.slane %v414_v22, 1  ;;  %v1037_v31 = vor.u32 %v1064_v30, %v1036_v29  ;;  %v395_v41 = vld [vmem:[%s380_s12] sm:$0xf]  ;;  %s387_s20 = sadd.s32 %s933_s25, %s1425_s24 }
  0x1b   : > { %652 = vmatpush.bf16.msrb.mxu2 %v1077_v13  ;;  %698 = vmatpush.bf16.msrb.mxu3 %v1079_v14  ;;  %v557_v35 = vshll.u32 %v994_v32, 16  ;;  %v595_v36 = vrot.slane %v994_v32, 1  ;;  %v555_v39 = vshrl.u32 %v994_v32, 16  ;;  %s934_s18 = sshll.u32 %s387_s20, 2 }
  0x1c   : > { %583 = vmatpush.bf16.msrb.mxu0 %v1073_v12  ;;  %618 = vmatpush.bf16.msrb.mxu1 %v1075_v17  ;;  %v417_v28 = vor.u32 %v416_v23, %v412_v21  ;;  %v672_v34 = vshll.u32 %v1037_v31, 16  ;;  %v670_v37 = vshrl.u32 %v1037_v31, 16  ;;  %v710_v44 = vrot.slane %v1037_v31, 1  ;;  %s389_s16 = scalar_lea.vmem %s1404_s5, %s934_s18 }
  0x1d   : > { %v559_v40 = vrot.slane %v557_v35, 1 }
  0x1e   : > { %951 = vmatmul.msk.bf16.vlgmr.msra.gmra.mxu0 %vm430_vm0, %v417_v28  ;;  %v674_v38 = vrot.slane %v672_v34, 1 }
  0x1f   : > { %v560_v43 = vor.u32 %v559_v40, %v555_v39 }
  0x20   : > { %732 = vmatpush.bf16.msra.mxu0 %v1082_v24  ;;  %v675_v42 = vor.u32 %v674_v38, %v670_v37 }
  0x24   : > { %733 = vmatpush.bf16.msra.mxu0 %v1081_v33 }
  0x29   : > { %1016 = vmatmul.msk.bf16.vlgmr.msrb.gmra.mxu1 %vm430_vm0, %v595_v36  ;;  %1046 = vmatmul.msk.bf16.vlgmr.msrb.gmra.mxu3 %vm430_vm0, %v675_v42 }
  0x2a   : > { %1029 = vmatmul.msk.bf16.vlgmr.msrb.gmra.mxu2 %vm430_vm0, %v395_v41 }
  0x2e   : > { %1003 = vmatmul.msk.bf16.vlgmr.msrb.gmra.mxu0 %vm430_vm0, %v560_v43 }
  0x3e   : > { %1059 = vmatmul.msk.bf16.vlgmr.msra.gmra.mxu0 %vm430_vm0, %v710_v44 }
  0x96   : > { %v471_v45 = vpop.f32.mrf.mxu1 }
  0x9b   : > { %v443_v46 = vpop.f32.mrf.mxu0 }
  0x9c   : > { %v539_v49 = vpop.f32.mrf.mxu3  ;;  %v472_v51 = vadd.f32 %v471_v45, %v443_v46 }
  0x9d   : > { %v505_v48 = vpop.f32.mrf.mxu2 }
  0x9e   : > { %v473_v47 = vpop.f32.mrf.mxu1  ;;  %v509_v55 = vadd.f32 %v505_v48, %v472_v51 }
  0xa0   : > { %v543_v57 = vadd.f32 %v539_v49, %v509_v55 }
  0xa3   : > { %v445_v50 = vpop.f32.mrf.mxu0 }
  0xa4   : > { %v541_v54 = vpop.f32.mrf.mxu3 }
  0xa5   : > { %v507_v53 = vpop.f32.mrf.mxu2 }
  0xa6   : > { %v620_v52 = vpop.f32.mrf.mxu1 }
  0xab   : > { %v585_v56 = vpop.f32.mrf.mxu0 }
  0xac   : > { %v589_v60 = vadd.f32 %v585_v56, %v543_v57  ;;  %v700_v61 = vpop.f32.mrf.mxu3 }
  0xad   : > { %v654_v59 = vpop.f32.mrf.mxu2 }
  0xae   : > { %v622_v58 = vpop.f32.mrf.mxu1  ;;  %v624_v62 = vadd.f32 %v620_v52, %v589_v60 }
  0xb0   : > { %v658_v1 = vadd.f32 %v654_v59, %v624_v62 }
  0xb2   : > { %v704_v3 = vadd.f32 %v700_v61, %v658_v1 }
  0xb3   : > { %v587_v63 = vpop.f32.mrf.mxu0 }
  0xb4   : > { %v702_v2 = vpop.f32.mrf.mxu3 }
  0xb5   : > { %v656_v0 = vpop.f32.mrf.mxu2 }
  0xbb   : > { %v735_v5 = vpop.f32.mrf.mxu0 }
  0xbc   : > { %v739_v6 = vadd.f32 %v735_v5, %v704_v3 }
  0xbe   : > { %v744_v7 = vadd.f32 %v1125_v4, %v739_v6 }
  0xbf   : > { %753 = sbr.rel (%p1349_p11) target bundleno = 199 (0xc7), region = 44 }
  0xc0   : > { %v745_v8 = vpack.c.bf16 %v744_v7, %v744_v7 }
  0xc2   : > { %747 = vst.msk [vmem:[%s389_s16] sm:$0xf] %vm746_vm1, %v745_v8 }
  0xc3   : > { %v737_v9 = vpop.f32.mrf.mxu0 }
  0xc4   : > { %vm754_vm2 = vcmask 253952   ;;  %v1166_v10 = vmov 0.0  }
  0xc5   : > { %755 = vst.msk [vmem:[%s1405_s6] sm:$0x1] %vm754_vm2, %v1166_v10 }
  0xc6   : > { %756 = vst.msk [vmem:[%s1406_s7] sm:$0x1] %vm754_vm2, %v1166_v10 }
  0xc7 PF: > { %v758_v11 = vsel %vm430_vm0, %v744_v7, 0.0  ;;  %v769_v12 = vmul.f32 %v744_v7, %v744_v7  ;;  %vm766_vm3 = vcmask 253952  }
  0xc8   : > { %v759_v13 = vrot.slane %v758_v11, 4 }
  0xc9   : > { %v770_v14 = vsel %vm430_vm0, %v769_v12, 0.0 }
  0xca   : > { %v760_v15 = vadd.f32 %v759_v13, %v758_v11  ;;  %v771_v16 = vrot.slane %v770_v14, 4 }
  0xcc   : > { %v761_v17 = vrot.slane %v760_v15, 2  ;;  %v772_v18 = vadd.f32 %v771_v16, %v770_v14  ;;  %v757_v23 = vld [vmem:[%s1405_s6] sm:$0x1] }
  0xcd   : > { %v768_v26 = vld [vmem:[%s1406_s7] sm:$0x1] }
  0xce   : > { %v762_v19 = vadd.f32 %v761_v17, %v760_v15  ;;  %v773_v20 = vrot.slane %v772_v18, 2 }
  0xd0   : > { %v763_v21 = vrot.slane %v762_v19, 1  ;;  %v774_v22 = vadd.f32 %v773_v20, %v772_v18 }
  0xd2   : > { %v764_v24 = vadd.f32 %v763_v21, %v762_v19  ;;  %v775_v25 = vrot.slane %v774_v22, 1 }
  0xd4   : > { %v765_v27 = vadd.f32 %v764_v24, %v757_v23  ;;  %v776_v28 = vadd.f32 %v775_v25, %v774_v22 }
  0xd6   : > { %767 = vst.msk [vmem:[%s1405_s6] sm:$0x1] %vm766_vm3, %v765_v27  ;;  %v777_v29 = vadd.f32 %v776_v28, %v768_v26 }
  0xd8   : > { %778 = vst.msk [vmem:[%s1406_s7] sm:$0x1] %vm766_vm3, %v777_v29 }
  0xd9 PF: > { %s18_s28 = sadd.s32 1, %s1164_s28   ;;  %s1410_s24 = smov %s1156_s26 }
  0xda   : > { %p15_p13 = scmp.ge.s32.totalorder %s18_s28, 18   ;;  %s1411_s25 = smov %s1160_s27 }
  0xdb   : > { %s1412_s26 = smov %s1415_s29  ;;  %s1413_s27 = smov %s1419_s30 }
  0xdc   :  { %17 = sbr.rel (!%p15_p13) target bundleno = 3 (0x3), region = 104 }

// kernel: attention_unet_forward.33
= control target key start
LH: loop header
LB: loop body
LE: loop exit
PB: predicated region body
PF: predicated region fallthrough
CT: control target
= control target key end

     0   :  { %s1163_s24 = smov 0   ;;  %s1165_s25 = smov 0   ;;  %s1353_s0 = inlined_call_operand.vmem [shape: bf16[2,6,6,32], index: 0, kind: input, shape index: {}, may-alias: {0,1,2}]   ;;  %s1354_s1 = inlined_call_operand.vmem [shape: bf16[2,6,6,32], index: 1, kind: input, shape index: {}, may-alias: {0,1,2}]   ;;  %s1355_s2 = inlined_call_operand.vmem [shape: bf16[2,6,6,32], index: 2, kind: input, shape index: {}, may-alias: {0,1,2}]   ;;  %s1356_s3 = inlined_call_operand.vmem [shape: bf16[3,3,32,64], index: 3, kind: input, shape index: {}]   ;;  %s1357_s4 = inlined_call_operand.vmem [shape: f32[1,64], index: 4, kind: input, shape index: {}]   ;;  %s1358_s5 = inlined_call_operand.vmem [shape: bf16[2,4,4,64], index: 5, kind: output, shape index: {0}]   ;;  %s1359_s6 = inlined_call_operand.vmem [shape: f32[1,64], index: 6, kind: output, shape index: {1}]   ;;  %s1360_s7 = inlined_call_operand.vmem [shape: f32[1,64], index: 7, kind: output, shape index: {2}]  }
   0x1   :  { %s1167_s26 = smov 0   ;;  %s1169_s27 = smov 0  }
   0x2   :  { %s1171_s28 = smov 0  }
   0x3 LB: > { %s27_s29 = sadd.s32 1, %s1112_s26  ;;  %s30_s30 = sadd.s32 1, %s1116_s27  ;;  %s1120_s28 = sphi %s1171_s28, %s18_s28   ;;  %s1116_s27 = sphi %s1169_s27, %s1367_s27   ;;  %s1112_s26 = sphi %s1167_s26, %s1366_s26   ;;  %s1108_s25 = sphi %s1165_s25, %s1365_s25   ;;  %s1104_s24 = sphi %s1163_s24, %s1364_s24  }
   0x4   : > { %p28_p0 = scmp.ge.s32.totalorder %s27_s29, 4  ;;  %p900_p1 = scmp.ge.s32.totalorder %s1120_s28, 1 }
   0x5   : > { %p289_p2 = scmp.lt.s32.totalorder %s1120_s28, 9 }
   0x6   : > { %s1369_s29 = smov (%p28_p0, %s27_s29), 0  ;;  %s1371_s30 = smov (!%p28_p0, %s30_s30), %s1116_s27 }
   0x7   : > { %p290_p3 = pnand %p900_p1, %p289_p2  ;;  %p32_p4 = scmp.ge.s32.totalorder %s1371_s30, 2 }
   0x8   : > { %p345_p5 = scmp.lt.s32.totalorder (!%p290_p3), %s1108_s25, 1  ;;  %p347_p6 = scmp.lt.s32.totalorder (!%p290_p3), %s1104_s24, 5 }
   0x9   : > { %s1373_s30 = smov (%p32_p4, %s1371_s30), 0  ;;  %293 = sbr.rel (%p290_p3) target bundleno = 219 (0xdb), region = 40 }
   0xa   : > { %s353_s16 = sadd.s32 (!%p290_p3), 1, %s1104_s24  ;;  %s363_s17 = sadd.s32 (!%p290_p3), 2, %s1104_s24 }
   0xb   : > { %p1240_p7 = scmp.lt.s32.totalorder (!%p290_p3), %s353_s16, 5  ;;  %p1253_p8 = scmp.lt.s32.totalorder (!%p290_p3), %s363_s17, 5 }
   0xc   : > { %p730_p9 = scmp.eq.s32.totalorder (!%p290_p3), %s1108_s25, 0  ;;  %p731_p10 = scmp.eq.s32.totalorder (!%p290_p3), %s1104_s24, 0 }
   0xd   : > { %p375_p12 = scmp.lt.s32.totalorder (!%p290_p3), %s1104_s24, 3 }
   0xe   : > { %v1026_v0 = vld [vmem:[%s1356_s3 + $0x28] sm:$0xff]  ;;  %v1028_v1 = vld [vmem:[%s1356_s3 + $0x38] sm:$0xff]  ;;  %v1025_v4 = vld [vmem:[%s1356_s3 + $0x20] sm:$0xff]  ;;  %s1220_s22 = scalar_select %p345_p5, %s1108_s25, 1  ;;  %vm416_vm0 = vcmask 261120   ;;  %vm728_vm1 = vcmask 517120  }
   0xf   : > { %v1024_v2 = vld [vmem:[%s1356_s3 + $0x18] sm:$0xff]  ;;  %v1022_v3 = vld [vmem:[%s1356_s3 + $0x8] sm:$0xff]  ;;  %488 = vmatpush.bf16.msra.mxu2 %v1026_v0  ;;  %522 = vmatpush.bf16.msra.mxu3 %v1028_v1  ;;  %v1027_v5 = vld [vmem:[%s1356_s3 + $0x30] sm:$0xff]  ;;  %s348_s23 = scalar_select %p347_p6, %s1104_s24, 5 }
  0x10   : > { %426 = vmatpush.bf16.msra.mxu0 %v1024_v2  ;;  %454 = vmatpush.bf16.msra.mxu1 %v1022_v3  ;;  %v1023_v6 = vld [vmem:[%s1356_s3 + $0x10] sm:$0xff]  ;;  %v1021_v7 = vld [vmem:[%s1356_s3] sm:$0xff]  ;;  %s1230_s12 = smul.u32 6, %s1220_s22  ;;  %v1030_v8 = vld [vmem:[%s1356_s3 + $0x48] sm:$0xff]  ;;  %s1375_s16 = smov (!%p1240_p7, %s353_s16), 5 }
  0x11   : > { %v1034_v9 = vld [vmem:[%s1356_s3 + $0x68] sm:$0xff]  ;;  %v1036_v10 = vld [vmem:[%s1356_s3 + $0x78] sm:$0xff]  ;;  %v1029_v12 = vld [vmem:[%s1356_s3 + $0x40] sm:$0xff]  ;;  %s1377_s17 = smov (!%p1253_p8, %s363_s17), 5  ;;  %p1305_p11 = pnand %p731_p10, %p730_p9 }
  0x12   : > { %v1032_v11 = vld [vmem:[%s1356_s3 + $0x58] sm:$0xff]  ;;  %s350_s10 = sadd.s32 %s1230_s12, %s348_s23  ;;  %v1033_v13 = vld [vmem:[%s1356_s3 + $0x60] sm:$0xff]  ;;  %v1035_v15 = vld [vmem:[%s1356_s3 + $0x70] sm:$0xff]  ;;  %s359_s15 = sadd.s32 %s1230_s12, %s1375_s16 }
  0x13   : > { %489 = vmatpush.bf16.msra.mxu2 %v1025_v4  ;;  %523 = vmatpush.bf16.msra.mxu3 %v1027_v5  ;;  %s901_s13 = sshll.u32 %s350_s10, 2  ;;  %v1031_v16 = vld [vmem:[%s1356_s3 + $0x50] sm:$0xff]  ;;  %s902_s19 = sshll.u32 %s359_s15, 2  ;;  %v1038_v27 = vld [vmem:[%s1356_s3 + $0x88] sm:$0xff]  ;;  %v1037_v32 = vld [vmem:[%s1356_s3 + $0x80] sm:$0xff] }
  0x14   : > { %427 = vmatpush.bf16.msra.mxu0 %v1023_v6  ;;  %455 = vmatpush.bf16.msra.mxu1 %v1021_v7  ;;  %s352_s18 = scalar_lea.vmem %s1353_s0, %s901_s13  ;;  %s361_s23 = scalar_lea.vmem %s1354_s1, %s902_s19  ;;  %v1081_v1 = vld [vmem:[%s1357_s4] ss:$0 sm:$0xff] }
  0x15   : > { %v382_v14 = vld [vmem:[%s352_s18] sm:$0x7]  ;;  %s369_s18 = sadd.s32 %s1230_s12, %s1377_s17  ;;  %s1379_s24 = smov (!%p375_p12, %s1104_s24), 3 }
  0x16   : > { %v395_v17 = vunpack.c.l.b16 %v382_v14  ;;  %s903_s8 = sshll.u32 %s369_s18, 2  ;;  %v383_v20 = vld [vmem:[%s361_s23] sm:$0x7]  ;;  %s904_s25 = sshll.u32 %s1220_s22, 2 }
  0x17   : > { %635 = vmatpush.bf16.msrb.mxu2 %v1034_v9  ;;  %679 = vmatpush.bf16.msrb.mxu3 %v1036_v10  ;;  %s371_s16 = scalar_lea.vmem %s1355_s2, %s903_s8  ;;  %v536_v24 = vunpack.c.l.b16 %v383_v20  ;;  %s378_s15 = sadd.s32 %s904_s25, %s1379_s24 }
  0x18   : > { %566 = vmatpush.bf16.msrb.mxu0 %v1030_v8  ;;  %601 = vmatpush.bf16.msrb.mxu1 %v1032_v11  ;;  %v396_v18 = vpack.c.b16 %v395_v17, %v395_v17  ;;  %v384_v23 = vld [vmem:[%s371_s16] sm:$0x7]  ;;  %s905_s20 = sshll.u32 %s378_s15, 1 }
  0x19   : > { %927 = vmatmul.msk.bf16.vlgmr.msra.gmra.mxu1 %vm416_vm0, %v382_v14  ;;  %953 = vmatmul.msk.bf16.vlgmr.msra.gmra.mxu3 %vm416_vm0, %v383_v20  ;;  %v649_v26 = vunpack.c.l.b16 %v384_v23  ;;  %v537_v30 = vpack.c.b16 %v536_v24, %v536_v24  ;;  %s380_s8 = scalar_lea.vmem %s1358_s5, %s905_s20 }
  0x1a   : > { %v466_v19 = vrot.slane %v396_v18, 1  ;;  %v398_v21 = vshrl.u32 %v396_v18, 16  ;;  %v400_v22 = vshll.u32 %v396_v18, 16 }
  0x1b   : > { %636 = vmatpush.bf16.msrb.mxu2 %v1033_v13  ;;  %680 = vmatpush.bf16.msrb.mxu3 %v1035_v15  ;;  %v650_v29 = vpack.c.b16 %v649_v26, %v649_v26  ;;  %v579_v33 = vrot.slane %v537_v30, 1  ;;  %v541_v36 = vshll.u32 %v537_v30, 16  ;;  %v539_v38 = vshrl.u32 %v537_v30, 16 }
  0x1c   : > { %567 = vmatpush.bf16.msrb.mxu0 %v1029_v12  ;;  %602 = vmatpush.bf16.msrb.mxu1 %v1031_v16  ;;  %v402_v25 = vrot.slane %v400_v22, 1 }
  0x1d   : > { %940 = vmatmul.msk.bf16.vlgmr.msra.gmra.mxu2 %vm416_vm0, %v466_v19  ;;  %v654_v31 = vshll.u32 %v650_v29, 16  ;;  %v652_v34 = vshrl.u32 %v650_v29, 16  ;;  %v543_v39 = vrot.slane %v541_v36, 1  ;;  %v692_v41 = vrot.slane %v650_v29, 1 }
  0x1e   : > { %v403_v28 = vor.u32 %v402_v25, %v398_v21 }
  0x1f   : > { %v656_v35 = vrot.slane %v654_v31, 1  ;;  %v544_v40 = vor.u32 %v543_v39, %v539_v38 }
  0x20   : > { %918 = vmatmul.msk.bf16.vlgmr.msra.gmra.mxu0 %vm416_vm0, %v403_v28 }
  0x21   : > { %714 = vmatpush.bf16.msra.mxu0 %v1038_v27  ;;  %v657_v37 = vor.u32 %v656_v35, %v652_v34 }
  0x25   : > { %715 = vmatpush.bf16.msra.mxu0 %v1037_v32 }
  0x29   : > { %979 = vmatmul.msk.bf16.vlgmr.msrb.gmra.mxu1 %vm416_vm0, %v579_v33  ;;  %1005 = vmatmul.msk.bf16.vlgmr.msrb.gmra.mxu3 %vm416_vm0, %v657_v37 }
  0x2d   : > { %992 = vmatmul.msk.bf16.vlgmr.msrb.gmra.mxu2 %vm416_vm0, %v384_v23 }
  0x30   : > { %966 = vmatmul.msk.bf16.vlgmr.msrb.gmra.mxu0 %vm416_vm0, %v544_v40 }
  0x40   : > { %1018 = vmatmul.msk.bf16.vlgmr.msra.gmra.mxu0 %vm416_vm0, %v692_v41 }
  0x96   : > { %v457_v42 = vpop.f32.mrf.mxu1 }
  0x9c   : > { %v525_v45 = vpop.f32.mrf.mxu3 }
  0x9d   : > { %v429_v44 = vpop.f32.mrf.mxu0 }
  0x9e   : > { %v459_v43 = vpop.f32.mrf.mxu1  ;;  %v458_v49 = vadd.f32 %v457_v42, %v429_v44 }
  0xa0   : > { %v491_v46 = vpop.f32.mrf.mxu2 }
  0xa1   : > { %v495_v52 = vadd.f32 %v491_v46, %v458_v49 }
  0xa3   : > { %v529_v55 = vadd.f32 %v525_v45, %v495_v52 }
  0xa4   : > { %v527_v50 = vpop.f32.mrf.mxu3 }
  0xa5   : > { %v431_v48 = vpop.f32.mrf.mxu0 }
  0xa6   : > { %v604_v47 = vpop.f32.mrf.mxu1 }
  0xa8   : > { %v493_v51 = vpop.f32.mrf.mxu2 }
  0xac   : > { %v682_v56 = vpop.f32.mrf.mxu3 }
  0xad   : > { %v569_v54 = vpop.f32.mrf.mxu0 }
  0xae   : > { %v606_v53 = vpop.f32.mrf.mxu1  ;;  %v573_v58 = vadd.f32 %v569_v54, %v529_v55 }
  0xb0   : > { %v638_v57 = vpop.f32.mrf.mxu2  ;;  %v608_v59 = vadd.f32 %v604_v47, %v573_v58 }
  0xb2   : > { %v642_v63 = vadd.f32 %v638_v57, %v608_v59 }
  0xb4   : > { %v684_v61 = vpop.f32.mrf.mxu3  ;;  %v686_v0 = vadd.f32 %v682_v56, %v642_v63 }
  0xb5   : > { %v571_v60 = vpop.f32.mrf.mxu0 }
  0xb8   : > { %v640_v62 = vpop.f32.mrf.mxu2 }
  0xbd   : > { %v717_v2 = vpop.f32.mrf.mxu0 }
  0xbe   : > { %v721_v3 = vadd.f32 %v717_v2, %v686_v0 }
  0xc0   : > { %v726_v4 = vadd.f32 %v1081_v1, %v721_v3 }
  0xc1   : > { %735 = sbr.rel (%p1305_p11) target bundleno = 201 (0xc9), region = 44 }
  0xc2   : > { %v727_v5 = vpack.c.bf16 %v726_v4, %v726_v4 }
  0xc4   : > { %729 = vst.msk [vmem:[%s380_s8] sm:$0x3] %vm728_vm1, %v727_v5 }
  0xc5   : > { %v719_v6 = vpop.f32.mrf.mxu0 }
  0xc6   : > { %vm736_vm2 = vcmask 516096   ;;  %v1122_v7 = vmov 0.0  }
  0xc7   : > { %737 = vst.msk [vmem:[%s1359_s6] sm:$0x1] %vm736_vm2, %v1122_v7 }
  0xc8   : > { %738 = vst.msk [vmem:[%s1360_s7] sm:$0x1] %vm736_vm2, %v1122_v7 }
  0xc9 PF: > { %vm740_vm3 = vcmask 519168   ;;  %v752_v8 = vmul.f32 %v726_v4, %v726_v4  ;;  %vm749_vm4 = vcmask 516096  }
  0xca   : > { %v741_v9 = vsel %vm740_vm3, %v726_v4, 0.0 }
  0xcb   : > { %v742_v10 = vrot.slane %v741_v9, 4  ;;  %v753_v11 = vsel %vm740_vm3, %v752_v8, 0.0 }
  0xcc   : > { %v754_v12 = vrot.slane %v753_v11, 4 }
  0xcd   : > { %v743_v13 = vadd.f32 %v742_v10, %v741_v9 }
  0xce   : > { %v755_v14 = vadd.f32 %v754_v12, %v753_v11  ;;  %v739_v20 = vld [vmem:[%s1359_s6] sm:$0x1] }
  0xcf   : > { %v744_v15 = vrot.slane %v743_v13, 2  ;;  %v751_v23 = vld [vmem:[%s1360_s7] sm:$0x1] }
  0xd0   : > { %v756_v16 = vrot.slane %v755_v14, 2 }
  0xd1   : > { %v745_v17 = vadd.f32 %v744_v15, %v743_v13 }
  0xd2   : > { %v757_v18 = vadd.f32 %v756_v16, %v755_v14 }
  0xd3   : > { %v746_v19 = vrot.slane %v745_v17, 1 }
  0xd4   : > { %v758_v21 = vrot.slane %v757_v18, 1 }
  0xd5   : > { %v747_v22 = vadd.f32 %v746_v19, %v745_v17 }
  0xd6   : > { %v759_v24 = vadd.f32 %v758_v21, %v757_v18 }
  0xd7   : > { %v748_v25 = vadd.f32 %v747_v22, %v739_v20 }
  0xd8   : > { %v760_v26 = vadd.f32 %v759_v24, %v751_v23 }
  0xd9   : > { %750 = vst.msk [vmem:[%s1359_s6] sm:$0x1] %vm749_vm4, %v748_v25 }
  0xda   : > { %761 = vst.msk [vmem:[%s1360_s7] sm:$0x1] %vm749_vm4, %v760_v26 }
  0xdb PF: > { %s18_s28 = sadd.s32 1, %s1120_s28   ;;  %s1364_s24 = smov %s1112_s26 }
  0xdc   : > { %p15_p13 = scmp.ge.s32.totalorder %s18_s28, 10   ;;  %s1365_s25 = smov %s1116_s27 }
  0xdd   : > { %s1366_s26 = smov %s1369_s29  ;;  %s1367_s27 = smov %s1373_s30 }
  0xde   :  { %17 = sbr.rel (!%p15_p13) target bundleno = 3 (0x3), region = 104 }

// kernel: tile.13
= control target key start
LH: loop header
LB: loop body
LE: loop exit
PB: predicated region body
PF: predicated region fallthrough
CT: control target
= control target key end

     0   :  { %s22_s0 = inlined_call_operand.vmem [shape: f32[32], index: 0, kind: input, shape index: {}]   ;;  %s23_s1 = inlined_call_operand.vmem [shape: f32[2,32], index: 1, kind: output, shape index: {}]  }
   0x1   :  { %v4_v0 = vld [vmem:[%s22_s0] ss:$0 sm:$0xff] }
   0x2   :  { %5 = vst [vmem:[%s23_s1] sm:$0x3] %v4_v0 }

// kernel: tile.14
= control target key start
LH: loop header
LB: loop body
LE: loop exit
PB: predicated region body
PF: predicated region fallthrough
CT: control target
= control target key end

     0   :  { %vm7_vm0 = vcmask 261120   ;;  %vm13_vm1 = vcmask 523520   ;;  %s39_s0 = inlined_call_operand.vmem [shape: f32[2,32], index: 0, kind: input, shape index: {}]   ;;  %s40_s1 = inlined_call_operand.vmem [shape: f32[1,64], index: 1, kind: output, shape index: {}]  }
   0x1   :  { %v4_v0 = vld [vmem:[%s39_s0] sm:$0x3]  ;;  %s22_s0 = smov 32  }
   0x2   :  { %5 = vst [vmem:[#allocation1] sm:$0x3] %v4_v0 }
   0x9   :  { %v10_v1 = vld [vmem:[#allocation1 + $0x1] sm:$0x1]   ;;  %v6_v2 = vld [vmem:[#allocation1] sm:$0x1]  }
   0xa   :  { %11 = vrot.lane.b32.xlu0 %v10_v1, %s22_s0  ;;  %8 = vst.msk [vmem:[#allocation0] sm:$0x1] %vm7_vm0, %v6_v2  }
  0x7c   :  { %v12_v3 = vpop.permute.xlu0 %11  }
  0x7d   :  { %14 = vst.msk [vmem:[#allocation0] sm:$0x1] %vm13_vm1, %v12_v3  }
  0x84   :  { %v17_v4 = vld [vmem:[#allocation0] sm:$0x1] }
  0x85   :  { %20 = vst [vmem:[%s40_s1] sm:$0x1] %v17_v4 }

// kernel: attention_unet_forward.37
= control target key start
LH: loop header
LB: loop body
LE: loop exit
PB: predicated region body
PF: predicated region fallthrough
CT: control target
= control target key end

     0   :  { %s590_s15 = smov 0   ;;  %s592_s16 = smov 0   ;;  %s668_s0 = inlined_call_operand.vmem [shape: bf16[2,4,4,64], index: 0, kind: input, shape index: {}]   ;;  %s669_s1 = inlined_call_operand.vmem [shape: bf16[64,64], index: 1, kind: input, shape index: {}]   ;;  %s670_s2 = inlined_call_operand.vmem [shape: bf16[64,64], index: 2, kind: input, shape index: {}]   ;;  %s671_s3 = inlined_call_operand.vmem [shape: f32[1,64], index: 3, kind: input, shape index: {}]   ;;  %s672_s4 = inlined_call_operand.vmem [shape: bf16[2,4,2,4,64], index: 4, kind: output, shape index: {}]  }
   0x1   :  { %s594_s17 = smov 0   ;;  %s596_s18 = smov 0  }
   0x2   :  { %s598_s19 = smov 0  }
   0x3 LB: > { %s23_s20 = sadd.s32 1, %s555_s17  ;;  %s26_s21 = sadd.s32 1, %s559_s18  ;;  %s563_s19 = sphi %s598_s19, %s14_s19   ;;  %s559_s18 = sphi %s596_s18, %s676_s18   ;;  %s555_s17 = sphi %s594_s17, %s675_s17   ;;  %s551_s16 = sphi %s592_s16, %s674_s16   ;;  %s547_s15 = sphi %s590_s15, %s673_s15  }
   0x4   : > { %p24_p0 = scmp.ge.s32.totalorder %s23_s20, 4  ;;  %p433_p1 = scmp.ge.s32.totalorder %s563_s19, 1 }
   0x5   : > { %p181_p2 = scmp.lt.s32.totalorder %s563_s19, 9 }
   0x6   : > { %s678_s20 = smov (%p24_p0, %s23_s20), 0  ;;  %s680_s21 = smov (!%p24_p0, %s26_s21), %s559_s18 }
   0x7   : > { %p182_p3 = pnand %p433_p1, %p181_p2  ;;  %p28_p4 = scmp.ge.s32.totalorder %s680_s21, 2 }
   0x8   : > { %p214_p5 = scmp.lt.s32.totalorder (!%p182_p3), %s551_s16, 1  ;;  %p216_p6 = scmp.lt.s32.totalorder (!%p182_p3), %s547_s15, 3 }
   0x9   : > { %s682_s21 = smov (%p28_p4, %s680_s21), 0  ;;  %185 = sbr.rel (%p182_p3) target bundleno = 165 (0xa5), region = 36 }
   0xe   : > { %v479_v0 = vld [vmem:[%s669_s1 + $0x18] sm:$0xff]  ;;  %v478_v2 = vld [vmem:[%s669_s1 + $0x10] sm:$0xff]  ;;  %s684_s16 = smov (!%p214_p5, %s551_s16), 1  ;;  %s686_s15 = smov (!%p216_p6, %s547_s15), 3  ;;  %v477_v4 = vld [vmem:[%s669_s1 + $0x8] sm:$0xff]  ;;  %vm269_vm0 = vcmask 523264  }
   0xf   : > { %v483_v1 = vld [vmem:[%s670_s2 + $0x18] sm:$0xff]  ;;  %277 = vmatpush.bf16.msra.mxu0 %v479_v0  ;;  %v482_v3 = vld [vmem:[%s670_s2 + $0x10] sm:$0xff]  ;;  %s434_s30 = sshll.u32 %s684_s16, 2  ;;  %s437_s5 = sshll.u32 %s684_s16, 3  ;;  %v481_v5 = vld [vmem:[%s670_s2 + $0x8] sm:$0xff]  ;;  %vm332_vm1 = vcmask 517120  }
  0x10   : > { %322 = vmatpush.bf16.msra.mxu1 %v483_v1  ;;  %s219_s6 = sadd.s32 %s434_s30, %s686_s15  ;;  %s436_s7 = sshll.u32 %s686_s15, 1  ;;  %v476_v6 = vld [vmem:[%s669_s1] sm:$0xff] }
  0x11   : > { %s228_s12 = sadd.s32 %s437_s5, %s436_s7  ;;  %s435_s13 = sshll.u32 %s219_s6, 1  ;;  %v480_v7 = vld [vmem:[%s670_s2] sm:$0xff] }
  0x12   : > { %s221_s25 = scalar_lea.vmem %s668_s0, %s435_s13  ;;  %v524_v9 = vld [vmem:[%s671_s3] ss:$0 sm:$0xff]  ;;  %s438_s28 = sshll.u32 %s228_s12, 1 }
  0x13   : > { %278 = vmatpush.bf16.msra.mxu0 %v478_v2  ;;  %v232_v8 = vld [vmem:[%s221_s25] sm:$0x3]  ;;  %s230_s5 = scalar_lea.vmem %s672_s4, %s438_s28 }
  0x14   : > { %323 = vmatpush.bf16.msra.mxu1 %v482_v3 }
  0x17   : > { %279 = vmatpush.bf16.msra.mxu0 %v477_v4 }
  0x18   : > { %324 = vmatpush.bf16.msra.mxu1 %v481_v5 }
  0x1b   : > { %280 = vmatpush.bf16.msra.mxu0 %v476_v6 }
  0x1c   : > { %325 = vmatpush.bf16.msra.mxu1 %v480_v7 }
  0x1e   : > { %455 = vmatmul.msk.bf16.vlgmr.msra.gmra.mxu0 %vm269_vm0, %v232_v8 }
  0x1f   : > { %472 = vmatmul.msk.bf16.vlgmr.msra.gmra.mxu1 %vm269_vm0, %v232_v8 }
  0x9b   : > { %v282_v10 = vpop.f32.mrf.mxu0 }
  0x9c   : > { %v327_v11 = vpop.f32.mrf.mxu1  ;;  %v283_v12 = vadd.f32 %v524_v9, %v282_v10 }
  0x9d   : > { %v328_v13 = vadd.f32 %v524_v9, %v327_v11 }
  0x9e   : > { %v331_v14 = vpack.c.bf16 %v283_v12, %v283_v12 }
  0x9f   : > { %v334_v15 = vpack.c.bf16 %v328_v13, %v328_v13 }
  0xa0   : > { %333 = vst.msk [vmem:[%s230_s5] sm:$0x3] %vm332_vm1, %v331_v14 }
  0xa1   : > { %473 = vst.msk [vmem:[%s230_s5 + $0x2] sm:$0x3] %vm332_vm1, %v334_v15 }
  0xa3   : > { %v284_v16 = vpop.f32.mrf.mxu0 }
  0xa4   : > { %v329_v17 = vpop.f32.mrf.mxu1 }
  0xa5 PF: > { %s14_s19 = sadd.s32 1, %s563_s19   ;;  %s673_s15 = smov %s555_s17 }
  0xa6   : > { %p11_p7 = scmp.ge.s32.totalorder %s14_s19, 10   ;;  %s674_s16 = smov %s559_s18 }
  0xa7   : > { %s675_s17 = smov %s678_s20  ;;  %s676_s18 = smov %s682_s21 }
  0xa8   :  { %13 = sbr.rel (!%p11_p7) target bundleno = 3 (0x3), region = 67 }

// kernel: attention_unet_forward.35
= control target key start
LH: loop header
LB: loop body
LE: loop exit
PB: predicated region body
PF: predicated region fallthrough
CT: control target
= control target key end

     0   :  { %s1429_s24 = smov 0   ;;  %s1431_s25 = smov 0   ;;  %s1669_s0 = inlined_call_operand.vmem [shape: bf16[2,6,6,64], index: 0, kind: input, shape index: {}, may-alias: {0,1,2}]   ;;  %s1670_s1 = inlined_call_operand.vmem [shape: bf16[2,6,6,64], index: 1, kind: input, shape index: {}, may-alias: {0,1,2}]   ;;  %s1671_s2 = inlined_call_operand.vmem [shape: bf16[2,6,6,64], index: 2, kind: input, shape index: {}, may-alias: {0,1,2}]   ;;  %s1672_s3 = inlined_call_operand.vmem [shape: bf16[3,3,64,64], index: 3, kind: input, shape index: {}]   ;;  %s1673_s4 = inlined_call_operand.vmem [shape: f32[1,64], index: 4, kind: input, shape index: {}]   ;;  %s1674_s5 = inlined_call_operand.vmem [shape: bf16[2,4,4,64], index: 5, kind: output, shape index: {0}]   ;;  %s1675_s6 = inlined_call_operand.vmem [shape: f32[1,64], index: 6, kind: output, shape index: {1}]   ;;  %s1676_s7 = inlined_call_operand.vmem [shape: f32[1,64], index: 7, kind: output, shape index: {2}]  }
   0x1   :  { %1678 = sst [smem:[#allocation3_spill]] %s1669_s0  ;;  %s1433_s26 = smov 0  }
   0x2   :  { %s1435_s27 = smov 0   ;;  %s1437_s28 = smov 0  }
   0x3 LB: > { %s27_s29 = sadd.s32 1, %s1378_s26  ;;  %s30_s30 = sadd.s32 1, %s1382_s27  ;;  %s1386_s28 = sphi %s1437_s28, %s18_s28   ;;  %s1382_s27 = sphi %s1435_s27, %s1689_s27   ;;  %s1378_s26 = sphi %s1433_s26, %s1688_s26   ;;  %s1374_s25 = sphi %s1431_s25, %s1687_s25   ;;  %s1370_s24 = sphi %s1429_s24, %s1686_s24  }
   0x4   : > { %p28_p0 = scmp.ge.s32.totalorder %s27_s29, 4  ;;  %p1044_p1 = scmp.ge.s32.totalorder %s1386_s28, 1 }
   0x5   : > { %p289_p2 = scmp.lt.s32.totalorder %s1386_s28, 9 }
   0x6   : > { %s1691_s29 = smov (%p28_p0, %s27_s29), 0  ;;  %s1693_s30 = smov (!%p28_p0, %s30_s30), %s1382_s27 }
   0x7   : > { %p290_p3 = pnand %p1044_p1, %p289_p2  ;;  %p32_p4 = scmp.ge.s32.totalorder %s1693_s30, 2 }
   0x8   : > { %p345_p5 = scmp.lt.s32.totalorder (!%p290_p3), %s1374_s25, 1  ;;  %p347_p6 = scmp.lt.s32.totalorder (!%p290_p3), %s1370_s24, 5 }
   0x9   : > { %s1695_s30 = smov (%p32_p4, %s1693_s30), 0  ;;  %293 = sbr.rel (%p290_p3) target bundleno = 221 (0xdd), region = 40 }
   0xa   : > { %1679 = sst [smem:[#allocation2_spill]] %s1695_s30  ;;  %s353_s16 = sadd.s32 (!%p290_p3), 1, %s1370_s24 }
   0xb   : > { %s1677_s17 = sadd.s32 (!%p290_p3), 2, %s1370_s24  ;;  %p1498_p7 = scmp.lt.s32.totalorder (!%p290_p3), %s353_s16, 5 }
   0xc   : > { %p1511_p8 = scmp.lt.s32.totalorder (!%p290_p3), %s1677_s17, 5  ;;  %s1682_s0 = sld [smem:[#allocation3_spill]] (!%p290_p3) }
   0xd   : > { %p874_p9 = scmp.eq.s32.totalorder (!%p290_p3), %s1374_s25, 0  ;;  %p875_p10 = scmp.eq.s32.totalorder (!%p290_p3), %s1370_s24, 0 }
   0xe   : > { %v1280_v0 = vld [vmem:[%s1672_s3 + $0x58] sm:$0xff]  ;;  %v1279_v4 = vld [vmem:[%s1672_s3 + $0x50] sm:$0xff]  ;;  %s1486_s22 = scalar_select %p345_p5, %s1374_s25, 1  ;;  %v1278_v8 = vld [vmem:[%s1672_s3 + $0x48] sm:$0xff]  ;;  %vm436_vm0 = vcmask 523264   ;;  %vm872_vm1 = vcmask 517120  }
   0xf   : > { %v1276_v1 = vld [vmem:[%s1672_s3 + $0x38] sm:$0xff]  ;;  %534 = vmatpush.bf16.msra.mxu2 %v1280_v0  ;;  %v1275_v5 = vld [vmem:[%s1672_s3 + $0x30] sm:$0xff]  ;;  %s348_s11 = scalar_select %p347_p6, %s1370_s24, 5  ;;  %v1274_v9 = vld [vmem:[%s1672_s3 + $0x28] sm:$0xff] }
  0x10   : > { %v1272_v2 = vld [vmem:[%s1672_s3 + $0x18] sm:$0xff]  ;;  %444 = vmatpush.bf16.msra.mxu0 %v1276_v1  ;;  %v1271_v6 = vld [vmem:[%s1672_s3 + $0x10] sm:$0xff]  ;;  %s1496_s12 = smul.u32 6, %s1486_s22  ;;  %v1270_v10 = vld [vmem:[%s1672_s3 + $0x8] sm:$0xff]  ;;  %s1697_s16 = smov (!%p1498_p7, %s353_s16), 5 }
  0x11   : > { %v1284_v3 = vld [vmem:[%s1672_s3 + $0x78] sm:$0xff]  ;;  %484 = vmatpush.bf16.msra.mxu1 %v1272_v2  ;;  %v1283_v7 = vld [vmem:[%s1672_s3 + $0x70] sm:$0xff]  ;;  %v1282_v11 = vld [vmem:[%s1672_s3 + $0x68] sm:$0xff]  ;;  %p1621_p11 = pnand %p875_p10, %p874_p9  ;;  %p375_p12 = scmp.lt.s32.totalorder %s1370_s24, 3 }
  0x12   : > { %584 = vmatpush.bf16.msra.mxu3 %v1284_v3  ;;  %s350_s20 = sadd.s32 %s1496_s12, %s348_s11  ;;  %v1277_v13 = vld [vmem:[%s1672_s3 + $0x40] sm:$0xff]  ;;  %s359_s17 = sadd.s32 %s1496_s12, %s1697_s16  ;;  %v1296_v19 = vld [vmem:[%s1672_s3 + $0xd8] sm:$0xff]  ;;  %v1295_v30 = vld [vmem:[%s1672_s3 + $0xd0] sm:$0xff] }
  0x13   : > { %535 = vmatpush.bf16.msra.mxu2 %v1279_v4  ;;  %s1045_s14 = sshll.u32 %s350_s20, 2  ;;  %v1273_v14 = vld [vmem:[%s1672_s3 + $0x20] sm:$0xff]  ;;  %s1683_s20 = sadd.s32 2, %s1370_s24  ;;  %v1288_v20 = vld [vmem:[%s1672_s3 + $0x98] sm:$0xff]  ;;  %v1287_v32 = vld [vmem:[%s1672_s3 + $0x90] sm:$0xff] }
  0x14   : > { %445 = vmatpush.bf16.msra.mxu0 %v1275_v5  ;;  %s352_s18 = scalar_lea.vmem %s1682_s0, %s1045_s14  ;;  %s1699_s20 = smov (!%p1511_p8, %s1683_s20), 5  ;;  %v1269_v16 = vld [vmem:[%s1672_s3] sm:$0xff]  ;;  %v1300_v21 = vld [vmem:[%s1672_s3 + $0xf8] sm:$0xff]  ;;  %v1299_v33 = vld [vmem:[%s1672_s3 + $0xf0] sm:$0xff] }
  0x15   : > { %485 = vmatpush.bf16.msra.mxu1 %v1271_v6  ;;  %v382_v12 = vld [vmem:[%s352_s18] sm:$0x7]  ;;  %s1046_s18 = sshll.u32 %s359_s17, 2  ;;  %s369_s23 = sadd.s32 %s1496_s12, %s1699_s20  ;;  %v1292_v26 = vld [vmem:[%s1672_s3 + $0xb8] sm:$0xff]  ;;  %v1291_v36 = vld [vmem:[%s1672_s3 + $0xb0] sm:$0xff] }
  0x16   : > { %585 = vmatpush.bf16.msra.mxu3 %v1283_v7  ;;  %v403_v15 = vunpack.c.l.b16 %v382_v12  ;;  %v1281_v17 = vld [vmem:[%s1672_s3 + $0x60] sm:$0xff]  ;;  %s361_s9 = scalar_lea.vmem %s1670_s1, %s1046_s18  ;;  %s1047_s16 = sshll.u32 %s369_s23, 2  ;;  %v1294_v38 = vld [vmem:[%s1672_s3 + $0xc8] sm:$0xff]  ;;  %v1304_v49 = vld [vmem:[%s1672_s3 + $0x118] sm:$0xff] }
  0x17   : > { %536 = vmatpush.bf16.msra.mxu2 %v1278_v8  ;;  %s371_s17 = scalar_lea.vmem %s1671_s2, %s1047_s16  ;;  %v383_v25 = vld [vmem:[%s361_s9] sm:$0x7]  ;;  %v1286_v39 = vld [vmem:[%s1672_s3 + $0x88] sm:$0xff]  ;;  %v1303_v55 = vld [vmem:[%s1672_s3 + $0x110] sm:$0xff]  ;;  %s1701_s24 = smov (!%p375_p12, %s1370_s24), 3 }
  0x18   : > { %446 = vmatpush.bf16.msra.mxu0 %v1274_v9  ;;  %v404_v18 = vpack.c.b16 %v403_v15, %v403_v15  ;;  %v384_v27 = vld [vmem:[%s371_s17] sm:$0x7]  ;;  %v604_v29 = vunpack.c.l.b16 %v383_v25  ;;  %v1298_v40 = vld [vmem:[%s1672_s3 + $0xe8] sm:$0xff]  ;;  %s1048_s25 = sshll.u32 %s1486_s22, 2 }
  0x19   : > { %486 = vmatpush.bf16.msra.mxu1 %v1270_v10  ;;  %v765_v31 = vunpack.c.l.b16 %v384_v27  ;;  %v1290_v42 = vld [vmem:[%s1672_s3 + $0xa8] sm:$0xff]  ;;  %v1293_v44 = vld [vmem:[%s1672_s3 + $0xc0] sm:$0xff]  ;;  %s378_s12 = sadd.s32 %s1048_s25, %s1701_s24 }
  0x1a   : > { %586 = vmatpush.bf16.msra.mxu3 %v1282_v11  ;;  %v502_v22 = vrot.slane %v404_v18, 1  ;;  %v406_v23 = vshrl.u32 %v404_v18, 16  ;;  %v408_v24 = vshll.u32 %v404_v18, 16  ;;  %v605_v37 = vpack.c.b16 %v604_v29, %v604_v29  ;;  %v1285_v45 = vld [vmem:[%s1672_s3 + $0x80] sm:$0xff]  ;;  %v1302_v57 = vld [vmem:[%s1672_s3 + $0x108] sm:$0xff]  ;;  %s1049_s15 = sshll.u32 %s378_s12, 1 }
  0x1b   : > { %537 = vmatpush.bf16.msra.mxu2 %v1277_v13  ;;  %v766_v35 = vpack.c.b16 %v765_v31, %v765_v31  ;;  %v1297_v46 = vld [vmem:[%s1672_s3 + $0xe0] sm:$0xff]  ;;  %s380_s19 = scalar_lea.vmem %s1674_s5, %s1049_s15 }
  0x1c   : > { %447 = vmatpush.bf16.msra.mxu0 %v1273_v14  ;;  %v410_v28 = vrot.slane %v408_v24, 1  ;;  %v609_v43 = vshll.u32 %v605_v37, 16  ;;  %v1289_v50 = vld [vmem:[%s1672_s3 + $0xa0] sm:$0xff]  ;;  %v607_v51 = vshrl.u32 %v605_v37, 16  ;;  %v663_v54 = vrot.slane %v605_v37, 1 }
  0x1d   : > { %487 = vmatpush.bf16.msra.mxu1 %v1269_v16  ;;  %v770_v41 = vshll.u32 %v766_v35, 16  ;;  %v768_v47 = vshrl.u32 %v766_v35, 16  ;;  %v1301_v58 = vld [vmem:[%s1672_s3 + $0x100] sm:$0xff]  ;;  %v824_v59 = vrot.slane %v766_v35, 1 }
  0x1e   : > { %587 = vmatpush.bf16.msra.mxu3 %v1281_v17  ;;  %1116 = vmatmul.msk.bf16.vlgmr.msra.gmra.mxu2 %vm436_vm0, %v502_v22  ;;  %v411_v34 = vor.u32 %v410_v28, %v406_v23  ;;  %v611_v52 = vrot.slane %v609_v43, 1 }
  0x1f   : > { %745 = vmatpush.bf16.msrb.mxu2 %v1296_v19  ;;  %v772_v48 = vrot.slane %v770_v41, 1  ;;  %v1347_v19 = vld [vmem:[%s1673_s4] ss:$0 sm:$0xff] }
  0x20   : > { %644 = vmatpush.bf16.msrb.mxu0 %v1288_v20  ;;  %1091 = vmatmul.msk.bf16.vlgmr.msra.gmra.mxu1 %vm436_vm0, %v382_v12  ;;  %v612_v56 = vor.u32 %v611_v52, %v607_v51 }
  0x21   : > { %1141 = vmatmul.msk.bf16.vlgmr.msra.gmra.mxu3 %vm436_vm0, %v383_v25  ;;  %695 = vmatpush.bf16.msrb.mxu1 %v1292_v26  ;;  %v773_v53 = vor.u32 %v772_v48, %v768_v47 }
  0x22   : > { %805 = vmatpush.bf16.msrb.mxu3 %v1300_v21  ;;  %1074 = vmatmul.msk.bf16.vlgmr.msra.gmra.mxu0 %vm436_vm0, %v411_v34 }
  0x23   : > { %746 = vmatpush.bf16.msrb.mxu2 %v1295_v30 }
  0x24   : > { %645 = vmatpush.bf16.msrb.mxu0 %v1287_v32 }
  0x25   : > { %696 = vmatpush.bf16.msrb.mxu1 %v1291_v36 }
  0x26   : > { %806 = vmatpush.bf16.msrb.mxu3 %v1299_v33 }
  0x27   : > { %747 = vmatpush.bf16.msrb.mxu2 %v1294_v38 }
  0x28   : > { %646 = vmatpush.bf16.msrb.mxu0 %v1286_v39 }
  0x29   : > { %697 = vmatpush.bf16.msrb.mxu1 %v1290_v42 }
  0x2a   : > { %807 = vmatpush.bf16.msrb.mxu3 %v1298_v40 }
  0x2b   : > { %748 = vmatpush.bf16.msrb.mxu2 %v1293_v44 }
  0x2c   : > { %647 = vmatpush.bf16.msrb.mxu0 %v1285_v45 }
  0x2d   : > { %698 = vmatpush.bf16.msrb.mxu1 %v1289_v50 }
  0x2e   : > { %808 = vmatpush.bf16.msrb.mxu3 %v1297_v46  ;;  %1216 = vmatmul.msk.bf16.vlgmr.msrb.gmra.mxu2 %vm436_vm0, %v384_v27 }
  0x30   : > { %856 = vmatpush.bf16.msra.mxu0 %v1304_v49  ;;  %1191 = vmatmul.msk.bf16.vlgmr.msrb.gmra.mxu1 %vm436_vm0, %v663_v54 }
  0x31   : > { %1241 = vmatmul.msk.bf16.vlgmr.msrb.gmra.mxu3 %vm436_vm0, %v773_v53 }
  0x32   : > { %1166 = vmatmul.msk.bf16.vlgmr.msrb.gmra.mxu0 %vm436_vm0, %v612_v56 }
  0x34   : > { %857 = vmatpush.bf16.msra.mxu0 %v1303_v55 }
  0x38   : > { %858 = vmatpush.bf16.msra.mxu0 %v1302_v57 }
  0x3c   : > { %859 = vmatpush.bf16.msra.mxu0 %v1301_v58 }
  0x42   : > { %1266 = vmatmul.msk.bf16.vlgmr.msra.gmra.mxu0 %vm436_vm0, %v824_v59 }
  0x9d   : > { %v489_v60 = vpop.f32.mrf.mxu1 }
  0x9f   : > { %v449_v61 = vpop.f32.mrf.mxu0 }
  0xa0   : > { %v490_v2 = vadd.f32 %v489_v60, %v449_v61 }
  0xa1   : > { %v539_v62 = vpop.f32.mrf.mxu2 }
  0xa2   : > { %v543_v5 = vadd.f32 %v539_v62, %v490_v2 }
  0xa4   : > { %v589_v63 = vpop.f32.mrf.mxu3 }
  0xa5   : > { %v491_v0 = vpop.f32.mrf.mxu1  ;;  %v593_v8 = vadd.f32 %v589_v63, %v543_v5 }
  0xa7   : > { %v451_v1 = vpop.f32.mrf.mxu0 }
  0xa9   : > { %v541_v3 = vpop.f32.mrf.mxu2 }
  0xac   : > { %v591_v4 = vpop.f32.mrf.mxu3 }
  0xad   : > { %v700_v6 = vpop.f32.mrf.mxu1 }
  0xaf   : > { %v649_v7 = vpop.f32.mrf.mxu0 }
  0xb0   : > { %v653_v9 = vadd.f32 %v649_v7, %v593_v8 }
  0xb1   : > { %v750_v10 = vpop.f32.mrf.mxu2 }
  0xb2   : > { %v704_v13 = vadd.f32 %v700_v6, %v653_v9 }
  0xb4   : > { %v810_v11 = vpop.f32.mrf.mxu3  ;;  %v754_v15 = vadd.f32 %v750_v10, %v704_v13 }
  0xb5   : > { %v702_v12 = vpop.f32.mrf.mxu1 }
  0xb6   : > { %v814_v18 = vadd.f32 %v810_v11, %v754_v15 }
  0xb7   : > { %v651_v14 = vpop.f32.mrf.mxu0 }
  0xb9   : > { %v752_v16 = vpop.f32.mrf.mxu2 }
  0xbc   : > { %v812_v17 = vpop.f32.mrf.mxu3 }
  0xbf   : > { %v861_v20 = vpop.f32.mrf.mxu0 }
  0xc0   : > { %v865_v21 = vadd.f32 %v861_v20, %v814_v18 }
  0xc2   : > { %v870_v22 = vadd.f32 %v1347_v19, %v865_v21 }
  0xc3   : > { %879 = sbr.rel (%p1621_p11) target bundleno = 203 (0xcb), region = 44 }
  0xc4   : > { %v871_v23 = vpack.c.bf16 %v870_v22, %v870_v22 }
  0xc6   : > { %873 = vst.msk [vmem:[%s380_s19] sm:$0x3] %vm872_vm1, %v871_v23 }
  0xc7   : > { %v863_v24 = vpop.f32.mrf.mxu0 }
  0xc8   : > { %vm880_vm2 = vcmask 516096   ;;  %v1388_v25 = vmov 0.0  }
  0xc9   : > { %881 = vst.msk [vmem:[%s1675_s6] sm:$0x1] %vm880_vm2, %v1388_v25 }
  0xca   : > { %882 = vst.msk [vmem:[%s1676_s7] sm:$0x1] %vm880_vm2, %v1388_v25 }
  0xcb PF: > { %vm884_vm3 = vcmask 519168   ;;  %v896_v26 = vmul.f32 %v870_v22, %v870_v22  ;;  %vm893_vm4 = vcmask 516096  }
  0xcc   : > { %v885_v27 = vsel %vm884_vm3, %v870_v22, 0.0 }
  0xcd   : > { %v886_v28 = vrot.slane %v885_v27, 4  ;;  %v897_v29 = vsel %vm884_vm3, %v896_v26, 0.0 }
  0xce   : > { %v898_v30 = vrot.slane %v897_v29, 4 }
  0xcf   : > { %v887_v31 = vadd.f32 %v886_v28, %v885_v27 }
  0xd0   : > { %v899_v32 = vadd.f32 %v898_v30, %v897_v29  ;;  %v883_v38 = vld [vmem:[%s1675_s6] sm:$0x1] }
  0xd1   : > { %v888_v33 = vrot.slane %v887_v31, 2  ;;  %v895_v41 = vld [vmem:[%s1676_s7] sm:$0x1] }
  0xd2   : > { %v900_v34 = vrot.slane %v899_v32, 2 }
  0xd3   : > { %v889_v35 = vadd.f32 %v888_v33, %v887_v31 }
  0xd4   : > { %v901_v36 = vadd.f32 %v900_v34, %v899_v32 }
  0xd5   : > { %v890_v37 = vrot.slane %v889_v35, 1 }
  0xd6   : > { %v902_v39 = vrot.slane %v901_v36, 1 }
  0xd7   : > { %v891_v40 = vadd.f32 %v890_v37, %v889_v35 }
  0xd8   : > { %v903_v42 = vadd.f32 %v902_v39, %v901_v36 }
  0xd9   : > { %v892_v43 = vadd.f32 %v891_v40, %v883_v38 }
  0xda   : > { %v904_v44 = vadd.f32 %v903_v42, %v895_v41 }
  0xdb   : > { %894 = vst.msk [vmem:[%s1675_s6] sm:$0x1] %vm893_vm4, %v892_v43 }
  0xdc   : > { %905 = vst.msk [vmem:[%s1676_s7] sm:$0x1] %vm893_vm4, %v904_v44 }
  0xdd PF: > { %s18_s28 = sadd.s32 1, %s1386_s28   ;;  %s1685_s12 = sld [smem:[#allocation2_spill]] }
  0xde   : > { %p15_p13 = scmp.ge.s32.totalorder %s18_s28, 10   ;;  %s1686_s24 = smov %s1378_s26 }
  0xdf   : > { %s1687_s25 = smov %s1382_s27  ;;  %s1688_s26 = smov %s1691_s29 }
  0xe0   :  { %17 = sbr.rel (!%p15_p13) target bundleno = 3 (0x3), region = 104 }
  0xe3   : > { %s1689_s27 = smov %s1685_s12 }

// kernel: attention_unet_forward.38
= control target key start
LH: loop header
LB: loop body
LE: loop exit
PB: predicated region body
PF: predicated region fallthrough
CT: control target
= control target key end

     0   :  { %s548_s25 = smov 32   ;;  %vm149_vm0 = vcmask 261120   ;;  %vm210_vm1 = vcmask 523264   ;;  %vm292_vm2 = vcmask 257024   ;;  %vm313_vm3 = vcmask 253952   ;;  %s850_s1 = inlined_call_operand.vmem [shape: bf16[128,32], index: 1, kind: input, shape index: {}]   ;;  %s851_s2 = inlined_call_operand.vmem [shape: bf16[64,32], index: 2, kind: input, shape index: {}]   ;;  %s852_s3 = inlined_call_operand.vmem [shape: f32[1,32], index: 3, kind: input, shape index: {}]   ;;  %s853_s0 = inlined_call_operand.vmem [shape: bf16[128,32], index: 0, kind: input, shape index: {}]   ;;  %s854_s4 = inlined_call_operand.vmem [shape: bf16[128,32], index: 4, kind: output, shape index: {0}]   ;;  %s855_s5 = inlined_call_operand.vmem [shape: f32[1,32], index: 5, kind: output, shape index: {1}]   ;;  %s856_s6 = inlined_call_operand.vmem [shape: f32[1,32], index: 6, kind: output, shape index: {2}]  }
   0x1   :  { %v525_v0 = vld [vmem:[%s850_s1 + $0x20] sm:$0xff]  ;;  %v527_v2 = vld [vmem:[%s850_s1 + $0x30] sm:$0xff]  ;;  %v532_v3 = vld [vmem:[%s851_s2 + $0x18] sm:$0xff] }
   0x2   :  { %v521_v1 = vld [vmem:[%s850_s1] sm:$0xff]  ;;  %141 = vrot.lane.b32.xlu1 %v525_v0, %s548_s25  ;;  %145 = vrot.lane.b32.xlu2 %v527_v2, %s548_s25  ;;  %v531_v4 = vld [vmem:[%s851_s2 + $0x10] sm:$0xff] }
   0x3   :  { %133 = vrot.lane.b32.xlu0 %v521_v1, %s548_s25  ;;  %231 = vmatpush.bf16.msra.mxu0 %v532_v3  ;;  %v523_v5 = vld [vmem:[%s850_s1 + $0x10] sm:$0xff]  ;;  %v522_v6 = vld [vmem:[%s850_s1 + $0x8] sm:$0xff]  ;;  %v524_v7 = vld [vmem:[%s850_s1 + $0x18] sm:$0xff] }
   0x4   :  { %534 = vmatpush.bf16.msra.mxu2 %v532_v3  ;;  %533 = vmatpush.bf16.msra.mxu1 %v532_v3  ;;  %v530_v8 = vld [vmem:[%s851_s2 + $0x8] sm:$0xff]  ;;  %v529_v9 = vld [vmem:[%s851_s2] sm:$0xff]  ;;  %v528_v11 = vld [vmem:[%s850_s1 + $0x38] sm:$0xff] }
   0x5   :  { %535 = vmatpush.bf16.msra.mxu3 %v532_v3  ;;  %v526_v10 = vld [vmem:[%s850_s1 + $0x28] sm:$0xff]  ;;  %v519_v12 = vld [vmem:[%s853_s0 + $0x30] sm:$0xff]  ;;  %v513_v15 = vld [vmem:[%s853_s0] sm:$0xff] }
   0x6   :  { %v517_v16 = vld [vmem:[%s853_s0 + $0x20] sm:$0xff]  ;;  %v515_v21 = vld [vmem:[%s853_s0 + $0x10] sm:$0xff]  ;;  %v514_v25 = vld [vmem:[%s853_s0 + $0x8] sm:$0xff] }
   0x7   :  { %232 = vmatpush.bf16.msra.mxu0 %v531_v4  ;;  %v518_v26 = vld [vmem:[%s853_s0 + $0x28] sm:$0xff]  ;;  %v520_v27 = vld [vmem:[%s853_s0 + $0x38] sm:$0xff]  ;;  %v672_v37 = vld [vmem:[%s852_s3] ss:$0 sm:$0xff] }
   0x8   :  { %537 = vmatpush.bf16.msra.mxu2 %v531_v4  ;;  %536 = vmatpush.bf16.msra.mxu1 %v531_v4  ;;  %v516_v33 = vld [vmem:[%s853_s0 + $0x18] sm:$0xff] }
   0x9   :  { %538 = vmatpush.bf16.msra.mxu3 %v531_v4 }
   0xa   :  { %135 = vrot.lane.b32.xlu1 %v522_v6, %s548_s25  ;;  %139 = vrot.lane.b32.xlu2 %v524_v7, %s548_s25 }
   0xb   :  { %137 = vrot.lane.b32.xlu0 %v523_v5, %s548_s25  ;;  %233 = vmatpush.bf16.msra.mxu0 %v530_v8 }
   0xc   :  { %540 = vmatpush.bf16.msra.mxu2 %v530_v8  ;;  %539 = vmatpush.bf16.msra.mxu1 %v530_v8 }
   0xd   :  { %541 = vmatpush.bf16.msra.mxu3 %v530_v8 }
   0xf   :  { %234 = vmatpush.bf16.msra.mxu0 %v529_v9 }
  0x10   :  { %543 = vmatpush.bf16.msra.mxu2 %v529_v9  ;;  %542 = vmatpush.bf16.msra.mxu1 %v529_v9 }
  0x11   :  { %544 = vmatpush.bf16.msra.mxu3 %v529_v9 }
  0x12   :  { %147 = vrot.lane.b32.xlu1 %v528_v11, %s548_s25 }
  0x13   :  { %143 = vrot.lane.b32.xlu0 %v526_v10, %s548_s25  ;;  %v549_v10 = vmov 0.0  }
  0x14   :  { %314 = vst.msk [vmem:[%s855_s5] sm:$0x1] %vm313_vm3, %v549_v10 }
  0x15   :  { %315 = vst.msk [vmem:[%s856_s6] sm:$0x1] %vm313_vm3, %v549_v10 }
  0x5c   :  { %v146_v13 = vpop.permute.xlu2 %145 }
  0x5d   :  { %v170_v14 = vsel %vm149_vm0, %v519_v12, %v146_v13 }
  0x5e   :  { %511 = vmatmul.msk.bf16.vlgmr.msra.gmra.mxu3 %vm210_vm1, %v170_v14 }
  0x64   :  { %v140_v34 = vpop.permute.xlu2 %139 }
  0x65   :  { %v161_v35 = vsel %vm149_vm0, %v516_v33, %v140_v34 }
  0x74   :  { %v142_v17 = vpop.permute.xlu1 %141 }
  0x75   :  { %v134_v18 = vpop.permute.xlu0 %133  ;;  %v164_v20 = vsel %vm149_vm0, %v517_v16, %v142_v17 }
  0x76   :  { %v152_v19 = vsel %vm149_vm0, %v513_v15, %v134_v18  ;;  %509 = vmatmul.msk.bf16.vlgmr.msra.gmra.mxu2 %vm210_vm1, %v164_v20 }
  0x77   :  { %505 = vmatmul.msk.bf16.vlgmr.msra.gmra.mxu0 %vm210_vm1, %v152_v19 }
  0x7c   :  { %v136_v23 = vpop.permute.xlu1 %135 }
  0x7d   :  { %v138_v22 = vpop.permute.xlu0 %137  ;;  %v155_v28 = vsel %vm149_vm0, %v514_v25, %v136_v23 }
  0x7e   :  { %v158_v24 = vsel %vm149_vm0, %v515_v21, %v138_v22 }
  0x7f   :  { %507 = vmatmul.msk.bf16.vlgmr.msra.gmra.mxu1 %vm210_vm1, %v158_v24 }
  0x84   :  { %v148_v30 = vpop.permute.xlu1 %147 }
  0x85   :  { %v144_v29 = vpop.permute.xlu0 %143  ;;  %v173_v32 = vsel %vm149_vm0, %v520_v27, %v148_v30 }
  0x86   :  { %v167_v31 = vsel %vm149_vm0, %v518_v26, %v144_v29  ;;  %512 = vmatmul.msk.bf16.gmra.mxu3 %vm210_vm1, %v173_v32 }
  0x87   :  { %506 = vmatmul.msk.bf16.gmra.mxu0 %vm210_vm1, %v155_v28  ;;  %510 = vmatmul.msk.bf16.gmra.mxu2 %vm210_vm1, %v167_v31 }
  0x8f   :  { %508 = vmatmul.msk.bf16.gmra.mxu1 %vm210_vm1, %v161_v35 }
  0xe1   :  { %v266_v36 = vpop.f32.mrf.mxu3 }
  0xe2   :  { %v675_v38 = vadd.f32 %v672_v37, %v266_v36 }
  0xe4   :  { %v288_v39 = vpack.c.bf16 %v675_v38, %v675_v38 }
  0xe6   :  { %305 = vst.msk [vmem:[%s854_s4 + $0x30] sm:$0xf] %vm292_vm2, %v288_v39 }
  0xe9   :  { %v268_v40 = vpop.f32.mrf.mxu3 }
  0xea   :  { %v684_v41 = vadd.f32 %v672_v37, %v268_v40 }
  0xec   :  { %v289_v42 = vpack.c.bf16 %v684_v41, %v684_v41 }
  0xee   :  { %306 = vst.msk [vmem:[%s854_s4 + $0x34] sm:$0xf] %vm292_vm2, %v289_v42 }
  0xf4   :  { %v236_v43 = vpop.f32.mrf.mxu0 }
  0xf5   :  { %v237_v44 = vadd.f32 %v672_v37, %v236_v43 }
  0xf7   :  { %v276_v45 = vpack.c.bf16 %v237_v44, %v237_v44  ;;  %v358_v0 = vmul.f32 %v237_v44, %v237_v44  ;;  %v317_v5 = vsel %vm149_vm0, %v237_v44, 0.0 }
  0xf9   :  { %293 = vst.msk [vmem:[%s854_s4] sm:$0xf] %vm292_vm2, %v276_v45  ;;  %v256_v46 = vpop.f32.mrf.mxu2  ;;  %v374_v11 = vsel %vm149_vm0, %v358_v0, 0.0 }
  0xfa   :  { %v698_v47 = vadd.f32 %v672_v37, %v256_v46 }
  0xfc   :  { %v238_v48 = vpop.f32.mrf.mxu0  ;;  %v246_v49 = vpop.f32.mrf.mxu1  ;;  %v284_v50 = vpack.c.bf16 %v698_v47, %v698_v47 }
  0xfd   :  { %v239_v51 = vadd.f32 %v672_v37, %v238_v48  ;;  %v247_v52 = vadd.f32 %v672_v37, %v246_v49 }
  0xfe   :  { %301 = vst.msk [vmem:[%s854_s4 + $0x20] sm:$0xf] %vm292_vm2, %v284_v50 }
  0xff   :  { %v277_v53 = vpack.c.bf16 %v239_v51, %v239_v51  ;;  %v280_v54 = vpack.c.bf16 %v247_v52, %v247_v52  ;;  %v359_v62 = vmul.f32 %v239_v51, %v239_v51  ;;  %v318_v2 = vsel %vm149_vm0, %v239_v51, 0.0 }
 0x100   :  { %v319_v12 = vadd.f32 %v318_v2, %v317_v5  ;;  %v362_v21 = vmul.f32 %v247_v52, %v247_v52  ;;  %v324_v30 = vsel %vm149_vm0, %v247_v52, 0.0 }
 0x101   :  { %294 = vst.msk [vmem:[%s854_s4 + $0x4] sm:$0xf] %vm292_vm2, %v277_v53  ;;  %v258_v55 = vpop.f32.mrf.mxu2  ;;  %v375_v6 = vsel %vm149_vm0, %v359_v62, 0.0  ;;  %v366_v53 = vmul.f32 %v698_v47, %v698_v47 }
 0x102   :  { %297 = vst.msk [vmem:[%s854_s4 + $0x10] sm:$0xf] %vm292_vm2, %v280_v54  ;;  %v717_v56 = vadd.f32 %v672_v37, %v258_v55  ;;  %v376_v20 = vadd.f32 %v375_v6, %v374_v11  ;;  %v381_v36 = vsel %vm149_vm0, %v362_v21, 0.0 }
 0x104   :  { %v241_v57 = vpop.f32.mrf.mxu0  ;;  %v248_v58 = vpop.f32.mrf.mxu1  ;;  %v285_v59 = vpack.c.bf16 %v717_v56, %v717_v56  ;;  %v367_v0 = vmul.f32 %v717_v56, %v717_v56  ;;  %v334_v5 = vsel %vm149_vm0, %v717_v56, 0.0 }
 0x105   :  { %v242_v60 = vadd.f32 %v672_v37, %v241_v57  ;;  %v249_v61 = vadd.f32 %v672_v37, %v248_v58 }
 0x106   :  { %302 = vst.msk [vmem:[%s854_s4 + $0x24] sm:$0xf] %vm292_vm2, %v285_v59 }
 0x107   :  { %v278_v63 = vpack.c.bf16 %v242_v60, %v242_v60  ;;  %v281_v1 = vpack.c.bf16 %v249_v61, %v249_v61  ;;  %v360_v3 = vmul.f32 %v242_v60, %v242_v60  ;;  %v320_v7 = vsel %vm149_vm0, %v242_v60, 0.0 }
 0x108   :  { %v321_v22 = vadd.f32 %v320_v7, %v319_v12  ;;  %v363_v31 = vmul.f32 %v249_v61, %v249_v61  ;;  %v326_v39 = vsel %vm149_vm0, %v249_v61, 0.0 }
 0x109   :  { %295 = vst.msk [vmem:[%s854_s4 + $0x8] sm:$0xf] %vm292_vm2, %v278_v63  ;;  %v271_v9 = vpop.f32.mrf.mxu3  ;;  %v377_v16 = vsel %vm149_vm0, %v360_v3, 0.0  ;;  %v332_v63 = vsel %vm149_vm0, %v698_v47, 0.0 }
 0x10a   :  { %298 = vst.msk [vmem:[%s854_s4 + $0x14] sm:$0xf] %vm292_vm2, %v281_v1  ;;  %v261_v4 = vpop.f32.mrf.mxu2  ;;  %v748_v15 = vadd.f32 %v672_v37, %v271_v9  ;;  %v378_v28 = vadd.f32 %v377_v16, %v376_v20  ;;  %v383_v49 = vsel %vm149_vm0, %v363_v31, 0.0  ;;  %v391_v9 = vsel %vm149_vm0, %v367_v0, 0.0 }
 0x10b   :  { %v740_v8 = vadd.f32 %v672_v37, %v261_v4  ;;  %v389_v4 = vsel %vm149_vm0, %v366_v53, 0.0  ;;  %v371_v20 = vmul.f32 %v684_v41, %v684_v41 }
 0x10c   :  { %v243_v13 = vpop.f32.mrf.mxu0  ;;  %v251_v14 = vpop.f32.mrf.mxu1  ;;  %v290_v23 = vpack.c.bf16 %v748_v15, %v748_v15 }
 0x10d   :  { %v244_v17 = vadd.f32 %v672_v37, %v243_v13  ;;  %v252_v18 = vadd.f32 %v672_v37, %v251_v14  ;;  %v286_v19 = vpack.c.bf16 %v740_v8, %v740_v8  ;;  %v368_v47 = vmul.f32 %v740_v8, %v740_v8 }
 0x10e   :  { %307 = vst.msk [vmem:[%s854_s4 + $0x38] sm:$0xf] %vm292_vm2, %v290_v23  ;;  %v336_v10 = vsel %vm149_vm0, %v740_v8, 0.0  ;;  %v370_v14 = vmul.f32 %v675_v38, %v675_v38 }
 0x10f   :  { %v279_v24 = vpack.c.bf16 %v244_v17, %v244_v17  ;;  %v322_v25 = vsel %vm149_vm0, %v244_v17, 0.0  ;;  %v361_v26 = vmul.f32 %v244_v17, %v244_v17  ;;  %v282_v27 = vpack.c.bf16 %v252_v18, %v252_v18  ;;  %303 = vst.msk [vmem:[%s854_s4 + $0x28] sm:$0xf] %vm292_vm2, %v286_v19 }
 0x110   :  { %v323_v29 = vadd.f32 %v322_v25, %v321_v22  ;;  %v364_v40 = vmul.f32 %v252_v18, %v252_v18  ;;  %v328_v50 = vsel %vm149_vm0, %v252_v18, 0.0  ;;  %v393_v16 = vsel %vm149_vm0, %v368_v47, 0.0 }
 0x111   :  { %296 = vst.msk [vmem:[%s854_s4 + $0xc] sm:$0xf] %vm292_vm2, %v279_v24  ;;  %v379_v32 = vsel %vm149_vm0, %v361_v26, 0.0  ;;  %v273_v43 = vpop.f32.mrf.mxu3  ;;  %v340_v19 = vsel %vm149_vm0, %v675_v38, 0.0  ;;  %v397_v23 = vsel %vm149_vm0, %v370_v14, 0.0  ;;  %v342_v24 = vsel %vm149_vm0, %v684_v41, 0.0 }
 0x112   :  { %v325_v33 = vadd.f32 %v324_v30, %v323_v29  ;;  %v380_v34 = vadd.f32 %v379_v32, %v378_v28  ;;  %299 = vst.msk [vmem:[%s854_s4 + $0x18] sm:$0xf] %vm292_vm2, %v282_v27  ;;  %v263_v35 = vpop.f32.mrf.mxu2  ;;  %v274_v48 = vadd.f32 %v672_v37, %v273_v43  ;;  %v385_v58 = vsel %vm149_vm0, %v364_v40, 0.0 }
 0x113   :  { %v264_v42 = vadd.f32 %v672_v37, %v263_v35  ;;  %v372_v25 = vmul.f32 %v748_v15, %v748_v15  ;;  %v399_v28 = vsel %vm149_vm0, %v371_v20, 0.0  ;;  %v344_v38 = vsel %vm149_vm0, %v748_v15, 0.0 }
 0x114   :  { %v382_v44 = vadd.f32 %v381_v36, %v380_v34  ;;  %v327_v45 = vadd.f32 %v326_v39, %v325_v33  ;;  %v253_v46 = vpop.f32.mrf.mxu1  ;;  %v291_v57 = vpack.c.bf16 %v274_v48, %v274_v48  ;;  %v373_v29 = vmul.f32 %v274_v48, %v274_v48 }
 0x115   :  { %v254_v51 = vadd.f32 %v672_v37, %v253_v46  ;;  %v287_v52 = vpack.c.bf16 %v264_v42, %v264_v42  ;;  %v369_v11 = vmul.f32 %v264_v42, %v264_v42  ;;  %v338_v56 = vsel %vm149_vm0, %v264_v42, 0.0 }
 0x116   :  { %v329_v54 = vadd.f32 %v328_v50, %v327_v45  ;;  %v384_v55 = vadd.f32 %v383_v49, %v382_v44  ;;  %308 = vst.msk [vmem:[%s854_s4 + $0x3c] sm:$0xf] %vm292_vm2, %v291_v57  ;;  %v401_v32 = vsel %vm149_vm0, %v372_v25, 0.0  ;;  %v346_v33 = vsel %vm149_vm0, %v274_v48, 0.0  ;;  %v316_v50 = vld [vmem:[%s855_s5] sm:$0x1] }
 0x117   :  { %v283_v59 = vpack.c.bf16 %v254_v51, %v254_v51  ;;  %v330_v60 = vsel %vm149_vm0, %v254_v51, 0.0  ;;  %v365_v61 = vmul.f32 %v254_v51, %v254_v51  ;;  %304 = vst.msk [vmem:[%s854_s4 + $0x2c] sm:$0xf] %vm292_vm2, %v287_v52  ;;  %v395_v8 = vsel %vm149_vm0, %v369_v11, 0.0  ;;  %v357_v52 = vld [vmem:[%s856_s6] sm:$0x1] }
 0x118   :  { %v386_v62 = vadd.f32 %v385_v58, %v384_v55  ;;  %v331_v37 = vadd.f32 %v330_v60, %v329_v54  ;;  %v403_v41 = vsel %vm149_vm0, %v373_v29, 0.0 }
 0x119   :  { %300 = vst.msk [vmem:[%s854_s4 + $0x1c] sm:$0xf] %vm292_vm2, %v283_v59  ;;  %v387_v1 = vsel %vm149_vm0, %v365_v61, 0.0 }
 0x11a   :  { %v333_v2 = vadd.f32 %v332_v63, %v331_v37  ;;  %v388_v3 = vadd.f32 %v387_v1, %v386_v62 }
 0x11c   :  { %v390_v6 = vadd.f32 %v389_v4, %v388_v3  ;;  %v335_v7 = vadd.f32 %v334_v5, %v333_v2 }
 0x11e   :  { %v337_v12 = vadd.f32 %v336_v10, %v335_v7  ;;  %v392_v13 = vadd.f32 %v391_v9, %v390_v6 }
 0x120   :  { %v339_v17 = vadd.f32 %v338_v56, %v337_v12  ;;  %v394_v18 = vadd.f32 %v393_v16, %v392_v13 }
 0x122   :  { %v341_v21 = vadd.f32 %v340_v19, %v339_v17  ;;  %v396_v22 = vadd.f32 %v395_v8, %v394_v18 }
 0x124   :  { %v398_v26 = vadd.f32 %v397_v23, %v396_v22  ;;  %v343_v27 = vadd.f32 %v342_v24, %v341_v21 }
 0x126   :  { %v345_v30 = vadd.f32 %v344_v38, %v343_v27  ;;  %v400_v31 = vadd.f32 %v399_v28, %v398_v26 }
 0x128   :  { %v402_v34 = vadd.f32 %v401_v32, %v400_v31  ;;  %v347_v35 = vadd.f32 %v346_v33, %v345_v30 }
 0x12a   :  { %v348_v36 = vrot.slane %v347_v35, 4  ;;  %v404_v39 = vadd.f32 %v403_v41, %v402_v34 }
 0x12c   :  { %v349_v40 = vadd.f32 %v348_v36, %v347_v35  ;;  %v405_v42 = vrot.slane %v404_v39, 4 }
 0x12e   :  { %v350_v43 = vrot.slane %v349_v40, 2  ;;  %v406_v44 = vadd.f32 %v405_v42, %v404_v39 }
 0x130   :  { %v351_v45 = vadd.f32 %v350_v43, %v349_v40  ;;  %v407_v46 = vrot.slane %v406_v44, 2 }
 0x132   :  { %v352_v15 = vrot.slane %v351_v45, 1  ;;  %v408_v49 = vadd.f32 %v407_v46, %v406_v44 }
 0x134   :  { %v353_v51 = vadd.f32 %v352_v15, %v351_v45  ;;  %v409_v48 = vrot.slane %v408_v49, 1 }
 0x136   :  { %v354_v53 = vadd.f32 %v353_v51, %v316_v50  ;;  %v410_v54 = vadd.f32 %v409_v48, %v408_v49 }
 0x138   :  { %356 = vst.msk [vmem:[%s855_s5] sm:$0x1] %vm313_vm3, %v354_v53  ;;  %v411_v55 = vadd.f32 %v410_v54, %v357_v52 }
 0x13a   :  { %412 = vst.msk [vmem:[%s856_s6] sm:$0x1] %vm313_vm3, %v411_v55 }

// kernel: attention_unet_forward.39
= control target key start
LH: loop header
LB: loop body
LE: loop exit
PB: predicated region body
PF: predicated region fallthrough
CT: control target
= control target key end

     0   :  { %vm179_vm0 = vcmask 261120   ;;  %s1553_s0 = inlined_call_operand.vmem [shape: bf16[128,32], index: 0, kind: input, shape index: {}]   ;;  %s1554_s2 = inlined_call_operand.vmem [shape: f32[1,32], index: 2, kind: input, shape index: {}]   ;;  %s1555_s3 = inlined_call_operand.vmem [shape: f32[1,32], index: 3, kind: input, shape index: {}]   ;;  %s1556_s4 = inlined_call_operand.vmem [shape: f32[1,32], index: 4, kind: input, shape index: {}]   ;;  %s1557_s5 = inlined_call_operand.vmem [shape: f32[1,32], index: 5, kind: input, shape index: {}]   ;;  %s1558_s6 = inlined_call_operand.vmem [shape: f32[1,32], index: 6, kind: input, shape index: {}]   ;;  %s1559_s7 = inlined_call_operand.<no memory space> [shape: f32[1,1], index: 7, kind: input, shape index: {}]   ;;  %s1560_s1 = inlined_call_operand.vmem [shape: bf16[128,32], index: 1, kind: input, shape index: {}]   ;;  %s1561_s8 = inlined_call_operand.vmem [shape: bf16[128,32], index: 8, kind: output, shape index: {}]  }
   0x1   :  { %v798_v0 = vld [vmem:[%s1553_s0 + $0x10] sm:$0xff]   ;;  %v937_v1 = vld [vmem:[%s1554_s2] ss:$0 sm:$0xff]  ;;  %v797_v10 = vld [vmem:[%s1553_s0 + $0x8] sm:$0xff]  }
   0x2   :  { %v743_v2 = vunpack.c.l.bf16 %v798_v0  ;;  %v942_v3 = vld [vmem:[%s1555_s3] ss:$0 sm:$0xff]  ;;  %v744_v4 = vunpack.c.h.bf16 %v798_v0  ;;  %v965_v13 = vld [vmem:[%s1553_s0 + $0x18] sm:$0xff]   ;;  %v739_v16 = vunpack.c.l.bf16 %v797_v10  ;;  %v740_v21 = vunpack.c.h.bf16 %v797_v10  ;;  %v801_v53 = vld [vmem:[%s1553_s0 + $0x28] sm:$0xff]  }
   0x3   :  { %v948_v6 = vld [vmem:[%s1556_s4] ss:$0 sm:$0xff]  ;;  %v747_v22 = vunpack.c.l.bf16 %v965_v13  ;;  %v756_v61 = vunpack.c.h.bf16 %v801_v53  ;;  %v803_v63 = vld [vmem:[%s1553_s0 + $0x38] sm:$0xff]  }
   0x4   :  { %v71_v5 = vsub.f32 %v743_v2, %v937_v1  ;;  %v734_v7 = vld [vmem:[%s1553_s0] sm:$0xff]   ;;  %v72_v8 = vsub.f32 %v744_v4, %v937_v1  ;;  %v69_v24 = vsub.f32 %v739_v16, %v937_v1  ;;  %v70_v29 = vsub.f32 %v740_v21, %v937_v1 }
   0x5   :  { %v735_v9 = vunpack.c.l.bf16 %v734_v7  ;;  %v736_v11 = vunpack.c.h.bf16 %v734_v7  ;;  %v960_v12 = vld [vmem:[%s1553_s0 + $0x20] sm:$0xff]   ;;  %v73_v30 = vsub.f32 %v747_v22, %v937_v1  ;;  %v748_v16 = vunpack.c.h.bf16 %v965_v13 }
   0x6   :  { %v91_v14 = vmul.f32 %v942_v3, %v71_v5  ;;  %v971_v15 = vld [vmem:[%s1557_s5] ss:$0 sm:$0xff]  ;;  %v92_v17 = vmul.f32 %v942_v3, %v72_v8  ;;  %v751_v18 = vunpack.c.l.bf16 %v960_v12  ;;  %v89_v33 = vmul.f32 %v942_v3, %v69_v24  ;;  %v802_v5 = vld [vmem:[%s1553_s0 + $0x30] sm:$0xff]  }
   0x7   :  { %v67_v19 = vsub.f32 %v735_v9, %v937_v1  ;;  %v68_v20 = vsub.f32 %v736_v11, %v937_v1  ;;  %v990_v32 = vld [vmem:[%s1558_s6] ss:$0 sm:$0xff]  ;;  %v90_v38 = vmul.f32 %v942_v3, %v70_v29  ;;  %v93_v39 = vmul.f32 %v942_v3, %v73_v30 }
   0x8   :  { %v111_v23 = vmul.f32 %v948_v6, %v91_v14  ;;  %v112_v25 = vmul.f32 %v948_v6, %v92_v17  ;;  %v75_v26 = vsub.f32 %v751_v18, %v937_v1  ;;  %v109_v41 = vmul.f32 %v948_v6, %v89_v33 }
   0x9   :  { %v87_v27 = vmul.f32 %v942_v3, %v67_v19  ;;  %v88_v28 = vmul.f32 %v942_v3, %v68_v20  ;;  %v110_v46 = vmul.f32 %v948_v6, %v90_v38  ;;  %v113_v52 = vmul.f32 %v948_v6, %v93_v39 }
   0xa   :  { %v131_v31 = vadd.f32 %v971_v15, %v111_v23  ;;  %v132_v34 = vadd.f32 %v971_v15, %v112_v25  ;;  %v95_v35 = vmul.f32 %v942_v3, %v75_v26  ;;  %v129_v48 = vadd.f32 %v971_v15, %v109_v41 }
   0xb   :  { %v107_v36 = vmul.f32 %v948_v6, %v87_v27  ;;  %v108_v37 = vmul.f32 %v948_v6, %v88_v28  ;;  %v130_v51 = vadd.f32 %v971_v15, %v110_v46  ;;  %v752_v62 = vunpack.c.h.bf16 %v960_v12 }
   0xc   :  { %v147_v40 = vmax.f32 %v131_v31, 0.0  ;;  %v115_v42 = vmul.f32 %v948_v6, %v95_v35  ;;  %v148_v44 = vmax.f32 %v132_v34, 0.0  ;;  %v145_v55 = vmax.f32 %v129_v48, 0.0 }
   0xd   :  { %v127_v43 = vadd.f32 %v971_v15, %v107_v36  ;;  %v128_v45 = vadd.f32 %v971_v15, %v108_v37  ;;  %v146_v59 = vmax.f32 %v130_v51, 0.0  ;;  %v133_v4 = vadd.f32 %v971_v15, %v113_v52 }
   0xe   :  { %v167_v47 = vmul.f32 %v990_v32, %v147_v40  ;;  %v135_v50 = vadd.f32 %v971_v15, %v115_v42  ;;  %v168_v58 = vmul.f32 %v990_v32, %v148_v44  ;;  %v165_v60 = vmul.f32 %v990_v32, %v145_v55 }
   0xf   :  { %v143_v49 = vmax.f32 %v127_v43, 0.0  ;;  %v144_v56 = vmax.f32 %v128_v45, 0.0  ;;  %v78_v9 = vsub.f32 %v756_v61, %v937_v1  ;;  %v76_v10 = vsub.f32 %v752_v62, %v937_v1 }
  0x10   :  { %v192_v54 = vsel %vm179_vm0, %v167_v47, 0.0  ;;  %v151_v2 = vmax.f32 %v135_v50, 0.0  ;;  %v186_v7 = vsel %vm179_vm0, %v165_v60, 0.0  ;;  %v195_v11 = vsel %vm179_vm0, %v168_v58, 0.0 }
  0x11   :  { %193 = vadd.xlane.f32.xlu2 %v192_v54  ;;  %v163_v57 = vmul.f32 %v990_v32, %v143_v49  ;;  %v164_v8 = vmul.f32 %v990_v32, %v144_v56  ;;  %187 = vadd.xlane.f32.xlu1 %v186_v7  ;;  %v166_v12 = vmul.f32 %v990_v32, %v146_v59  ;;  %v763_v14 = vunpack.c.l.bf16 %v803_v63 }
  0x12   :  { %v98_v17 = vmul.f32 %v942_v3, %v78_v9  ;;  %v96_v18 = vmul.f32 %v942_v3, %v76_v10  ;;  %v759_v19 = vunpack.c.l.bf16 %v802_v5  ;;  %v755_v20 = vunpack.c.l.bf16 %v801_v53 }
  0x13   :  { %v180_v0 = vsel %vm179_vm0, %v163_v57, 0.0  ;;  %v149_v21 = vmax.f32 %v133_v4, 0.0  ;;  %v81_v22 = vsub.f32 %v763_v14, %v937_v1  ;;  %v74_v23 = vsub.f32 %v748_v16, %v937_v1 }
  0x14   :  { %181 = vadd.xlane.f32.xlu0 %v180_v0  ;;  %v760_v24 = vunpack.c.h.bf16 %v802_v5  ;;  %v183_v25 = vsel %vm179_vm0, %v164_v8, 0.0  ;;  %v171_v26 = vmul.f32 %v990_v32, %v151_v2  ;;  %v118_v27 = vmul.f32 %v948_v6, %v98_v17 }
  0x15   :  { %v77_v13 = vsub.f32 %v755_v20, %v937_v1  ;;  %v116_v28 = vmul.f32 %v948_v6, %v96_v18  ;;  %v101_v29 = vmul.f32 %v942_v3, %v81_v22  ;;  %v94_v30 = vmul.f32 %v942_v3, %v74_v23 }
  0x16   :  { %v79_v31 = vsub.f32 %v759_v19, %v937_v1  ;;  %v189_v33 = vsel %vm179_vm0, %v166_v12, 0.0  ;;  %v138_v34 = vadd.f32 %v971_v15, %v118_v27  ;;  %v80_v36 = vsub.f32 %v760_v24, %v937_v1 }
  0x17   :  { %v97_v35 = vmul.f32 %v942_v3, %v77_v13  ;;  %v114_v37 = vmul.f32 %v948_v6, %v94_v30  ;;  %v169_v38 = vmul.f32 %v990_v32, %v149_v21  ;;  %v764_v40 = vunpack.c.h.bf16 %v803_v63 }
  0x18   :  { %v136_v41 = vadd.f32 %v971_v15, %v116_v28  ;;  %v121_v42 = vmul.f32 %v948_v6, %v101_v29  ;;  %v99_v44 = vmul.f32 %v942_v3, %v79_v31  ;;  %v204_v45 = vsel %vm179_vm0, %v171_v26, 0.0 }
  0x19   :  { %196 = vadd.xlane.f32.xlu2 %v195_v11  ;;  %v117_v39 = vmul.f32 %v948_v6, %v97_v35  ;;  %190 = vadd.xlane.f32.xlu1 %v189_v33  ;;  %v134_v43 = vadd.f32 %v971_v15, %v114_v37  ;;  %v154_v46 = vmax.f32 %v138_v34, 0.0  ;;  %v100_v48 = vmul.f32 %v942_v3, %v80_v36 }
  0x1a   :  { %v198_v50 = vsel %vm179_vm0, %v169_v38, 0.0  ;;  %v82_v51 = vsub.f32 %v764_v40, %v937_v1  ;;  %v152_v52 = vmax.f32 %v136_v41, 0.0  ;;  %v141_v53 = vadd.f32 %v971_v15, %v121_v42 }
  0x1b   :  { %v137_v47 = vadd.f32 %v971_v15, %v117_v39  ;;  %v150_v49 = vmax.f32 %v134_v43, 0.0  ;;  %v119_v55 = vmul.f32 %v948_v6, %v99_v44  ;;  %v174_v56 = vmul.f32 %v990_v32, %v154_v46 }
  0x1c   :  { %184 = vadd.xlane.f32.xlu0 %v183_v25  ;;  %v120_v58 = vmul.f32 %v948_v6, %v100_v48  ;;  %v13_v59 = vstv %s1559_s7  ;;  %v172_v1 = vmul.f32 %v990_v32, %v152_v52  ;;  %v102_v62 = vmul.f32 %v942_v3, %v82_v51 }
  0x1d   :  { %v170_v54 = vmul.f32 %v990_v32, %v150_v49  ;;  %v153_v57 = vmax.f32 %v137_v47, 0.0  ;;  %14 = vst [vmem:[#allocation2] sm:$0x1] %v13_v59  ;;  %v139_v61 = vadd.f32 %v971_v15, %v119_v55  ;;  %v213_v63 = vsel %vm179_vm0, %v174_v56, 0.0 }
  0x1e   :  { %v157_v0 = vmax.f32 %v141_v53, 0.0  ;;  %v140_v4 = vadd.f32 %v971_v15, %v120_v58  ;;  %v207_v5 = vsel %vm179_vm0, %v172_v1, 0.0  ;;  %v122_v8 = vmul.f32 %v948_v6, %v102_v62 }
  0x1f   :  { %v201_v60 = vsel %vm179_vm0, %v170_v54, 0.0  ;;  %v173_v2 = vmul.f32 %v990_v32, %v153_v57  ;;  %v155_v7 = vmax.f32 %v139_v61, 0.0  ;;  %v885_v23 = vmov 0  }
  0x20   :  { %v177_v9 = vmul.f32 %v990_v32, %v157_v0  ;;  %v156_v11 = vmax.f32 %v140_v4, 0.0  ;;  %v142_v12 = vadd.f32 %v971_v15, %v122_v8  ;;  %812 = vset.pattern.permute.xlu1 %v885_v23  ;;  %814 = vset.pattern.permute.xlu0 %v885_v23 }
  0x21   :  { %205 = vadd.xlane.f32.xlu2 %v204_v45  ;;  %202 = vadd.xlane.f32.xlu1 %v201_v60  ;;  %v210_v10 = vsel %vm179_vm0, %v173_v2, 0.0  ;;  %v175_v3 = vmul.f32 %v990_v32, %v155_v7 }
  0x22   :  { %v222_v14 = vsel %vm179_vm0, %v177_v9, 0.0  ;;  %v176_v16 = vmul.f32 %v990_v32, %v156_v11  ;;  %v158_v18 = vmax.f32 %v142_v12, 0.0  ;;  %813 = vset.pattern.permute.xlu2 %v885_v23 }
  0x23   :  { %v216_v17 = vsel %vm179_vm0, %v175_v3, 0.0 }
  0x24   :  { %199 = vadd.xlane.f32.xlu0 %v198_v50  ;;  %v219_v6 = vsel %vm179_vm0, %v176_v16, 0.0  ;;  %v178_v19 = vmul.f32 %v990_v32, %v158_v18  ;;  %v1087_v21 = vld [vmem:[#allocation2] ss:$0 sm:$0xff] }
  0x26   :  { %v225_v20 = vsel %vm179_vm0, %v178_v19, 0.0 }
  0x29   :  { %214 = vadd.xlane.f32.xlu2 %v213_v63  ;;  %211 = vadd.xlane.f32.xlu1 %v210_v10 }
  0x2c   :  { %208 = vadd.xlane.f32.xlu0 %v207_v5 }
  0x31   :  { %223 = vadd.xlane.f32.xlu2 %v222_v14  ;;  %220 = vadd.xlane.f32.xlu1 %v219_v6 }
  0x34   :  { %217 = vadd.xlane.f32.xlu0 %v216_v17 }
  0x3c   :  { %226 = vadd.xlane.f32.xlu0 %v225_v20 }
  0x84   :  { %v194_v15 = vpop.xlane.xlu2 %193  ;;  %v188_v27 = vpop.xlane.xlu1 %187 }
  0x85   :  { %v236_v22 = vadd.f32 %v1087_v21, %v194_v15  ;;  %v234_v32 = vadd.f32 %v1087_v21, %v188_v27 }
  0x87   :  { %v721_v24 = vmul.f32 -1.442695, %v236_v22  ;;  %v182_v25 = vpop.xlane.xlu0 %181  ;;  %v719_v28 = vmul.f32 -1.442695, %v234_v32 }
  0x88   :  { %v232_v26 = vadd.f32 %v1087_v21, %v182_v25 }
  0x89   :  { %821 = vpow2.f32 %v721_v24 }
  0x8a   :  { %v717_v13 = vmul.f32 -1.442695, %v232_v26 }
  0x8c   :  { %823 = vpow2.f32 %v717_v13  ;;  %v197_v29 = vpop.xlane.xlu2 %196  ;;  %v191_v37 = vpop.xlane.xlu1 %190 }
  0x8d   :  { %825 = vpow2.f32 %v719_v28  ;;  %v237_v30 = vadd.f32 %v1087_v21, %v197_v29  ;;  %v235_v38 = vadd.f32 %v1087_v21, %v191_v37 }
  0x8f   :  { %v822_v31 = vpop.eup %821  ;;  %v722_v33 = vmul.f32 -1.442695, %v237_v30  ;;  %v185_v34 = vpop.xlane.xlu0 %184  ;;  %v720_v43 = vmul.f32 -1.442695, %v235_v38 }
  0x90   :  { %v1093_v35 = vadd.f32 1.0, %v822_v31  ;;  %v233_v36 = vadd.f32 %v1087_v21, %v185_v34 }
  0x91   :  { %827 = vpow2.f32 %v722_v33 }
  0x92   :  { %v824_v39 = vpop.eup %823  ;;  %829 = vrcp.f32 %v1093_v35  ;;  %v718_v40 = vmul.f32 -1.442695, %v233_v36  ;;  %vm377_vm1 = vweird.f32 %v1093_v35  ;;  %v381_v48 = vand.u32 2147483647, %v1093_v35 }
  0x93   :  { %v826_v41 = vpop.eup %825  ;;  %v1098_v42 = vadd.f32 1.0, %v824_v39  ;;  %v383_v53 = vand.u32 2147483648, %v1093_v35 }
  0x94   :  { %v1100_v44 = vadd.f32 1.0, %v826_v41  ;;  %831 = vpow2.f32 %v718_v40  ;;  %v206_v45 = vpop.xlane.xlu2 %205  ;;  %v203_v58 = vpop.xlane.xlu1 %202  ;;  %vm1145_vm8 = vcmp.eq.f32.partialorder %v381_v48, 8.507059e+37 }
  0x95   :  { %833 = vrcp.f32 %v1098_v42  ;;  %v240_v46 = vadd.f32 %v1087_v21, %v206_v45  ;;  %v323_v47 = vand.u32 2147483648, %v1098_v42  ;;  %v321_v57 = vand.u32 2147483647, %v1098_v42 }
  0x96   :  { %835 = vrcp.f32 %v1100_v44  ;;  %v353_v52 = vand.u32 2147483648, %v1100_v44  ;;  %v351_v59 = vand.u32 2147483647, %v1100_v44  ;;  %vm317_vm2 = vweird.f32 %v1098_v42 }
  0x97   :  { %v828_v49 = vpop.eup %827  ;;  %v725_v50 = vmul.f32 -1.442695, %v240_v46  ;;  %837 = vpow2.f32 %v720_v43  ;;  %v200_v51 = vpop.xlane.xlu0 %199  ;;  %v239_v60 = vadd.f32 %v1087_v21, %v203_v58  ;;  %v1121_v63 = vor.u32 1.1754944e-38, %v323_v47 }
  0x98   :  { %v1110_v54 = vpop.eup %829  ;;  %v1112_v55 = vadd.f32 1.0, %v828_v49  ;;  %v238_v56 = vadd.f32 %v1087_v21, %v200_v51  ;;  %vm347_vm3 = vweird.f32 %v1100_v44  ;;  %v1124_v0 = vor.u32 1.1754944e-38, %v353_v52 }
  0x99   :  { %839 = vpow2.f32 %v725_v50  ;;  %v373_v1 = vmul.f32 %v1110_v54, %v1093_v35  ;;  %v724_v5 = vmul.f32 -1.442695, %v239_v60  ;;  %vm1132_vm4 = vcmp.eq.f32.partialorder %v321_v57, 8.507059e+37 }
  0x9a   :  { %v832_v61 = vpop.eup %831  ;;  %v723_v62 = vmul.f32 -1.442695, %v238_v56  ;;  %841 = vrcp.f32 %v1112_v55  ;;  %vm1136_vm5 = vcmp.eq.f32.partialorder %v351_v59, 8.507059e+37  ;;  %vm378_vm6 = vweird.f32 %v1110_v54 }
  0x9b   :  { %v834_v2 = vpop.eup %833  ;;  %v1127_v4 = vadd.f32 1.0, %v832_v61  ;;  %v374_v7 = vsub.f32 1.0, %v373_v1  ;;  %v384_v12 = vor.u32 1.1754944e-38, %v383_v53  ;;  %vm1166_vm10 = vmor %vm377_vm1, %vm378_vm6  ;;  %v396_v33 = vand.u32 2147483647, %v1112_v55 }
  0x9c   :  { %v1129_v8 = vpop.eup %835  ;;  %843 = vpow2.f32 %v723_v62  ;;  %v215_v9 = vpop.xlane.xlu2 %214  ;;  %v313_v10 = vmul.f32 %v834_v2, %v1098_v42  ;;  %vm318_vm7 = vweird.f32 %v834_v2 }
  0x9d   :  { %v838_v14 = vpop.eup %837  ;;  %845 = vrcp.f32 %v1127_v4  ;;  %v243_v16 = vadd.f32 %v1087_v21, %v215_v9  ;;  %v343_v17 = vmul.f32 %v1129_v8, %v1100_v44  ;;  %v375_v20 = vmul.f32 %v1110_v54, %v374_v7  ;;  %v212_v13 = vpop.xlane.xlu1 %211  ;;  %vm1175_vm11 = vmor %vm317_vm2, %vm318_vm7 }
  0x9e   :  { %v1149_v6 = vadd.f32 1.0, %v838_v14  ;;  %v314_v19 = vsub.f32 1.0, %v313_v10  ;;  %847 = vpow2.f32 %v724_v5  ;;  %vm348_vm9 = vweird.f32 %v1129_v8 }
  0x9f   :  { %v840_v15 = vpop.eup %839  ;;  %v728_v22 = vmul.f32 -1.442695, %v243_v16  ;;  %v209_v23 = vpop.xlane.xlu0 %208  ;;  %v344_v24 = vsub.f32 1.0, %v343_v17  ;;  %v336_v25 = vand.u32 2147483647, %v1127_v4  ;;  %v376_v30 = vadd.f32 %v1110_v54, %v375_v20  ;;  %vm1187_vm13 = vmor %vm347_vm3, %vm348_vm9 }
  0xa0   :  { %v1154_v26 = vadd.f32 1.0, %v840_v15  ;;  %849 = vrcp.f32 %v1149_v6  ;;  %v241_v27 = vadd.f32 %v1087_v21, %v209_v23  ;;  %v315_v32 = vmul.f32 %v834_v2, %v314_v19  ;;  %v1158_v28 = vpop.eup %841 }
  0xa1   :  { %851 = vpow2.f32 %v728_v22  ;;  %v345_v29 = vmul.f32 %v1129_v8, %v344_v24  ;;  %vm332_vm12 = vweird.f32 %v1127_v4  ;;  %v380_v42 = vsel %vm1166_vm10, %v1110_v54, %v376_v30 }
  0xa2   :  { %v844_v34 = vpop.eup %843  ;;  %853 = vrcp.f32 %v1154_v26  ;;  %v726_v36 = vmul.f32 -1.442695, %v241_v27  ;;  %v316_v37 = vadd.f32 %v834_v2, %v315_v32  ;;  %v242_v43 = vadd.f32 %v1087_v21, %v212_v13 }
  0xa3   :  { %v846_v35 = vpop.eup %845  ;;  %v1180_v39 = vadd.f32 1.0, %v844_v34  ;;  %v346_v40 = vadd.f32 %v1129_v8, %v345_v29  ;;  %vm1198_vm14 = vcmp.eq.f32.partialorder %v336_v25, 8.507059e+37  ;;  %v385_v54 = vsel %vm1145_vm8, %v384_v12, %v380_v42 }
  0xa4   :  { %v848_v45 = vpop.eup %847  ;;  %855 = vpow2.f32 %v726_v36  ;;  %v320_v46 = vsel %vm1175_vm11, %v834_v2, %v316_v37  ;;  %v224_v47 = vpop.xlane.xlu2 %223  ;;  %v328_v48 = vmul.f32 %v846_v35, %v1127_v4  ;;  %v338_v57 = vand.u32 2147483648, %v1127_v4 }
  0xa5   :  { %857 = vrcp.f32 %v1180_v39  ;;  %v325_v49 = vsel %vm1132_vm4, %v1121_v63, %v320_v46  ;;  %v246_v50 = vadd.f32 %v1087_v21, %v224_v47  ;;  %v1207_v51 = vadd.f32 1.0, %v848_v45  ;;  %v221_v20 = vpop.xlane.xlu1 %220 }
  0xa6   :  { %v1209_v52 = vpop.eup %849  ;;  %586 = vperm.xlu1 %812, %v325_v49   ;;  %v350_v53 = vsel %vm1187_vm13, %v1129_v8, %v346_v40  ;;  %v329_v56 = vsub.f32 1.0, %v328_v48  ;;  %vm333_vm15 = vweird.f32 %v846_v35  ;;  %v727_v61 = vmul.f32 -1.442695, %v242_v43 }
  0xa7   :  { %v852_v58 = vpop.eup %851  ;;  %v731_v59 = vmul.f32 -1.442695, %v246_v50  ;;  %v218_v60 = vpop.xlane.xlu0 %217  ;;  %v355_v1 = vsel %vm1136_vm5, %v1124_v0, %v350_v53  ;;  %859 = vrcp.f32 %v1207_v51  ;;  %v358_v5 = vmul.f32 %v1209_v52, %v1149_v6  ;;  %vm334_vm2 = vmor %vm332_vm12, %vm333_vm15 }
  0xa8   :  { %v1220_v62 = vpop.eup %853  ;;  %v244_v63 = vadd.f32 %v1087_v21, %v218_v60  ;;  %596 = vperm.xlu0 %814, %v355_v1   ;;  %v330_v2 = vmul.f32 %v846_v35, %v329_v56  ;;  %v1226_v7 = vadd.f32 1.0, %v852_v58  ;;  %vm362_vm0 = vweird.f32 %v1149_v6 }
  0xa9   :  { %861 = vpow2.f32 %v731_v59  ;;  %v366_v0 = vand.u32 2147483647, %v1149_v6  ;;  %v359_v11 = vsub.f32 1.0, %v358_v5  ;;  %vm363_vm1 = vweird.f32 %v1209_v52 }
  0xaa   :  { %v856_v8 = vpop.eup %855  ;;  %v729_v9 = vmul.f32 -1.442695, %v244_v63  ;;  %v331_v10 = vadd.f32 %v846_v35, %v330_v2  ;;  %v339_v14 = vor.u32 1.1754944e-38, %v338_v57  ;;  %863 = vpow2.f32 %v727_v61  ;;  %vm1244_vm3 = vmor %vm362_vm0, %vm363_vm1 }
  0xab   :  { %v858_v3 = vpop.eup %857  ;;  %v1231_v12 = vadd.f32 1.0, %v856_v8  ;;  %v368_v16 = vand.u32 2147483648, %v1149_v6  ;;  %v360_v18 = vmul.f32 %v1209_v52, %v359_v11  ;;  %vm1248_vm4 = vcmp.eq.f32.partialorder %v366_v0, 8.507059e+37 }
  0xac   :  { %865 = vpow2.f32 %v729_v9  ;;  %v335_v17 = vsel %vm334_vm2, %v846_v35, %v331_v10  ;;  %v403_v19 = vmul.f32 %v858_v3, %v1180_v39  ;;  %vm392_vm5 = vweird.f32 %v1112_v55 }
  0xad   :  { %867 = vrcp.f32 %v1226_v7  ;;  %v340_v15 = vsel %vm1198_vm14, %v339_v14, %v335_v17  ;;  %v369_v23 = vor.u32 1.1754944e-38, %v368_v16  ;;  %v1253_v24 = vpop.eup %859  ;;  %v361_v25 = vadd.f32 %v1209_v52, %v360_v18 }
  0xae   :  { %869 = vrcp.f32 %v1231_v12  ;;  %606 = vperm.xlu1 %812, %v385_v54   ;;  %591 = vperm.xlu2 %813, %v340_v15   ;;  %v404_v6 = vsub.f32 1.0, %v403_v19  ;;  %v411_v27 = vand.u32 2147483647, %v1180_v39  ;;  %vm408_vm6 = vweird.f32 %v858_v3 }
  0xaf   :  { %v862_v32 = vpop.eup %861  ;;  %v227_v13 = vpop.xlane.xlu0 %226  ;;  %v413_v29 = vand.u32 2147483648, %v1180_v39  ;;  %v245_v30 = vadd.f32 %v1087_v21, %v221_v20  ;;  %v388_v31 = vmul.f32 %v1158_v28, %v1112_v55  ;;  %v365_v37 = vsel %vm1244_vm3, %v1209_v52, %v361_v25 }
  0xb0   :  { %v1262_v34 = vadd.f32 1.0, %v862_v32  ;;  %v247_v36 = vadd.f32 %v1087_v21, %v227_v13  ;;  %v405_v38 = vmul.f32 %v858_v3, %v404_v6  ;;  %v864_v35 = vpop.eup %863  ;;  %v370_v40 = vsel %vm1248_vm4, %v369_v23, %v365_v37 }
  0xb1   :  { %vm407_vm7 = vweird.f32 %v1180_v39  ;;  %vm1271_vm8 = vcmp.eq.f32.partialorder %v411_v27, 8.507059e+37  ;;  %v730_v42 = vmul.f32 -1.442695, %v245_v30  ;;  %v1276_v21 = vadd.f32 1.0, %v864_v35 }
  0xb2   :  { %v866_v43 = vpop.eup %865  ;;  %871 = vrcp.f32 %v1262_v34  ;;  %v732_v45 = vmul.f32 -1.442695, %v247_v36  ;;  %v406_v46 = vadd.f32 %v858_v3, %v405_v38  ;;  %vm409_vm9 = vmor %vm407_vm7, %vm408_vm6  ;;  %v414_v44 = vor.u32 1.1754944e-38, %v413_v29 }
  0xb3   :  { %v1278_v47 = vpop.eup %867  ;;  %v1280_v48 = vadd.f32 1.0, %v866_v43  ;;  %873 = vpow2.f32 %v730_v42  ;;  %v389_v39 = vsub.f32 1.0, %v388_v31  ;;  %v398_v52 = vand.u32 2147483648, %v1112_v55  ;;  %v766_v31 = vld [vmem:[%s1560_s1] sm:$0xff]  }
  0xb4   :  { %v1283_v49 = vpop.eup %869  ;;  %875 = vrcp.f32 %v1276_v21  ;;  %v410_v50 = vsel %vm409_vm9, %v858_v3, %v406_v46  ;;  %v433_v53 = vmul.f32 %v1220_v62, %v1154_v26  ;;  %vm393_vm10 = vweird.f32 %v1158_v28 }
  0xb5   :  { %877 = vrcp.f32 %v1280_v48  ;;  %v415_v54 = vsel %vm1271_vm8, %v414_v44, %v410_v50  ;;  %v390_v56 = vmul.f32 %v1158_v28, %v389_v39  ;;  %vm1296_vm11 = vcmp.eq.f32.partialorder %v396_v33, 8.507059e+37  ;;  %vm1310_vm13 = vmor %vm392_vm5, %vm393_vm10 }
  0xb6   :  { %879 = vpow2.f32 %v732_v45  ;;  %601 = vperm.xlu2 %813, %v370_v40   ;;  %616 = vperm.xlu1 %812, %v415_v54   ;;  %v434_v58 = vsub.f32 1.0, %v433_v53  ;;  %vm437_vm12 = vweird.f32 %v1154_v26  ;;  %v441_v60 = vand.u32 2147483647, %v1154_v26 }
  0xb7   :  { %v391_v59 = vadd.f32 %v1158_v28, %v390_v56  ;;  %v443_v1 = vand.u32 2147483648, %v1154_v26  ;;  %v448_v61 = vmul.f32 %v1283_v49, %v1231_v12  ;;  %v399_v2 = vor.u32 1.1754944e-38, %v398_v52 }
  0xb8   :  { %v1306_v63 = vpop.eup %871  ;;  %v435_v5 = vmul.f32 %v1220_v62, %v434_v58  ;;  %vm438_vm14 = vweird.f32 %v1220_v62  ;;  %vm452_vm15 = vweird.f32 %v1231_v12  ;;  %vm453_vm0 = vweird.f32 %v1283_v49 }
  0xb9   :  { %v874_v0 = vpop.eup %873  ;;  %v395_v8 = vsel %vm1310_vm13, %v1158_v28, %v391_v59  ;;  %v449_v9 = vsub.f32 1.0, %v448_v61  ;;  %v456_v55 = vand.u32 2147483647, %v1231_v12  ;;  %vm442_vm1 = vcmp.eq.f32.partialorder %v441_v60, 8.507059e+37  ;;  %vm439_vm2 = vmor %vm437_vm12, %vm438_vm14 }
  0xba   :  { %v1322_v10 = vpop.eup %875  ;;  %v1324_v11 = vadd.f32 1.0, %v874_v0  ;;  %v436_v3 = vadd.f32 %v1220_v62, %v435_v5  ;;  %v444_v14 = vor.u32 1.1754944e-38, %v443_v1  ;;  %v400_v17 = vsel %vm1296_vm11, %v399_v2, %v395_v8  ;;  %vm454_vm5 = vmor %vm452_vm15, %vm453_vm0 }
  0xbb   :  { %v1327_v16 = vpop.eup %877  ;;  %v450_v28 = vmul.f32 %v1283_v49, %v449_v9  ;;  %v458_v18 = vand.u32 2147483648, %v1231_v12  ;;  %v418_v19 = vmul.f32 %v1253_v24, %v1207_v51  ;;  %vm422_vm3 = vweird.f32 %v1207_v51 }
  0xbc   :  { %v880_v20 = vpop.eup %879  ;;  %881 = vrcp.f32 %v1324_v11  ;;  %v440_v15 = vsel %vm439_vm2, %v1220_v62, %v436_v3  ;;  %v426_v4 = vand.u32 2147483647, %v1207_v51  ;;  %vm423_vm4 = vweird.f32 %v1253_v24 }
  0xbd   :  { %v1341_v22 = vadd.f32 1.0, %v880_v20  ;;  %v445_v26 = vsel %vm442_vm1, %v444_v14, %v440_v15  ;;  %v451_v23 = vadd.f32 %v1283_v49, %v450_v28  ;;  %v459_v25 = vor.u32 1.1754944e-38, %v458_v18  ;;  %vm1364_vm9 = vmor %vm422_vm3, %vm423_vm4 }
  0xbe   :  { %611 = vperm.xlu2 %813, %v400_v17   ;;  %626 = vperm.xlu1 %812, %v445_v26   ;;  %v419_v62 = vsub.f32 1.0, %v418_v19  ;;  %v428_v6 = vand.u32 2147483648, %v1207_v51  ;;  %v478_v27 = vmul.f32 %v1278_v47, %v1226_v7  ;;  %vm457_vm6 = vcmp.eq.f32.partialorder %v456_v55, 8.507059e+37  ;;  %v805_v51 = vld [vmem:[%s1560_s1 + $0x10] sm:$0xff]  }
  0xbf   :  { %883 = vrcp.f32 %v1341_v22  ;;  %v455_v32 = vsel %vm454_vm5, %v1283_v49, %v451_v23  ;;  %vm1354_vm7 = vcmp.eq.f32.partialorder %v426_v4, 8.507059e+37  ;;  %vm482_vm8 = vweird.f32 %v1226_v7 }
  0xc0   :  { %v460_v29 = vsel %vm457_vm6, %v459_v25, %v455_v32  ;;  %v420_v12 = vmul.f32 %v1253_v24, %v419_v62  ;;  %v479_v30 = vsub.f32 1.0, %v478_v27  ;;  %v429_v36 = vor.u32 1.1754944e-38, %v428_v6 }
  0xc1   :  { %631 = vperm.xlu0 %814, %v460_v29   ;;  %v486_v37 = vand.u32 2147483647, %v1226_v7  ;;  %v488_v38 = vand.u32 2147483648, %v1226_v7  ;;  %v493_v35 = vmul.f32 %v1327_v16, %v1280_v48  ;;  %vm483_vm10 = vweird.f32 %v1278_v47 }
  0xc2   :  { %v1372_v40 = vpop.eup %881  ;;  %v421_v41 = vadd.f32 %v1253_v24, %v420_v12  ;;  %v480_v42 = vmul.f32 %v1278_v47, %v479_v30  ;;  %vm497_vm11 = vweird.f32 %v1280_v48  ;;  %vm498_vm13 = vweird.f32 %v1327_v16  ;;  %vm484_vm14 = vmor %vm482_vm8, %vm483_vm10 }
  0xc3   :  { %vm1378_vm12 = vcmp.eq.f32.partialorder %v486_v37, 8.507059e+37  ;;  %v494_v43 = vsub.f32 1.0, %v493_v35  ;;  %v501_v45 = vand.u32 2147483647, %v1280_v48  ;;  %v503_v39 = vand.u32 2147483648, %v1280_v48  ;;  %vm499_vm1 = vmor %vm497_vm11, %vm498_vm13 }
  0xc4   :  { %v425_v46 = vsel %vm1364_vm9, %v1253_v24, %v421_v41  ;;  %v481_v44 = vadd.f32 %v1278_v47, %v480_v42  ;;  %v463_v49 = vmul.f32 %v1322_v10, %v1276_v21  ;;  %v489_v53 = vor.u32 1.1754944e-38, %v488_v38 }
  0xc5   :  { %v1391_v50 = vpop.eup %883  ;;  %v430_v52 = vsel %vm1354_vm7, %v429_v36, %v425_v46  ;;  %v495_v54 = vmul.f32 %v1327_v16, %v494_v43  ;;  %vm467_vm15 = vweird.f32 %v1276_v21  ;;  %vm468_vm0 = vweird.f32 %v1322_v10 }
  0xc6   :  { %621 = vperm.xlu2 %813, %v430_v52   ;;  %v485_v24 = vsel %vm484_vm14, %v1278_v47, %v481_v44  ;;  %v464_v56 = vsub.f32 1.0, %v463_v49  ;;  %v471_v57 = vand.u32 2147483647, %v1276_v21  ;;  %v473_v7 = vand.u32 2147483648, %v1276_v21  ;;  %vm1420_vm4 = vmor %vm467_vm15, %vm468_vm0 }
  0xc7   :  { %v490_v58 = vsel %vm1378_vm12, %v489_v53, %v485_v24  ;;  %v496_v59 = vadd.f32 %v1327_v16, %v495_v54  ;;  %v523_v60 = vmul.f32 %v1306_v63, %v1262_v34  ;;  %vm502_vm2 = vcmp.eq.f32.partialorder %v501_v45, 8.507059e+37  ;;  %v806_v54 = vld [vmem:[%s1560_s1 + $0x18] sm:$0xff]  }
  0xc8   :  { %641 = vperm.xlu1 %812, %v490_v58   ;;  %v504_v47 = vor.u32 1.1754944e-38, %v503_v39  ;;  %v465_v1 = vmul.f32 %v1322_v10, %v464_v56  ;;  %vm1413_vm3 = vcmp.eq.f32.partialorder %v471_v57, 8.507059e+37  ;;  %v474_v5 = vor.u32 1.1754944e-38, %v473_v7 }
  0xc9   :  { %v500_v33 = vsel %vm499_vm1, %v1327_v16, %v496_v59  ;;  %v524_v0 = vsub.f32 1.0, %v523_v60  ;;  %v531_v48 = vand.u32 2147483647, %v1262_v34  ;;  %v533_v55 = vand.u32 2147483648, %v1262_v34 }
  0xca   :  { %v505_v8 = vsel %vm502_vm2, %v504_v47, %v500_v33  ;;  %v466_v9 = vadd.f32 %v1322_v10, %v465_v1  ;;  %v538_v3 = vmul.f32 %v1391_v50, %v1341_v22  ;;  %vm527_vm5 = vweird.f32 %v1262_v34  ;;  %v808_v33 = vld [vmem:[%s1560_s1 + $0x28] sm:$0xff]  }
  0xcb   :  { %646 = vperm.xlu0 %814, %v505_v8   ;;  %v525_v14 = vmul.f32 %v1306_v63, %v524_v0  ;;  %vm528_vm6 = vweird.f32 %v1306_v63  ;;  %vm1435_vm7 = vcmp.eq.f32.partialorder %v531_v48, 8.507059e+37  ;;  %vm543_vm8 = vweird.f32 %v1391_v50 }
  0xcc   :  { %v470_v21 = vsel %vm1420_vm4, %v1322_v10, %v466_v9  ;;  %v539_v17 = vsub.f32 1.0, %v538_v3  ;;  %v548_v34 = vand.u32 2147483648, %v1341_v22  ;;  %v508_v19 = vmul.f32 %v1372_v40, %v1324_v11  ;;  %vm529_vm9 = vmor %vm527_vm5, %vm528_vm6 }
  0xcd   :  { %v475_v28 = vsel %vm1413_vm3, %v474_v5, %v470_v21  ;;  %v526_v18 = vadd.f32 %v1306_v63, %v525_v14  ;;  %v534_v10 = vor.u32 1.1754944e-38, %v533_v55  ;;  %v546_v15 = vand.u32 2147483647, %v1341_v22  ;;  %v807_v14 = vld [vmem:[%s1560_s1 + $0x20] sm:$0xff]  }
  0xce   :  { %636 = vperm.xlu2 %813, %v475_v28   ;;  %v540_v20 = vmul.f32 %v1391_v50, %v539_v17  ;;  %vm512_vm10 = vweird.f32 %v1324_v11  ;;  %v509_v26 = vsub.f32 1.0, %v508_v19  ;;  %vm513_vm11 = vweird.f32 %v1372_v40  ;;  %v809_v17 = vld [vmem:[%s1560_s1 + $0x30] sm:$0xff]  }
  0xcf   :  { %v530_v4 = vsel %vm529_vm9, %v1306_v63, %v526_v18  ;;  %v516_v23 = vand.u32 2147483647, %v1324_v11  ;;  %vm542_vm12 = vweird.f32 %v1341_v22  ;;  %v518_v6 = vand.u32 2147483648, %v1324_v11  ;;  %vm514_vm15 = vmor %vm512_vm10, %vm513_vm11  ;;  %v804_v11 = vld [vmem:[%s1560_s1 + $0x8] sm:$0xff]  }
  0xd0   :  { %v535_v25 = vsel %vm1435_vm7, %v534_v10, %v530_v4  ;;  %v541_v62 = vadd.f32 %v1391_v50, %v540_v20  ;;  %vm544_vm13 = vmor %vm542_vm12, %vm543_vm8  ;;  %v549_v27 = vor.u32 1.1754944e-38, %v548_v34  ;;  %v510_v63 = vmul.f32 %v1372_v40, %v509_v26 }
  0xd1   :  { %656 = vperm.xlu1 %812, %v535_v25   ;;  %vm547_vm14 = vcmp.eq.f32.partialorder %v546_v15, 8.507059e+37  ;;  %v519_v13 = vor.u32 1.1754944e-38, %v518_v6  ;;  %vm517_vm0 = vcmp.eq.f32.partialorder %v516_v23, 8.507059e+37  ;;  %v768_v36 = vunpack.c.h.bf16 %v766_v31 }
  0xd2   :  { %v545_v32 = vsel %vm544_vm13, %v1391_v50, %v541_v62  ;;  %v511_v12 = vadd.f32 %v1372_v40, %v510_v63  ;;  %vm696_vm1 = vcmask 257024   ;;  %v767_v45 = vunpack.c.l.bf16 %v766_v31 }
  0xd3   :  { %v550_v29 = vsel %vm547_vm14, %v549_v27, %v545_v32  ;;  %v776_v46 = vunpack.c.h.bf16 %v805_v51  ;;  %v771_v44 = vunpack.c.l.bf16 %v804_v11  ;;  %v775_v59 = vunpack.c.l.bf16 %v805_v51 }
  0xd4   :  { %661 = vperm.xlu0 %814, %v550_v29   ;;  %v515_v22 = vsel %vm514_vm15, %v1372_v40, %v511_v12  ;;  %v772_v40 = vunpack.c.h.bf16 %v804_v11  ;;  %v780_v7 = vunpack.c.h.bf16 %v806_v54  ;;  %v787_v0 = vunpack.c.l.bf16 %v808_v33  ;;  %v810_v12 = vld [vmem:[%s1560_s1 + $0x38] sm:$0xff]  }
  0xd5   :  { %v520_v30 = vsel %vm517_vm0, %v519_v13, %v515_v22  ;;  %v779_v48 = vunpack.c.l.bf16 %v806_v54  ;;  %v783_v28 = vunpack.c.l.bf16 %v807_v14  ;;  %v792_v18 = vunpack.c.h.bf16 %v809_v17 }
  0xd6   :  { %651 = vperm.xlu2 %813, %v520_v30   ;;  %v784_v19 = vunpack.c.h.bf16 %v807_v14  ;;  %v788_v6 = vunpack.c.h.bf16 %v808_v33  ;;  %v791_v63 = vunpack.c.l.bf16 %v809_v17  ;;  %v795_v31 = vunpack.c.l.bf16 %v810_v12 }
 0x108   :  { %v592_v37 = vpop.permute.xlu2 %591 }
 0x109   :  { %v665_v38 = vmul.f32 %v768_v36, %v592_v37  ;;  %v796_v37 = vunpack.c.h.bf16 %v810_v12 }
 0x10b   :  { %v681_v35 = vpack.c.bf16 %v665_v38, %v665_v38 }
 0x10d   :  { %698 = vst.msk [vmem:[%s1561_s8 + $0x4] sm:$0xf] %vm696_vm1, %v681_v35 }
 0x110   :  { %v602_v41 = vpop.permute.xlu2 %601 }
 0x111   :  { %v667_v42 = vmul.f32 %v772_v40, %v602_v41 }
 0x113   :  { %v683_v43 = vpack.c.bf16 %v667_v42, %v667_v42 }
 0x115   :  { %700 = vst.msk [vmem:[%s1561_s8 + $0xc] sm:$0xf] %vm696_vm1, %v683_v43 }
 0x118   :  { %v587_v39 = vpop.permute.xlu1 %586  ;;  %v612_v49 = vpop.permute.xlu2 %611 }
 0x119   :  { %v664_v50 = vmul.f32 %v767_v45, %v587_v39  ;;  %v669_v52 = vmul.f32 %v776_v46, %v612_v49 }
 0x11a   :  { %v597_v53 = vpop.permute.xlu0 %596 }
 0x11b   :  { %v680_v24 = vpack.c.bf16 %v664_v50, %v664_v50  ;;  %v685_v56 = vpack.c.bf16 %v669_v52, %v669_v52  ;;  %v666_v57 = vmul.f32 %v771_v44, %v597_v53 }
 0x11d   :  { %697 = vst.msk [vmem:[%s1561_s8] sm:$0xf] %vm696_vm1, %v680_v24  ;;  %v682_v58 = vpack.c.bf16 %v666_v57, %v666_v57 }
 0x11e   :  { %702 = vst.msk [vmem:[%s1561_s8 + $0x14] sm:$0xf] %vm696_vm1, %v685_v56 }
 0x11f   :  { %699 = vst.msk [vmem:[%s1561_s8 + $0x8] sm:$0xf] %vm696_vm1, %v682_v58 }
 0x120   :  { %v607_v60 = vpop.permute.xlu1 %606  ;;  %v622_v47 = vpop.permute.xlu2 %621 }
 0x121   :  { %v668_v1 = vmul.f32 %v775_v59, %v607_v60  ;;  %v671_v61 = vmul.f32 %v780_v7, %v622_v47 }
 0x123   :  { %v684_v2 = vpack.c.bf16 %v668_v1, %v668_v1  ;;  %v687_v5 = vpack.c.bf16 %v671_v61, %v671_v61 }
 0x125   :  { %701 = vst.msk [vmem:[%s1561_s8 + $0x10] sm:$0xf] %vm696_vm1, %v684_v2 }
 0x126   :  { %704 = vst.msk [vmem:[%s1561_s8 + $0x1c] sm:$0xf] %vm696_vm1, %v687_v5 }
 0x128   :  { %v637_v8 = vpop.permute.xlu2 %636  ;;  %v617_v9 = vpop.permute.xlu1 %616 }
 0x129   :  { %v674_v55 = vmul.f32 %v787_v0, %v637_v8  ;;  %v670_v3 = vmul.f32 %v779_v48, %v617_v9 }
 0x12b   :  { %v690_v21 = vpack.c.bf16 %v674_v55, %v674_v55  ;;  %v686_v16 = vpack.c.bf16 %v670_v3, %v670_v3 }
 0x12d   :  { %707 = vst.msk [vmem:[%s1561_s8 + $0x28] sm:$0xf] %vm696_vm1, %v690_v21 }
 0x12e   :  { %703 = vst.msk [vmem:[%s1561_s8 + $0x18] sm:$0xf] %vm696_vm1, %v686_v16 }
 0x130   :  { %v627_v34 = vpop.permute.xlu1 %626  ;;  %v652_v10 = vpop.permute.xlu2 %651 }
 0x131   :  { %v672_v20 = vmul.f32 %v783_v28, %v627_v34  ;;  %v677_v15 = vmul.f32 %v792_v18, %v652_v10 }
 0x133   :  { %v688_v4 = vpack.c.bf16 %v672_v20, %v672_v20  ;;  %v632_v26 = vpop.permute.xlu0 %631  ;;  %v693_v23 = vpack.c.bf16 %v677_v15, %v677_v15 }
 0x134   :  { %v673_v25 = vmul.f32 %v784_v19, %v632_v26 }
 0x135   :  { %705 = vst.msk [vmem:[%s1561_s8 + $0x20] sm:$0xf] %vm696_vm1, %v688_v4 }
 0x136   :  { %710 = vst.msk [vmem:[%s1561_s8 + $0x34] sm:$0xf] %vm696_vm1, %v693_v23  ;;  %v689_v62 = vpack.c.bf16 %v673_v25, %v673_v25 }
 0x138   :  { %706 = vst.msk [vmem:[%s1561_s8 + $0x24] sm:$0xf] %vm696_vm1, %v689_v62 }
 0x13a   :  { %v642_v27 = vpop.permute.xlu1 %641 }
 0x13b   :  { %v675_v32 = vmul.f32 %v788_v6, %v642_v27 }
 0x13d   :  { %v691_v13 = vpack.c.bf16 %v675_v32, %v675_v32  ;;  %v647_v29 = vpop.permute.xlu0 %646 }
 0x13e   :  { %v676_v22 = vmul.f32 %v791_v63, %v647_v29 }
 0x13f   :  { %708 = vst.msk [vmem:[%s1561_s8 + $0x2c] sm:$0xf] %vm696_vm1, %v691_v13 }
 0x140   :  { %v692_v30 = vpack.c.bf16 %v676_v22, %v676_v22 }
 0x142   :  { %709 = vst.msk [vmem:[%s1561_s8 + $0x30] sm:$0xf] %vm696_vm1, %v692_v30 }
 0x143   :  { %v657_v36 = vpop.permute.xlu1 %656 }
 0x144   :  { %v678_v38 = vmul.f32 %v795_v31, %v657_v36 }
 0x146   :  { %v694_v11 = vpack.c.bf16 %v678_v38, %v678_v38  ;;  %v662_v35 = vpop.permute.xlu0 %661 }
 0x147   :  { %v679_v40 = vmul.f32 %v796_v37, %v662_v35 }
 0x148   :  { %711 = vst.msk [vmem:[%s1561_s8 + $0x38] sm:$0xf] %vm696_vm1, %v694_v11 }
 0x149   :  { %v695_v41 = vpack.c.bf16 %v679_v40, %v679_v40 }
 0x14b   :  { %712 = vst.msk [vmem:[%s1561_s8 + $0x3c] sm:$0xf] %vm696_vm1, %v695_v41 }

// kernel: tile.18
= control target key start
LH: loop header
LB: loop body
LE: loop exit
PB: predicated region body
PF: predicated region fallthrough
CT: control target
= control target key end

     0   :  { %s22_s0 = inlined_call_operand.vmem [shape: f32[16], index: 0, kind: input, shape index: {}]   ;;  %s23_s1 = inlined_call_operand.vmem [shape: f32[2,16], index: 1, kind: output, shape index: {}]  }
   0x1   :  { %v4_v0 = vld [vmem:[%s22_s0] ss:$0 sm:$0xff] }
   0x2   :  { %5 = vst [vmem:[%s23_s1] sm:$0x3] %v4_v0 }

// kernel: tile.19
= control target key start
LH: loop header
LB: loop body
LE: loop exit
PB: predicated region body
PF: predicated region fallthrough
CT: control target
= control target key end

     0   :  { %vm7_vm0 = vcmask 130048   ;;  %vm13_vm1 = vcmask 261248   ;;  %s39_s0 = inlined_call_operand.vmem [shape: f32[2,16], index: 0, kind: input, shape index: {}]   ;;  %s40_s1 = inlined_call_operand.vmem [shape: f32[1,32], index: 1, kind: output, shape index: {}]  }
   0x1   :  { %v4_v0 = vld [vmem:[%s39_s0] sm:$0x3]  ;;  %s22_s0 = smov 16  }
   0x2   :  { %5 = vst [vmem:[#allocation1] sm:$0x3] %v4_v0 }
   0x9   :  { %v10_v1 = vld [vmem:[#allocation1 + $0x1] sm:$0x1]   ;;  %v6_v2 = vld [vmem:[#allocation1] sm:$0x1]  }
   0xa   :  { %11 = vrot.lane.b32.xlu0 %v10_v1, %s22_s0  ;;  %8 = vst.msk [vmem:[#allocation0] sm:$0x1] %vm7_vm0, %v6_v2  }
  0x7c   :  { %v12_v3 = vpop.permute.xlu0 %11  }
  0x7d   :  { %14 = vst.msk [vmem:[#allocation0] sm:$0x1] %vm13_vm1, %v12_v3  }
  0x84   :  { %v17_v4 = vld [vmem:[#allocation0] sm:$0x1] }
  0x85   :  { %20 = vst [vmem:[%s40_s1] sm:$0x1] %v17_v4 }

// kernel: attention_unet_forward.44
= control target key start
LH: loop header
LB: loop body
LE: loop exit
PB: predicated region body
PF: predicated region fallthrough
CT: control target
= control target key end

     0   :  { %s538_s15 = smov 0   ;;  %s540_s16 = smov 0   ;;  %s604_s0 = inlined_call_operand.vmem [shape: bf16[2,8,8,32], index: 0, kind: input, shape index: {}]   ;;  %s605_s1 = inlined_call_operand.vmem [shape: bf16[32,32], index: 1, kind: input, shape index: {}]   ;;  %s606_s2 = inlined_call_operand.vmem [shape: bf16[32,32], index: 2, kind: input, shape index: {}]   ;;  %s607_s3 = inlined_call_operand.vmem [shape: f32[1,32], index: 3, kind: input, shape index: {}]   ;;  %s608_s4 = inlined_call_operand.vmem [shape: bf16[2,8,2,8,32], index: 4, kind: output, shape index: {}]  }
   0x1   :  { %s542_s17 = smov 0   ;;  %s544_s18 = smov 0  }
   0x2   :  { %s546_s19 = smov 0  }
   0x3 LB: > { %s23_s20 = sadd.s32 1, %s503_s17  ;;  %s26_s21 = sadd.s32 1, %s507_s18  ;;  %s511_s19 = sphi %s546_s19, %s14_s19   ;;  %s507_s18 = sphi %s544_s18, %s612_s18   ;;  %s503_s17 = sphi %s542_s17, %s611_s17   ;;  %s499_s16 = sphi %s540_s16, %s610_s16   ;;  %s495_s15 = sphi %s538_s15, %s609_s15  }
   0x4   : > { %p24_p0 = scmp.ge.s32.totalorder %s23_s20, 8  ;;  %p401_p1 = scmp.ge.s32.totalorder %s511_s19, 1 }
   0x5   : > { %p181_p2 = scmp.lt.s32.totalorder %s511_s19, 17 }
   0x6   : > { %s614_s20 = smov (%p24_p0, %s23_s20), 0  ;;  %s616_s21 = smov (!%p24_p0, %s26_s21), %s507_s18 }
   0x7   : > { %p182_p3 = pnand %p401_p1, %p181_p2  ;;  %p28_p4 = scmp.ge.s32.totalorder %s616_s21, 2 }
   0x8   : > { %p214_p5 = scmp.lt.s32.totalorder (!%p182_p3), %s499_s16, 1  ;;  %p216_p6 = scmp.lt.s32.totalorder (!%p182_p3), %s495_s15, 7 }
   0x9   : > { %s618_s21 = smov (%p28_p4, %s616_s21), 0  ;;  %185 = sbr.rel (%p182_p3) target bundleno = 157 (0x9d), region = 36 }
   0xe   : > { %v429_v0 = vld [vmem:[%s605_s1 + $0x8] sm:$0xff]  ;;  %v428_v2 = vld [vmem:[%s605_s1] sm:$0xff]  ;;  %s620_s16 = smov (!%p214_p5, %s499_s16), 1  ;;  %s622_s15 = smov (!%p216_p6, %s495_s15), 7  ;;  %vm253_vm0 = vcmask 261120   ;;  %vm300_vm1 = vcmask 257024  }
   0xf   : > { %v431_v1 = vld [vmem:[%s606_s2 + $0x8] sm:$0xff]  ;;  %263 = vmatpush.bf16.msra.mxu0 %v429_v0  ;;  %v430_v3 = vld [vmem:[%s606_s2] sm:$0xff]  ;;  %s402_s30 = sshll.u32 %s620_s16, 3  ;;  %s405_s5 = sshll.u32 %s620_s16, 4 }
  0x10   : > { %292 = vmatpush.bf16.msra.mxu1 %v431_v1  ;;  %s219_s6 = sadd.s32 %s402_s30, %s622_s15  ;;  %s404_s7 = sshll.u32 %s622_s15, 1  ;;  %v472_v5 = vld [vmem:[%s607_s3] ss:$0 sm:$0xff] }
  0x11   : > { %s403_s8 = sshll.u32 %s219_s6, 2  ;;  %s228_s9 = sadd.s32 %s405_s5, %s404_s7 }
  0x12   : > { %s221_s12 = scalar_lea.vmem %s604_s0, %s403_s8  ;;  %s406_s22 = sshll.u32 %s228_s9, 2 }
  0x13   : > { %264 = vmatpush.bf16.msra.mxu0 %v428_v2  ;;  %v232_v4 = vld [vmem:[%s221_s12] sm:$0xf]  ;;  %s230_s23 = scalar_lea.vmem %s608_s4, %s406_s22 }
  0x14   : > { %293 = vmatpush.bf16.msra.mxu1 %v430_v3 }
  0x16   : > { %415 = vmatmul.msk.bf16.vlgmr.msra.gmra.mxu0 %vm253_vm0, %v232_v4 }
  0x17   : > { %424 = vmatmul.msk.bf16.vlgmr.msra.gmra.mxu1 %vm253_vm0, %v232_v4 }
  0x93   : > { %v266_v6 = vpop.f32.mrf.mxu0 }
  0x94   : > { %v295_v7 = vpop.f32.mrf.mxu1  ;;  %v267_v8 = vadd.f32 %v472_v5, %v266_v6 }
  0x95   : > { %v296_v9 = vadd.f32 %v472_v5, %v295_v7 }
  0x96   : > { %v299_v10 = vpack.c.bf16 %v267_v8, %v267_v8 }
  0x97   : > { %v302_v11 = vpack.c.bf16 %v296_v9, %v296_v9 }
  0x98   : > { %301 = vst.msk [vmem:[%s230_s23] sm:$0xf] %vm300_vm1, %v299_v10 }
  0x99   : > { %425 = vst.msk [vmem:[%s230_s23 + $0x4] sm:$0xf] %vm300_vm1, %v302_v11 }
  0x9b   : > { %v268_v12 = vpop.f32.mrf.mxu0 }
  0x9c   : > { %v297_v13 = vpop.f32.mrf.mxu1 }
  0x9d PF: > { %s14_s19 = sadd.s32 1, %s511_s19   ;;  %s609_s15 = smov %s503_s17 }
  0x9e   : > { %p11_p7 = scmp.ge.s32.totalorder %s14_s19, 18   ;;  %s610_s16 = smov %s507_s18 }
  0x9f   : > { %s611_s17 = smov %s614_s20  ;;  %s612_s18 = smov %s618_s21 }
  0xa0   :  { %13 = sbr.rel (!%p11_p7) target bundleno = 3 (0x3), region = 67 }

// kernel: attention_unet_forward.40
= control target key start
LH: loop header
LB: loop body
LE: loop exit
PB: predicated region body
PF: predicated region fallthrough
CT: control target
= control target key end

     0   :  { %s1474_s24 = smov 0   ;;  %s1476_s25 = smov 0   ;;  %s1719_s0 = inlined_call_operand.vmem [shape: bf16[2,10,10,64], index: 0, kind: input, shape index: {}, may-alias: {0,1,2}]   ;;  %s1720_s1 = inlined_call_operand.vmem [shape: bf16[2,10,10,64], index: 1, kind: input, shape index: {}, may-alias: {0,1,2}]   ;;  %s1721_s2 = inlined_call_operand.vmem [shape: bf16[2,10,10,64], index: 2, kind: input, shape index: {}, may-alias: {0,1,2}]   ;;  %s1722_s3 = inlined_call_operand.vmem [shape: bf16[3,3,64,32], index: 3, kind: input, shape index: {}]   ;;  %s1723_s4 = inlined_call_operand.vmem [shape: f32[1,32], index: 4, kind: input, shape index: {}]   ;;  %s1724_s5 = inlined_call_operand.vmem [shape: bf16[2,8,8,32], index: 5, kind: output, shape index: {0}]   ;;  %s1725_s6 = inlined_call_operand.vmem [shape: f32[1,32], index: 6, kind: output, shape index: {1}]   ;;  %s1726_s7 = inlined_call_operand.vmem [shape: f32[1,32], index: 7, kind: output, shape index: {2}]  }
   0x1   :  { %s1478_s26 = smov 0   ;;  %s1480_s27 = smov 0  }
   0x2   :  { %s1482_s28 = smov 0  }
   0x3 LB: > { %s27_s29 = sadd.s32 1, %s1423_s26  ;;  %s30_s30 = sadd.s32 1, %s1427_s27  ;;  %s1431_s28 = sphi %s1482_s28, %s18_s28   ;;  %s1427_s27 = sphi %s1480_s27, %s1733_s27   ;;  %s1423_s26 = sphi %s1478_s26, %s1732_s26   ;;  %s1419_s25 = sphi %s1476_s25, %s1731_s25   ;;  %s1415_s24 = sphi %s1474_s24, %s1730_s24  }
   0x4   : > { %p28_p0 = scmp.ge.s32.totalorder %s27_s29, 8  ;;  %p1071_p1 = scmp.ge.s32.totalorder %s1431_s28, 1 }
   0x5   : > { %p292_p2 = scmp.lt.s32.totalorder %s1431_s28, 17 }
   0x6   : > { %s1735_s29 = smov (%p28_p0, %s27_s29), 0  ;;  %s1737_s30 = smov (!%p28_p0, %s30_s30), %s1427_s27 }
   0x7   : > { %p293_p3 = pnand %p1071_p1, %p292_p2  ;;  %p32_p4 = scmp.ge.s32.totalorder %s1737_s30, 2 }
   0x8   : > { %p351_p5 = scmp.lt.s32.totalorder (!%p293_p3), %s1419_s25, 1  ;;  %p353_p6 = scmp.lt.s32.totalorder (!%p293_p3), %s1415_s24, 9 }
   0x9   : > { %s1739_s30 = smov (%p32_p4, %s1737_s30), 0  ;;  %296 = sbr.rel (%p293_p3) target bundleno = 217 (0xd9), region = 40 }
   0xa   : > { %s360_s16 = sadd.s32 (!%p293_p3), 1, %s1415_s24  ;;  %s371_s12 = sadd.s32 (!%p293_p3), 2, %s1415_s24 }
   0xb   : > { %p1552_p7 = scmp.lt.s32.totalorder (!%p293_p3), %s360_s16, 9  ;;  %p1562_p8 = scmp.lt.s32.totalorder (!%p293_p3), %s371_s12, 9 }
   0xc   : > { %p892_p9 = scmp.eq.s32.totalorder (!%p293_p3), %s1419_s25, 0  ;;  %p893_p10 = scmp.eq.s32.totalorder (!%p293_p3), %s1415_s24, 0 }
   0xd   : > { %p384_p12 = scmp.lt.s32.totalorder (!%p293_p3), %s1415_s24, 7 }
   0xe   : > { %v1321_v0 = vld [vmem:[%s1722_s3 + $0x38] sm:$0xff]  ;;  %v1320_v4 = vld [vmem:[%s1722_s3 + $0x30] sm:$0xff]  ;;  %s1530_s21 = scalar_select %p351_p5, %s1419_s25, 1  ;;  %v1319_v8 = vld [vmem:[%s1722_s3 + $0x28] sm:$0xff]  ;;  %vm450_vm0 = vcmask 523264   ;;  %vm890_vm1 = vcmask 257024  }
   0xf   : > { %v1317_v1 = vld [vmem:[%s1722_s3 + $0x18] sm:$0xff]  ;;  %458 = vmatpush.bf16.msra.mxu0 %v1321_v0  ;;  %v1316_v5 = vld [vmem:[%s1722_s3 + $0x10] sm:$0xff]  ;;  %s354_s10 = scalar_select %p353_p6, %s1415_s24, 9  ;;  %v1315_v9 = vld [vmem:[%s1722_s3 + $0x8] sm:$0xff] }
  0x10   : > { %v1325_v2 = vld [vmem:[%s1722_s3 + $0x58] sm:$0xff]  ;;  %498 = vmatpush.bf16.msra.mxu1 %v1317_v1  ;;  %v1324_v6 = vld [vmem:[%s1722_s3 + $0x50] sm:$0xff]  ;;  %s1540_s11 = smul.u32 20, %s1530_s21  ;;  %v1323_v10 = vld [vmem:[%s1722_s3 + $0x48] sm:$0xff]  ;;  %s1741_s16 = smov (!%p1552_p7, %s360_s16), 9 }
  0x11   : > { %v1329_v3 = vld [vmem:[%s1722_s3 + $0x78] sm:$0xff]  ;;  %548 = vmatpush.bf16.msra.mxu2 %v1325_v2  ;;  %v1328_v7 = vld [vmem:[%s1722_s3 + $0x70] sm:$0xff]  ;;  %s1072_s13 = sshll.u32 %s354_s10, 1  ;;  %v1327_v11 = vld [vmem:[%s1722_s3 + $0x68] sm:$0xff]  ;;  %s1743_s12 = smov (!%p1562_p8, %s371_s12), 9 }
  0x12   : > { %598 = vmatpush.bf16.msra.mxu3 %v1329_v3  ;;  %s357_s19 = sadd.s32 %s1540_s11, %s1072_s13  ;;  %v1318_v14 = vld [vmem:[%s1722_s3 + $0x20] sm:$0xff]  ;;  %v1333_v21 = vld [vmem:[%s1722_s3 + $0x98] sm:$0xff]  ;;  %s1074_s20 = sshll.u32 %s1741_s16, 1  ;;  %v1332_v28 = vld [vmem:[%s1722_s3 + $0x90] sm:$0xff] }
  0x13   : > { %459 = vmatpush.bf16.msra.mxu0 %v1320_v4  ;;  %s1073_s10 = sshll.u32 %s357_s19, 2  ;;  %v1314_v15 = vld [vmem:[%s1722_s3] sm:$0xff]  ;;  %v1341_v22 = vld [vmem:[%s1722_s3 + $0xd8] sm:$0xff]  ;;  %s367_s19 = sadd.s32 %s1540_s11, %s1074_s20  ;;  %v1340_v29 = vld [vmem:[%s1722_s3 + $0xd0] sm:$0xff] }
  0x14   : > { %499 = vmatpush.bf16.msra.mxu1 %v1316_v5  ;;  %s359_s17 = scalar_lea.vmem %s1719_s0, %s1073_s10  ;;  %v1322_v17 = vld [vmem:[%s1722_s3 + $0x40] sm:$0xff]  ;;  %v1345_v23 = vld [vmem:[%s1722_s3 + $0xf8] sm:$0xff]  ;;  %s1076_s10 = sshll.u32 %s1743_s12, 1  ;;  %v1344_v34 = vld [vmem:[%s1722_s3 + $0xf0] sm:$0xff] }
  0x15   : > { %549 = vmatpush.bf16.msra.mxu2 %v1324_v6  ;;  %v1090_v12 = vld [vmem:[%s359_s17] sm:$0xf]  ;;  %v1311_v13 = vld [vmem:[%s359_s17] sm:$0x10]  ;;  %s1075_s13 = sshll.u32 %s367_s19, 2  ;;  %s378_s14 = sadd.s32 %s1540_s11, %s1076_s10  ;;  %v1337_v27 = vld [vmem:[%s1722_s3 + $0xb8] sm:$0xff] }
  0x16   : > { %599 = vmatpush.bf16.msra.mxu3 %v1328_v7  ;;  %v1091_v16 = vor.u32 %v1311_v13, %v1090_v12  ;;  %v1326_v18 = vld [vmem:[%s1722_s3 + $0x60] sm:$0xff]  ;;  %s369_s18 = scalar_lea.vmem %s1720_s1, %s1075_s13  ;;  %v1336_v38 = vld [vmem:[%s1722_s3 + $0xb0] sm:$0xff]  ;;  %v1331_v40 = vld [vmem:[%s1722_s3 + $0x88] sm:$0xff]  ;;  %p1671_p11 = pnand %p893_p10, %p892_p9 }
  0x17   : > { %460 = vmatpush.bf16.msra.mxu0 %v1319_v8  ;;  %v391_v25 = vld [vmem:[%s359_s17] sm:$0xf]  ;;  %s1077_s17 = sshll.u32 %s378_s14, 2  ;;  %v1312_v33 = vld [vmem:[%s369_s18] sm:$0x10]  ;;  %v1339_v41 = vld [vmem:[%s1722_s3 + $0xc8] sm:$0xff] }
  0x18   : > { %500 = vmatpush.bf16.msra.mxu1 %v1315_v9  ;;  %v420_v19 = vshrl.u32 %v1091_v16, 16  ;;  %v422_v20 = vshll.u32 %v1091_v16, 16  ;;  %v516_v26 = vrot.slane %v1091_v16, 1  ;;  %v393_v31 = vld [vmem:[%s369_s18] sm:$0xf]  ;;  %s1613_s10 = scalar_lea.vmem %s1721_s2, %s1077_s17  ;;  %v1343_v42 = vld [vmem:[%s1722_s3 + $0xe8] sm:$0xff] }
  0x19   : > { %550 = vmatpush.bf16.msra.mxu2 %v1323_v10  ;;  %v1186_v32 = vld [vmem:[%s369_s18] sm:$0xf]  ;;  %v1313_v36 = vld [vmem:[%s1613_s10] sm:$0x10]  ;;  %v1335_v44 = vld [vmem:[%s1722_s3 + $0xa8] sm:$0xff]  ;;  %s1745_s24 = smov (!%p384_p12, %s1415_s24), 7 }
  0x1a   : > { %600 = vmatpush.bf16.msra.mxu3 %v1327_v11  ;;  %v424_v24 = vrot.slane %v422_v20, 1  ;;  %v1265_v35 = vld [vmem:[%s1613_s10] sm:$0xf]  ;;  %v1187_v37 = vor.u32 %v1312_v33, %v1186_v32  ;;  %v1349_v49 = vld [vmem:[%s1722_s3 + $0x118] sm:$0xff]  ;;  %v1348_v55 = vld [vmem:[%s1722_s3 + $0x110] sm:$0xff]  ;;  %s1078_s25 = sshll.u32 %s1530_s21, 3 }
  0x1b   : > { %461 = vmatpush.bf16.msra.mxu0 %v1318_v14  ;;  %v1266_v39 = vor.u32 %v1313_v36, %v1265_v35  ;;  %v1330_v46 = vld [vmem:[%s1722_s3 + $0x80] sm:$0xff]  ;;  %v1347_v60 = vld [vmem:[%s1722_s3 + $0x108] sm:$0xff]  ;;  %s387_s13 = sadd.s32 %s1078_s25, %s1745_s24 }
  0x1c   : > { %501 = vmatpush.bf16.msra.mxu1 %v1314_v15  ;;  %v425_v30 = vor.u32 %v424_v24, %v420_v19  ;;  %v625_v43 = vshll.u32 %v1187_v37, 16  ;;  %v1338_v47 = vld [vmem:[%s1722_s3 + $0xc0] sm:$0xff]  ;;  %v623_v50 = vshrl.u32 %v1187_v37, 16  ;;  %v679_v59 = vrot.slane %v1187_v37, 1  ;;  %s1079_s15 = sshll.u32 %s387_s13, 2 }
  0x1d   : > { %551 = vmatpush.bf16.msra.mxu2 %v1322_v17  ;;  %v788_v45 = vshll.u32 %v1266_v39, 16  ;;  %v1342_v48 = vld [vmem:[%s1722_s3 + $0xe0] sm:$0xff]  ;;  %v786_v53 = vshrl.u32 %v1266_v39, 16  ;;  %v842_v62 = vrot.slane %v1266_v39, 1  ;;  %s389_s22 = scalar_lea.vmem %s1724_s5, %s1079_s15 }
  0x1e   : > { %601 = vmatpush.bf16.msra.mxu3 %v1326_v18  ;;  %1108 = vmatmul.msk.bf16.vlgmr.msra.gmra.mxu0 %vm450_vm0, %v425_v30  ;;  %v627_v51 = vrot.slane %v625_v43, 1  ;;  %v1334_v52 = vld [vmem:[%s1722_s3 + $0xa0] sm:$0xff] }
  0x1f   : > { %660 = vmatpush.bf16.msrb.mxu0 %v1333_v21  ;;  %1125 = vmatmul.msk.bf16.vlgmr.msra.gmra.mxu1 %vm450_vm0, %v391_v25  ;;  %v790_v54 = vrot.slane %v788_v45, 1  ;;  %v395_v57 = vld [vmem:[%s1613_s10] sm:$0xf] }
  0x20   : > { %1150 = vmatmul.msk.bf16.vlgmr.msra.gmra.mxu2 %vm450_vm0, %v516_v26  ;;  %711 = vmatpush.bf16.msrb.mxu1 %v1337_v27  ;;  %v628_v56 = vor.u32 %v627_v51, %v623_v50  ;;  %v1346_v61 = vld [vmem:[%s1722_s3 + $0x100] sm:$0xff] }
  0x21   : > { %761 = vmatpush.bf16.msrb.mxu2 %v1341_v22  ;;  %1175 = vmatmul.msk.bf16.vlgmr.msra.gmra.mxu3 %vm450_vm0, %v393_v31  ;;  %v791_v58 = vor.u32 %v790_v54, %v786_v53  ;;  %v1392_v22 = vld [vmem:[%s1723_s4] ss:$0 sm:$0xff] }
  0x22   : > { %823 = vmatpush.bf16.msrb.mxu3 %v1345_v23 }
  0x23   : > { %661 = vmatpush.bf16.msrb.mxu0 %v1332_v28 }
  0x24   : > { %712 = vmatpush.bf16.msrb.mxu1 %v1336_v38 }
  0x25   : > { %762 = vmatpush.bf16.msrb.mxu2 %v1340_v29 }
  0x26   : > { %824 = vmatpush.bf16.msrb.mxu3 %v1344_v34 }
  0x27   : > { %662 = vmatpush.bf16.msrb.mxu0 %v1331_v40 }
  0x28   : > { %713 = vmatpush.bf16.msrb.mxu1 %v1335_v44 }
  0x29   : > { %763 = vmatpush.bf16.msrb.mxu2 %v1339_v41 }
  0x2a   : > { %825 = vmatpush.bf16.msrb.mxu3 %v1343_v42 }
  0x2b   : > { %663 = vmatpush.bf16.msrb.mxu0 %v1330_v46 }
  0x2c   : > { %714 = vmatpush.bf16.msrb.mxu1 %v1334_v52 }
  0x2d   : > { %764 = vmatpush.bf16.msrb.mxu2 %v1338_v47 }
  0x2e   : > { %826 = vmatpush.bf16.msrb.mxu3 %v1342_v48  ;;  %1204 = vmatmul.msk.bf16.vlgmr.msrb.gmra.mxu0 %vm450_vm0, %v628_v56 }
  0x2f   : > { %874 = vmatpush.bf16.msra.mxu0 %v1349_v49  ;;  %1229 = vmatmul.msk.bf16.vlgmr.msrb.gmra.mxu1 %vm450_vm0, %v679_v59 }
  0x30   : > { %1254 = vmatmul.msk.bf16.vlgmr.msrb.gmra.mxu2 %vm450_vm0, %v395_v57 }
  0x31   : > { %1283 = vmatmul.msk.bf16.vlgmr.msrb.gmra.mxu3 %vm450_vm0, %v791_v58 }
  0x33   : > { %875 = vmatpush.bf16.msra.mxu0 %v1348_v55 }
  0x37   : > { %876 = vmatpush.bf16.msra.mxu0 %v1347_v60 }
  0x3b   : > { %877 = vmatpush.bf16.msra.mxu0 %v1346_v61 }
  0x3e   : > { %1308 = vmatmul.msk.bf16.vlgmr.msra.gmra.mxu0 %vm450_vm0, %v842_v62 }
  0x9b   : > { %v463_v0 = vpop.f32.mrf.mxu0 }
  0x9c   : > { %v503_v63 = vpop.f32.mrf.mxu1 }
  0x9d   : > { %v504_v5 = vadd.f32 %v503_v63, %v463_v0 }
  0xa3   : > { %v553_v1 = vpop.f32.mrf.mxu2  ;;  %v465_v4 = vpop.f32.mrf.mxu0 }
  0xa4   : > { %v603_v2 = vpop.f32.mrf.mxu3  ;;  %v505_v3 = vpop.f32.mrf.mxu1  ;;  %v557_v6 = vadd.f32 %v553_v1, %v504_v5 }
  0xa6   : > { %v607_v10 = vadd.f32 %v603_v2, %v557_v6 }
  0xab   : > { %v555_v7 = vpop.f32.mrf.mxu2  ;;  %v665_v9 = vpop.f32.mrf.mxu0 }
  0xac   : > { %v605_v8 = vpop.f32.mrf.mxu3  ;;  %v716_v11 = vpop.f32.mrf.mxu1  ;;  %v669_v12 = vadd.f32 %v665_v9, %v607_v10 }
  0xae   : > { %v720_v14 = vadd.f32 %v716_v11, %v669_v12 }
  0xb3   : > { %v766_v13 = vpop.f32.mrf.mxu2  ;;  %v667_v16 = vpop.f32.mrf.mxu0 }
  0xb4   : > { %v828_v15 = vpop.f32.mrf.mxu3  ;;  %v718_v17 = vpop.f32.mrf.mxu1  ;;  %v770_v18 = vadd.f32 %v766_v13, %v720_v14 }
  0xb6   : > { %v832_v20 = vadd.f32 %v828_v15, %v770_v18 }
  0xbb   : > { %v768_v19 = vpop.f32.mrf.mxu2  ;;  %v879_v23 = vpop.f32.mrf.mxu0 }
  0xbc   : > { %v830_v21 = vpop.f32.mrf.mxu3  ;;  %v883_v24 = vadd.f32 %v879_v23, %v832_v20 }
  0xbe   : > { %v888_v25 = vadd.f32 %v1392_v22, %v883_v24 }
  0xbf   : > { %897 = sbr.rel (%p1671_p11) target bundleno = 199 (0xc7), region = 44 }
  0xc0   : > { %v889_v26 = vpack.c.bf16 %v888_v25, %v888_v25 }
  0xc2   : > { %891 = vst.msk [vmem:[%s389_s22] sm:$0xf] %vm890_vm1, %v889_v26 }
  0xc3   : > { %v881_v27 = vpop.f32.mrf.mxu0 }
  0xc4   : > { %vm898_vm2 = vcmask 253952   ;;  %v1433_v28 = vmov 0.0  }
  0xc5   : > { %899 = vst.msk [vmem:[%s1725_s6] sm:$0x1] %vm898_vm2, %v1433_v28 }
  0xc6   : > { %900 = vst.msk [vmem:[%s1726_s7] sm:$0x1] %vm898_vm2, %v1433_v28 }
  0xc7 PF: > { %vm902_vm3 = vcmask 261120   ;;  %v914_v29 = vmul.f32 %v888_v25, %v888_v25  ;;  %vm911_vm4 = vcmask 253952  }
  0xc8   : > { %v903_v30 = vsel %vm902_vm3, %v888_v25, 0.0 }
  0xc9   : > { %v904_v31 = vrot.slane %v903_v30, 4  ;;  %v915_v32 = vsel %vm902_vm3, %v914_v29, 0.0 }
  0xca   : > { %v916_v33 = vrot.slane %v915_v32, 4 }
  0xcb   : > { %v905_v34 = vadd.f32 %v904_v31, %v903_v30 }
  0xcc   : > { %v917_v35 = vadd.f32 %v916_v33, %v915_v32  ;;  %v901_v41 = vld [vmem:[%s1725_s6] sm:$0x1] }
  0xcd   : > { %v906_v36 = vrot.slane %v905_v34, 2  ;;  %v913_v44 = vld [vmem:[%s1726_s7] sm:$0x1] }
  0xce   : > { %v918_v37 = vrot.slane %v917_v35, 2 }
  0xcf   : > { %v907_v38 = vadd.f32 %v906_v36, %v905_v34 }
  0xd0   : > { %v919_v39 = vadd.f32 %v918_v37, %v917_v35 }
  0xd1   : > { %v908_v40 = vrot.slane %v907_v38, 1 }
  0xd2   : > { %v920_v42 = vrot.slane %v919_v39, 1 }
  0xd3   : > { %v909_v43 = vadd.f32 %v908_v40, %v907_v38 }
  0xd4   : > { %v921_v45 = vadd.f32 %v920_v42, %v919_v39 }
  0xd5   : > { %v910_v46 = vadd.f32 %v909_v43, %v901_v41 }
  0xd6   : > { %v922_v47 = vadd.f32 %v921_v45, %v913_v44 }
  0xd7   : > { %912 = vst.msk [vmem:[%s1725_s6] sm:$0x1] %vm911_vm4, %v910_v46 }
  0xd8   : > { %923 = vst.msk [vmem:[%s1726_s7] sm:$0x1] %vm911_vm4, %v922_v47 }
  0xd9 PF: > { %s18_s28 = sadd.s32 1, %s1431_s28   ;;  %s1730_s24 = smov %s1423_s26 }
  0xda   : > { %p15_p13 = scmp.ge.s32.totalorder %s18_s28, 18   ;;  %s1731_s25 = smov %s1427_s27 }
  0xdb   : > { %s1732_s26 = smov %s1735_s29  ;;  %s1733_s27 = smov %s1739_s30 }
  0xdc   :  { %17 = sbr.rel (!%p15_p13) target bundleno = 3 (0x3), region = 104 }

// kernel: attention_unet_forward.49
= control target key start
LH: loop header
LB: loop body
LE: loop exit
PB: predicated region body
PF: predicated region fallthrough
CT: control target
= control target key end

     0   :  { %s678_s12 = smov 0   ;;  %s821_s0 = inlined_call_operand.vmem [shape: bf16[512,16], index: 0, kind: input, shape index: {}]   ;;  %s822_s1 = inlined_call_operand.vmem [shape: bf16[16,2], index: 1, kind: input, shape index: {}]   ;;  %s823_s2 = inlined_call_operand.vmem [shape: f32[1,2], index: 2, kind: input, shape index: {}]   ;;  %s824_s3 = inlined_call_operand.vmem [shape: f32[512,2], index: 3, kind: output, shape index: {}]  }
   0x1 LB: > { %s526_s13 = sadd.s32 4294967295, %s656_s12   ;;  %p530_p0 = scmp.ge.s32.totalorder %s656_s12, 1  ;;  %s656_s12 = sphi %s678_s12, %s13_s12  }
   0x2   : > { %p138_p1 = scmp.lt.s32.totalorder %s656_s12, 3 }
   0x4   : > { %p139_p2 = pnand %p530_p0, %p138_p1 }
   0x5   : > { %s531_s16 = sshll.u32 (!%p139_p2), %s526_s13, 5 }
   0x6   : > { %142 = sbr.rel (%p139_p2) target bundleno = 209 (0xd1), region = 32  ;;  %p163_p3 = scmp.lt.s32.totalorder (!%p139_p2), %s531_s16, 63 }
   0xb   : > { %v637_v0 = vld [vmem:[%s822_s1] sm:$0xff]  ;;  %s826_s16 = smov (!%p163_p3, %s531_s16), 63  ;;  %vm299_vm0 = vcmask 130048   ;;  %vm437_vm1 = vcmask 15360  }
   0xc   : > { %355 = vmatpush.bf16.msra.mxu0 %v637_v0  ;;  %638 = vmatpush.bf16.msra.mxu1 %v637_v0  ;;  %s532_s17 = sshll.u32 %s826_s16, 2  ;;  %s534_s21 = sshll.u32 %s826_s16, 3  ;;  %v715_v17 = vld [vmem:[%s823_s2] ss:$0 sm:$0xff] }
   0xd   : > { %639 = vmatpush.bf16.msra.mxu2 %v637_v0  ;;  %640 = vmatpush.bf16.msra.mxu3 %v637_v0  ;;  %s166_s20 = scalar_lea.vmem %s821_s0, %s532_s17  ;;  %s720_s26 = scalar_lea.vmem %s824_s3, %s534_s21 }
   0xe   : > { %v621_v1 = vld [vmem:[%s166_s20] sm:$0xff]  ;;  %v622_v5 = vld [vmem:[%s166_s20 + $0x8] sm:$0xff]  ;;  %v623_v9 = vld [vmem:[%s166_s20 + $0x10] sm:$0xff] }
   0xf   : > { %v625_v2 = vld [vmem:[%s166_s20 + $0x20] sm:$0xff]  ;;  %603 = vmatmul.msk.bf16.vlgmr.msra.gmra.mxu0 %vm299_vm0, %v621_v1  ;;  %v626_v6 = vld [vmem:[%s166_s20 + $0x28] sm:$0xff]  ;;  %v627_v10 = vld [vmem:[%s166_s20 + $0x30] sm:$0xff] }
  0x10   : > { %v629_v3 = vld [vmem:[%s166_s20 + $0x40] sm:$0xff]  ;;  %607 = vmatmul.msk.bf16.vlgmr.msra.gmra.mxu1 %vm299_vm0, %v625_v2  ;;  %v630_v7 = vld [vmem:[%s166_s20 + $0x48] sm:$0xff]  ;;  %v631_v11 = vld [vmem:[%s166_s20 + $0x50] sm:$0xff] }
  0x11   : > { %v633_v4 = vld [vmem:[%s166_s20 + $0x60] sm:$0xff]  ;;  %611 = vmatmul.msk.bf16.vlgmr.msra.gmra.mxu2 %vm299_vm0, %v629_v3  ;;  %v634_v8 = vld [vmem:[%s166_s20 + $0x68] sm:$0xff]  ;;  %v635_v12 = vld [vmem:[%s166_s20 + $0x70] sm:$0xff] }
  0x12   : > { %615 = vmatmul.msk.bf16.vlgmr.msra.gmra.mxu3 %vm299_vm0, %v633_v4  ;;  %v624_v13 = vld [vmem:[%s166_s20 + $0x18] sm:$0xff] }
  0x13   : > { %v628_v14 = vld [vmem:[%s166_s20 + $0x38] sm:$0xff] }
  0x14   : > { %v632_v15 = vld [vmem:[%s166_s20 + $0x58] sm:$0xff] }
  0x15   : > { %v636_v16 = vld [vmem:[%s166_s20 + $0x78] sm:$0xff] }
  0x1f   : > { %604 = vmatmul.msk.bf16.gmra.mxu0 %vm299_vm0, %v622_v5 }
  0x20   : > { %608 = vmatmul.msk.bf16.gmra.mxu1 %vm299_vm0, %v626_v6 }
  0x21   : > { %612 = vmatmul.msk.bf16.gmra.mxu2 %vm299_vm0, %v630_v7 }
  0x22   : > { %616 = vmatmul.msk.bf16.gmra.mxu3 %vm299_vm0, %v634_v8 }
  0x2f   : > { %605 = vmatmul.msk.bf16.gmra.mxu0 %vm299_vm0, %v623_v9 }
  0x30   : > { %609 = vmatmul.msk.bf16.gmra.mxu1 %vm299_vm0, %v627_v10 }
  0x31   : > { %613 = vmatmul.msk.bf16.gmra.mxu2 %vm299_vm0, %v631_v11 }
  0x32   : > { %617 = vmatmul.msk.bf16.gmra.mxu3 %vm299_vm0, %v635_v12 }
  0x3f   : > { %606 = vmatmul.msk.bf16.gmra.mxu0 %vm299_vm0, %v624_v13 }
  0x40   : > { %610 = vmatmul.msk.bf16.gmra.mxu1 %vm299_vm0, %v628_v14 }
  0x41   : > { %614 = vmatmul.msk.bf16.gmra.mxu2 %vm299_vm0, %v632_v15 }
  0x42   : > { %618 = vmatmul.msk.bf16.gmra.mxu3 %vm299_vm0, %v636_v16 }
  0x8c   : > { %v357_v18 = vpop.f32.mrf.mxu0 }
  0x8d   : > { %v377_v19 = vpop.f32.mrf.mxu1  ;;  %v358_v20 = vadd.f32 %v715_v17, %v357_v18 }
  0x8e   : > { %v378_v21 = vadd.f32 %v715_v17, %v377_v19 }
  0x8f   : > { %438 = vst.msk [vmem:[%s720_s26] sm:$0xff] %vm437_vm1, %v358_v20 }
  0x90   : > { %446 = vst.msk [vmem:[%s720_s26 + $0x40] sm:$0xff] %vm437_vm1, %v378_v21 }
  0x94   : > { %v397_v22 = vpop.f32.mrf.mxu2  ;;  %v359_v26 = vpop.f32.mrf.mxu0 }
  0x95   : > { %v417_v23 = vpop.f32.mrf.mxu3  ;;  %v398_v24 = vadd.f32 %v715_v17, %v397_v22  ;;  %v379_v27 = vpop.f32.mrf.mxu1  ;;  %v360_v28 = vadd.f32 %v715_v17, %v359_v26 }
  0x96   : > { %v418_v25 = vadd.f32 %v715_v17, %v417_v23  ;;  %v380_v29 = vadd.f32 %v715_v17, %v379_v27 }
  0x97   : > { %454 = vst.msk [vmem:[%s720_s26 + $0x80] sm:$0xff] %vm437_vm1, %v398_v24 }
  0x98   : > { %462 = vst.msk [vmem:[%s720_s26 + $0xc0] sm:$0xff] %vm437_vm1, %v418_v25 }
  0x99   : > { %439 = vst.msk [vmem:[%s720_s26 + $0x8] sm:$0xff] %vm437_vm1, %v360_v28 }
  0x9a   : > { %447 = vst.msk [vmem:[%s720_s26 + $0x48] sm:$0xff] %vm437_vm1, %v380_v29 }
  0x9c   : > { %v399_v30 = vpop.f32.mrf.mxu2  ;;  %v362_v34 = vpop.f32.mrf.mxu0 }
  0x9d   : > { %v419_v31 = vpop.f32.mrf.mxu3  ;;  %v400_v32 = vadd.f32 %v715_v17, %v399_v30  ;;  %v382_v35 = vpop.f32.mrf.mxu1  ;;  %v363_v36 = vadd.f32 %v715_v17, %v362_v34 }
  0x9e   : > { %v420_v33 = vadd.f32 %v715_v17, %v419_v31  ;;  %v383_v37 = vadd.f32 %v715_v17, %v382_v35 }
  0x9f   : > { %455 = vst.msk [vmem:[%s720_s26 + $0x88] sm:$0xff] %vm437_vm1, %v400_v32 }
  0xa0   : > { %463 = vst.msk [vmem:[%s720_s26 + $0xc8] sm:$0xff] %vm437_vm1, %v420_v33 }
  0xa1   : > { %440 = vst.msk [vmem:[%s720_s26 + $0x10] sm:$0xff] %vm437_vm1, %v363_v36 }
  0xa2   : > { %448 = vst.msk [vmem:[%s720_s26 + $0x50] sm:$0xff] %vm437_vm1, %v383_v37 }
  0xa4   : > { %v402_v38 = vpop.f32.mrf.mxu2  ;;  %v364_v42 = vpop.f32.mrf.mxu0 }
  0xa5   : > { %v422_v39 = vpop.f32.mrf.mxu3  ;;  %v403_v40 = vadd.f32 %v715_v17, %v402_v38  ;;  %v384_v43 = vpop.f32.mrf.mxu1  ;;  %v365_v44 = vadd.f32 %v715_v17, %v364_v42 }
  0xa6   : > { %v423_v41 = vadd.f32 %v715_v17, %v422_v39  ;;  %v385_v45 = vadd.f32 %v715_v17, %v384_v43 }
  0xa7   : > { %456 = vst.msk [vmem:[%s720_s26 + $0x90] sm:$0xff] %vm437_vm1, %v403_v40 }
  0xa8   : > { %464 = vst.msk [vmem:[%s720_s26 + $0xd0] sm:$0xff] %vm437_vm1, %v423_v41 }
  0xa9   : > { %441 = vst.msk [vmem:[%s720_s26 + $0x18] sm:$0xff] %vm437_vm1, %v365_v44 }
  0xaa   : > { %449 = vst.msk [vmem:[%s720_s26 + $0x58] sm:$0xff] %vm437_vm1, %v385_v45 }
  0xac   : > { %v404_v46 = vpop.f32.mrf.mxu2  ;;  %v367_v50 = vpop.f32.mrf.mxu0 }
  0xad   : > { %v424_v47 = vpop.f32.mrf.mxu3  ;;  %v405_v48 = vadd.f32 %v715_v17, %v404_v46  ;;  %v387_v51 = vpop.f32.mrf.mxu1  ;;  %v368_v52 = vadd.f32 %v715_v17, %v367_v50 }
  0xae   : > { %v425_v49 = vadd.f32 %v715_v17, %v424_v47  ;;  %v388_v53 = vadd.f32 %v715_v17, %v387_v51 }
  0xaf   : > { %457 = vst.msk [vmem:[%s720_s26 + $0x98] sm:$0xff] %vm437_vm1, %v405_v48 }
  0xb0   : > { %465 = vst.msk [vmem:[%s720_s26 + $0xd8] sm:$0xff] %vm437_vm1, %v425_v49 }
  0xb1   : > { %442 = vst.msk [vmem:[%s720_s26 + $0x20] sm:$0xff] %vm437_vm1, %v368_v52 }
  0xb2   : > { %450 = vst.msk [vmem:[%s720_s26 + $0x60] sm:$0xff] %vm437_vm1, %v388_v53 }
  0xb4   : > { %v407_v54 = vpop.f32.mrf.mxu2  ;;  %v369_v58 = vpop.f32.mrf.mxu0 }
  0xb5   : > { %v427_v55 = vpop.f32.mrf.mxu3  ;;  %v408_v56 = vadd.f32 %v715_v17, %v407_v54  ;;  %v389_v59 = vpop.f32.mrf.mxu1  ;;  %v370_v60 = vadd.f32 %v715_v17, %v369_v58 }
  0xb6   : > { %v428_v57 = vadd.f32 %v715_v17, %v427_v55  ;;  %v390_v61 = vadd.f32 %v715_v17, %v389_v59 }
  0xb7   : > { %458 = vst.msk [vmem:[%s720_s26 + $0xa0] sm:$0xff] %vm437_vm1, %v408_v56 }
  0xb8   : > { %466 = vst.msk [vmem:[%s720_s26 + $0xe0] sm:$0xff] %vm437_vm1, %v428_v57 }
  0xb9   : > { %443 = vst.msk [vmem:[%s720_s26 + $0x28] sm:$0xff] %vm437_vm1, %v370_v60 }
  0xba   : > { %451 = vst.msk [vmem:[%s720_s26 + $0x68] sm:$0xff] %vm437_vm1, %v390_v61 }
  0xbc   : > { %v409_v62 = vpop.f32.mrf.mxu2  ;;  %v372_v2 = vpop.f32.mrf.mxu0 }
  0xbd   : > { %v429_v63 = vpop.f32.mrf.mxu3  ;;  %v410_v0 = vadd.f32 %v715_v17, %v409_v62  ;;  %v392_v3 = vpop.f32.mrf.mxu1  ;;  %v373_v4 = vadd.f32 %v715_v17, %v372_v2 }
  0xbe   : > { %v430_v1 = vadd.f32 %v715_v17, %v429_v63  ;;  %v393_v5 = vadd.f32 %v715_v17, %v392_v3 }
  0xbf   : > { %459 = vst.msk [vmem:[%s720_s26 + $0xa8] sm:$0xff] %vm437_vm1, %v410_v0 }
  0xc0   : > { %467 = vst.msk [vmem:[%s720_s26 + $0xe8] sm:$0xff] %vm437_vm1, %v430_v1 }
  0xc1   : > { %444 = vst.msk [vmem:[%s720_s26 + $0x30] sm:$0xff] %vm437_vm1, %v373_v4 }
  0xc2   : > { %452 = vst.msk [vmem:[%s720_s26 + $0x70] sm:$0xff] %vm437_vm1, %v393_v5 }
  0xc4   : > { %v412_v6 = vpop.f32.mrf.mxu2  ;;  %v374_v10 = vpop.f32.mrf.mxu0 }
  0xc5   : > { %v432_v7 = vpop.f32.mrf.mxu3  ;;  %v413_v8 = vadd.f32 %v715_v17, %v412_v6  ;;  %v394_v11 = vpop.f32.mrf.mxu1  ;;  %v375_v12 = vadd.f32 %v715_v17, %v374_v10 }
  0xc6   : > { %v433_v9 = vadd.f32 %v715_v17, %v432_v7  ;;  %v395_v13 = vadd.f32 %v715_v17, %v394_v11 }
  0xc7   : > { %460 = vst.msk [vmem:[%s720_s26 + $0xb0] sm:$0xff] %vm437_vm1, %v413_v8 }
  0xc8   : > { %468 = vst.msk [vmem:[%s720_s26 + $0xf0] sm:$0xff] %vm437_vm1, %v433_v9 }
  0xc9   : > { %445 = vst.msk [vmem:[%s720_s26 + $0x38] sm:$0xff] %vm437_vm1, %v375_v12 }
  0xca   : > { %453 = vst.msk [vmem:[%s720_s26 + $0x78] sm:$0xff] %vm437_vm1, %v395_v13 }
  0xcc   : > { %v414_v14 = vpop.f32.mrf.mxu2 }
  0xcd   : > { %v434_v15 = vpop.f32.mrf.mxu3  ;;  %v415_v16 = vadd.f32 %v715_v17, %v414_v14 }
  0xce   : > { %v435_v18 = vadd.f32 %v715_v17, %v434_v15 }
  0xcf   : > { %461 = vst.msk [vmem:[%s720_s26 + $0xb8] sm:$0xff] %vm437_vm1, %v415_v16 }
  0xd0   : > { %469 = vst.msk [vmem:[%s720_s26 + $0xf8] sm:$0xff] %vm437_vm1, %v435_v18 }
  0xd1 PF: > { %s13_s12 = sadd.s32 1, %s656_s12  }
  0xd2   : > { %p10_p4 = scmp.ge.s32.totalorder %s13_s12, 4  }
  0xd4   :  { %12 = sbr.rel (!%p10_p4) target bundleno = 1 (0x1), region = 62 }

// kernel: attention_unet_forward.45
= control target key start
LH: loop header
LB: loop body
LE: loop exit
PB: predicated region body
PF: predicated region fallthrough
CT: control target
= control target key end

     0   :  { %s1273_s24 = smov 0   ;;  %s1275_s25 = smov 0   ;;  %s1461_s0 = inlined_call_operand.vmem [shape: bf16[2,18,18,32], index: 0, kind: input, shape index: {}, may-alias: {0,1,2}]   ;;  %s1462_s1 = inlined_call_operand.vmem [shape: bf16[2,18,18,32], index: 1, kind: input, shape index: {}, may-alias: {0,1,2}]   ;;  %s1463_s2 = inlined_call_operand.vmem [shape: bf16[2,18,18,32], index: 2, kind: input, shape index: {}, may-alias: {0,1,2}]   ;;  %s1464_s3 = inlined_call_operand.vmem [shape: bf16[3,3,32,16], index: 3, kind: input, shape index: {}]   ;;  %s1465_s4 = inlined_call_operand.vmem [shape: f32[1,16], index: 4, kind: input, shape index: {}]   ;;  %s1466_s5 = inlined_call_operand.vmem [shape: bf16[2,16,16,16], index: 5, kind: output, shape index: {0}]   ;;  %s1467_s6 = inlined_call_operand.vmem [shape: f32[1,16], index: 6, kind: output, shape index: {1}]   ;;  %s1468_s7 = inlined_call_operand.vmem [shape: f32[1,16], index: 7, kind: output, shape index: {2}]  }
   0x1   :  { %s1277_s26 = smov 0   ;;  %s1279_s27 = smov 0  }
   0x2   :  { %s1281_s28 = smov 0  }
   0x3 LB: > { %s27_s29 = sadd.s32 1, %s1222_s26  ;;  %s30_s30 = sadd.s32 1, %s1226_s27  ;;  %s1230_s28 = sphi %s1281_s28, %s18_s28   ;;  %s1226_s27 = sphi %s1279_s27, %s1477_s27   ;;  %s1222_s26 = sphi %s1277_s26, %s1476_s26   ;;  %s1218_s25 = sphi %s1275_s25, %s1475_s25   ;;  %s1214_s24 = sphi %s1273_s24, %s1474_s24  }
   0x4   : > { %p28_p0 = scmp.ge.s32.totalorder %s27_s29, 16  ;;  %p991_p1 = scmp.ge.s32.totalorder %s1230_s28, 1 }
   0x5   : > { %p292_p2 = scmp.lt.s32.totalorder %s1230_s28, 33 }
   0x6   : > { %s1479_s29 = smov (%p28_p0, %s27_s29), 0  ;;  %s1481_s30 = smov (!%p28_p0, %s30_s30), %s1226_s27 }
   0x7   : > { %p293_p3 = pnand %p991_p1, %p292_p2  ;;  %p32_p4 = scmp.ge.s32.totalorder %s1481_s30, 2 }
   0x8   : > { %p352_p5 = scmp.lt.s32.totalorder (!%p293_p3), %s1218_s25, 1  ;;  %p354_p6 = scmp.lt.s32.totalorder (!%p293_p3), %s1214_s24, 17 }
   0x9   : > { %s1483_s30 = smov (%p32_p4, %s1481_s30), 0  ;;  %296 = sbr.rel (%p293_p3) target bundleno = 228 (0xe4), region = 40 }
   0xa   : > { %1469 = sst [smem:[#allocation2_spill]] %s1483_s30  ;;  %s361_s11 = sadd.s32 (!%p293_p3), 1, %s1214_s24 }
   0xb   : > { %p1353_p7 = scmp.lt.s32.totalorder (!%p293_p3), %s361_s11, 17  ;;  %s372_s23 = sadd.s32 (!%p293_p3), 2, %s1214_s24 }
   0xc   : > { %p1359_p8 = scmp.lt.s32.totalorder (!%p293_p3), %s372_s23, 17  ;;  %p801_p9 = scmp.eq.s32.totalorder (!%p293_p3), %s1218_s25, 0 }
   0xd   : > { %p802_p10 = scmp.eq.s32.totalorder (!%p293_p3), %s1214_s24, 0  ;;  %p385_p12 = scmp.lt.s32.totalorder (!%p293_p3), %s1214_s24, 15 }
   0xe   : > { %v1133_v0 = vld [vmem:[%s1464_s3 + $0x28] sm:$0xff]  ;;  %v1131_v1 = vld [vmem:[%s1464_s3 + $0x18] sm:$0xff]  ;;  %v1132_v4 = vld [vmem:[%s1464_s3 + $0x20] sm:$0xff]  ;;  %s1328_s20 = scalar_select %p352_p5, %s1218_s25, 1  ;;  %vm444_vm0 = vcmask 261120   ;;  %vm495_vm1 = vcmask 1046528  }
   0xf   : > { %v1129_v2 = vld [vmem:[%s1464_s3 + $0x8] sm:$0xff]  ;;  %v1135_v3 = vld [vmem:[%s1464_s3 + $0x38] sm:$0xff]  ;;  %520 = vmatpush.bf16.msra.mxu2 %v1133_v0  ;;  %454 = vmatpush.bf16.msra.mxu0 %v1131_v1  ;;  %v1130_v5 = vld [vmem:[%s1464_s3 + $0x10] sm:$0xff]  ;;  %s355_s9 = scalar_select %p354_p6, %s1214_s24, 17  ;;  %vm419_vm2 = vsmask.f32 7424 }
  0x10   : > { %482 = vmatpush.bf16.msra.mxu1 %v1129_v2  ;;  %561 = vmatpush.bf16.msra.mxu3 %v1135_v3  ;;  %v1128_v6 = vld [vmem:[%s1464_s3] sm:$0xff]  ;;  %v1134_v7 = vld [vmem:[%s1464_s3 + $0x30] sm:$0xff]  ;;  %s1338_s10 = smul.u32 54, %s1328_s20  ;;  %v1137_v8 = vld [vmem:[%s1464_s3 + $0x48] sm:$0xff]  ;;  %s1485_s11 = smov (!%p1353_p7, %s361_s11), 17  ;;  %vm798_vm3 = vcmask 125952  }
  0x11   : > { %v1141_v9 = vld [vmem:[%s1464_s3 + $0x68] sm:$0xff]  ;;  %s1146_s16 = smul.u32 3, %s355_s9  ;;  %v1143_v10 = vld [vmem:[%s1464_s3 + $0x78] sm:$0xff]  ;;  %v1136_v12 = vld [vmem:[%s1464_s3 + $0x40] sm:$0xff]  ;;  %s1487_s23 = smov (!%p1359_p8, %s372_s23), 17 }
  0x12   : > { %v1139_v11 = vld [vmem:[%s1464_s3 + $0x58] sm:$0xff]  ;;  %v1140_v13 = vld [vmem:[%s1464_s3 + $0x60] sm:$0xff]  ;;  %v1142_v14 = vld [vmem:[%s1464_s3 + $0x70] sm:$0xff]  ;;  %s1148_s30 = smul.u32 3, %s1485_s11  ;;  %p1413_p11 = pnand %p802_p10, %p801_p9 }
  0x13   : > { %521 = vmatpush.bf16.msra.mxu2 %v1132_v4  ;;  %455 = vmatpush.bf16.msra.mxu0 %v1130_v5  ;;  %s358_s8 = sadd.s32 %s1338_s10, %s1146_s16  ;;  %v1138_v17 = vld [vmem:[%s1464_s3 + $0x50] sm:$0xff]  ;;  %s1149_s22 = smul.u32 3, %s1487_s23  ;;  %v1145_v31 = vld [vmem:[%s1464_s3 + $0x88] sm:$0xff]  ;;  %v1144_v42 = vld [vmem:[%s1464_s3 + $0x80] sm:$0xff] }
  0x14   : > { %483 = vmatpush.bf16.msra.mxu1 %v1128_v6  ;;  %562 = vmatpush.bf16.msra.mxu3 %v1134_v7  ;;  %s992_s12 = sshll.u32 %s358_s8, 2  ;;  %s1489_s24 = smov (!%p385_p12, %s1214_s24), 15 }
  0x15   : > { %s360_s18 = scalar_lea.vmem %s1461_s0, %s992_s12  ;;  %s368_s12 = sadd.s32 %s1148_s30, %s1338_s10 }
  0x16   : > { %v1125_v15 = vld [vmem:[%s360_s18] sm:$0xff]  ;;  %v395_v16 = vld [vmem:[%s360_s18 + $0x8] sm:$0x1]  ;;  %s993_s9 = sshll.u32 %s368_s12, 2  ;;  %s379_s14 = sadd.s32 %s1149_s22, %s1338_s10 }
  0x17   : > { %611 = vmatpush.bf16.msrb.mxu0 %v1137_v8  ;;  %691 = vmatpush.bf16.msrb.mxu2 %v1141_v9  ;;  %v416_v18 = vunpack.c.l.b16 %v395_v16  ;;  %v421_v19 = vshrl.u32 %v1125_v15, 16  ;;  %v423_v20 = vshll.u32 %v1125_v15, 16  ;;  %v496_v22 = vrot.slane %v1125_v15, 1  ;;  %s370_s11 = scalar_lea.vmem %s1462_s1, %s993_s9  ;;  %s994_s18 = sshll.u32 %s379_s14, 2 }
  0x18   : > { %741 = vmatpush.bf16.msrb.mxu3 %v1143_v10  ;;  %650 = vmatpush.bf16.msrb.mxu1 %v1139_v11  ;;  %v1126_v29 = vld [vmem:[%s370_s11] sm:$0xff]  ;;  %s381_s16 = scalar_lea.vmem %s1463_s2, %s994_s18  ;;  %v398_v30 = vld [vmem:[%s370_s11 + $0x8] sm:$0x1]  ;;  %s995_s25 = sshll.u32 %s1489_s24, 1 }
  0x19   : > { %1023 = vmatmul.msk.bf16.vlgmr.msra.gmra.mxu1 %vm444_vm0, %v1125_v15  ;;  %v418_v21 = vpack.c.b16 %v416_v18, %v416_v18  ;;  %v425_v23 = vrot.slane %v423_v20, 1  ;;  %v1127_v32 = vld [vmem:[%s381_s16] sm:$0xff]  ;;  %v577_v33 = vunpack.c.l.b16 %v398_v30  ;;  %v401_v34 = vld [vmem:[%s381_s16 + $0x8] sm:$0x1]  ;;  %1053 = vmatmul.msk.bf16.vlgmr.msra.gmra.mxu3 %vm444_vm0, %v1126_v29  ;;  %v581_v39 = vshll.u32 %v1126_v29, 16  ;;  %s996_s22 = sshll.u32 %s1328_s20, 5 }
  0x1a   : > { %v707_v36 = vunpack.c.l.b16 %v401_v34  ;;  %v711_v38 = vshll.u32 %v1127_v32, 16  ;;  %v626_v41 = vrot.slane %v1126_v29, 1  ;;  %v709_v44 = vshrl.u32 %v1127_v32, 16  ;;  %s389_s12 = sadd.s32 %s996_s22, %s995_s25 }
  0x1b   : > { %612 = vmatpush.bf16.msrb.mxu0 %v1136_v12  ;;  %692 = vmatpush.bf16.msrb.mxu2 %v1140_v13  ;;  %v497_v24 = vrot.slane %v418_v21, 1  ;;  %v428_v25 = vshll.u32 %v418_v21, 16  ;;  %v426_v26 = vor.u32 %v425_v23, %v421_v19  ;;  %v578_v37 = vpack.c.b16 %v577_v33, %v577_v33  ;;  %s997_s15 = sshll.u32 %s389_s12, 2 }
  0x1c   : > { %742 = vmatpush.bf16.msrb.mxu3 %v1142_v14  ;;  %651 = vmatpush.bf16.msrb.mxu1 %v1138_v17  ;;  %v708_v40 = vpack.c.b16 %v707_v36, %v707_v36  ;;  %v713_v45 = vrot.slane %v711_v38, 1  ;;  %v579_v47 = vshrl.u32 %v1126_v29, 16  ;;  %v583_v48 = vrot.slane %v581_v39, 1  ;;  %s391_s24 = scalar_lea.vmem %s1466_s5, %s997_s15 }
  0x1d   : > { %v498_v27 = vsel %vm495_vm1, %v496_v22, %v497_v24  ;;  %v430_v28 = vrot.slane %v428_v25, 1  ;;  %v627_v43 = vrot.slane %v578_v37, 1  ;;  %v586_v49 = vshll.u32 %v578_v37, 16  ;;  %v1191_v22 = vld [vmem:[%s1465_s4] ss:$0 sm:$0xff] }
  0x1e   : > { %1036 = vmatmul.msk.bf16.vlgmr.msra.gmra.mxu2 %vm444_vm0, %v498_v27  ;;  %v716_v46 = vshll.u32 %v708_v40, 16  ;;  %v714_v51 = vor.u32 %v713_v45, %v709_v44  ;;  %v584_v53 = vor.u32 %v583_v48, %v579_v47  ;;  %v756_v57 = vrot.slane %v1127_v32, 1 }
  0x1f   : > { %v431_v35 = vsel %vm419_vm2, %v426_v26, %v430_v28  ;;  %v628_v50 = vsel %vm495_vm1, %v626_v41, %v627_v43  ;;  %v588_v54 = vrot.slane %v586_v49, 1  ;;  %v757_v58 = vrot.slane %v708_v40, 1 }
  0x20   : > { %1014 = vmatmul.msk.bf16.vlgmr.msra.gmra.mxu0 %vm444_vm0, %v431_v35  ;;  %v718_v52 = vrot.slane %v716_v46, 1 }
  0x21   : > { %780 = vmatpush.bf16.msra.mxu0 %v1145_v31  ;;  %v589_v56 = vsel %vm419_vm2, %v584_v53, %v588_v54  ;;  %v758_v59 = vsel %vm495_vm1, %v756_v57, %v757_v58 }
  0x22   : > { %v719_v55 = vsel %vm419_vm2, %v714_v51, %v718_v52 }
  0x25   : > { %781 = vmatpush.bf16.msra.mxu0 %v1144_v42 }
  0x29   : > { %1079 = vmatmul.msk.bf16.vlgmr.msrb.gmra.mxu1 %vm444_vm0, %v628_v50  ;;  %1109 = vmatmul.msk.bf16.vlgmr.msrb.gmra.mxu3 %vm444_vm0, %v719_v55 }
  0x2e   : > { %1096 = vmatmul.msk.bf16.vlgmr.msrb.gmra.mxu2 %vm444_vm0, %v1127_v32 }
  0x30   : > { %1066 = vmatmul.msk.bf16.vlgmr.msrb.gmra.mxu0 %vm444_vm0, %v589_v56 }
  0x40   : > { %1122 = vmatmul.msk.bf16.vlgmr.msra.gmra.mxu0 %vm444_vm0, %v758_v59 }
  0x96   : > { %v485_v61 = vpop.f32.mrf.mxu1 }
  0x9c   : > { %v564_v63 = vpop.f32.mrf.mxu3 }
  0x9d   : > { %v457_v60 = vpop.f32.mrf.mxu0 }
  0x9e   : > { %v487_v1 = vpop.f32.mrf.mxu1  ;;  %v486_v2 = vadd.f32 %v485_v61, %v457_v60 }
  0xa1   : > { %v523_v62 = vpop.f32.mrf.mxu2 }
  0xa2   : > { %v528_v4 = vadd.f32 %v523_v62, %v486_v2 }
  0xa4   : > { %v566_v5 = vpop.f32.mrf.mxu3  ;;  %v569_v7 = vadd.f32 %v564_v63, %v528_v4 }
  0xa5   : > { %v459_v0 = vpop.f32.mrf.mxu0 }
  0xa6   : > { %v653_v8 = vpop.f32.mrf.mxu1  ;;  %v488_v9 = vadd.f32 %v487_v1, %v459_v0 }
  0xa9   : > { %v525_v3 = vpop.f32.mrf.mxu2 }
  0xaa   : > { %v529_v11 = vadd.f32 %v525_v3, %v488_v9 }
  0xac   : > { %v570_v15 = vadd.f32 %v566_v5, %v529_v11  ;;  %v744_v16 = vpop.f32.mrf.mxu3 }
  0xad   : > { %v614_v6 = vpop.f32.mrf.mxu0 }
  0xae   : > { %v619_v10 = vadd.f32 %v614_v6, %v569_v7  ;;  %v655_v19 = vpop.f32.mrf.mxu1 }
  0xb0   : > { %v658_v13 = vadd.f32 %v653_v8, %v619_v10 }
  0xb1   : > { %v694_v12 = vpop.f32.mrf.mxu2 }
  0xb2   : > { %v699_v17 = vadd.f32 %v694_v12, %v658_v13 }
  0xb4   : > { %v749_v20 = vadd.f32 %v744_v16, %v699_v17  ;;  %v746_v28 = vpop.f32.mrf.mxu3 }
  0xb5   : > { %v616_v14 = vpop.f32.mrf.mxu0 }
  0xb6   : > { %v620_v18 = vadd.f32 %v616_v14, %v570_v15 }
  0xb8   : > { %v659_v21 = vadd.f32 %v655_v19, %v620_v18 }
  0xb9   : > { %v696_v23 = vpop.f32.mrf.mxu2 }
  0xba   : > { %v700_v26 = vadd.f32 %v696_v23, %v659_v21 }
  0xbc   : > { %v750_v30 = vadd.f32 %v746_v28, %v700_v26 }
  0xbd   : > { %v783_v24 = vpop.f32.mrf.mxu0 }
  0xbe   : > { %v788_v25 = vadd.f32 %v783_v24, %v749_v20 }
  0xc0   : > { %v794_v27 = vadd.f32 %v1191_v22, %v788_v25 }
  0xc2   : > { %v796_v29 = vpack.c.bf16 %v794_v27, %v794_v27 }
  0xc4   : > { %799 = vst.msk [vmem:[%s391_s24] sm:$0xf] %vm798_vm3, %v796_v29 }
  0xc5   : > { %v785_v31 = vpop.f32.mrf.mxu0 }
  0xc6   : > { %v789_v32 = vadd.f32 %v785_v31, %v750_v30 }
  0xc8   : > { %v795_v33 = vadd.f32 %v1191_v22, %v789_v32  ;;  %806 = sbr.rel (%p1413_p11) target bundleno = 208 (0xd0), region = 44 }
  0xca   : > { %v797_v34 = vpack.c.bf16 %v795_v33, %v795_v33 }
  0xcc   : > { %800 = vst.msk [vmem:[%s391_s24 + $0x4] sm:$0xf] %vm798_vm3, %v797_v34 }
  0xcd   : > { %vm807_vm4 = vcmask 122880   ;;  %v1232_v35 = vmov 0.0  }
  0xce   : > { %808 = vst.msk [vmem:[%s1467_s6] sm:$0x1] %vm807_vm4, %v1232_v35 }
  0xcf   : > { %809 = vst.msk [vmem:[%s1468_s7] sm:$0x1] %vm807_vm4, %v1232_v35 }
  0xd0 PF: > { %vm811_vm5 = vcmask 130048   ;;  %v825_v36 = vmul.f32 %v794_v27, %v794_v27  ;;  %v826_v37 = vmul.f32 %v795_v33, %v795_v33  ;;  %vm822_vm6 = vcmask 122880  }
  0xd1   : > { %v812_v38 = vsel %vm811_vm5, %v794_v27, 0.0  ;;  %v813_v39 = vsel %vm811_vm5, %v795_v33, 0.0 }
  0xd2   : > { %v814_v40 = vadd.f32 %v813_v39, %v812_v38  ;;  %v827_v41 = vsel %vm811_vm5, %v825_v36, 0.0  ;;  %v828_v42 = vsel %vm811_vm5, %v826_v37, 0.0 }
  0xd3   : > { %v829_v43 = vadd.f32 %v828_v42, %v827_v41 }
  0xd4   : > { %v815_v44 = vrot.slane %v814_v40, 4 }
  0xd5   : > { %v830_v45 = vrot.slane %v829_v43, 4  ;;  %v810_v53 = vld [vmem:[%s1467_s6] sm:$0x1] }
  0xd6   : > { %v816_v46 = vadd.f32 %v815_v44, %v814_v40  ;;  %v824_v56 = vld [vmem:[%s1468_s7] sm:$0x1] }
  0xd7   : > { %v831_v47 = vadd.f32 %v830_v45, %v829_v43 }
  0xd8   : > { %v817_v48 = vrot.slane %v816_v46, 2 }
  0xd9   : > { %v832_v49 = vrot.slane %v831_v47, 2 }
  0xda   : > { %v818_v50 = vadd.f32 %v817_v48, %v816_v46 }
  0xdb   : > { %v833_v51 = vadd.f32 %v832_v49, %v831_v47 }
  0xdc   : > { %v819_v52 = vrot.slane %v818_v50, 1 }
  0xdd   : > { %v834_v54 = vrot.slane %v833_v51, 1 }
  0xde   : > { %v820_v55 = vadd.f32 %v819_v52, %v818_v50 }
  0xdf   : > { %v835_v57 = vadd.f32 %v834_v54, %v833_v51 }
  0xe0   : > { %v821_v58 = vadd.f32 %v820_v55, %v810_v53 }
  0xe1   : > { %v836_v59 = vadd.f32 %v835_v57, %v824_v56 }
  0xe2   : > { %823 = vst.msk [vmem:[%s1467_s6] sm:$0x1] %vm822_vm6, %v821_v58 }
  0xe3   : > { %837 = vst.msk [vmem:[%s1468_s7] sm:$0x1] %vm822_vm6, %v836_v59 }
  0xe4 PF: > { %s18_s28 = sadd.s32 1, %s1230_s28   ;;  %s1473_s12 = sld [smem:[#allocation2_spill]] }
  0xe5   : > { %p15_p13 = scmp.ge.s32.totalorder %s18_s28, 34   ;;  %s1474_s24 = smov %s1222_s26 }
  0xe6   : > { %s1475_s25 = smov %s1226_s27  ;;  %s1476_s26 = smov %s1479_s29 }
  0xe7   :  { %17 = sbr.rel (!%p15_p13) target bundleno = 3 (0x3), region = 104 }
  0xea   : > { %s1477_s27 = smov %s1473_s12 }

</bundles_post_ra>
